<compile_context>
chip_gen: v6e
topology: v6e:2x2x1
jax: 0.10.0
libtpu: 0.0.40
codegen_flags: <defaults>
</compile_context>

<pallas_src>
import functools

import jax
import jax.numpy as jnp
from jax.experimental import pallas as pl
from jax.experimental.pallas import tpu as pltpu


# ----------------------------- kernel bodies --------------------------------

def _im2col_matmul(body_ref, halo_ref, w_ref, xbuf_ref, pk_ref, th, width, cin):
    """Stitch the halo tile, im2col-pack it, and run one MXU matmul.

    body_ref: (1, th,  W+2, cin) bf16   padded rows [i*th, i*th+th)
    halo_ref: (1, 2,   W+2, cin) bf16   padded rows [i*th+th, i*th+th+2)
    w_ref:    (9*cin, Cout)      bf16   (ky, kx, ci) flattened, BN scale folded
    xbuf_ref: (th+2, W+2, cin)   bf16   VMEM scratch (stitched window)
    pk_ref:   (th*W, 9*cin)      bf16   VMEM scratch (im2col rows)
    returns:  (th*W, Cout) f32 accumulated conv result
    """
    xbuf_ref[0:th] = body_ref[0]
    xbuf_ref[th:th + 2] = halo_ref[0]

    # pk[(h, w), (dy*3+dx)*cin + c] = x_pad[h+dy, w+dx, c]
    for tap in range(9):
        dy, dx = divmod(tap, 3)
        pk_ref[:, tap * cin:(tap + 1) * cin] = (
            xbuf_ref[dy:dy + th, dx:dx + width, :].reshape(th * width, cin))

    # Single MXU matmul: K = 9*cin, f32 accumulation.
    return jnp.dot(pk_ref[...], w_ref[...], preferred_element_type=jnp.float32)


def _fused_pair_kernel(body_ref, halo_ref, w_ref, b_ref, o1_ref, o2_ref,
                       xbuf_ref, pk_ref, *, th, width, cin, c1, c2):
    """Two sibling 3x3 conv+BN(+ReLU) layers sharing one input, one matmul."""
    y = _im2col_matmul(body_ref, halo_ref, w_ref, xbuf_ref, pk_ref,
                       th, width, cin)
    y = jnp.maximum(y + b_ref[...], 0.0)          # ReLU valid for all channels
    o1_ref[0] = y[:, :c1].reshape(th, width, c1).astype(o1_ref.dtype)
    o2_ref[0] = y[:, c1:].reshape(th, width, c2).astype(o2_ref.dtype)


def _tail_concat_kernel(body_ref, halo_ref, w_ref, b_ref, c3_ref, c5_ref,
                        out_ref, xbuf_ref, pk_ref,
                        *, th, width, cin, c3w, c5w, c7w):
    """conv7x7_3 + assembly of relu(concat(conv3X3, conv5X5, conv7X7)).

    c3_ref / c5_ref already hold relu'd branch results (bf16); the final
    output block is written full-channel-width (lane dense), so no separate
    HBM concat pass is needed.
    """
    y = _im2col_matmul(body_ref, halo_ref, w_ref, xbuf_ref, pk_ref,
                       th, width, cin)
    c7 = jnp.maximum(y + b_ref[...], 0.0)

    out_ref[0, :, :, 0:c3w] = c3_ref[0].astype(out_ref.dtype)
    out_ref[0, :, :, c3w:c3w + c5w] = c5_ref[0].astype(out_ref.dtype)
    out_ref[0, :, :, c3w + c5w:] = (
        c7.reshape(th, width, c7w).astype(out_ref.dtype))


# ------------------------------ wrappers -------------------------------------

def _pick_tile_h(H, tile_h):
    th = tile_h if (H % tile_h == 0 and tile_h % 2 == 0) else H
    assert H % th == 0 and th % 2 == 0, (H, th)
    return th


def _halo_in_specs(th, W, Cin):
    """Row-tile body + 2-row halo views over the same padded array."""
    return [
        pl.BlockSpec((1, th, W + 2, Cin), lambda n, i: (n, i, 0, 0)),
        pl.BlockSpec((1, 2, W + 2, Cin),
                     lambda n, i: (n, (i + 1) * (th // 2), 0, 0)),
    ]


def _common_call_kwargs(th, W, Cin):
    return dict(
        scratch_shapes=[
            pltpu.VMEM((th + 2, W + 2, Cin), jnp.bfloat16),   # stitched window
            pltpu.VMEM((th * W, 9 * Cin), jnp.bfloat16),      # im2col rows
        ],
        compiler_params=pltpu.CompilerParams(
            dimension_semantics=("parallel", "parallel")),
    )


def fused_conv_bn_pair(x, w9, bias, c1, c2, *, tile_h=8):
    """relu(conv3x3_bn) for two convs sharing input x. Returns (y1, y2) bf16."""
    N, H, W, Cin = x.shape
    th = _pick_tile_h(H, tile_h)
    nt = H // th
    ctot = c1 + c2
    xp = jnp.pad(x.astype(jnp.bfloat16), ((0, 0), (1, 1), (1, 1), (0, 0)))

    kernel = functools.partial(_fused_pair_kernel, th=th, width=W, cin=Cin,
                               c1=c1, c2=c2)
    y1, y2 = pl.pallas_call(
        kernel,
        grid=(N, nt),
        in_specs=_halo_in_specs(th, W, Cin) + [
            pl.BlockSpec((9 * Cin, ctot), lambda n, i: (0, 0)),
            pl.BlockSpec((1, ctot), lambda n, i: (0, 0)),
        ],
        out_specs=[
            pl.BlockSpec((1, th, W, c1), lambda n, i: (n, i, 0, 0)),
            pl.BlockSpec((1, th, W, c2), lambda n, i: (n, i, 0, 0)),
        ],
        out_shape=[
            jax.ShapeDtypeStruct((N, H, W, c1), jnp.bfloat16),
            jax.ShapeDtypeStruct((N, H, W, c2), jnp.bfloat16),
        ],
        **_common_call_kwargs(th, W, Cin),
    )(xp, xp, w9, bias.reshape(1, ctot))
    return y1, y2


def tail_conv_concat(x, w9, bias, c3_piece, c5_piece, *, tile_h=8):
    """conv7x7_3(x) fused with the final channel concat + ReLU."""
    N, H, W, Cin = x.shape
    c3w, c5w = c3_piece.shape[-1], c5_piece.shape[-1]
    c7w = w9.shape[-1]
    cout = c3w + c5w + c7w
    th = _pick_tile_h(H, tile_h)
    nt = H // th
    xp = jnp.pad(x.astype(jnp.bfloat16), ((0, 0), (1, 1), (1, 1), (0, 0)))

    kernel = functools.partial(_tail_concat_kernel, th=th, width=W, cin=Cin,
                               c3w=c3w, c5w=c5w, c7w=c7w)
    return pl.pallas_call(
        kernel,
        grid=(N, nt),
        in_specs=_halo_in_specs(th, W, Cin) + [
            pl.BlockSpec((9 * Cin, c7w), lambda n, i: (0, 0)),
            pl.BlockSpec((1, c7w), lambda n, i: (0, 0)),
            pl.BlockSpec((1, th, W, c3w), lambda n, i: (n, i, 0, 0)),
            pl.BlockSpec((1, th, W, c5w), lambda n, i: (n, i, 0, 0)),
        ],
        out_specs=pl.BlockSpec((1, th, W, cout), lambda n, i: (n, i, 0, 0)),
        out_shape=jax.ShapeDtypeStruct((N, H, W, cout), jnp.float32),
        **_common_call_kwargs(th, W, Cin),
    )(xp, xp, w9, bias.reshape(1, c7w), c3_piece, c5_piece)


# --------------------------- params & forward --------------------------------

def make_conv_bn_params(key, cin, cout):
    """Deterministic synthetic params for Conv2d(3x3, no bias) + BatchNorm2d."""
    kw, kg, kb, km, kv = jax.random.split(key, 5)
    w = 0.1 * jax.random.normal(kw, (3, 3, cin, cout), jnp.float32)  # HWIO
    gamma = 1.0 + 0.1 * jax.random.normal(kg, (cout,), jnp.float32)
    beta = 0.1 * jax.random.normal(kb, (cout,), jnp.float32)
    run_mean = 0.1 * jax.random.normal(km, (cout,), jnp.float32)
    run_var = jnp.abs(jax.random.normal(kv, (cout,), jnp.float32)) + 0.5
    eps = 1e-5
    scale = gamma / jnp.sqrt(run_var + eps)   # folded BN
    bias = beta - run_mean * scale
    return w, scale, bias


def make_ssh_params(key, in_channel, out_channel):
    assert out_channel % 4 == 0
    keys = jax.random.split(key, 5)
    return {
        "conv3X3":   make_conv_bn_params(keys[0], in_channel, out_channel // 2),
        "conv5X5_1": make_conv_bn_params(keys[1], in_channel, out_channel // 4),
        "conv5X5_2": make_conv_bn_params(keys[2], out_channel // 4, out_channel // 4),
        "conv7X7_2": make_conv_bn_params(keys[3], out_channel // 4, out_channel // 4),
        "conv7x7_3": make_conv_bn_params(keys[4], out_channel // 4, out_channel // 4),
    }


def _stack_convs(param_list):
    """Fold BN scale into weights, cast bf16, stack sibling Couts, flatten taps."""
    ws, bs = [], []
    for w, scale, bias in param_list:
        ws.append((w * scale).astype(jnp.bfloat16))
        bs.append(bias.astype(jnp.float32))
    cin = ws[0].shape[2]
    w9 = jnp.concatenate(ws, axis=-1).reshape(9 * cin, -1)   # (9*Cin, sum Cout)
    return w9, jnp.concatenate(bs)


@functools.partial(jax.jit, static_argnames=("tile_h",))
def ssh_forward(x, params, tile_h=8):
    """SSH forward with Pallas conv kernels. x: (N, H, W, Cin) NHWC -> f32."""
    c_half = params["conv3X3"][0].shape[-1]     # out_channel // 2
    c_quar = params["conv5X5_1"][0].shape[-1]   # out_channel // 4

    # Stage A: conv3X3 + conv5X5_1 share x -> one fused kernel.
    wa, ba = _stack_convs([params["conv3X3"], params["conv5X5_1"]])
    c3, t1 = fused_conv_bn_pair(x, wa, ba, c_half, c_quar, tile_h=tile_h)

    # Stage B: conv5X5_2 + conv7X7_2 share conv5x5_1 -> one fused kernel.
    wb, bb = _stack_convs([params["conv5X5_2"], params["conv7X7_2"]])
    c5, t2 = fused_conv_bn_pair(t1, wb, bb, c_quar, c_quar, tile_h=tile_h)

    # Stage C: conv7x7_3 + final concat + ReLU fused (full-width output blocks).
    wc, bc = _stack_convs([params["conv7x7_3"]])
    return tail_conv_concat(t2, wc, bc, c3, c5, tile_h=tile_h)


# ---------------- pure-JAX reference (for correctness check) ----------------

def _ref_conv_bn(x, w, scale, bias, relu):
    """Same bf16 quantization points as the kernel path (weights & inputs)."""
    w_bf = (w * scale).astype(jnp.bfloat16)
    y = jax.lax.conv_general_dilated(
        x.astype(jnp.bfloat16), w_bf, window_strides=(1, 1), padding="SAME",
        dimension_numbers=("NHWC", "HWIO", "NHWC"),
        preferred_element_type=jnp.float32)
    y = y + bias.astype(jnp.float32)
    return jnp.maximum(y, 0.0) if relu else y


def ssh_forward_ref(x, params):
    c3 = _ref_conv_bn(x, *params["conv3X3"], relu=False)
    t1 = _ref_conv_bn(x, *params["conv5X5_1"], relu=True).astype(jnp.bfloat16)
    c5 = _ref_conv_bn(t1, *params["conv5X5_2"], relu=False)
    t2 = _ref_conv_bn(t1, *params["conv7X7_2"], relu=True).astype(jnp.bfloat16)
    c7 = _ref_conv_bn(t2, *params["conv7x7_3"], relu=False)
    out = jnp.concatenate([c3, c5, c7], axis=-1)
    return jnp.maximum(out, 0.0)


if __name__ == "__main__":
    key = jax.random.PRNGKey(0)
    k_x, k_p = jax.random.split(key)

    N, H, W = 2, 16, 16
    in_channel, out_channel = 16, 32

    x = jax.random.normal(k_x, (N, H, W, in_channel), jnp.float32)
    params = make_ssh_params(k_p, in_channel, out_channel)

    out = jax.block_until_ready(ssh_forward(x, params))
    ref = jax.block_until_ready(ssh_forward_ref(x, params))

    assert out.shape == (N, H, W, out_channel), out.shape
    max_err = float(jnp.max(jnp.abs(out - ref)))
    # bf16 activations/weights (f32 accumulation) -> compare at bf16 accuracy.
    assert jnp.allclose(out, ref, atol=2e-2, rtol=2e-2), max_err

    print("KERNEL_OK")
</pallas_src>

<mosaic_0001>
module attributes {stable_mosaic.version = 11 : i64} {
  func.func @_fused_pair_kernel(%arg0: i32, %arg1: i32, %arg2: memref<1x8x18x16xbf16, #tpu.memory_space<vmem>>, %arg3: memref<1x2x18x16xbf16, #tpu.memory_space<vmem>>, %arg4: memref<144x24xbf16, #tpu.memory_space<vmem>>, %arg5: memref<1x24xf32, #tpu.memory_space<vmem>>, %arg6: memref<1x8x16x16xbf16, #tpu.memory_space<vmem>>, %arg7: memref<1x8x16x8xbf16, #tpu.memory_space<vmem>>, %arg8: memref<10x18x16xbf16, #tpu.memory_space<vmem>>, %arg9: memref<128x144xbf16, #tpu.memory_space<vmem>>) attributes {dimension_semantics = [#tpu.dimension_semantics<parallel>, #tpu.dimension_semantics<parallel>], iteration_bounds = array<i64: 2, 2>, scalar_prefetch = 0 : i64, scratch_operands = 2 : i64, tpu.core_type = #tpu.core_type<tc>, window_params = [{transform_indices = @transform_0, window_bounds = array<i64: 1, 8, 18, 16>}, {transform_indices = @transform_1, window_bounds = array<i64: 1, 2, 18, 16>}, {pipeline_mode = #tpu.pipeline_mode<synchronous>, transform_indices = @transform_2, window_bounds = array<i64: 144, 24>}, {pipeline_mode = #tpu.pipeline_mode<synchronous>, transform_indices = @transform_3, window_bounds = array<i64: 1, 24>}, {transform_indices = @transform_4, window_bounds = array<i64: 1, 8, 16, 16>}, {transform_indices = @transform_5, window_bounds = array<i64: 1, 8, 16, 8>}]} {
    %c0 = arith.constant 0 : index
    %c0_0 = arith.constant 0 : index
    %c0_1 = arith.constant 0 : index
    %c0_2 = arith.constant 0 : index
    %0 = vector.load %arg2[%c0, %c0_0, %c0_1, %c0_2] : memref<1x8x18x16xbf16, #tpu.memory_space<vmem>>, vector<1x8x18x16xbf16>
    %1 = vector.shape_cast %0 : vector<1x8x18x16xbf16> to vector<8x18x16xbf16>
    %c0_3 = arith.constant 0 : index
    %c0_4 = arith.constant 0 : index
    %c0_5 = arith.constant 0 : index
    %2 = vector.load %arg8[%c0_3, %c0_4, %c0_5] : memref<10x18x16xbf16, #tpu.memory_space<vmem>>, vector<8x18x16xbf16>
    tpu.vector_store %arg8[%c0_3, %c0_4, %c0_5], %1 {strides = array<i32>} : memref<10x18x16xbf16, #tpu.memory_space<vmem>>, vector<8x18x16xbf16>,
    %c0_6 = arith.constant 0 : index
    %c0_7 = arith.constant 0 : index
    %c0_8 = arith.constant 0 : index
    %c0_9 = arith.constant 0 : index
    %3 = vector.load %arg3[%c0_6, %c0_7, %c0_8, %c0_9] : memref<1x2x18x16xbf16, #tpu.memory_space<vmem>>, vector<1x2x18x16xbf16>
    %4 = vector.shape_cast %3 : vector<1x2x18x16xbf16> to vector<2x18x16xbf16>
    %c8 = arith.constant 8 : index
    %c0_10 = arith.constant 0 : index
    %c0_11 = arith.constant 0 : index
    %5 = vector.load %arg8[%c8, %c0_10, %c0_11] : memref<10x18x16xbf16, #tpu.memory_space<vmem>>, vector<2x18x16xbf16>
    tpu.vector_store %arg8[%c8, %c0_10, %c0_11], %4 {strides = array<i32>} : memref<10x18x16xbf16, #tpu.memory_space<vmem>>, vector<2x18x16xbf16>,
    %c0_12 = arith.constant 0 : index
    %c0_13 = arith.constant 0 : index
    %c0_14 = arith.constant 0 : index
    %6 = vector.load %arg8[%c0_12, %c0_13, %c0_14] : memref<10x18x16xbf16, #tpu.memory_space<vmem>>, vector<8x16x16xbf16>
    %7 = vector.shape_cast %6 : vector<8x16x16xbf16> to vector<128x16xbf16>
    %c0_15 = arith.constant 0 : index
    %c0_16 = arith.constant 0 : index
    %8 = vector.load %arg9[%c0_15, %c0_16] : memref<128x144xbf16, #tpu.memory_space<vmem>>, vector<128x16xbf16>
    tpu.vector_store %arg9[%c0_15, %c0_16], %7 {strides = array<i32>} : memref<128x144xbf16, #tpu.memory_space<vmem>>, vector<128x16xbf16>,
    %c0_17 = arith.constant 0 : index
    %c1 = arith.constant 1 : index
    %c0_18 = arith.constant 0 : index
    %9 = vector.load %arg8[%c0_17, %c1, %c0_18] : memref<10x18x16xbf16, #tpu.memory_space<vmem>>, vector<8x16x16xbf16>
    %10 = vector.shape_cast %9 : vector<8x16x16xbf16> to vector<128x16xbf16>
    %c0_19 = arith.constant 0 : index
    %c16 = arith.constant 16 : index
    %11 = vector.load %arg9[%c0_19, %c16] : memref<128x144xbf16, #tpu.memory_space<vmem>>, vector<128x16xbf16>
    tpu.vector_store %arg9[%c0_19, %c16], %10 {strides = array<i32>} : memref<128x144xbf16, #tpu.memory_space<vmem>>, vector<128x16xbf16>,
    %c0_20 = arith.constant 0 : index
    %c2 = arith.constant 2 : index
    %c0_21 = arith.constant 0 : index
    %12 = vector.load %arg8[%c0_20, %c2, %c0_21] : memref<10x18x16xbf16, #tpu.memory_space<vmem>>, vector<8x16x16xbf16>
    %13 = vector.shape_cast %12 : vector<8x16x16xbf16> to vector<128x16xbf16>
    %c0_22 = arith.constant 0 : index
    %c32 = arith.constant 32 : index
    %14 = vector.load %arg9[%c0_22, %c32] : memref<128x144xbf16, #tpu.memory_space<vmem>>, vector<128x16xbf16>
    tpu.vector_store %arg9[%c0_22, %c32], %13 {strides = array<i32>} : memref<128x144xbf16, #tpu.memory_space<vmem>>, vector<128x16xbf16>,
    %c1_23 = arith.constant 1 : index
    %c0_24 = arith.constant 0 : index
    %c0_25 = arith.constant 0 : index
    %15 = vector.load %arg8[%c1_23, %c0_24, %c0_25] : memref<10x18x16xbf16, #tpu.memory_space<vmem>>, vector<8x16x16xbf16>
    %16 = vector.shape_cast %15 : vector<8x16x16xbf16> to vector<128x16xbf16>
    %c0_26 = arith.constant 0 : index
    %c48 = arith.constant 48 : index
    %17 = vector.load %arg9[%c0_26, %c48] : memref<128x144xbf16, #tpu.memory_space<vmem>>, vector<128x16xbf16>
    tpu.vector_store %arg9[%c0_26, %c48], %16 {strides = array<i32>} : memref<128x144xbf16, #tpu.memory_space<vmem>>, vector<128x16xbf16>,
    %c1_27 = arith.constant 1 : index
    %c1_28 = arith.constant 1 : index
    %c0_29 = arith.constant 0 : index
    %18 = vector.load %arg8[%c1_27, %c1_28, %c0_29] : memref<10x18x16xbf16, #tpu.memory_space<vmem>>, vector<8x16x16xbf16>
    %19 = vector.shape_cast %18 : vector<8x16x16xbf16> to vector<128x16xbf16>
    %c0_30 = arith.constant 0 : index
    %c64 = arith.constant 64 : index
    %20 = vector.load %arg9[%c0_30, %c64] : memref<128x144xbf16, #tpu.memory_space<vmem>>, vector<128x16xbf16>
    tpu.vector_store %arg9[%c0_30, %c64], %19 {strides = array<i32>} : memref<128x144xbf16, #tpu.memory_space<vmem>>, vector<128x16xbf16>,
    %c1_31 = arith.constant 1 : index
    %c2_32 = arith.constant 2 : index
    %c0_33 = arith.constant 0 : index
    %21 = vector.load %arg8[%c1_31, %c2_32, %c0_33] : memref<10x18x16xbf16, #tpu.memory_space<vmem>>, vector<8x16x16xbf16>
    %22 = vector.shape_cast %21 : vector<8x16x16xbf16> to vector<128x16xbf16>
    %c0_34 = arith.constant 0 : index
    %c80 = arith.constant 80 : index
    %23 = vector.load %arg9[%c0_34, %c80] : memref<128x144xbf16, #tpu.memory_space<vmem>>, vector<128x16xbf16>
    tpu.vector_store %arg9[%c0_34, %c80], %22 {strides = array<i32>} : memref<128x144xbf16, #tpu.memory_space<vmem>>, vector<128x16xbf16>,
    %c2_35 = arith.constant 2 : index
    %c0_36 = arith.constant 0 : index
    %c0_37 = arith.constant 0 : index
    %24 = vector.load %arg8[%c2_35, %c0_36, %c0_37] : memref<10x18x16xbf16, #tpu.memory_space<vmem>>, vector<8x16x16xbf16>
    %25 = vector.shape_cast %24 : vector<8x16x16xbf16> to vector<128x16xbf16>
    %c0_38 = arith.constant 0 : index
    %c96 = arith.constant 96 : index
    %26 = vector.load %arg9[%c0_38, %c96] : memref<128x144xbf16, #tpu.memory_space<vmem>>, vector<128x16xbf16>
    tpu.vector_store %arg9[%c0_38, %c96], %25 {strides = array<i32>} : memref<128x144xbf16, #tpu.memory_space<vmem>>, vector<128x16xbf16>,
    %c2_39 = arith.constant 2 : index
    %c1_40 = arith.constant 1 : index
    %c0_41 = arith.constant 0 : index
    %27 = vector.load %arg8[%c2_39, %c1_40, %c0_41] : memref<10x18x16xbf16, #tpu.memory_space<vmem>>, vector<8x16x16xbf16>
    %28 = vector.shape_cast %27 : vector<8x16x16xbf16> to vector<128x16xbf16>
    %c0_42 = arith.constant 0 : index
    %c112 = arith.constant 112 : index
    %29 = vector.load %arg9[%c0_42, %c112] : memref<128x144xbf16, #tpu.memory_space<vmem>>, vector<128x16xbf16>
    tpu.vector_store %arg9[%c0_42, %c112], %28 {strides = array<i32>} : memref<128x144xbf16, #tpu.memory_space<vmem>>, vector<128x16xbf16>,
    %c2_43 = arith.constant 2 : index
    %c2_44 = arith.constant 2 : index
    %c0_45 = arith.constant 0 : index
    %30 = vector.load %arg8[%c2_43, %c2_44, %c0_45] : memref<10x18x16xbf16, #tpu.memory_space<vmem>>, vector<8x16x16xbf16>
    %31 = vector.shape_cast %30 : vector<8x16x16xbf16> to vector<128x16xbf16>
    %c0_46 = arith.constant 0 : index
    %c128 = arith.constant 128 : index
    %32 = vector.load %arg9[%c0_46, %c128] : memref<128x144xbf16, #tpu.memory_space<vmem>>, vector<128x16xbf16>
    tpu.vector_store %arg9[%c0_46, %c128], %31 {strides = array<i32>} : memref<128x144xbf16, #tpu.memory_space<vmem>>, vector<128x16xbf16>,
    %c0_47 = arith.constant 0 : index
    %c0_48 = arith.constant 0 : index
    %33 = vector.load %arg9[%c0_47, %c0_48] : memref<128x144xbf16, #tpu.memory_space<vmem>>, vector<128x144xbf16>
    %c0_49 = arith.constant 0 : index
    %c0_50 = arith.constant 0 : index
    %34 = vector.load %arg4[%c0_49, %c0_50] : memref<144x24xbf16, #tpu.memory_space<vmem>>, vector<144x24xbf16>
    %cst = arith.constant dense<0.000000e+00> : vector<128x24xf32>
    %35 = tpu.matmul %33, %34, %cst {dimension_numbers = #tpu.dot_dimension_numbers<[1], [0], [0], [1], [0, 0, 1, 1], [], []>} : vector<128x144xbf16>, vector<144x24xbf16>, vector<128x24xf32> -> vector<128x24xf32>
    %c0_51 = arith.constant 0 : index
    %c0_52 = arith.constant 0 : index
    %36 = vector.load %arg5[%c0_51, %c0_52] : memref<1x24xf32, #tpu.memory_space<vmem>>, vector<1x24xf32>
    %37 = vector.broadcast %36 : vector<1x24xf32> to vector<128x24xf32>
    %38 = arith.addf %35, %37 : vector<128x24xf32>
    %cst_53 = arith.constant 0.000000e+00 : f32
    %39 = vector.broadcast %cst_53 : f32 to vector<128x24xf32>
    %40 = arith.maximumf %38, %39 : vector<128x24xf32>
    %41 = vector.extract_strided_slice %40 {offsets = [0, 0], sizes = [128, 16], strides = [1, 1]} : vector<128x24xf32> to vector<128x16xf32>
    %42 = vector.shape_cast %41 : vector<128x16xf32> to vector<8x16x16xf32>
    %43 = arith.truncf %42 : vector<8x16x16xf32> to vector<8x16x16xbf16>
    %c0_54 = arith.constant 0 : index
    %c0_55 = arith.constant 0 : index
    %c0_56 = arith.constant 0 : index
    %c0_57 = arith.constant 0 : index
    %44 = vector.load %arg6[%c0_54, %c0_55, %c0_56, %c0_57] : memref<1x8x16x16xbf16, #tpu.memory_space<vmem>>, vector<1x8x16x16xbf16>
    %45 = vector.shape_cast %44 : vector<1x8x16x16xbf16> to vector<8x16x16xbf16>
    %46 = vector.shape_cast %43 : vector<8x16x16xbf16> to vector<1x8x16x16xbf16>
    tpu.vector_store %arg6[%c0_54, %c0_55, %c0_56, %c0_57], %46 {strides = array<i32>} : memref<1x8x16x16xbf16, #tpu.memory_space<vmem>>, vector<1x8x16x16xbf16>,
    %47 = vector.extract_strided_slice %40 {offsets = [0, 16], sizes = [128, 8], strides = [1, 1]} : vector<128x24xf32> to vector<128x8xf32>
    %48 = vector.shape_cast %47 : vector<128x8xf32> to vector<8x16x8xf32>
    %49 = arith.truncf %48 : vector<8x16x8xf32> to vector<8x16x8xbf16>
    %c0_58 = arith.constant 0 : index
    %c0_59 = arith.constant 0 : index
    %c0_60 = arith.constant 0 : index
    %c0_61 = arith.constant 0 : index
    %50 = vector.load %arg7[%c0_58, %c0_59, %c0_60, %c0_61] : memref<1x8x16x8xbf16, #tpu.memory_space<vmem>>, vector<1x8x16x8xbf16>
    %51 = vector.shape_cast %50 : vector<1x8x16x8xbf16> to vector<8x16x8xbf16>
    %52 = vector.shape_cast %49 : vector<8x16x8xbf16> to vector<1x8x16x8xbf16>
    tpu.vector_store %arg7[%c0_58, %c0_59, %c0_60, %c0_61], %52 {strides = array<i32>} : memref<1x8x16x8xbf16, #tpu.memory_space<vmem>>, vector<1x8x16x8xbf16>,
    return
  }
  func.func @transform_0(%arg0: i32, %arg1: i32) -> (i32, i32, i32, i32) {
    %c0_i32 = arith.constant 0 : i32
    %c0_i32_0 = arith.constant 0 : i32
    %c0_i32_1 = arith.constant 0 : i32
    return %arg0, %arg1, %c0_i32, %c0_i32_0 : i32, i32, i32, i32
  }
  func.func @transform_1(%arg0: i32, %arg1: i32) -> (i32, i32, i32, i32) {
    %c1_i32 = arith.constant 1 : i32
    %0 = arith.addi %arg1, %c1_i32 : i32
    %c4_i32 = arith.constant 4 : i32
    %1 = arith.muli %0, %c4_i32 : i32
    %c0_i32 = arith.constant 0 : i32
    %c0_i32_0 = arith.constant 0 : i32
    %c0_i32_1 = arith.constant 0 : i32
    return %arg0, %1, %c0_i32, %c0_i32_0 : i32, i32, i32, i32
  }
  func.func @transform_2(%arg0: i32, %arg1: i32) -> (i32, i32) {
    %c0_i32 = arith.constant 0 : i32
    %c0_i32_0 = arith.constant 0 : i32
    %c0_i32_1 = arith.constant 0 : i32
    return %c0_i32, %c0_i32_0 : i32, i32
  }
  func.func @transform_3(%arg0: i32, %arg1: i32) -> (i32, i32) {
    %c0_i32 = arith.constant 0 : i32
    %c0_i32_0 = arith.constant 0 : i32
    %c0_i32_1 = arith.constant 0 : i32
    return %c0_i32, %c0_i32_0 : i32, i32
  }
  func.func @transform_4(%arg0: i32, %arg1: i32) -> (i32, i32, i32, i32) {
    %c0_i32 = arith.constant 0 : i32
    %c0_i32_0 = arith.constant 0 : i32
    %c0_i32_1 = arith.constant 0 : i32
    return %arg0, %arg1, %c0_i32, %c0_i32_0 : i32, i32, i32, i32
  }
  func.func @transform_5(%arg0: i32, %arg1: i32) -> (i32, i32, i32, i32) {
    %c0_i32 = arith.constant 0 : i32
    %c0_i32_0 = arith.constant 0 : i32
    %c0_i32_1 = arith.constant 0 : i32
    return %arg0, %arg1, %c0_i32, %c0_i32_0 : i32, i32, i32, i32
  }
}

module attributes {stable_mosaic.version = 11 : i64} {
  func.func @_fused_pair_kernel(%arg0: i32, %arg1: i32, %arg2: memref<1x8x18x8xbf16, #tpu.memory_space<vmem>>, %arg3: memref<1x2x18x8xbf16, #tpu.memory_space<vmem>>, %arg4: memref<72x16xbf16, #tpu.memory_space<vmem>>, %arg5: memref<1x16xf32, #tpu.memory_space<vmem>>, %arg6: memref<1x8x16x8xbf16, #tpu.memory_space<vmem>>, %arg7: memref<1x8x16x8xbf16, #tpu.memory_space<vmem>>, %arg8: memref<10x18x8xbf16, #tpu.memory_space<vmem>>, %arg9: memref<128x72xbf16, #tpu.memory_space<vmem>>) attributes {dimension_semantics = [#tpu.dimension_semantics<parallel>, #tpu.dimension_semantics<parallel>], iteration_bounds = array<i64: 2, 2>, scalar_prefetch = 0 : i64, scratch_operands = 2 : i64, tpu.core_type = #tpu.core_type<tc>, window_params = [{transform_indices = @transform_0, window_bounds = array<i64: 1, 8, 18, 8>}, {transform_indices = @transform_1, window_bounds = array<i64: 1, 2, 18, 8>}, {pipeline_mode = #tpu.pipeline_mode<synchronous>, transform_indices = @transform_2, window_bounds = array<i64: 72, 16>}, {pipeline_mode = #tpu.pipeline_mode<synchronous>, transform_indices = @transform_3, window_bounds = array<i64: 1, 16>}, {transform_indices = @transform_4, window_bounds = array<i64: 1, 8, 16, 8>}, {transform_indices = @transform_5, window_bounds = array<i64: 1, 8, 16, 8>}]} {
    %c0 = arith.constant 0 : index
    %c0_0 = arith.constant 0 : index
    %c0_1 = arith.constant 0 : index
    %c0_2 = arith.constant 0 : index
    %0 = vector.load %arg2[%c0, %c0_0, %c0_1, %c0_2] : memref<1x8x18x8xbf16, #tpu.memory_space<vmem>>, vector<1x8x18x8xbf16>
    %1 = vector.shape_cast %0 : vector<1x8x18x8xbf16> to vector<8x18x8xbf16>
    %c0_3 = arith.constant 0 : index
    %c0_4 = arith.constant 0 : index
    %c0_5 = arith.constant 0 : index
    %2 = vector.load %arg8[%c0_3, %c0_4, %c0_5] : memref<10x18x8xbf16, #tpu.memory_space<vmem>>, vector<8x18x8xbf16>
    tpu.vector_store %arg8[%c0_3, %c0_4, %c0_5], %1 {strides = array<i32>} : memref<10x18x8xbf16, #tpu.memory_space<vmem>>, vector<8x18x8xbf16>,
    %c0_6 = arith.constant 0 : index
    %c0_7 = arith.constant 0 : index
    %c0_8 = arith.constant 0 : index
    %c0_9 = arith.constant 0 : index
    %3 = vector.load %arg3[%c0_6, %c0_7, %c0_8, %c0_9] : memref<1x2x18x8xbf16, #tpu.memory_space<vmem>>, vector<1x2x18x8xbf16>
    %4 = vector.shape_cast %3 : vector<1x2x18x8xbf16> to vector<2x18x8xbf16>
    %c8 = arith.constant 8 : index
    %c0_10 = arith.constant 0 : index
    %c0_11 = arith.constant 0 : index
    %5 = vector.load %arg8[%c8, %c0_10, %c0_11] : memref<10x18x8xbf16, #tpu.memory_space<vmem>>, vector<2x18x8xbf16>
    tpu.vector_store %arg8[%c8, %c0_10, %c0_11], %4 {strides = array<i32>} : memref<10x18x8xbf16, #tpu.memory_space<vmem>>, vector<2x18x8xbf16>,
    %c0_12 = arith.constant 0 : index
    %c0_13 = arith.constant 0 : index
    %c0_14 = arith.constant 0 : index
    %6 = vector.load %arg8[%c0_12, %c0_13, %c0_14] : memref<10x18x8xbf16, #tpu.memory_space<vmem>>, vector<8x16x8xbf16>
    %7 = vector.shape_cast %6 : vector<8x16x8xbf16> to vector<128x8xbf16>
    %c0_15 = arith.constant 0 : index
    %c0_16 = arith.constant 0 : index
    %8 = vector.load %arg9[%c0_15, %c0_16] : memref<128x72xbf16, #tpu.memory_space<vmem>>, vector<128x8xbf16>
    tpu.vector_store %arg9[%c0_15, %c0_16], %7 {strides = array<i32>} : memref<128x72xbf16, #tpu.memory_space<vmem>>, vector<128x8xbf16>,
    %c0_17 = arith.constant 0 : index
    %c1 = arith.constant 1 : index
    %c0_18 = arith.constant 0 : index
    %9 = vector.load %arg8[%c0_17, %c1, %c0_18] : memref<10x18x8xbf16, #tpu.memory_space<vmem>>, vector<8x16x8xbf16>
    %10 = vector.shape_cast %9 : vector<8x16x8xbf16> to vector<128x8xbf16>
    %c0_19 = arith.constant 0 : index
    %c8_20 = arith.constant 8 : index
    %11 = vector.load %arg9[%c0_19, %c8_20] : memref<128x72xbf16, #tpu.memory_space<vmem>>, vector<128x8xbf16>
    tpu.vector_store %arg9[%c0_19, %c8_20], %10 {strides = array<i32>} : memref<128x72xbf16, #tpu.memory_space<vmem>>, vector<128x8xbf16>,
    %c0_21 = arith.constant 0 : index
    %c2 = arith.constant 2 : index
    %c0_22 = arith.constant 0 : index
    %12 = vector.load %arg8[%c0_21, %c2, %c0_22] : memref<10x18x8xbf16, #tpu.memory_space<vmem>>, vector<8x16x8xbf16>
    %13 = vector.shape_cast %12 : vector<8x16x8xbf16> to vector<128x8xbf16>
    %c0_23 = arith.constant 0 : index
    %c16 = arith.constant 16 : index
    %14 = vector.load %arg9[%c0_23, %c16] : memref<128x72xbf16, #tpu.memory_space<vmem>>, vector<128x8xbf16>
    tpu.vector_store %arg9[%c0_23, %c16], %13 {strides = array<i32>} : memref<128x72xbf16, #tpu.memory_space<vmem>>, vector<128x8xbf16>,
    %c1_24 = arith.constant 1 : index
    %c0_25 = arith.constant 0 : index
    %c0_26 = arith.constant 0 : index
    %15 = vector.load %arg8[%c1_24, %c0_25, %c0_26] : memref<10x18x8xbf16, #tpu.memory_space<vmem>>, vector<8x16x8xbf16>
    %16 = vector.shape_cast %15 : vector<8x16x8xbf16> to vector<128x8xbf16>
    %c0_27 = arith.constant 0 : index
    %c24 = arith.constant 24 : index
    %17 = vector.load %arg9[%c0_27, %c24] : memref<128x72xbf16, #tpu.memory_space<vmem>>, vector<128x8xbf16>
    tpu.vector_store %arg9[%c0_27, %c24], %16 {strides = array<i32>} : memref<128x72xbf16, #tpu.memory_space<vmem>>, vector<128x8xbf16>,
    %c1_28 = arith.constant 1 : index
    %c1_29 = arith.constant 1 : index
    %c0_30 = arith.constant 0 : index
    %18 = vector.load %arg8[%c1_28, %c1_29, %c0_30] : memref<10x18x8xbf16, #tpu.memory_space<vmem>>, vector<8x16x8xbf16>
    %19 = vector.shape_cast %18 : vector<8x16x8xbf16> to vector<128x8xbf16>
    %c0_31 = arith.constant 0 : index
    %c32 = arith.constant 32 : index
    %20 = vector.load %arg9[%c0_31, %c32] : memref<128x72xbf16, #tpu.memory_space<vmem>>, vector<128x8xbf16>
    tpu.vector_store %arg9[%c0_31, %c32], %19 {strides = array<i32>} : memref<128x72xbf16, #tpu.memory_space<vmem>>, vector<128x8xbf16>,
    %c1_32 = arith.constant 1 : index
    %c2_33 = arith.constant 2 : index
    %c0_34 = arith.constant 0 : index
    %21 = vector.load %arg8[%c1_32, %c2_33, %c0_34] : memref<10x18x8xbf16, #tpu.memory_space<vmem>>, vector<8x16x8xbf16>
    %22 = vector.shape_cast %21 : vector<8x16x8xbf16> to vector<128x8xbf16>
    %c0_35 = arith.constant 0 : index
    %c40 = arith.constant 40 : index
    %23 = vector.load %arg9[%c0_35, %c40] : memref<128x72xbf16, #tpu.memory_space<vmem>>, vector<128x8xbf16>
    tpu.vector_store %arg9[%c0_35, %c40], %22 {strides = array<i32>} : memref<128x72xbf16, #tpu.memory_space<vmem>>, vector<128x8xbf16>,
    %c2_36 = arith.constant 2 : index
    %c0_37 = arith.constant 0 : index
    %c0_38 = arith.constant 0 : index
    %24 = vector.load %arg8[%c2_36, %c0_37, %c0_38] : memref<10x18x8xbf16, #tpu.memory_space<vmem>>, vector<8x16x8xbf16>
    %25 = vector.shape_cast %24 : vector<8x16x8xbf16> to vector<128x8xbf16>
    %c0_39 = arith.constant 0 : index
    %c48 = arith.constant 48 : index
    %26 = vector.load %arg9[%c0_39, %c48] : memref<128x72xbf16, #tpu.memory_space<vmem>>, vector<128x8xbf16>
    tpu.vector_store %arg9[%c0_39, %c48], %25 {strides = array<i32>} : memref<128x72xbf16, #tpu.memory_space<vmem>>, vector<128x8xbf16>,
    %c2_40 = arith.constant 2 : index
    %c1_41 = arith.constant 1 : index
    %c0_42 = arith.constant 0 : index
    %27 = vector.load %arg8[%c2_40, %c1_41, %c0_42] : memref<10x18x8xbf16, #tpu.memory_space<vmem>>, vector<8x16x8xbf16>
    %28 = vector.shape_cast %27 : vector<8x16x8xbf16> to vector<128x8xbf16>
    %c0_43 = arith.constant 0 : index
    %c56 = arith.constant 56 : index
    %29 = vector.load %arg9[%c0_43, %c56] : memref<128x72xbf16, #tpu.memory_space<vmem>>, vector<128x8xbf16>
    tpu.vector_store %arg9[%c0_43, %c56], %28 {strides = array<i32>} : memref<128x72xbf16, #tpu.memory_space<vmem>>, vector<128x8xbf16>,
    %c2_44 = arith.constant 2 : index
    %c2_45 = arith.constant 2 : index
    %c0_46 = arith.constant 0 : index
    %30 = vector.load %arg8[%c2_44, %c2_45, %c0_46] : memref<10x18x8xbf16, #tpu.memory_space<vmem>>, vector<8x16x8xbf16>
    %31 = vector.shape_cast %30 : vector<8x16x8xbf16> to vector<128x8xbf16>
    %c0_47 = arith.constant 0 : index
    %c64 = arith.constant 64 : index
    %32 = vector.load %arg9[%c0_47, %c64] : memref<128x72xbf16, #tpu.memory_space<vmem>>, vector<128x8xbf16>
    tpu.vector_store %arg9[%c0_47, %c64], %31 {strides = array<i32>} : memref<128x72xbf16, #tpu.memory_space<vmem>>, vector<128x8xbf16>,
    %c0_48 = arith.constant 0 : index
    %c0_49 = arith.constant 0 : index
    %33 = vector.load %arg9[%c0_48, %c0_49] : memref<128x72xbf16, #tpu.memory_space<vmem>>, vector<128x72xbf16>
    %c0_50 = arith.constant 0 : index
    %c0_51 = arith.constant 0 : index
    %34 = vector.load %arg4[%c0_50, %c0_51] : memref<72x16xbf16, #tpu.memory_space<vmem>>, vector<72x16xbf16>
    %cst = arith.constant dense<0.000000e+00> : vector<128x16xf32>
    %35 = tpu.matmul %33, %34, %cst {dimension_numbers = #tpu.dot_dimension_numbers<[1], [0], [0], [1], [0, 0, 1, 1], [], []>} : vector<128x72xbf16>, vector<72x16xbf16>, vector<128x16xf32> -> vector<128x16xf32>
    %c0_52 = arith.constant 0 : index
    %c0_53 = arith.constant 0 : index
    %36 = vector.load %arg5[%c0_52, %c0_53] : memref<1x16xf32, #tpu.memory_space<vmem>>, vector<1x16xf32>
    %37 = vector.broadcast %36 : vector<1x16xf32> to vector<128x16xf32>
    %38 = arith.addf %35, %37 : vector<128x16xf32>
    %cst_54 = arith.constant 0.000000e+00 : f32
    %39 = vector.broadcast %cst_54 : f32 to vector<128x16xf32>
    %40 = arith.maximumf %38, %39 : vector<128x16xf32>
    %41 = vector.extract_strided_slice %40 {offsets = [0, 0], sizes = [128, 8], strides = [1, 1]} : vector<128x16xf32> to vector<128x8xf32>
    %42 = vector.shape_cast %41 : vector<128x8xf32> to vector<8x16x8xf32>
    %43 = arith.truncf %42 : vector<8x16x8xf32> to vector<8x16x8xbf16>
    %c0_55 = arith.constant 0 : index
    %c0_56 = arith.constant 0 : index
    %c0_57 = arith.constant 0 : index
    %c0_58 = arith.constant 0 : index
    %44 = vector.load %arg6[%c0_55, %c0_56, %c0_57, %c0_58] : memref<1x8x16x8xbf16, #tpu.memory_space<vmem>>, vector<1x8x16x8xbf16>
    %45 = vector.shape_cast %44 : vector<1x8x16x8xbf16> to vector<8x16x8xbf16>
    %46 = vector.shape_cast %43 : vector<8x16x8xbf16> to vector<1x8x16x8xbf16>
    tpu.vector_store %arg6[%c0_55, %c0_56, %c0_57, %c0_58], %46 {strides = array<i32>} : memref<1x8x16x8xbf16, #tpu.memory_space<vmem>>, vector<1x8x16x8xbf16>,
    %47 = vector.extract_strided_slice %40 {offsets = [0, 8], sizes = [128, 8], strides = [1, 1]} : vector<128x16xf32> to vector<128x8xf32>
    %48 = vector.shape_cast %47 : vector<128x8xf32> to vector<8x16x8xf32>
    %49 = arith.truncf %48 : vector<8x16x8xf32> to vector<8x16x8xbf16>
    %c0_59 = arith.constant 0 : index
    %c0_60 = arith.constant 0 : index
    %c0_61 = arith.constant 0 : index
    %c0_62 = arith.constant 0 : index
    %50 = vector.load %arg7[%c0_59, %c0_60, %c0_61, %c0_62] : memref<1x8x16x8xbf16, #tpu.memory_space<vmem>>, vector<1x8x16x8xbf16>
    %51 = vector.shape_cast %50 : vector<1x8x16x8xbf16> to vector<8x16x8xbf16>
    %52 = vector.shape_cast %49 : vector<8x16x8xbf16> to vector<1x8x16x8xbf16>
    tpu.vector_store %arg7[%c0_59, %c0_60, %c0_61, %c0_62], %52 {strides = array<i32>} : memref<1x8x16x8xbf16, #tpu.memory_space<vmem>>, vector<1x8x16x8xbf16>,
    return
  }
  func.func @transform_0(%arg0: i32, %arg1: i32) -> (i32, i32, i32, i32) {
    %c0_i32 = arith.constant 0 : i32
    %c0_i32_0 = arith.constant 0 : i32
    %c0_i32_1 = arith.constant 0 : i32
    return %arg0, %arg1, %c0_i32, %c0_i32_0 : i32, i32, i32, i32
  }
  func.func @transform_1(%arg0: i32, %arg1: i32) -> (i32, i32, i32, i32) {
    %c1_i32 = arith.constant 1 : i32
    %0 = arith.addi %arg1, %c1_i32 : i32
    %c4_i32 = arith.constant 4 : i32
    %1 = arith.muli %0, %c4_i32 : i32
    %c0_i32 = arith.constant 0 : i32
    %c0_i32_0 = arith.constant 0 : i32
    %c0_i32_1 = arith.constant 0 : i32
    return %arg0, %1, %c0_i32, %c0_i32_0 : i32, i32, i32, i32
  }
  func.func @transform_2(%arg0: i32, %arg1: i32) -> (i32, i32) {
    %c0_i32 = arith.constant 0 : i32
    %c0_i32_0 = arith.constant 0 : i32
    %c0_i32_1 = arith.constant 0 : i32
    return %c0_i32, %c0_i32_0 : i32, i32
  }
  func.func @transform_3(%arg0: i32, %arg1: i32) -> (i32, i32) {
    %c0_i32 = arith.constant 0 : i32
    %c0_i32_0 = arith.constant 0 : i32
    %c0_i32_1 = arith.constant 0 : i32
    return %c0_i32, %c0_i32_0 : i32, i32
  }
  func.func @transform_4(%arg0: i32, %arg1: i32) -> (i32, i32, i32, i32) {
    %c0_i32 = arith.constant 0 : i32
    %c0_i32_0 = arith.constant 0 : i32
    %c0_i32_1 = arith.constant 0 : i32
    return %arg0, %arg1, %c0_i32, %c0_i32_0 : i32, i32, i32, i32
  }
  func.func @transform_5(%arg0: i32, %arg1: i32) -> (i32, i32, i32, i32) {
    %c0_i32 = arith.constant 0 : i32
    %c0_i32_0 = arith.constant 0 : i32
    %c0_i32_1 = arith.constant 0 : i32
    return %arg0, %arg1, %c0_i32, %c0_i32_0 : i32, i32, i32, i32
  }
}

module attributes {stable_mosaic.version = 11 : i64} {
  func.func @_tail_concat_kernel(%arg0: i32, %arg1: i32, %arg2: memref<1x8x18x8xbf16, #tpu.memory_space<vmem>>, %arg3: memref<1x2x18x8xbf16, #tpu.memory_space<vmem>>, %arg4: memref<72x8xbf16, #tpu.memory_space<vmem>>, %arg5: memref<1x8xf32, #tpu.memory_space<vmem>>, %arg6: memref<1x8x16x16xbf16, #tpu.memory_space<vmem>>, %arg7: memref<1x8x16x8xbf16, #tpu.memory_space<vmem>>, %arg8: memref<1x8x16x32xf32, #tpu.memory_space<vmem>>, %arg9: memref<10x18x8xbf16, #tpu.memory_space<vmem>>, %arg10: memref<128x72xbf16, #tpu.memory_space<vmem>>) attributes {dimension_semantics = [#tpu.dimension_semantics<parallel>, #tpu.dimension_semantics<parallel>], iteration_bounds = array<i64: 2, 2>, scalar_prefetch = 0 : i64, scratch_operands = 2 : i64, tpu.core_type = #tpu.core_type<tc>, window_params = [{transform_indices = @transform_0, window_bounds = array<i64: 1, 8, 18, 8>}, {transform_indices = @transform_1, window_bounds = array<i64: 1, 2, 18, 8>}, {pipeline_mode = #tpu.pipeline_mode<synchronous>, transform_indices = @transform_2, window_bounds = array<i64: 72, 8>}, {pipeline_mode = #tpu.pipeline_mode<synchronous>, transform_indices = @transform_3, window_bounds = array<i64: 1, 8>}, {transform_indices = @transform_4, window_bounds = array<i64: 1, 8, 16, 16>}, {transform_indices = @transform_5, window_bounds = array<i64: 1, 8, 16, 8>}, {transform_indices = @transform_6, window_bounds = array<i64: 1, 8, 16, 32>}]} {
    %c0 = arith.constant 0 : index
    %c0_0 = arith.constant 0 : index
    %c0_1 = arith.constant 0 : index
    %c0_2 = arith.constant 0 : index
    %0 = vector.load %arg2[%c0, %c0_0, %c0_1, %c0_2] : memref<1x8x18x8xbf16, #tpu.memory_space<vmem>>, vector<1x8x18x8xbf16>
    %1 = vector.shape_cast %0 : vector<1x8x18x8xbf16> to vector<8x18x8xbf16>
    %c0_3 = arith.constant 0 : index
    %c0_4 = arith.constant 0 : index
    %c0_5 = arith.constant 0 : index
    %2 = vector.load %arg9[%c0_3, %c0_4, %c0_5] : memref<10x18x8xbf16, #tpu.memory_space<vmem>>, vector<8x18x8xbf16>
    tpu.vector_store %arg9[%c0_3, %c0_4, %c0_5], %1 {strides = array<i32>} : memref<10x18x8xbf16, #tpu.memory_space<vmem>>, vector<8x18x8xbf16>,
    %c0_6 = arith.constant 0 : index
    %c0_7 = arith.constant 0 : index
    %c0_8 = arith.constant 0 : index
    %c0_9 = arith.constant 0 : index
    %3 = vector.load %arg3[%c0_6, %c0_7, %c0_8, %c0_9] : memref<1x2x18x8xbf16, #tpu.memory_space<vmem>>, vector<1x2x18x8xbf16>
    %4 = vector.shape_cast %3 : vector<1x2x18x8xbf16> to vector<2x18x8xbf16>
    %c8 = arith.constant 8 : index
    %c0_10 = arith.constant 0 : index
    %c0_11 = arith.constant 0 : index
    %5 = vector.load %arg9[%c8, %c0_10, %c0_11] : memref<10x18x8xbf16, #tpu.memory_space<vmem>>, vector<2x18x8xbf16>
    tpu.vector_store %arg9[%c8, %c0_10, %c0_11], %4 {strides = array<i32>} : memref<10x18x8xbf16, #tpu.memory_space<vmem>>, vector<2x18x8xbf16>,
    %c0_12 = arith.constant 0 : index
    %c0_13 = arith.constant 0 : index
    %c0_14 = arith.constant 0 : index
    %6 = vector.load %arg9[%c0_12, %c0_13, %c0_14] : memref<10x18x8xbf16, #tpu.memory_space<vmem>>, vector<8x16x8xbf16>
    %7 = vector.shape_cast %6 : vector<8x16x8xbf16> to vector<128x8xbf16>
    %c0_15 = arith.constant 0 : index
    %c0_16 = arith.constant 0 : index
    %8 = vector.load %arg10[%c0_15, %c0_16] : memref<128x72xbf16, #tpu.memory_space<vmem>>, vector<128x8xbf16>
    tpu.vector_store %arg10[%c0_15, %c0_16], %7 {strides = array<i32>} : memref<128x72xbf16, #tpu.memory_space<vmem>>, vector<128x8xbf16>,
    %c0_17 = arith.constant 0 : index
    %c1 = arith.constant 1 : index
    %c0_18 = arith.constant 0 : index
    %9 = vector.load %arg9[%c0_17, %c1, %c0_18] : memref<10x18x8xbf16, #tpu.memory_space<vmem>>, vector<8x16x8xbf16>
    %10 = vector.shape_cast %9 : vector<8x16x8xbf16> to vector<128x8xbf16>
    %c0_19 = arith.constant 0 : index
    %c8_20 = arith.constant 8 : index
    %11 = vector.load %arg10[%c0_19, %c8_20] : memref<128x72xbf16, #tpu.memory_space<vmem>>, vector<128x8xbf16>
    tpu.vector_store %arg10[%c0_19, %c8_20], %10 {strides = array<i32>} : memref<128x72xbf16, #tpu.memory_space<vmem>>, vector<128x8xbf16>,
    %c0_21 = arith.constant 0 : index
    %c2 = arith.constant 2 : index
    %c0_22 = arith.constant 0 : index
    %12 = vector.load %arg9[%c0_21, %c2, %c0_22] : memref<10x18x8xbf16, #tpu.memory_space<vmem>>, vector<8x16x8xbf16>
    %13 = vector.shape_cast %12 : vector<8x16x8xbf16> to vector<128x8xbf16>
    %c0_23 = arith.constant 0 : index
    %c16 = arith.constant 16 : index
    %14 = vector.load %arg10[%c0_23, %c16] : memref<128x72xbf16, #tpu.memory_space<vmem>>, vector<128x8xbf16>
    tpu.vector_store %arg10[%c0_23, %c16], %13 {strides = array<i32>} : memref<128x72xbf16, #tpu.memory_space<vmem>>, vector<128x8xbf16>,
    %c1_24 = arith.constant 1 : index
    %c0_25 = arith.constant 0 : index
    %c0_26 = arith.constant 0 : index
    %15 = vector.load %arg9[%c1_24, %c0_25, %c0_26] : memref<10x18x8xbf16, #tpu.memory_space<vmem>>, vector<8x16x8xbf16>
    %16 = vector.shape_cast %15 : vector<8x16x8xbf16> to vector<128x8xbf16>
    %c0_27 = arith.constant 0 : index
    %c24 = arith.constant 24 : index
    %17 = vector.load %arg10[%c0_27, %c24] : memref<128x72xbf16, #tpu.memory_space<vmem>>, vector<128x8xbf16>
    tpu.vector_store %arg10[%c0_27, %c24], %16 {strides = array<i32>} : memref<128x72xbf16, #tpu.memory_space<vmem>>, vector<128x8xbf16>,
    %c1_28 = arith.constant 1 : index
    %c1_29 = arith.constant 1 : index
    %c0_30 = arith.constant 0 : index
    %18 = vector.load %arg9[%c1_28, %c1_29, %c0_30] : memref<10x18x8xbf16, #tpu.memory_space<vmem>>, vector<8x16x8xbf16>
    %19 = vector.shape_cast %18 : vector<8x16x8xbf16> to vector<128x8xbf16>
    %c0_31 = arith.constant 0 : index
    %c32 = arith.constant 32 : index
    %20 = vector.load %arg10[%c0_31, %c32] : memref<128x72xbf16, #tpu.memory_space<vmem>>, vector<128x8xbf16>
    tpu.vector_store %arg10[%c0_31, %c32], %19 {strides = array<i32>} : memref<128x72xbf16, #tpu.memory_space<vmem>>, vector<128x8xbf16>,
    %c1_32 = arith.constant 1 : index
    %c2_33 = arith.constant 2 : index
    %c0_34 = arith.constant 0 : index
    %21 = vector.load %arg9[%c1_32, %c2_33, %c0_34] : memref<10x18x8xbf16, #tpu.memory_space<vmem>>, vector<8x16x8xbf16>
    %22 = vector.shape_cast %21 : vector<8x16x8xbf16> to vector<128x8xbf16>
    %c0_35 = arith.constant 0 : index
    %c40 = arith.constant 40 : index
    %23 = vector.load %arg10[%c0_35, %c40] : memref<128x72xbf16, #tpu.memory_space<vmem>>, vector<128x8xbf16>
    tpu.vector_store %arg10[%c0_35, %c40], %22 {strides = array<i32>} : memref<128x72xbf16, #tpu.memory_space<vmem>>, vector<128x8xbf16>,
    %c2_36 = arith.constant 2 : index
    %c0_37 = arith.constant 0 : index
    %c0_38 = arith.constant 0 : index
    %24 = vector.load %arg9[%c2_36, %c0_37, %c0_38] : memref<10x18x8xbf16, #tpu.memory_space<vmem>>, vector<8x16x8xbf16>
    %25 = vector.shape_cast %24 : vector<8x16x8xbf16> to vector<128x8xbf16>
    %c0_39 = arith.constant 0 : index
    %c48 = arith.constant 48 : index
    %26 = vector.load %arg10[%c0_39, %c48] : memref<128x72xbf16, #tpu.memory_space<vmem>>, vector<128x8xbf16>
    tpu.vector_store %arg10[%c0_39, %c48], %25 {strides = array<i32>} : memref<128x72xbf16, #tpu.memory_space<vmem>>, vector<128x8xbf16>,
    %c2_40 = arith.constant 2 : index
    %c1_41 = arith.constant 1 : index
    %c0_42 = arith.constant 0 : index
    %27 = vector.load %arg9[%c2_40, %c1_41, %c0_42] : memref<10x18x8xbf16, #tpu.memory_space<vmem>>, vector<8x16x8xbf16>
    %28 = vector.shape_cast %27 : vector<8x16x8xbf16> to vector<128x8xbf16>
    %c0_43 = arith.constant 0 : index
    %c56 = arith.constant 56 : index
    %29 = vector.load %arg10[%c0_43, %c56] : memref<128x72xbf16, #tpu.memory_space<vmem>>, vector<128x8xbf16>
    tpu.vector_store %arg10[%c0_43, %c56], %28 {strides = array<i32>} : memref<128x72xbf16, #tpu.memory_space<vmem>>, vector<128x8xbf16>,
    %c2_44 = arith.constant 2 : index
    %c2_45 = arith.constant 2 : index
    %c0_46 = arith.constant 0 : index
    %30 = vector.load %arg9[%c2_44, %c2_45, %c0_46] : memref<10x18x8xbf16, #tpu.memory_space<vmem>>, vector<8x16x8xbf16>
    %31 = vector.shape_cast %30 : vector<8x16x8xbf16> to vector<128x8xbf16>
    %c0_47 = arith.constant 0 : index
    %c64 = arith.constant 64 : index
    %32 = vector.load %arg10[%c0_47, %c64] : memref<128x72xbf16, #tpu.memory_space<vmem>>, vector<128x8xbf16>
    tpu.vector_store %arg10[%c0_47, %c64], %31 {strides = array<i32>} : memref<128x72xbf16, #tpu.memory_space<vmem>>, vector<128x8xbf16>,
    %c0_48 = arith.constant 0 : index
    %c0_49 = arith.constant 0 : index
    %33 = vector.load %arg10[%c0_48, %c0_49] : memref<128x72xbf16, #tpu.memory_space<vmem>>, vector<128x72xbf16>
    %c0_50 = arith.constant 0 : index
    %c0_51 = arith.constant 0 : index
    %34 = vector.load %arg4[%c0_50, %c0_51] : memref<72x8xbf16, #tpu.memory_space<vmem>>, vector<72x8xbf16>
    %cst = arith.constant dense<0.000000e+00> : vector<128x8xf32>
    %35 = tpu.matmul %33, %34, %cst {dimension_numbers = #tpu.dot_dimension_numbers<[1], [0], [0], [1], [0, 0, 1, 1], [], []>} : vector<128x72xbf16>, vector<72x8xbf16>, vector<128x8xf32> -> vector<128x8xf32>
    %c0_52 = arith.constant 0 : index
    %c0_53 = arith.constant 0 : index
    %36 = vector.load %arg5[%c0_52, %c0_53] : memref<1x8xf32, #tpu.memory_space<vmem>>, vector<1x8xf32>
    %37 = vector.broadcast %36 : vector<1x8xf32> to vector<128x8xf32>
    %38 = arith.addf %35, %37 : vector<128x8xf32>
    %cst_54 = arith.constant 0.000000e+00 : f32
    %39 = vector.broadcast %cst_54 : f32 to vector<128x8xf32>
    %40 = arith.maximumf %38, %39 : vector<128x8xf32>
    %c0_55 = arith.constant 0 : index
    %c0_56 = arith.constant 0 : index
    %c0_57 = arith.constant 0 : index
    %c0_58 = arith.constant 0 : index
    %41 = vector.load %arg6[%c0_55, %c0_56, %c0_57, %c0_58] : memref<1x8x16x16xbf16, #tpu.memory_space<vmem>>, vector<1x8x16x16xbf16>
    %42 = vector.shape_cast %41 : vector<1x8x16x16xbf16> to vector<8x16x16xbf16>
    %43 = arith.extf %42 : vector<8x16x16xbf16> to vector<8x16x16xf32>
    %c0_59 = arith.constant 0 : index
    %c0_60 = arith.constant 0 : index
    %c0_61 = arith.constant 0 : index
    %c0_62 = arith.constant 0 : index
    %44 = vector.load %arg8[%c0_59, %c0_60, %c0_61, %c0_62] : memref<1x8x16x32xf32, #tpu.memory_space<vmem>>, vector<1x8x16x16xf32>
    %45 = vector.shape_cast %44 : vector<1x8x16x16xf32> to vector<8x16x16xf32>
    %46 = vector.shape_cast %43 : vector<8x16x16xf32> to vector<1x8x16x16xf32>
    tpu.vector_store %arg8[%c0_59, %c0_60, %c0_61, %c0_62], %46 {strides = array<i32>} : memref<1x8x16x32xf32, #tpu.memory_space<vmem>>, vector<1x8x16x16xf32>,
    %c0_63 = arith.constant 0 : index
    %c0_64 = arith.constant 0 : index
    %c0_65 = arith.constant 0 : index
    %c0_66 = arith.constant 0 : index
    %47 = vector.load %arg7[%c0_63, %c0_64, %c0_65, %c0_66] : memref<1x8x16x8xbf16, #tpu.memory_space<vmem>>, vector<1x8x16x8xbf16>
    %48 = vector.shape_cast %47 : vector<1x8x16x8xbf16> to vector<8x16x8xbf16>
    %49 = arith.extf %48 : vector<8x16x8xbf16> to vector<8x16x8xf32>
    %c0_67 = arith.constant 0 : index
    %c0_68 = arith.constant 0 : index
    %c0_69 = arith.constant 0 : index
    %c16_70 = arith.constant 16 : index
    %50 = vector.load %arg8[%c0_67, %c0_68, %c0_69, %c16_70] : memref<1x8x16x32xf32, #tpu.memory_space<vmem>>, vector<1x8x16x8xf32>
    %51 = vector.shape_cast %50 : vector<1x8x16x8xf32> to vector<8x16x8xf32>
    %52 = vector.shape_cast %49 : vector<8x16x8xf32> to vector<1x8x16x8xf32>
    tpu.vector_store %arg8[%c0_67, %c0_68, %c0_69, %c16_70], %52 {strides = array<i32>} : memref<1x8x16x32xf32, #tpu.memory_space<vmem>>, vector<1x8x16x8xf32>,
    %53 = vector.shape_cast %40 : vector<128x8xf32> to vector<8x16x8xf32>
    %c0_71 = arith.constant 0 : index
    %c0_72 = arith.constant 0 : index
    %c0_73 = arith.constant 0 : index
    %c24_74 = arith.constant 24 : index
    %54 = vector.load %arg8[%c0_71, %c0_72, %c0_73, %c24_74] : memref<1x8x16x32xf32, #tpu.memory_space<vmem>>, vector<1x8x16x8xf32>
    %55 = vector.shape_cast %54 : vector<1x8x16x8xf32> to vector<8x16x8xf32>
    %56 = vector.shape_cast %53 : vector<8x16x8xf32> to vector<1x8x16x8xf32>
    tpu.vector_store %arg8[%c0_71, %c0_72, %c0_73, %c24_74], %56 {strides = array<i32>} : memref<1x8x16x32xf32, #tpu.memory_space<vmem>>, vector<1x8x16x8xf32>,
    return
  }
  func.func @transform_0(%arg0: i32, %arg1: i32) -> (i32, i32, i32, i32) {
    %c0_i32 = arith.constant 0 : i32
    %c0_i32_0 = arith.constant 0 : i32
    %c0_i32_1 = arith.constant 0 : i32
    return %arg0, %arg1, %c0_i32, %c0_i32_0 : i32, i32, i32, i32
  }
  func.func @transform_1(%arg0: i32, %arg1: i32) -> (i32, i32, i32, i32) {
    %c1_i32 = arith.constant 1 : i32
    %0 = arith.addi %arg1, %c1_i32 : i32
    %c4_i32 = arith.constant 4 : i32
    %1 = arith.muli %0, %c4_i32 : i32
    %c0_i32 = arith.constant 0 : i32
    %c0_i32_0 = arith.constant 0 : i32
    %c0_i32_1 = arith.constant 0 : i32
    return %arg0, %1, %c0_i32, %c0_i32_0 : i32, i32, i32, i32
  }
  func.func @transform_2(%arg0: i32, %arg1: i32) -> (i32, i32) {
    %c0_i32 = arith.constant 0 : i32
    %c0_i32_0 = arith.constant 0 : i32
    %c0_i32_1 = arith.constant 0 : i32
    return %c0_i32, %c0_i32_0 : i32, i32
  }
  func.func @transform_3(%arg0: i32, %arg1: i32) -> (i32, i32) {
    %c0_i32 = arith.constant 0 : i32
    %c0_i32_0 = arith.constant 0 : i32
    %c0_i32_1 = arith.constant 0 : i32
    return %c0_i32, %c0_i32_0 : i32, i32
  }
  func.func @transform_4(%arg0: i32, %arg1: i32) -> (i32, i32, i32, i32) {
    %c0_i32 = arith.constant 0 : i32
    %c0_i32_0 = arith.constant 0 : i32
    %c0_i32_1 = arith.constant 0 : i32
    return %arg0, %arg1, %c0_i32, %c0_i32_0 : i32, i32, i32, i32
  }
  func.func @transform_5(%arg0: i32, %arg1: i32) -> (i32, i32, i32, i32) {
    %c0_i32 = arith.constant 0 : i32
    %c0_i32_0 = arith.constant 0 : i32
    %c0_i32_1 = arith.constant 0 : i32
    return %arg0, %arg1, %c0_i32, %c0_i32_0 : i32, i32, i32, i32
  }
  func.func @transform_6(%arg0: i32, %arg1: i32) -> (i32, i32, i32, i32) {
    %c0_i32 = arith.constant 0 : i32
    %c0_i32_0 = arith.constant 0 : i32
    %c0_i32_1 = arith.constant 0 : i32
    return %arg0, %arg1, %c0_i32, %c0_i32_0 : i32, i32, i32, i32
  }
}

</mosaic_0001>

<bundles_post_ra>
// kernel: ssh_forward.4
= control target key start
LH: loop header
LB: loop body
LE: loop exit
PB: predicated region body
PF: predicated region fallthrough
CT: control target
= control target key end

     0   :  { %s2886_s18 = smov 0   ;;  %s2888_s19 = smov 0   ;;  %s3696_s0 = inlined_call_operand.vmem [shape: bf16[2,18,18,8], index: 0, kind: input, shape index: {}, may-alias: {0,1}]   ;;  %s3697_s1 = inlined_call_operand.vmem [shape: bf16[2,18,18,8], index: 1, kind: input, shape index: {}, may-alias: {0,1}]   ;;  %s3698_s2 = inlined_call_operand.vmem [shape: bf16[72,16], index: 2, kind: input, shape index: {}]   ;;  %s3699_s3 = inlined_call_operand.vmem [shape: f32[1,16], index: 3, kind: input, shape index: {}]   ;;  %s3700_s4 = inlined_call_operand.vmem [shape: bf16[2,16,16,8], index: 4, kind: output, shape index: {0}]   ;;  %s3701_s5 = inlined_call_operand.vmem [shape: bf16[2,16,16,8], index: 5, kind: output, shape index: {1}]  }
   0x1   :  { %s2890_s20 = smov 0   ;;  %s2892_s21 = smov 0  }
   0x2   :  { %s2894_s22 = smov 0  }
   0x3 LB: > { %s25_s23 = sadd.s32 1, %s2837_s20  ;;  %s28_s24 = sadd.s32 1, %s2841_s21  ;;  %s2845_s22 = sphi %s2894_s22, %s16_s22   ;;  %s2841_s21 = sphi %s2892_s21, %s3709_s21   ;;  %s2837_s20 = sphi %s2890_s20, %s3708_s20   ;;  %s2833_s19 = sphi %s2888_s19, %s3707_s19   ;;  %s2829_s18 = sphi %s2886_s18, %s3706_s18  }
   0x4   : > { %p26_p0 = scmp.ge.s32.totalorder %s25_s23, 2  ;;  %p2588_p1 = scmp.ge.s32.totalorder %s2845_s22, 1 }
   0x5   : > { %p250_p2 = scmp.lt.s32.totalorder %s2845_s22, 5 }
   0x6   : > { %s3711_s23 = smov (%p26_p0, %s25_s23), 0  ;;  %s3713_s24 = smov (!%p26_p0, %s28_s24), %s2841_s21 }
   0x7   : > { %p251_p3 = pnand %p2588_p1, %p250_p2  ;;  %p30_p4 = scmp.ge.s32.totalorder %s3713_s24, 2 }
   0x8   : > { %s2916_s25 = sshll.u32 (!%p251_p3), %s2829_s18, 3  ;;  %p321_p5 = scmp.lt.s32.totalorder (!%p251_p3), %s2833_s19, 1 }
   0x9   : > { %s3715_s24 = smov (%p30_p4, %s3713_s24), 0  ;;  %254 = sbr.rel (%p251_p3) target bundleno = 745 (0x2e9), region = 36 }
   0xa   : > { %p323_p6 = scmp.lt.s32.totalorder (!%p251_p3), %s2916_s25, 17  ;;  %s2847_s9 = smov (!%p251_p3), 16  }
   0xb   : > { %s2848_s10 = smov (!%p251_p3), 8   ;;  %s2849_s11 = smov (!%p251_p3), 24  }
   0xc   : > { %s2850_s12 = smov (!%p251_p3), 32   ;;  %s2851_s13 = smov (!%p251_p3), 40  }
   0xd   : > { %s2690_s14 = sadd.s32 (!%p251_p3), 8, %s2916_s25  ;;  %s2852_s16 = smov (!%p251_p3), 48  }
   0xe   : > { %s3717_s19 = smov (!%p321_p5, %s2833_s19), 1  ;;  %vm801_vm0 = vcmask 1042432   ;;  %vm802_vm1 = vcmask 1046532   ;;  %vm398_vm2 = vcmask 60416   ;;  %vm401_vm3 = vcmask 57344   ;;  %p341_p7 = scmp.lt.s32.totalorder %s2690_s14, 17 }
   0xf   : > { %s324_s26 = scalar_select %p323_p6, %s2916_s25, 17  ;;  %vm2932_vm4 = vmor %vm801_vm0, %vm802_vm1  ;;  %vm493_vm5 = vsmask.f32 3328  ;;  %vm494_vm6 = vsmask.f32 7440  ;;  %vm2145_vm8 = vcmask 1043456  }
  0x10   : > { %s2743_s27 = smul.u32 54, %s3717_s19  ;;  %vm3004_vm7 = vmor %vm493_vm5, %vm494_vm6  ;;  %s3719_s14 = smov (!%p341_p7, %s2690_s14), 17  ;;  %vm736_vm9 = vcmask 126016   ;;  %vm908_vm10 = vcmask 191616   ;;  %vm1006_vm11 = vcmask 257216   ;;  %vm1287_vm12 = vcmask 322816  }
  0x11   : > { %s2742_s28 = smul.u32 3, %s324_s26  ;;  %vm1456_vm13 = vcmask 388416   ;;  %vm1554_vm14 = vcmask 454016   ;;  %vm1835_vm15 = vcmask 519616   ;;  %vm2004_vm0 = vcmask 585216   ;;  %p354_p8 = scmp.lt.s32.totalorder %s2916_s25, 15 }
  0x12   : > { %s2744_s15 = smul.u32 3, %s3719_s14  ;;  %vm2120_vm1 = vcmask 588800  }
  0x13   : > { %s327_s29 = sadd.s32 %s2743_s27, %s2742_s28  ;;  %s3721_s25 = smov (!%p354_p8, %s2916_s25), 15 }
  0x14   : > { %s2590_s30 = sshll.u32 %s327_s29, 2  ;;  %s345_s17 = sadd.s32 %s2744_s15, %s2743_s27 }
  0x15   : > { %s2928_s8 = scalar_lea.vmem %s3696_s0, %s2590_s30  ;;  %s2593_s18 = sshll.u32 %s345_s17, 2 }
  0x16   : > { %v374_v0 = vld [vmem:[%s2928_s8] sm:$0xf]  ;;  %v375_v1 = vld [vmem:[%s2928_s8 + $0x4] sm:$0xf]  ;;  %v376_v3 = vld [vmem:[%s2928_s8 + $0x8] sm:$0x1]  ;;  %s3113_s28 = scalar_lea.vmem %s3697_s1, %s2593_s18 }
  0x17   : > { %399 = vst.msk [vmem:[#allocation2] sm:$0xf] %vm398_vm2, %v374_v0  ;;  %400 = vst.msk [vmem:[#allocation2 + $0x4] sm:$0xf] %vm398_vm2, %v375_v1  ;;  %v386_v4 = vld [vmem:[%s2928_s8 + $0x30] sm:$0xf] }
  0x18   : > { %402 = vst.msk [vmem:[#allocation2 + $0x8] sm:$0x1] %vm401_vm3, %v376_v3  ;;  %v387_v5 = vld [vmem:[%s2928_s8 + $0x34] sm:$0xf]  ;;  %v388_v6 = vld [vmem:[%s2928_s8 + $0x38] sm:$0x1] }
  0x19   : > { %412 = vst.msk [vmem:[#allocation2 + $0x30] sm:$0xf] %vm398_vm2, %v386_v4  ;;  %413 = vst.msk [vmem:[#allocation2 + $0x34] sm:$0xf] %vm398_vm2, %v387_v5  ;;  %v377_v7 = vld [vmem:[%s2928_s8 + $0xc] sm:$0xf] }
  0x1a   : > { %414 = vst.msk [vmem:[#allocation2 + $0x38] sm:$0x1] %vm401_vm3, %v388_v6  ;;  %v378_v8 = vld [vmem:[%s2928_s8 + $0x10] sm:$0xf]  ;;  %v379_v9 = vld [vmem:[%s2928_s8 + $0x14] sm:$0x1] }
  0x1b   : > { %403 = vst.msk [vmem:[#allocation2 + $0xc] sm:$0xf] %vm398_vm2, %v377_v7  ;;  %404 = vst.msk [vmem:[#allocation2 + $0x10] sm:$0xf] %vm398_vm2, %v378_v8  ;;  %v389_v10 = vld [vmem:[%s2928_s8 + $0x3c] sm:$0xf] }
  0x1c   : > { %405 = vst.msk [vmem:[#allocation2 + $0x14] sm:$0x1] %vm401_vm3, %v379_v9  ;;  %v390_v11 = vld [vmem:[%s2928_s8 + $0x40] sm:$0xf]  ;;  %v391_v12 = vld [vmem:[%s2928_s8 + $0x44] sm:$0x1] }
  0x1d   : > { %415 = vst.msk [vmem:[#allocation2 + $0x3c] sm:$0xf] %vm398_vm2, %v389_v10  ;;  %416 = vst.msk [vmem:[#allocation2 + $0x40] sm:$0xf] %vm398_vm2, %v390_v11  ;;  %v381_v13 = vld [vmem:[%s2928_s8 + $0x1c] sm:$0xf] }
  0x1e   : > { %417 = vst.msk [vmem:[#allocation2 + $0x44] sm:$0x1] %vm401_vm3, %v391_v12  ;;  %v380_v14 = vld [vmem:[%s2928_s8 + $0x18] sm:$0xf]  ;;  %v393_v15 = vld [vmem:[%s2928_s8 + $0x4c] sm:$0xf] }
  0x1f   : > { %407 = vst.msk [vmem:[#allocation2 + $0x1c] sm:$0xf] %vm398_vm2, %v381_v13  ;;  %406 = vst.msk [vmem:[#allocation2 + $0x18] sm:$0xf] %vm398_vm2, %v380_v14  ;;  %v392_v16 = vld [vmem:[%s2928_s8 + $0x48] sm:$0xf] }
  0x20   : > { %419 = vst.msk [vmem:[#allocation2 + $0x4c] sm:$0xf] %vm398_vm2, %v393_v15  ;;  %v382_v17 = vld [vmem:[%s2928_s8 + $0x20] sm:$0x1]  ;;  %v394_v18 = vld [vmem:[%s2928_s8 + $0x50] sm:$0x1] }
  0x21   : > { %418 = vst.msk [vmem:[#allocation2 + $0x48] sm:$0xf] %vm398_vm2, %v392_v16  ;;  %v384_v19 = vld [vmem:[%s2928_s8 + $0x28] sm:$0xf]  ;;  %v383_v20 = vld [vmem:[%s2928_s8 + $0x24] sm:$0xf] }
  0x22   : > { %408 = vst.msk [vmem:[#allocation2 + $0x20] sm:$0x1] %vm401_vm3, %v382_v17  ;;  %420 = vst.msk [vmem:[#allocation2 + $0x50] sm:$0x1] %vm401_vm3, %v394_v18  ;;  %v396_v21 = vld [vmem:[%s2928_s8 + $0x58] sm:$0xf] }
  0x23   : > { %410 = vst.msk [vmem:[#allocation2 + $0x28] sm:$0xf] %vm398_vm2, %v384_v19  ;;  %409 = vst.msk [vmem:[#allocation2 + $0x24] sm:$0xf] %vm398_vm2, %v383_v20  ;;  %v395_v22 = vld [vmem:[%s2928_s8 + $0x54] sm:$0xf] }
  0x24   : > { %422 = vst.msk [vmem:[#allocation2 + $0x58] sm:$0xf] %vm398_vm2, %v396_v21  ;;  %v385_v23 = vld [vmem:[%s2928_s8 + $0x2c] sm:$0x1]  ;;  %v397_v24 = vld [vmem:[%s2928_s8 + $0x5c] sm:$0x1] }
  0x25   : > { %v753_v25 = vld [vmem:[#allocation2] sm:$0xe]  ;;  %v754_v26 = vld [vmem:[#allocation2 + $0x4] sm:$0xf]  ;;  %v755_v27 = vld [vmem:[#allocation2 + $0x8] sm:$0x1] }
  0x26   : > { %421 = vst.msk [vmem:[#allocation2 + $0x54] sm:$0xf] %vm398_vm2, %v395_v22  ;;  %v2602_v28 = vrot.slane %v753_v25, 9  ;;  %v806_v29 = vrot.slane %v754_v26, 5  ;;  %v809_v30 = vrot.slane %v755_v27, 5  ;;  %s2853_s29 = smov 56  }
  0x27   : > { %411 = vst.msk [vmem:[#allocation2 + $0x2c] sm:$0x1] %vm401_vm3, %v385_v23  ;;  %423 = vst.msk [vmem:[#allocation2 + $0x5c] sm:$0x1] %vm401_vm3, %v397_v24  ;;  %v765_v31 = vld [vmem:[#allocation2 + $0x30] sm:$0xe] }
  0x28   : > { %v766_v32 = vld [vmem:[#allocation2 + $0x34] sm:$0xf]  ;;  %v2606_v33 = vrot.slane %v765_v31, 9  ;;  %v767_v34 = vld [vmem:[#allocation2 + $0x38] sm:$0x1]  ;;  %v807_v35 = vsel %vm2932_vm4, %v2602_v28, %v806_v29  ;;  %v808_v36 = vrot.slane %v806_v29, 4 }
  0x29   : > { %v834_v37 = vrot.slane %v766_v32, 5  ;;  %v837_v38 = vrot.slane %v767_v34, 5  ;;  %v756_v39 = vld [vmem:[#allocation2 + $0xc] sm:$0xe]  ;;  %860 = vrot.lane.b32.xlu0 %v807_v35, %s2847_s9  ;;  %v757_v40 = vld [vmem:[#allocation2 + $0x10] sm:$0xf] }
  0x2a   : > { %v2603_v41 = vrot.slane %v756_v39, 9  ;;  %v758_v42 = vld [vmem:[#allocation2 + $0x14] sm:$0x1]  ;;  %v810_v43 = vsel %vm2932_vm4, %v808_v36, %v809_v30  ;;  %v813_v46 = vrot.slane %v757_v40, 5  ;;  %v768_v47 = vld [vmem:[#allocation2 + $0x3c] sm:$0xe] }
  0x2b   : > { %v835_v44 = vsel %vm2932_vm4, %v2606_v33, %v834_v37  ;;  %v836_v45 = vrot.slane %v834_v37, 4  ;;  %v769_v48 = vld [vmem:[#allocation2 + $0x40] sm:$0xf]  ;;  %862 = vrot.lane.b32.xlu1 %v810_v43, %s2847_s9  ;;  %v816_v49 = vrot.slane %v758_v42, 5  ;;  %v770_v51 = vld [vmem:[#allocation2 + $0x44] sm:$0x1] }
  0x2c   : > { %v841_v50 = vrot.slane %v769_v48, 5  ;;  %v815_v53 = vrot.slane %v813_v46, 4  ;;  %v2607_v54 = vrot.slane %v768_v47, 9  ;;  %v469_v55 = vld [vmem:[#allocation2] sm:$0xf]  ;;  %v814_v57 = vsel %vm2932_vm4, %v2603_v41, %v813_v46  ;;  %s2854_s30 = smov 64  }
  0x2d   : > { %v838_v52 = vsel %vm2932_vm4, %v836_v45, %v837_v38  ;;  %v470_v56 = vld [vmem:[#allocation2 + $0x4] sm:$0xf]  ;;  %876 = vrot.lane.b32.xlu0 %v835_v44, %s2847_s9  ;;  %v844_v58 = vrot.slane %v770_v51, 5  ;;  %v497_v59 = vshrl.u32 %v469_v55, 16  ;;  %v500_v60 = vshll.u32 %v469_v55, 16 }
  0x2e   : > { %v481_v61 = vld [vmem:[#allocation2 + $0x30] sm:$0xf]  ;;  %v843_v62 = vrot.slane %v841_v50, 4  ;;  %v506_v63 = vshll.u32 %v470_v56, 16  ;;  %v510_v0 = vshrl.u32 %v470_v56, 16  ;;  %v817_v4 = vsel %vm2932_vm4, %v815_v53, %v816_v49 }
  0x2f   : > { %v482_v1 = vld [vmem:[#allocation2 + $0x34] sm:$0xf]  ;;  %v593_v3 = vshrl.u32 %v481_v61, 16  ;;  %878 = vrot.lane.b32.xlu1 %v838_v52, %s2847_s9  ;;  %v499_v5 = vrot.slane %v497_v59, 4  ;;  %v502_v6 = vrot.slane %v500_v60, 5  ;;  %v596_v7 = vshll.u32 %v481_v61, 16 }
  0x30   : > { %v471_v8 = vld [vmem:[#allocation2 + $0x8] sm:$0x1]  ;;  %v508_v9 = vrot.slane %v506_v63, 5  ;;  %v602_v11 = vshll.u32 %v482_v1, 16  ;;  %v606_v12 = vshrl.u32 %v482_v1, 16  ;;  %v512_v16 = vrot.slane %v510_v0, 4 }
  0x31   : > { %v595_v10 = vrot.slane %v593_v3, 4  ;;  %v483_v13 = vld [vmem:[#allocation2 + $0x38] sm:$0x1]  ;;  %864 = vrot.lane.b32.xlu0 %v814_v57, %s2847_s9  ;;  %v503_v14 = vor.u32 %v502_v6, %v499_v5  ;;  %v598_v15 = vrot.slane %v596_v7, 5  ;;  %v516_v17 = vshll.u32 %v471_v8, 16 }
  0x32   : > { %v472_v18 = vld [vmem:[#allocation2 + $0xc] sm:$0xf]  ;;  %v842_v19 = vsel %vm2932_vm4, %v2607_v54, %v841_v50  ;;  %v604_v20 = vrot.slane %v602_v11, 5  ;;  %v608_v21 = vrot.slane %v606_v12, 4  ;;  %v473_v22 = vld [vmem:[#allocation2 + $0x10] sm:$0xf]  ;;  %v513_v27 = vor.u32 %v512_v16, %v508_v9 }
  0x33   : > { %v521_v23 = vshrl.u32 %v472_v18, 16  ;;  %866 = vrot.lane.b32.xlu1 %v817_v4, %s2847_s9  ;;  %v504_v25 = vrot.slane %v503_v14, 4  ;;  %v599_v26 = vor.u32 %v598_v15, %v595_v10  ;;  %v612_v28 = vshll.u32 %v483_v13, 16  ;;  %v484_v33 = vld [vmem:[#allocation2 + $0x3c] sm:$0xf] }
  0x34   : > { %v845_v29 = vsel %vm2932_vm4, %v843_v62, %v844_v58  ;;  %v609_v30 = vor.u32 %v608_v21, %v604_v20  ;;  %v524_v32 = vshll.u32 %v472_v18, 16  ;;  %v518_v35 = vrot.slane %v516_v17, 5  ;;  %v474_v37 = vld [vmem:[#allocation2 + $0x14] sm:$0x1]  ;;  %v485_v42 = vld [vmem:[#allocation2 + $0x40] sm:$0xf] }
  0x35   : > { %v523_v31 = vrot.slane %v521_v23, 4  ;;  %880 = vrot.lane.b32.xlu0 %v842_v19, %s2847_s9  ;;  %v600_v34 = vrot.slane %v599_v26, 4  ;;  %v530_v36 = vshll.u32 %v473_v22, 16  ;;  %v509_v38 = vsel %vm3004_vm7, %v504_v25, %v508_v9  ;;  %v486_v55 = vld [vmem:[#allocation2 + $0x44] sm:$0x1] }
  0x36   : > { %v514_v39 = vrot.slane %v513_v27, 4  ;;  %v526_v40 = vrot.slane %v524_v32, 5  ;;  %v534_v41 = vshrl.u32 %v473_v22, 16  ;;  %v610_v43 = vrot.slane %v609_v30, 4  ;;  %v1023_v11 = vld [vmem:[#allocation2 + $0xc] sm:$0xf] }
  0x37   : > { %882 = vrot.lane.b32.xlu1 %v845_v29, %s2847_s9  ;;  %v614_v44 = vrot.slane %v612_v28, 5  ;;  %v532_v45 = vrot.slane %v530_v36, 5  ;;  %v617_v46 = vshrl.u32 %v484_v33, 16  ;;  %v605_v47 = vsel %vm3004_vm7, %v600_v34, %v604_v20  ;;  %v1024_v13 = vld [vmem:[#allocation2 + $0x10] sm:$0xf] }
  0x38   : > { %v527_v48 = vor.u32 %v526_v40, %v523_v31  ;;  %v536_v49 = vrot.slane %v534_v41, 4  ;;  %v540_v50 = vshll.u32 %v474_v37, 16  ;;  %v620_v52 = vshll.u32 %v484_v33, 16  ;;  %v926_v16 = vld [vmem:[#allocation2 + $0xc] sm:$0xf] }
  0x39   : > { %688 = vrot.lane.b32.xlu0 %v509_v38, %s2848_s10  ;;  %v619_v51 = vrot.slane %v617_v46, 4  ;;  %v626_v53 = vshll.u32 %v485_v42, 16  ;;  %v630_v54 = vshrl.u32 %v485_v42, 16  ;;  %v519_v56 = vsel %vm3004_vm7, %v514_v39, %v518_v35  ;;  %v1035_v17 = vld [vmem:[#allocation2 + $0x3c] sm:$0xf] }
  0x3a   : > { %v528_v57 = vrot.slane %v527_v48, 4  ;;  %v537_v58 = vor.u32 %v536_v49, %v532_v45  ;;  %v622_v59 = vrot.slane %v620_v52, 5  ;;  %v615_v62 = vsel %vm3004_vm7, %v610_v43, %v614_v44  ;;  %v927_v20 = vld [vmem:[#allocation2 + $0x10] sm:$0xf]  ;;  %v1036_v21 = vld [vmem:[#allocation2 + $0x40] sm:$0xf] }
  0x3b   : > { %704 = vrot.lane.b32.xlu1 %v605_v47, %s2848_s10  ;;  %v628_v60 = vrot.slane %v626_v53, 5  ;;  %v632_v61 = vrot.slane %v630_v54, 4  ;;  %v542_v0 = vrot.slane %v540_v50, 5  ;;  %v636_v1 = vshll.u32 %v486_v55, 16  ;;  %v934_v27 = vld [vmem:[#allocation2 + $0x3c] sm:$0xf] }
  0x3c   : > { %v538_v63 = vrot.slane %v537_v58, 4  ;;  %v623_v3 = vor.u32 %v622_v59, %v619_v51  ;;  %v533_v5 = vsel %vm3004_vm7, %v528_v57, %v532_v45  ;;  %v1048_v14 = vshrl.u32 %v1023_v11, 16  ;;  %v1026_v32 = vld [vmem:[#allocation2 + $0x18] sm:$0xf]  ;;  %v935_v33 = vld [vmem:[#allocation2 + $0x40] sm:$0xf] }
  0x3d   : > { %690 = vrot.lane.b32.xlu0 %v519_v56, %s2848_s10  ;;  %v633_v4 = vor.u32 %v632_v61, %v628_v60  ;;  %v638_v9 = vrot.slane %v636_v1, 5  ;;  %v1051_v15 = vshll.u32 %v1023_v11, 16  ;;  %v1057_v18 = vshll.u32 %v1024_v13, 16  ;;  %v1025_v34 = vld [vmem:[#allocation2 + $0x14] sm:$0x1] }
  0x3e   : > { %v624_v6 = vrot.slane %v623_v3, 4  ;;  %v543_v7 = vsel %vm3004_vm7, %v538_v63, %v542_v0  ;;  %v1061_v19 = vshrl.u32 %v1024_v13, 16  ;;  %v1050_v22 = vrot.slane %v1048_v14, 4  ;;  %v1027_v38 = vld [vmem:[#allocation2 + $0x1c] sm:$0xf] }
  0x3f   : > { %706 = vrot.lane.b32.xlu1 %v615_v62, %s2848_s10  ;;  %v634_v8 = vrot.slane %v633_v4, 4  ;;  %v1053_v23 = vrot.slane %v1051_v15, 5  ;;  %v1144_v25 = vshrl.u32 %v1035_v17, 16  ;;  %v1147_v26 = vshll.u32 %v1035_v17, 16  ;;  %v928_v39 = vld [vmem:[#allocation2 + $0x18] sm:$0xf] }
  0x40   : > { %v629_v10 = vsel %vm3004_vm7, %v624_v6, %v628_v60  ;;  %v1059_v28 = vrot.slane %v1057_v18, 5  ;;  %v1063_v29 = vrot.slane %v1061_v19, 4  ;;  %v1153_v30 = vshll.u32 %v1036_v21, 16  ;;  %v1038_v46 = vld [vmem:[#allocation2 + $0x48] sm:$0xf] }
  0x41   : > { %692 = vrot.lane.b32.xlu0 %v533_v5, %s2848_s10  ;;  %v639_v12 = vsel %vm3004_vm7, %v634_v8, %v638_v9  ;;  %v1157_v31 = vshrl.u32 %v1036_v21, 16  ;;  %v1054_v35 = vor.u32 %v1053_v23, %v1050_v22  ;;  %v1146_v36 = vrot.slane %v1144_v25, 4  ;;  %v929_v47 = vld [vmem:[#allocation2 + $0x1c] sm:$0xf]  ;;  %v1037_v48 = vld [vmem:[#allocation2 + $0x44] sm:$0x1] }
  0x42   : > { %v1149_v37 = vrot.slane %v1147_v26, 5  ;;  %v1072_v40 = vshrl.u32 %v1026_v32, 16  ;;  %v1075_v41 = vshll.u32 %v1026_v32, 16  ;;  %v1064_v42 = vor.u32 %v1063_v29, %v1059_v28  ;;  %v1039_v53 = vld [vmem:[#allocation2 + $0x4c] sm:$0xf] }
  0x43   : > { %694 = vrot.lane.b32.xlu1 %v543_v7, %s2848_s10  ;;  %v1067_v43 = vshll.u32 %v1025_v34, 16  ;;  %v1155_v44 = vrot.slane %v1153_v30, 5  ;;  %v1159_v45 = vrot.slane %v1157_v31, 4  ;;  %v1081_v49 = vshll.u32 %v1027_v38, 16  ;;  %v936_v54 = vld [vmem:[#allocation2 + $0x48] sm:$0xf] }
  0x44   : > { %v1085_v50 = vshrl.u32 %v1027_v38, 16  ;;  %v1055_v51 = vrot.slane %v1054_v35, 4  ;;  %v1150_v52 = vor.u32 %v1149_v37, %v1146_v36  ;;  %v1074_v55 = vrot.slane %v1072_v40, 4  ;;  %v937_v59 = vld [vmem:[#allocation2 + $0x4c] sm:$0xf] }
  0x45   : > { %708 = vrot.lane.b32.xlu0 %v629_v10, %s2848_s10  ;;  %v1077_v56 = vrot.slane %v1075_v41, 5  ;;  %v1168_v57 = vshrl.u32 %v1038_v46, 16  ;;  %v1171_v58 = vshll.u32 %v1038_v46, 16  ;;  %v1065_v60 = vrot.slane %v1064_v42, 4  ;;  %v1028_v0 = vld [vmem:[#allocation2 + $0x20] sm:$0x1] }
  0x46   : > { %v1069_v61 = vrot.slane %v1067_v43, 5  ;;  %v1160_v62 = vor.u32 %v1159_v45, %v1155_v44  ;;  %v1163_v63 = vshll.u32 %v1037_v48, 16  ;;  %v1083_v1 = vrot.slane %v1081_v49, 5  ;;  %v1040_v18 = vld [vmem:[#allocation2 + $0x50] sm:$0x1] }
  0x47   : > { %710 = vrot.lane.b32.xlu1 %v639_v12, %s2848_s10  ;;  %v1087_v3 = vrot.slane %v1085_v50, 4  ;;  %v1177_v4 = vshll.u32 %v1039_v53, 16  ;;  %v1181_v5 = vshrl.u32 %v1039_v53, 16  ;;  %v1060_v6 = vsel %vm3004_vm7, %v1055_v51, %v1059_v28  ;;  %v1305_v28 = vld [vmem:[#allocation2 + $0x10] sm:$0xf] }
  0x48   : > { %v1151_v7 = vrot.slane %v1150_v52, 4  ;;  %v1078_v8 = vor.u32 %v1077_v56, %v1074_v55  ;;  %v1170_v9 = vrot.slane %v1168_v57, 4  ;;  %v1173_v10 = vrot.slane %v1171_v58, 5  ;;  %v1304_v31 = vld [vmem:[#allocation2 + $0xc] sm:$0xe] }
  0x49   : > { %958 = vrot.lane.b32.xlu0 %v926_v16, %s2849_s11  ;;  %v1070_v11 = vsel %vm3004_vm7, %v1065_v60, %v1069_v61  ;;  %v1165_v12 = vrot.slane %v1163_v63, 5  ;;  %v1091_v13 = vshll.u32 %v1028_v0, 16  ;;  %v1161_v14 = vrot.slane %v1160_v62, 4  ;;  %v1306_v36 = vld [vmem:[#allocation2 + $0x14] sm:$0x1] }
  0x4a   : > { %v1088_v15 = vor.u32 %v1087_v3, %v1083_v1  ;;  %v1179_v16 = vrot.slane %v1177_v4, 5  ;;  %v1183_v17 = vrot.slane %v1181_v5, 4  ;;  %v1156_v19 = vsel %vm3004_vm7, %v1151_v7, %v1155_v44  ;;  %v1317_v37 = vld [vmem:[#allocation2 + $0x40] sm:$0xf]  ;;  %v1316_v40 = vld [vmem:[#allocation2 + $0x3c] sm:$0xe] }
  0x4b   : > { %960 = vrot.lane.b32.xlu1 %v927_v20, %s2849_s11  ;;  %v1079_v20 = vrot.slane %v1078_v8, 4  ;;  %v1174_v21 = vor.u32 %v1173_v10, %v1170_v9  ;;  %v1093_v22 = vrot.slane %v1091_v13, 5  ;;  %v1166_v23 = vsel %vm3004_vm7, %v1161_v14, %v1165_v12  ;;  %v1318_v45 = vld [vmem:[#allocation2 + $0x44] sm:$0x1]  ;;  %v1308_v46 = vld [vmem:[#allocation2 + $0x1c] sm:$0xf] }
  0x4c   : > { %v1089_v25 = vrot.slane %v1088_v15, 4  ;;  %v1184_v26 = vor.u32 %v1183_v17, %v1179_v16  ;;  %v1354_v35 = vrot.slane %v1305_v28, 5  ;;  %v1357_v43 = vrot.slane %v1306_v36, 5  ;;  %v1307_v49 = vld [vmem:[#allocation2 + $0x18] sm:$0xe] }
  0x4d   : > { %974 = vrot.lane.b32.xlu0 %v934_v27, %s2849_s11  ;;  %v1187_v27 = vshll.u32 %v1040_v18, 16  ;;  %v1084_v29 = vsel %vm3004_vm7, %v1079_v20, %v1083_v1  ;;  %v1175_v30 = vrot.slane %v1174_v21, 4  ;;  %v1382_v44 = vrot.slane %v1317_v37, 5  ;;  %v437_v50 = vld [vmem:[#allocation2] sm:$0xf] }
  0x4e   : > { %v1094_v32 = vsel %vm3004_vm7, %v1089_v25, %v1093_v22  ;;  %v1356_v42 = vrot.slane %v1354_v35, 4  ;;  %v2614_v48 = vrot.slane %v1316_v40, 9  ;;  %v1385_v53 = vrot.slane %v1318_v45, 5  ;;  %453 = vst.msk [vmem:[#allocation3] sm:$0xf] %vm398_vm2, %v437_v50 }
  0x4f   : > { %976 = vrot.lane.b32.xlu1 %v935_v33, %s2849_s11  ;;  %v1185_v33 = vrot.slane %v1184_v26, 4  ;;  %v1189_v34 = vrot.slane %v1187_v27, 5  ;;  %v1180_v38 = vsel %vm3004_vm7, %v1175_v30, %v1179_v16  ;;  %v1384_v52 = vrot.slane %v1382_v44, 4  ;;  %v445_v55 = vld [vmem:[#allocation2 + $0x30] sm:$0xf] }
  0x50   : > { %v1358_v51 = vsel %vm2932_vm4, %v1356_v42, %v1357_v43  ;;  %v1309_v56 = vld [vmem:[#allocation2 + $0x20] sm:$0x1]  ;;  %v1320_v57 = vld [vmem:[#allocation2 + $0x4c] sm:$0xf]  ;;  %461 = vst.msk [vmem:[#allocation3 + $0x20] sm:$0xf] %vm398_vm2, %v445_v55  ;;  %v1383_v58 = vsel %vm2932_vm4, %v2614_v48, %v1382_v44 }
  0x51   : > { %962 = vrot.lane.b32.xlu0 %v928_v39, %s2849_s11  ;;  %v2610_v39 = vrot.slane %v1304_v31, 9  ;;  %v1190_v41 = vsel %vm3004_vm7, %v1185_v33, %v1189_v34  ;;  %v1319_v60 = vld [vmem:[#allocation2 + $0x48] sm:$0xe]  ;;  %v1386_v61 = vsel %vm2932_vm4, %v1384_v52, %v1385_v53  ;;  %v1364_v63 = vrot.slane %v1309_v56, 5  ;;  %v438_v1 = vld [vmem:[#allocation2 + $0x4] sm:$0xf] }
  0x52   : > { %v1389_v0 = vrot.slane %v1320_v57, 5  ;;  %v1321_v3 = vld [vmem:[#allocation2 + $0x50] sm:$0x1]  ;;  %454 = vst.msk [vmem:[#allocation3 + $0x4] sm:$0xf] %vm398_vm2, %v438_v1 }
  0x53   : > { %964 = vrot.lane.b32.xlu1 %v929_v47, %s2849_s11  ;;  %v1355_v47 = vsel %vm2932_vm4, %v2610_v39, %v1354_v35  ;;  %v446_v4 = vld [vmem:[#allocation2 + $0x34] sm:$0xf]  ;;  %v1392_v9 = vrot.slane %v1321_v3, 5  ;;  %v439_v10 = vld [vmem:[#allocation2 + $0xc] sm:$0xf] }
  0x54   : > { %462 = vst.msk [vmem:[#allocation3 + $0x24] sm:$0xf] %vm398_vm2, %v446_v4  ;;  %v1391_v8 = vrot.slane %v1389_v0, 4  ;;  %455 = vst.msk [vmem:[#allocation3 + $0x8] sm:$0xf] %vm398_vm2, %v439_v10 }
  0x55   : > { %978 = vrot.lane.b32.xlu0 %v936_v54, %s2849_s11  ;;  %v1361_v54 = vrot.slane %v1308_v46, 5  ;;  %v1571_v13 = vld [vmem:[#allocation2 + $0x18] sm:$0xf]  ;;  %v1572_v15 = vld [vmem:[#allocation2 + $0x1c] sm:$0xf] }
  0x56   : > { %v1393_v14 = vsel %vm2932_vm4, %v1391_v8, %v1392_v9  ;;  %v447_v16 = vld [vmem:[#allocation2 + $0x3c] sm:$0xf]  ;;  %v1596_v17 = vshrl.u32 %v1571_v13, 16  ;;  %v1599_v18 = vshll.u32 %v1571_v13, 16  ;;  %v1474_v20 = vld [vmem:[#allocation2 + $0x18] sm:$0xf] }
  0x57   : > { %980 = vrot.lane.b32.xlu1 %v937_v59, %s2849_s11  ;;  %v2611_v59 = vrot.slane %v1307_v49, 9  ;;  %v1363_v62 = vrot.slane %v1361_v54, 4  ;;  %463 = vst.msk [vmem:[#allocation3 + $0x28] sm:$0xf] %vm398_vm2, %v447_v16  ;;  %v1605_v21 = vshll.u32 %v1572_v15, 16  ;;  %v1609_v22 = vshrl.u32 %v1572_v15, 16 }
  0x58   : > { %v1475_v25 = vld [vmem:[#allocation2 + $0x1c] sm:$0xf]  ;;  %v1598_v26 = vrot.slane %v1596_v17, 4  ;;  %v1601_v27 = vrot.slane %v1599_v18, 5  ;;  %v1584_v28 = vld [vmem:[#allocation2 + $0x4c] sm:$0xf] }
  0x59   : > { %1239 = vrot.lane.b32.xlu0 %v1060_v6, %s2850_s12  ;;  %v1362_v5 = vsel %vm2932_vm4, %v2611_v59, %v1361_v54  ;;  %v2615_v6 = vrot.slane %v1319_v60, 9  ;;  %v1365_v7 = vsel %vm2932_vm4, %v1363_v62, %v1364_v63  ;;  %v1483_v33 = vld [vmem:[#allocation2 + $0x4c] sm:$0xf]  ;;  %v3105_v34 = vrot.slane %v1605_v21, 5  ;;  %v1573_v36 = vld [vmem:[#allocation2 + $0x20] sm:$0x1] }
  0x5a   : > { %v1611_v35 = vrot.slane %v1609_v22, 4  ;;  %v1701_v37 = vshll.u32 %v1584_v28, 16  ;;  %v1602_v39 = vor.u32 %v1601_v27, %v1598_v26  ;;  %v1575_v40 = vld [vmem:[#allocation2 + $0x28] sm:$0xf]  ;;  %v1476_v44 = vld [vmem:[#allocation2 + $0x24] sm:$0xf] }
  0x5b   : > { %1241 = vrot.lane.b32.xlu1 %v1070_v11, %s2850_s12  ;;  %v440_v11 = vld [vmem:[#allocation2 + $0x10] sm:$0xf]  ;;  %v1390_v12 = vsel %vm2932_vm4, %v2615_v6, %v1389_v0  ;;  %v1477_v43 = vld [vmem:[#allocation2 + $0x28] sm:$0xf]  ;;  %v1615_v48 = vshll.u32 %v1573_v36, 16  ;;  %v1629_v53 = vshll.u32 %v1575_v40, 16 }
  0x5c   : > { %456 = vst.msk [vmem:[#allocation3 + $0xc] sm:$0xf] %vm398_vm2, %v440_v11  ;;  %v1585_v49 = vld [vmem:[#allocation2 + $0x50] sm:$0x1]  ;;  %v1586_v50 = vld [vmem:[#allocation2 + $0x54] sm:$0xf] }
  0x5d   : > { %1255 = vrot.lane.b32.xlu0 %v1156_v19, %s2850_s12  ;;  %v448_v19 = vld [vmem:[#allocation2 + $0x40] sm:$0xf]  ;;  %v1633_v54 = vshrl.u32 %v1575_v40, 16  ;;  %v1587_v55 = vld [vmem:[#allocation2 + $0x58] sm:$0xf]  ;;  %v1603_v57 = vrot.slane %v1602_v39, 4 }
  0x5e   : > { %464 = vst.msk [vmem:[#allocation3 + $0x2c] sm:$0xf] %vm398_vm2, %v448_v19  ;;  %v1484_v56 = vld [vmem:[#allocation2 + $0x54] sm:$0xf]  ;;  %v1719_v62 = vshll.u32 %v1586_v50, 16  ;;  %v1617_v1 = vrot.slane %v1615_v48, 5 }
  0x5f   : > { %1257 = vrot.lane.b32.xlu1 %v1166_v23, %s2850_s12  ;;  %v1583_v23 = vld [vmem:[#allocation2 + $0x48] sm:$0xf]  ;;  %v425_v63 = vld [vmem:[%s3113_s28 + $0x4] sm:$0xf]  ;;  %v424_v0 = vld [vmem:[%s3113_s28] sm:$0xf]  ;;  %v1608_v11 = vsel %vm3004_vm7, %v1603_v57, %v3105_v34 }
  0x60   : > { %v1692_v30 = vshrl.u32 %v1583_v23, 16  ;;  %v1695_v31 = vshll.u32 %v1583_v23, 16  ;;  %v1711_v3 = vshll.u32 %v1585_v49, 16  ;;  %v1725_v4 = vshll.u32 %v1587_v55, 16  ;;  %432 = vst.msk [vmem:[#allocation2 + $0x64] sm:$0xf] %vm398_vm2, %v425_v63 }
  0x61   : > { %1243 = vrot.lane.b32.xlu0 %v1084_v29, %s2850_s12  ;;  %v1482_v29 = vld [vmem:[#allocation2 + $0x48] sm:$0xf]  ;;  %431 = vst.msk [vmem:[#allocation2 + $0x60] sm:$0xf] %vm398_vm2, %v424_v0  ;;  %v1485_v6 = vld [vmem:[#allocation2 + $0x58] sm:$0xf] }
  0x62   : > { %v1694_v45 = vrot.slane %v1692_v30, 4  ;;  %v1697_v46 = vrot.slane %v1695_v31, 5  ;;  %v1631_v9 = vrot.slane %v1629_v53, 5  ;;  %v1635_v10 = vrot.slane %v1633_v54, 4  ;;  %v475_v31 = vld [vmem:[#allocation2 + $0x18] sm:$0xf] }
  0x63   : > { %1245 = vrot.lane.b32.xlu1 %v1094_v32, %s2850_s12  ;;  %v1574_v32 = vld [vmem:[#allocation2 + $0x24] sm:$0xf]  ;;  %v1721_v16 = vrot.slane %v1719_v62, 5  ;;  %v1713_v17 = vrot.slane %v1711_v3, 5  ;;  %v1727_v18 = vrot.slane %v1725_v4, 5  ;;  %v545_v40 = vshrl.u32 %v475_v31, 16 }
  0x64   : > { %v1623_v42 = vshll.u32 %v1574_v32, 16  ;;  %v1698_v60 = vor.u32 %v1697_v46, %v1694_v45  ;;  %v1636_v22 = vor.u32 %v1635_v10, %v1631_v9  ;;  %v1853_v36 = vld [vmem:[#allocation2 + $0x1c] sm:$0xf]  ;;  %v1852_v46 = vld [vmem:[#allocation2 + $0x18] sm:$0xe] }
  0x65   : > { %1259 = vrot.lane.b32.xlu0 %v1180_v38, %s2850_s12  ;;  %v1705_v38 = vshrl.u32 %v1584_v28, 16  ;;  %v1902_v45 = vrot.slane %v1853_v36, 5  ;;  %v1854_v48 = vld [vmem:[#allocation2 + $0x20] sm:$0x1]  ;;  %v1865_v49 = vld [vmem:[#allocation2 + $0x4c] sm:$0xf] }
  0x66   : > { %v1625_v59 = vrot.slane %v1623_v42, 5  ;;  %v1699_v13 = vrot.slane %v1698_v60, 4  ;;  %v487_v42 = vld [vmem:[#allocation2 + $0x48] sm:$0xf]  ;;  %v547_v57 = vrot.slane %v545_v40, 4  ;;  %v1930_v62 = vrot.slane %v1865_v49, 5 }
  0x67   : > { %1261 = vrot.lane.b32.xlu1 %v1190_v41, %s2850_s12  ;;  %v1620_v41 = vshrl.u32 %v1574_v32, 16  ;;  %v1707_v52 = vrot.slane %v1705_v38, 4  ;;  %v426_v32 = vld [vmem:[%s3113_s28 + $0x8] sm:$0x1]  ;;  %v641_v53 = vshrl.u32 %v487_v42, 16  ;;  %v644_v54 = vshll.u32 %v487_v42, 16 }
  0x68   : > { %433 = vst.msk [vmem:[#allocation2 + $0x68] sm:$0x1] %vm401_vm3, %v426_v32  ;;  %v1904_v60 = vrot.slane %v1902_v45, 4  ;;  %v1864_v63 = vld [vmem:[#allocation2 + $0x48] sm:$0xe] }
  0x69   : > { %1408 = vrot.lane.b32.xlu0 %v1355_v47, %s2851_s13  ;;  %v1612_v47 = vor.u32 %v1611_v35, %v3105_v34  ;;  %v1637_v34 = vrot.slane %v1636_v22, 4  ;;  %v1866_v0 = vld [vmem:[#allocation2 + $0x50] sm:$0x1]  ;;  %v2622_v10 = vrot.slane %v1864_v63, 9  ;;  %v1855_v40 = vld [vmem:[#allocation2 + $0x24] sm:$0xe] }
  0x6b   : > { %1410 = vrot.lane.b32.xlu1 %v1358_v51, %s2851_s13  ;;  %v1703_v51 = vrot.slane %v1701_v37, 5  ;;  %v476_v37 = vld [vmem:[#allocation2 + $0x1c] sm:$0xf]  ;;  %v1931_v22 = vsel %vm2932_vm4, %v2622_v10, %v1930_v62 }
  0x6c   : > { %v2795_v10 = vld [vmem:[%s3698_s2 + $0x18] sm:$0xff]  }
  0x6d   : > { %1424 = vrot.lane.b32.xlu0 %v1383_v58, %s2851_s13  ;;  %v1622_v58 = vrot.slane %v1620_v41, 4  ;;  %v1708_v8 = vor.u32 %v1707_v52, %v1703_v51  ;;  %v1704_v26 = vsel %vm3004_vm7, %v1699_v13, %v1703_v51  ;;  %v548_v41 = vshll.u32 %v475_v31, 16  ;;  %v488_v52 = vld [vmem:[#allocation2 + $0x4c] sm:$0xf] }
  0x6e   : > { %v558_v51 = vshrl.u32 %v476_v37, 16  ;;  %v650_v4 = vshll.u32 %v488_v52, 16  ;;  %v1932_v13 = vrot.slane %v1930_v62, 4 }
  0x6f   : > { %1426 = vrot.lane.b32.xlu1 %v1386_v61, %s2851_s13  ;;  %v1716_v61 = vshrl.u32 %v1586_v50, 16  ;;  %v1709_v21 = vrot.slane %v1708_v8, 4  ;;  %v554_v50 = vshll.u32 %v476_v37, 16  ;;  %v646_v8 = vrot.slane %v644_v54, 5 }
  0x70   : > { %v560_v3 = vrot.slane %v558_v51, 4  ;;  %v491_v51 = vld [vmem:[#allocation2 + $0x58] sm:$0xf] }
  0x71   : > { %1412 = vrot.lane.b32.xlu0 %v1362_v5, %s2851_s13  ;;  %v1729_v5 = vshrl.u32 %v1587_v55, 16  ;;  %v1718_v15 = vrot.slane %v1716_v61, 4  ;;  %v1905_v61 = vrot.slane %v1854_v48, 5 }
  0x73   : > { %1414 = vrot.lane.b32.xlu1 %v1365_v7, %s2851_s13  ;;  %v1613_v7 = vrot.slane %v1612_v47, 4  ;;  %v1731_v19 = vrot.slane %v1729_v5, 4  ;;  %v1722_v28 = vor.u32 %v1721_v16, %v1718_v15  ;;  %v654_v5 = vshrl.u32 %v488_v52, 16 }
  0x75   : > { %1428 = vrot.lane.b32.xlu0 %v1390_v12, %s2851_s13  ;;  %v1576_v12 = vld [vmem:[#allocation2 + $0x2c] sm:$0x1]  ;;  %v1723_v39 = vrot.slane %v1722_v28, 4 }
  0x76   : > { %v1639_v23 = vshll.u32 %v1576_v12, 16  ;;  %v1906_v12 = vsel %vm2932_vm4, %v1904_v60, %v1905_v61 }
  0x77   : > { %1430 = vrot.lane.b32.xlu1 %v1393_v14, %s2851_s13  ;;  %v1626_v14 = vor.u32 %v1625_v59, %v1622_v58  ;;  %v1728_v55 = vsel %vm3004_vm7, %v1723_v39, %v1727_v18  ;;  %v550_v58 = vrot.slane %v548_v41, 5  ;;  %v1857_v39 = vld [vmem:[#allocation2 + $0x2c] sm:$0x1] }
  0x78   : > { %v1641_v35 = vrot.slane %v1639_v23, 5 }
  0x79   : > { %1506 = vrot.lane.b32.xlu0 %v1474_v20, %s2852_s16  ;;  %v1618_v20 = vsel %vm3004_vm7, %v1613_v7, %v1617_v1  ;;  %v1627_v27 = vrot.slane %v1626_v14, 4  ;;  %v556_v1 = vrot.slane %v554_v50, 5  ;;  %v643_v7 = vrot.slane %v641_v53, 4  ;;  %v3182_v50 = vld [vmem:[#allocation2 + $0x58] sm:$0xf] }
  0x7a   : > { %v1642_v47 = vsel %vm3004_vm7, %v1637_v34, %v1641_v35  ;;  %v1933_v14 = vrot.slane %v1866_v0, 5  ;;  %v479_v34 = vld [vmem:[#allocation2 + $0x28] sm:$0xf]  ;;  %v1937_v0 = vrot.slane %v3182_v50, 5 }
  0x7b   : > { %1508 = vrot.lane.b32.xlu1 %v1475_v25, %s2852_s16  ;;  %v1588_v25 = vld [vmem:[#allocation2 + $0x5c] sm:$0x1]  ;;  %v1632_v38 = vsel %vm3004_vm7, %v1627_v27, %v1631_v9  ;;  %v561_v15 = vor.u32 %v560_v3, %v556_v1 }
  0x7c   : > { %v1735_v30 = vshll.u32 %v1588_v25, 16  ;;  %v428_v25 = vld [vmem:[%s3113_s28 + $0x10] sm:$0xf]  ;;  %v1934_v28 = vsel %vm2932_vm4, %v1932_v13, %v1933_v14  ;;  %v480_v14 = vld [vmem:[#allocation2 + $0x2c] sm:$0x1] }
  0x7d   : > { %1522 = vrot.lane.b32.xlu0 %v1482_v29, %s2852_s16  ;;  %v1732_v29 = vor.u32 %v1731_v19, %v1727_v18  ;;  %v656_v18 = vrot.slane %v654_v5, 4  ;;  %v489_v19 = vld [vmem:[#allocation2 + $0x50] sm:$0x1]  ;;  %435 = vst.msk [vmem:[#allocation2 + $0x70] sm:$0xf] %vm398_vm2, %v428_v25 }
  0x7e   : > { %v2794_v5 = vld [vmem:[%s3698_s2 + $0x20] ss:$0 sps:$4 sm:$0xff]   ;;  %v450_v25 = vld [vmem:[#allocation2 + $0x4c] sm:$0xf] }
  0x7f   : > { %1524 = vrot.lane.b32.xlu1 %v1483_v33, %s2852_s16  ;;  %v1714_v33 = vsel %vm3004_vm7, %v1709_v21, %v1713_v17  ;;  %v3154_v17 = vrot.slane %v650_v4, 5  ;;  %v3157_v21 = vld [vmem:[#allocation2 + $0x28] sm:$0xf]  ;;  %v674_v4 = vshll.u32 %v491_v51, 16  ;;  %2740 = vmatprep.subr.msk.bf16.mxu0 %vm2145_vm8, %v2794_v5  ;;  %466 = vst.msk [vmem:[#allocation3 + $0x34] sm:$0xf] %vm398_vm2, %v450_v25 }
  0x80   : > { %v1909_v37 = vrot.slane %v3157_v21, 5  ;;  %2741 = vmatprep.subr.msk.bf16.mxu1 %vm2145_vm8, %v2794_v5 }
  0x81   : > { %1510 = vrot.lane.b32.xlu0 %v1476_v44, %s2852_s16  ;;  %v1737_v44 = vrot.slane %v1735_v30, 5  ;;  %v562_v30 = vrot.slane %v561_v15, 4  ;;  %v657_v32 = vor.u32 %v656_v18, %v3154_v17  ;;  %v429_v15 = vld [vmem:[%s3113_s28 + $0x14] sm:$0x1] }
  0x82   : > { %v1911_v54 = vrot.slane %v1909_v37, 4  ;;  %436 = vst.msk [vmem:[#allocation2 + $0x74] sm:$0x1] %vm401_vm3, %v429_v15  ;;  %v762_v15 = vld [vmem:[#allocation2 + $0x24] sm:$0xe] }
  0x83   : > { %1512 = vrot.lane.b32.xlu1 %v1477_v43, %s2852_s16  ;;  %v1733_v43 = vrot.slane %v1732_v29, 4  ;;  %v478_v29 = vld [vmem:[#allocation2 + $0x24] sm:$0xf]  ;;  %v658_v48 = vrot.slane %v657_v32, 4  ;;  %v2797_v32 = vld [vmem:[%s3698_s2 + $0x10] sm:$0xff]  }
  0x84   : > { %v569_v41 = vshrl.u32 %v478_v29, 16  ;;  %v572_v42 = vshll.u32 %v478_v29, 16  ;;  %v3222_v29 = vrot.slane %v674_v4, 5 }
  0x85   : > { %1526 = vrot.lane.b32.xlu0 %v1484_v56, %s2852_s16  ;;  %v2618_v56 = vrot.slane %v1852_v46, 9  ;;  %v1738_v59 = vsel %vm3004_vm7, %v1733_v43, %v1737_v44  ;;  %v578_v44 = vshll.u32 %v479_v34, 16  ;;  %v490_v46 = vld [vmem:[#allocation2 + $0x54] sm:$0xf] }
  0x86   : > { %v574_v60 = vrot.slane %v572_v42, 5  ;;  %v665_v61 = vshrl.u32 %v490_v46, 16  ;;  %v668_v62 = vshll.u32 %v490_v46, 16  ;;  %v2799_v46 = vld [vmem:[%s3698_s2 + $0x8] sm:$0xff]  }
  0x87   : > { %1528 = vrot.lane.b32.xlu1 %v1485_v6, %s2852_s16  ;;  %v477_v6 = vld [vmem:[#allocation2 + $0x20] sm:$0x1]  ;;  %v1903_v9 = vsel %vm2932_vm4, %v2618_v56, %v1902_v45  ;;  %v582_v45 = vshrl.u32 %v479_v34, 16  ;;  %v2619_v56 = vrot.slane %v1855_v40, 9  ;;  %v492_v34 = vld [vmem:[#allocation2 + $0x5c] sm:$0x1] }
  0x88   : > { %v564_v16 = vshll.u32 %v477_v6, 16  ;;  %v670_v18 = vrot.slane %v668_v62, 5 }
  0x89   : > { %1787 = vrot.lane.b32.xlu0 %v1608_v11, %s2853_s29  ;;  %v551_v11 = vor.u32 %v550_v58, %v547_v57  ;;  %v3190_v57 = vld [vmem:[#allocation2 + $0x5c] sm:$0x1]  ;;  %v1867_v58 = vld [vmem:[#allocation2 + $0x54] sm:$0xe]  ;;  %v584_v3 = vrot.slane %v582_v45, 4  ;;  %v684_v45 = vshll.u32 %v492_v34, 16 }
  0x8a   : > { %v566_v31 = vrot.slane %v564_v16, 5  ;;  %v2623_v13 = vrot.slane %v1867_v58, 9  ;;  %v2800_v58 = vld [vmem:[%s3698_s2] sm:$0xff]  }
  0x8b   : > { %1789 = vrot.lane.b32.xlu1 %v1618_v20, %s2853_s29  ;;  %v647_v20 = vor.u32 %v646_v8, %v643_v7  ;;  %v552_v23 = vrot.slane %v551_v11, 4  ;;  %v678_v7 = vshrl.u32 %v491_v51, 16  ;;  %v442_v8 = vld [vmem:[#allocation2 + $0x1c] sm:$0xf] }
  0x8c   : > { %458 = vst.msk [vmem:[#allocation3 + $0x14] sm:$0xf] %vm398_vm2, %v442_v8 }
  0x8d   : > { %1803 = vrot.lane.b32.xlu0 %v1704_v26, %s2853_s29  ;;  %v427_v26 = vld [vmem:[%s3113_s28 + $0xc] sm:$0xf]  ;;  %v648_v36 = vrot.slane %v647_v20, 4 }
  0x8e   : > { %434 = vst.msk [vmem:[#allocation2 + $0x6c] sm:$0xf] %vm398_vm2, %v427_v26 }
  0x8f   : > { %1805 = vrot.lane.b32.xlu1 %v1714_v33, %s2853_s29  ;;  %v660_v33 = vshll.u32 %v489_v19, 16  ;;  %v653_v53 = vsel %vm3004_vm7, %v648_v36, %v3154_v17  ;;  %v667_v17 = vrot.slane %v665_v61, 4  ;;  %v2147_v19 = vsel %vm2145_vm8, %v2794_v5, 0  ;;  %v772_v61 = vld [vmem:[#allocation2 + $0x4c] sm:$0xf] }
  0x90   : > { %2705 = vmatpush3.bf16.msra.mxu0 %v2147_v19  ;;  %2735 = vmatpush3.bf16.msra.mxu1 %v2147_v19  ;;  %v1938_v36 = vsel %vm2932_vm4, %v2623_v13, %v1937_v0  ;;  %v848_v8 = vrot.slane %v772_v61, 5  ;;  %v938_v61 = vld [vmem:[#allocation2 + $0x54] sm:$0xf] }
  0x91   : > { %1791 = vrot.lane.b32.xlu0 %v1632_v38, %s2853_s29  ;;  %v557_v38 = vsel %vm3004_vm7, %v552_v23, %v556_v1  ;;  %v662_v49 = vrot.slane %v660_v33, 5  ;;  %v3196_v1 = vrot.slane %v578_v44, 5  ;;  %v1940_v23 = vrot.slane %v3190_v57, 5  ;;  %2706 = vmatprep.subr.bf16.mxu0 %v2795_v10 }
  0x92   : > { %2731 = vmatprep.subr.bf16.mxu1 %v2795_v10 }
  0x93   : > { %1793 = vrot.lane.b32.xlu1 %v1642_v47, %s2853_s29  ;;  %v567_v47 = vsel %vm3004_vm7, %v562_v30, %v566_v31  ;;  %v663_v6 = vsel %vm3004_vm7, %v658_v48, %v662_v49  ;;  %v585_v26 = vor.u32 %v584_v3, %v3196_v1  ;;  %v680_v30 = vrot.slane %v678_v7, 4  ;;  %v449_v31 = vld [vmem:[#allocation2 + $0x48] sm:$0xf]  ;;  %v760_v48 = vld [vmem:[#allocation2 + $0x1c] sm:$0xf] }
  0x94   : > { %465 = vst.msk [vmem:[#allocation3 + $0x30] sm:$0xf] %vm398_vm2, %v449_v31  ;;  %2707 = vmatpush3.bf16.msra.mxu0 %v2795_v10  ;;  %2736 = vmatpush3.bf16.msra.mxu1 %v2795_v10  ;;  %v820_v57 = vrot.slane %v760_v48, 5  ;;  %v451_v3 = vld [vmem:[#allocation2 + $0x54] sm:$0xf] }
  0x95   : > { %1807 = vrot.lane.b32.xlu0 %v1728_v55, %s2853_s29  ;;  %v1912_v55 = vrot.slane %v1857_v39, 5  ;;  %v681_v44 = vor.u32 %v680_v30, %v3222_v29  ;;  %2708 = vmatprep.subr.bf16.mxu0 %v2797_v32  ;;  %467 = vst.msk [vmem:[#allocation3 + $0x38] sm:$0xf] %vm398_vm2, %v451_v3  ;;  %v763_v10 = vld [vmem:[#allocation2 + $0x28] sm:$0xf] }
  0x96   : > { %2732 = vmatprep.subr.bf16.mxu1 %v2797_v32 }
  0x97   : > { %1809 = vrot.lane.b32.xlu1 %v1738_v59, %s2853_s29  ;;  %v571_v59 = vrot.slane %v569_v41, 4  ;;  %v1913_v21 = vsel %vm2932_vm4, %v1911_v54, %v1912_v55  ;;  %v586_v41 = vrot.slane %v585_v26, 4  ;;  %v444_v54 = vld [vmem:[#allocation2 + $0x28] sm:$0xf]  ;;  %v682_v55 = vrot.slane %v681_v44, 4 }
  0x98   : > { %2709 = vmatpush3.bf16.msra.mxu0 %v2797_v32  ;;  %2737 = vmatpush3.bf16.msra.mxu1 %v2797_v32  ;;  %460 = vst.msk [vmem:[#allocation3 + $0x1c] sm:$0xf] %vm398_vm2, %v444_v54  ;;  %v774_v26 = vld [vmem:[#allocation2 + $0x54] sm:$0xe]  ;;  %v776_v32 = vld [vmem:[#allocation2 + $0x5c] sm:$0x1] }
  0x99   : > { %1956 = vrot.lane.b32.xlu0 %v1903_v9, %s2854_s30  ;;  %v441_v9 = vld [vmem:[#allocation2 + $0x18] sm:$0xf]  ;;  %v575_v16 = vor.u32 %v574_v60, %v571_v59  ;;  %2710 = vmatprep.subr.bf16.mxu0 %v2799_v46  ;;  %v443_v59 = vld [vmem:[#allocation2 + $0x24] sm:$0xf]  ;;  %v761_v60 = vld [vmem:[#allocation2 + $0x20] sm:$0x1] }
  0x9a   : > { %457 = vst.msk [vmem:[#allocation3 + $0x10] sm:$0xf] %vm398_vm2, %v441_v9  ;;  %2733 = vmatprep.subr.bf16.mxu1 %v2799_v46  ;;  %459 = vst.msk [vmem:[#allocation3 + $0x18] sm:$0xf] %vm398_vm2, %v443_v59  ;;  %v823_v7 = vrot.slane %v761_v60, 5 }
  0x9b   : > { %1958 = vrot.lane.b32.xlu1 %v1906_v12, %s2854_s30  ;;  %v3164_v27 = vpop.permute.xlu0 %860  ;;  %v1910_v12 = vsel %vm2932_vm4, %v2619_v56, %v1909_v37  ;;  %v576_v37 = vrot.slane %v575_v16, 4  ;;  %v686_v56 = vrot.slane %v684_v45, 5  ;;  %v850_v16 = vrot.slane %v848_v8, 4 }
  0x9c   : > { %2711 = vmatpush3.bf16.msra.mxu0 %v2799_v46  ;;  %2738 = vmatpush3.bf16.msra.mxu1 %v2799_v46  ;;  %v1030_v46 = vld [vmem:[#allocation2 + $0x28] sm:$0xf] }
  0x9d   : > { %v3171_v35 = vpop.permute.xlu1 %862  ;;  %1972 = vrot.lane.b32.xlu0 %v1931_v22, %s2854_s30  ;;  %v1939_v22 = vrot.slane %v1937_v0, 4  ;;  %v581_v49 = vsel %vm3004_vm7, %v576_v37, %v3196_v1  ;;  %v452_v1 = vld [vmem:[#allocation2 + $0x58] sm:$0xf]  ;;  %v687_v5 = vsel %vm3004_vm7, %v682_v55, %v686_v56  ;;  %2712 = vmatprep.subr.bf16.mxu0 %v2800_v58  ;;  %v1105_v54 = vshll.u32 %v1030_v46, 16  ;;  %v931_v55 = vld [vmem:[#allocation2 + $0x28] sm:$0xf] }
  0x9e   : > { %468 = vst.msk [vmem:[#allocation3 + $0x3c] sm:$0xf] %vm398_vm2, %v452_v1  ;;  %2734 = vmatprep.subr.bf16.mxu1 %v2800_v58  ;;  %v1042_v56 = vld [vmem:[#allocation2 + $0x58] sm:$0xf] }
  0x9f   : > { %1974 = vrot.lane.b32.xlu1 %v1934_v28, %s2854_s30  ;;  %v3178_v43 = vpop.permute.xlu0 %876  ;;  %v588_v28 = vshll.u32 %v480_v14, 16  ;;  %v1941_v40 = vsel %vm2932_vm4, %v1939_v22, %v1940_v23  ;;  %v2605_v23 = vrot.slane %v762_v15, 9  ;;  %v1201_v3 = vshll.u32 %v1042_v56, 16 }
  0xa0   : > { %2713 = vmatpush3.bf16.msra.mxu0 %v2800_v58  ;;  %2739 = vmatpush3.bf16.msra.mxu1 %v2800_v58 }
  0xa1   : > { %v3184_v52 = vpop.permute.xlu1 %878  ;;  %696 = vrot.lane.b32.xlu0 %v557_v38, %s2848_s10  ;;  %v671_v38 = vor.u32 %v670_v18, %v667_v17  ;;  %v590_v42 = vrot.slane %v588_v28, 5  ;;  %v827_v18 = vrot.slane %v763_v10, 5  ;;  %v1033_v10 = vld [vmem:[#allocation2 + $0x34] sm:$0xf] }
  0xa3   : > { %698 = vrot.lane.b32.xlu1 %v567_v47, %s2848_s10  ;;  %v3193_v63 = vpop.permute.xlu0 %864  ;;  %v672_v50 = vrot.slane %v671_v38, 4  ;;  %v829_v28 = vrot.slane %v827_v18, 4  ;;  %v828_v34 = vsel %vm2932_vm4, %v2605_v23, %v827_v18  ;;  %v1133_v23 = vshrl.u32 %v1033_v10, 16 }
  0xa5   : > { %v3206_v11 = vpop.permute.xlu1 %866  ;;  %712 = vrot.lane.b32.xlu0 %v653_v53, %s2848_s10  ;;  %v759_v53 = vld [vmem:[#allocation2 + $0x18] sm:$0xe]  ;;  %v677_v62 = vsel %vm3004_vm7, %v672_v50, %v3222_v29  ;;  %v930_v50 = vld [vmem:[#allocation2 + $0x24] sm:$0xf] }
  0xa6   : > { %v2604_v0 = vrot.slane %v759_v53, 9 }
  0xa7   : > { %714 = vrot.lane.b32.xlu1 %v663_v6, %s2848_s10  ;;  %v3216_v20 = vpop.permute.xlu0 %880  ;;  %v822_v6 = vrot.slane %v820_v57, 4 }
  0xa9   : > { %v3228_v33 = vpop.permute.xlu1 %882  ;;  %1960 = vrot.lane.b32.xlu0 %v1910_v12, %s2854_s30  ;;  %v821_v12 = vsel %vm2932_vm4, %v2604_v0, %v820_v57  ;;  %v3322_v0 = vrot.slane %v1105_v54, 5 }
  0xab   : > { %1962 = vrot.lane.b32.xlu1 %v1913_v21, %s2854_s30  ;;  %v689_v39 = vpop.permute.xlu0 %688  ;;  %v764_v21 = vld [vmem:[#allocation2 + $0x2c] sm:$0x1] }
  0xac   : > { %737 = vst.msk [vmem:[#allocation3] sm:$0xf] %vm736_vm9, %v689_v39  ;;  %v830_v29 = vrot.slane %v764_v21, 5  ;;  %v858_v39 = vrot.slane %v776_v32, 5  ;;  %v933_v21 = vld [vmem:[#allocation2 + $0x34] sm:$0xf] }
  0xad   : > { %v705_v47 = vpop.permute.xlu1 %704  ;;  %1976 = vrot.lane.b32.xlu0 %v1938_v36, %s2854_s30  ;;  %909 = vst.msk [vmem:[#allocation3] sm:$0xf] %vm908_vm10, %v3164_v27  ;;  %v591_v27 = vsel %vm3004_vm7, %v586_v41, %v590_v42  ;;  %v1029_v42 = vld [vmem:[#allocation2 + $0x24] sm:$0xf] }
  0xae   : > { %745 = vst.msk [vmem:[#allocation3 + $0x20] sm:$0xf] %vm736_vm9, %v705_v47  ;;  %v831_v37 = vsel %vm2932_vm4, %v829_v28, %v830_v29  ;;  %v1096_v48 = vshrl.u32 %v1029_v42, 16  ;;  %v1045_v28 = vld [vmem:[#allocation2 + $0x64] sm:$0xf] }
  0xaf   : > { %1978 = vrot.lane.b32.xlu1 %v1941_v40, %s2854_s30  ;;  %v691_v51 = vpop.permute.xlu0 %690  ;;  %917 = vst.msk [vmem:[#allocation3 + $0x20] sm:$0xf] %vm908_vm10, %v3178_v43  ;;  %v940_v29 = vld [vmem:[#allocation2 + $0x60] sm:$0xf] }
  0xb0   : > { %738 = vst.msk [vmem:[#allocation3 + $0x4] sm:$0xf] %vm736_vm9, %v691_v51  ;;  %v1041_v51 = vld [vmem:[#allocation2 + $0x54] sm:$0xf]  ;;  %v1098_v58 = vrot.slane %v1096_v48, 4 }
  0xb1   : > { %v707_v43 = vpop.permute.xlu1 %706  ;;  %700 = vrot.lane.b32.xlu0 %v581_v49, %s2848_s10  ;;  %910 = vst.msk [vmem:[#allocation3 + $0x4] sm:$0xf] %vm908_vm10, %v3171_v35  ;;  %v771_v35 = vld [vmem:[#allocation2 + $0x48] sm:$0xe]  ;;  %v1099_v49 = vshll.u32 %v1029_v42, 16  ;;  %v1195_v60 = vshll.u32 %v1041_v51, 16 }
  0xb2   : > { %746 = vst.msk [vmem:[#allocation3 + $0x24] sm:$0xf] %vm736_vm9, %v707_v43  ;;  %v2608_v13 = vrot.slane %v771_v35, 9  ;;  %v1192_v43 = vshrl.u32 %v1041_v51, 16  ;;  %v1032_v35 = vld [vmem:[#allocation2 + $0x30] sm:$0xf] }
  0xb3   : > { %702 = vrot.lane.b32.xlu1 %v591_v27, %s2848_s10  ;;  %v693_v4 = vpop.permute.xlu0 %692  ;;  %918 = vst.msk [vmem:[#allocation3 + $0x24] sm:$0xf] %vm908_vm10, %v3184_v52  ;;  %v773_v52 = vld [vmem:[#allocation2 + $0x50] sm:$0x1]  ;;  %v1109_v27 = vshrl.u32 %v1030_v46, 16  ;;  %v1101_v59 = vrot.slane %v1099_v49, 5 }
  0xb4   : > { %739 = vst.msk [vmem:[#allocation3 + $0x8] sm:$0xf] %vm736_vm9, %v693_v4  ;;  %v851_v17 = vrot.slane %v773_v52, 5  ;;  %v849_v22 = vsel %vm2932_vm4, %v2608_v13, %v848_v8  ;;  %v1205_v4 = vshrl.u32 %v1042_v56, 16  ;;  %v1197_v52 = vrot.slane %v1195_v60, 5 }
  0xb5   : > { %v695_v9 = vpop.permute.xlu1 %694  ;;  %716 = vrot.lane.b32.xlu0 %v677_v62, %s2848_s10  ;;  %911 = vst.msk [vmem:[#allocation3 + $0x8] sm:$0xf] %vm908_vm10, %v3193_v63  ;;  %v824_v63 = vsel %vm2932_vm4, %v822_v6, %v823_v7  ;;  %v1111_v1 = vrot.slane %v1109_v27, 4  ;;  %v1031_v6 = vld [vmem:[#allocation2 + $0x2c] sm:$0x1]  ;;  %v1102_v8 = vor.u32 %v1101_v59, %v1098_v58  ;;  %v1120_v13 = vshrl.u32 %v1032_v35, 16 }
  0xb6   : > { %740 = vst.msk [vmem:[#allocation3 + $0xc] sm:$0xf] %vm736_vm9, %v695_v9  ;;  %v1194_v9 = vrot.slane %v1192_v43, 4  ;;  %v1207_v18 = vrot.slane %v1205_v4, 4  ;;  %v1135_v42 = vrot.slane %v1133_v23, 4 }
  0xb7   : > { %718 = vrot.lane.b32.xlu1 %v687_v5, %s2848_s10  ;;  %v709_v14 = vpop.permute.xlu0 %708  ;;  %912 = vst.msk [vmem:[#allocation3 + $0xc] sm:$0xf] %vm908_vm10, %v3206_v11  ;;  %v775_v11 = vld [vmem:[#allocation2 + $0x58] sm:$0xf]  ;;  %v1322_v23 = vld [vmem:[#allocation2 + $0x54] sm:$0xe] }
  0xb8   : > { %747 = vst.msk [vmem:[#allocation3 + $0x28] sm:$0xf] %vm736_vm9, %v709_v14  ;;  %v855_v30 = vrot.slane %v775_v11, 5  ;;  %v939_v5 = vld [vmem:[#allocation2 + $0x58] sm:$0xf]  ;;  %v1123_v14 = vshll.u32 %v1032_v35, 16 }
  0xb9   : > { %v711_v19 = vpop.permute.xlu1 %710  ;;  %868 = vrot.lane.b32.xlu0 %v821_v12, %s2847_s9  ;;  %919 = vst.msk [vmem:[#allocation3 + $0x28] sm:$0xf] %vm908_vm10, %v3216_v20  ;;  %v852_v20 = vsel %vm2932_vm4, %v850_v16, %v851_v17  ;;  %v932_v12 = vld [vmem:[#allocation2 + $0x30] sm:$0xf]  ;;  %v1115_v16 = vshll.u32 %v1031_v6, 16  ;;  %v3329_v17 = vrot.slane %v1201_v3, 5 }
  0xba   : > { %748 = vst.msk [vmem:[#allocation3 + $0x2c] sm:$0xf] %vm736_vm9, %v711_v19  ;;  %v857_v38 = vrot.slane %v855_v30, 4  ;;  %v1044_v19 = vld [vmem:[#allocation2 + $0x60] sm:$0xf]  ;;  %s2596_s10 = sshll.u32 %s3717_s19, 5 }
  0xbb   : > { %870 = vrot.lane.b32.xlu1 %v824_v63, %s2847_s9  ;;  %920 = vst.msk [vmem:[#allocation3 + $0x2c] sm:$0xf] %vm908_vm10, %v3228_v33  ;;  %v959_v25 = vpop.permute.xlu0 %958  ;;  %v2609_v33 = vrot.slane %v774_v26, 9  ;;  %v1112_v63 = vor.u32 %v1111_v1, %v3322_v0  ;;  %v1043_v11 = vld [vmem:[#allocation2 + $0x5c] sm:$0x1]  ;;  %v1103_v26 = vrot.slane %v1102_v8, 4 }
  0xbc   : > { %1007 = vst.msk [vmem:[#allocation3] sm:$0xf] %vm1006_vm11, %v959_v25  ;;  %v859_v45 = vsel %vm2932_vm4, %v857_v38, %v858_v39  ;;  %v1216_v32 = vshrl.u32 %v1044_v19, 16  ;;  %v1208_v38 = vor.u32 %v1207_v18, %v3329_v17  ;;  %v1211_v39 = vshll.u32 %v1043_v11, 16  ;;  %v1034_v48 = vld [vmem:[#allocation2 + $0x38] sm:$0x1] }
  0xbd   : > { %v961_v31 = vpop.permute.xlu1 %960  ;;  %884 = vrot.lane.b32.xlu0 %v849_v22, %s2847_s9  ;;  %v856_v41 = vsel %vm2932_vm4, %v2609_v33, %v855_v30  ;;  %v1129_v22 = vshll.u32 %v1033_v10, 16  ;;  %v1122_v30 = vrot.slane %v1120_v13, 4  ;;  %v1139_v58 = vshll.u32 %v1034_v48, 16  ;;  %v1310_v13 = vld [vmem:[#allocation2 + $0x24] sm:$0xe] }
  0xbe   : > { %1008 = vst.msk [vmem:[#allocation3 + $0x4] sm:$0xf] %vm1006_vm11, %v961_v31  ;;  %v1125_v31 = vrot.slane %v1123_v14, 5  ;;  %v1218_v51 = vrot.slane %v1216_v32, 4  ;;  %v1213_v56 = vrot.slane %v1211_v39, 5  ;;  %v2612_v11 = vrot.slane %v1310_v13, 9 }
  0xbf   : > { %886 = vrot.lane.b32.xlu1 %v852_v20, %s2847_s9  ;;  %v975_v36 = vpop.permute.xlu0 %974  ;;  %v1198_v20 = vor.u32 %v1197_v52, %v1194_v9  ;;  %v1311_v9 = vld [vmem:[#allocation2 + $0x28] sm:$0xf]  ;;  %v1312_v18 = vld [vmem:[#allocation2 + $0x2c] sm:$0x1]  ;;  %v1325_v48 = vld [vmem:[#allocation2 + $0x60] sm:$0xe] }
  0xc0   : > { %1015 = vst.msk [vmem:[#allocation3 + $0x20] sm:$0xf] %vm1006_vm11, %v975_v36  ;;  %v1113_v36 = vrot.slane %v1112_v63, 4 }
  0xc1   : > { %v977_v40 = vpop.permute.xlu1 %976  ;;  %872 = vrot.lane.b32.xlu0 %v828_v34, %s2847_s9  ;;  %v1219_v34 = vshll.u32 %v1044_v19, 16  ;;  %v1199_v49 = vrot.slane %v1198_v20, 4  ;;  %v1323_v19 = vld [vmem:[#allocation2 + $0x58] sm:$0xf]  ;;  %v1371_v20 = vrot.slane %v1312_v18, 5 }
  0xc2   : > { %1016 = vst.msk [vmem:[#allocation3 + $0x24] sm:$0xf] %vm1006_vm11, %v977_v40  ;;  %v941_v40 = vld [vmem:[#allocation2 + $0x64] sm:$0xf] }
  0xc3   : > { %874 = vrot.lane.b32.xlu1 %v831_v37, %s2847_s9  ;;  %v963_v44 = vpop.permute.xlu0 %962  ;;  %v1117_v37 = vrot.slane %v1115_v16, 5  ;;  %v1368_v16 = vrot.slane %v1311_v9, 5 }
  0xc4   : > { %1009 = vst.msk [vmem:[#allocation3 + $0x8] sm:$0xf] %vm1006_vm11, %v963_v44  ;;  %v1225_v44 = vshll.u32 %v1045_v28, 16 }
  0xc5   : > { %v965_v47 = vpop.permute.xlu1 %964  ;;  %888 = vrot.lane.b32.xlu0 %v856_v41, %s2847_s9  ;;  %v1131_v41 = vrot.slane %v1129_v22, 5  ;;  %v1118_v27 = vsel %vm3004_vm7, %v1113_v36, %v1117_v37  ;;  %v1369_v32 = vsel %vm2932_vm4, %v2612_v11, %v1368_v16  ;;  %v1313_v36 = vld [vmem:[#allocation2 + $0x30] sm:$0xe] }
  0xc6   : > { %1010 = vst.msk [vmem:[#allocation3 + $0xc] sm:$0xf] %vm1006_vm11, %v965_v47  ;;  %v1108_v47 = vsel %vm3004_vm7, %v1103_v26, %v3322_v0  ;;  %v1227_v59 = vrot.slane %v1225_v44, 5  ;;  %v1370_v26 = vrot.slane %v1368_v16, 4  ;;  %v1326_v44 = vld [vmem:[#allocation2 + $0x64] sm:$0xf] }
  0xc7   : > { %890 = vrot.lane.b32.xlu1 %v859_v45, %s2847_s9  ;;  %v979_v53 = vpop.permute.xlu0 %978  ;;  %v1229_v45 = vshrl.u32 %v1045_v28, 16  ;;  %v1396_v28 = vrot.slane %v1323_v19, 5  ;;  %s2595_s9 = sshll.u32 %s3721_s25, 1 }
  0xc8   : > { %1017 = vst.msk [vmem:[#allocation3 + $0x28] sm:$0xf] %vm1006_vm11, %v979_v53  ;;  %v1221_v53 = vrot.slane %v1219_v34, 5  ;;  %v2616_v34 = vrot.slane %v1322_v23, 9  ;;  %v1372_v37 = vsel %vm2932_vm4, %v1370_v26, %v1371_v20  ;;  %v1580_v23 = vld [vmem:[#allocation2 + $0x3c] sm:$0xf] }
  0xc9   : > { %v981_v57 = vpop.permute.xlu1 %980  ;;  %966 = vrot.lane.b32.xlu0 %v930_v50, %s2849_s11  ;;  %v1126_v50 = vor.u32 %v1125_v31, %v1122_v30  ;;  %v1231_v43 = vrot.slane %v1229_v45, 4  ;;  %v1324_v30 = vld [vmem:[#allocation2 + $0x5c] sm:$0x1]  ;;  %v1314_v31 = vld [vmem:[#allocation2 + $0x34] sm:$0xf] }
  0xca   : > { %1018 = vst.msk [vmem:[#allocation3 + $0x2c] sm:$0xf] %vm1006_vm11, %v981_v57  ;;  %v1136_v57 = vor.u32 %v1135_v42, %v1131_v41  ;;  %v1222_v1 = vor.u32 %v1221_v53, %v1218_v51  ;;  %v1399_v39 = vrot.slane %v1324_v30, 5  ;;  %v1315_v42 = vld [vmem:[#allocation2 + $0x38] sm:$0x1]  ;;  %v1397_v45 = vsel %vm2932_vm4, %v2616_v34, %v1396_v28 }
  0xcb   : > { %968 = vrot.lane.b32.xlu1 %v931_v55, %s2849_s11  ;;  %v1240_v62 = vpop.permute.xlu0 %1239  ;;  %v1209_v55 = vrot.slane %v1208_v38, 4  ;;  %v1127_v0 = vrot.slane %v1126_v50, 4  ;;  %v1232_v6 = vor.u32 %v1231_v43, %v1227_v59  ;;  %v1398_v38 = vrot.slane %v1396_v28, 4  ;;  %v1579_v26 = vld [vmem:[#allocation2 + $0x38] sm:$0x1] }
  0xcc   : > { %1288 = vst.msk [vmem:[#allocation3] sm:$0xf] %vm1287_vm12, %v1240_v62  ;;  %v1204_v62 = vsel %vm3004_vm7, %v1199_v49, %v3329_v17  ;;  %v1137_v35 = vrot.slane %v1136_v57, 4  ;;  %v1223_v10 = vrot.slane %v1222_v1, 4  ;;  %v1378_v51 = vrot.slane %v1315_v42, 5 }
  0xcd   : > { %v1242_v7 = vpop.permute.xlu1 %1241  ;;  %982 = vrot.lane.b32.xlu0 %v938_v61, %s2849_s11  ;;  %v1046_v61 = vld [vmem:[#allocation2 + $0x68] sm:$0x1]  ;;  %v1214_v4 = vsel %vm3004_vm7, %v1209_v55, %v1213_v56  ;;  %v1132_v52 = vsel %vm3004_vm7, %v1127_v0, %v1131_v41  ;;  %v1400_v49 = vsel %vm2932_vm4, %v1398_v38, %v1399_v39  ;;  %v1403_v53 = vrot.slane %v1326_v44, 5  ;;  %v1481_v42 = vld [vmem:[#allocation2 + $0x40] sm:$0xf] }
  0xce   : > { %1289 = vst.msk [vmem:[#allocation3 + $0x4] sm:$0xf] %vm1287_vm12, %v1242_v7  ;;  %v1235_v7 = vshll.u32 %v1046_v61, 16  ;;  %v2617_v56 = vrot.slane %v1325_v48, 9  ;;  %v1668_v34 = vshrl.u32 %v1580_v23, 16  ;;  %v1663_v38 = vshll.u32 %v1579_v26, 16 }
  0xcf   : > { %984 = vrot.lane.b32.xlu1 %v939_v5, %s2849_s11  ;;  %v1256_v15 = vpop.permute.xlu0 %1255  ;;  %v1141_v5 = vrot.slane %v1139_v58, 5  ;;  %v1591_v44 = vld [vmem:[#allocation2 + $0x68] sm:$0x1] }
  0xd0   : > { %1296 = vst.msk [vmem:[#allocation3 + $0x20] sm:$0xf] %vm1287_vm12, %v1256_v15  ;;  %v1233_v15 = vrot.slane %v1232_v6, 4  ;;  %v1237_v63 = vrot.slane %v1235_v7, 5  ;;  %v1404_v61 = vsel %vm2932_vm4, %v2617_v56, %v1403_v53  ;;  %v1478_v6 = vld [vmem:[#allocation2 + $0x30] sm:$0xf] }
  0xd1   : > { %v1258_v25 = vpop.permute.xlu1 %1257  ;;  %970 = vrot.lane.b32.xlu0 %v932_v12, %s2849_s11  ;;  %v1142_v14 = vsel %vm3004_vm7, %v1137_v35, %v1141_v5  ;;  %v1589_v7 = vld [vmem:[#allocation2 + $0x60] sm:$0xf] }
  0xd2   : > { %1297 = vst.msk [vmem:[#allocation3 + $0x24] sm:$0xf] %vm1287_vm12, %v1258_v25  ;;  %v1238_v25 = vsel %vm3004_vm7, %v1233_v15, %v1237_v63  ;;  %v1740_v63 = vshrl.u32 %v1589_v7, 16  ;;  %v1743_v16 = vshll.u32 %v1589_v7, 16 }
  0xd3   : > { %972 = vrot.lane.b32.xlu1 %v933_v21, %s2849_s11  ;;  %v1244_v33 = vpop.permute.xlu0 %1243  ;;  %v1228_v21 = vsel %vm3004_vm7, %v1223_v10, %v1227_v59  ;;  %v1405_v59 = vrot.slane %v1403_v53, 4  ;;  %v1479_v10 = vld [vmem:[#allocation2 + $0x34] sm:$0xf]  ;;  %v1670_v53 = vrot.slane %v1668_v34, 4  ;;  %v1858_v34 = vld [vmem:[#allocation2 + $0x30] sm:$0xe] }
  0xd4   : > { %1290 = vst.msk [vmem:[#allocation3 + $0x8] sm:$0xf] %vm1287_vm12, %v1244_v33  ;;  %v1745_v30 = vrot.slane %v1743_v16, 5 }
  0xd5   : > { %v1246_v46 = vpop.permute.xlu1 %1245  ;;  %986 = vrot.lane.b32.xlu0 %v940_v29, %s2849_s11 }
  0xd6   : > { %1291 = vst.msk [vmem:[#allocation3 + $0xc] sm:$0xf] %vm1287_vm12, %v1246_v46  ;;  %v2613_v46 = vrot.slane %v1313_v36, 9 }
  0xd7   : > { %988 = vrot.lane.b32.xlu1 %v941_v40, %s2849_s11  ;;  %v1260_v54 = vpop.permute.xlu0 %1259  ;;  %v1375_v40 = vrot.slane %v1314_v31, 5  ;;  %v1581_v31 = vld [vmem:[#allocation2 + $0x40] sm:$0xf]  ;;  %s3563_s11 = sadd.s32 %s2596_s10, %s2595_s9 }
  0xd8   : > { %1298 = vst.msk [vmem:[#allocation3 + $0x28] sm:$0xf] %vm1287_vm12, %v1260_v54 }
  0xd9   : > { %v1262_v60 = vpop.permute.xlu1 %1261  ;;  %1247 = vrot.lane.b32.xlu0 %v1108_v47, %s2850_s12  ;;  %v1377_v50 = vrot.slane %v1375_v40, 4  ;;  %v1376_v55 = vsel %vm2932_vm4, %v2613_v46, %v1375_v40  ;;  %v1681_v46 = vshrl.u32 %v1581_v31, 16 }
  0xda   : > { %1299 = vst.msk [vmem:[#allocation3 + $0x2c] sm:$0xf] %vm1287_vm12, %v1262_v60 }
  0xdb   : > { %1249 = vrot.lane.b32.xlu1 %v1118_v27, %s2850_s12  ;;  %v1409_v3 = vpop.permute.xlu0 %1408  ;;  %v1327_v27 = vld [vmem:[#allocation2 + $0x68] sm:$0x1]  ;;  %v1379_v58 = vsel %vm2932_vm4, %v1377_v50, %v1378_v51  ;;  %v1593_v50 = vld [vmem:[#allocation2 + $0x70] sm:$0xf]  ;;  %v1488_v51 = vld [vmem:[#allocation2 + $0x6c] sm:$0xf] }
  0xdc   : > { %1457 = vst.msk [vmem:[#allocation3] sm:$0xf] %vm1456_vm13, %v1409_v3  ;;  %v1406_v43 = vrot.slane %v1327_v27, 5  ;;  %v1578_v3 = vld [vmem:[#allocation2 + $0x34] sm:$0xf] }
  0xdd   : > { %v1411_v8 = vpop.permute.xlu1 %1410  ;;  %1263 = vrot.lane.b32.xlu0 %v1204_v62, %s2850_s12  ;;  %v1577_v62 = vld [vmem:[#allocation2 + $0x30] sm:$0xf]  ;;  %v1653_v9 = vshll.u32 %v1578_v3, 16 }
  0xde   : > { %1458 = vst.msk [vmem:[#allocation3 + $0x4] sm:$0xf] %vm1456_vm13, %v1411_v8  ;;  %v1407_v1 = vsel %vm2932_vm4, %v1405_v59, %v1406_v43  ;;  %v1644_v35 = vshrl.u32 %v1577_v62, 16  ;;  %v1647_v5 = vshll.u32 %v1577_v62, 16  ;;  %v1759_v43 = vshll.u32 %v1591_v44, 16 }
  0xdf   : > { %1265 = vrot.lane.b32.xlu1 %v1214_v4, %s2850_s12  ;;  %v1425_v12 = vpop.permute.xlu0 %1424  ;;  %v3410_v19 = vrot.slane %v1653_v9, 5  ;;  %v1683_v62 = vrot.slane %v1681_v46, 4  ;;  %v2620_v44 = vrot.slane %v1858_v34, 9  ;;  %v1870_v46 = vld [vmem:[#allocation2 + $0x60] sm:$0xe] }
  0xe0   : > { %1465 = vst.msk [vmem:[#allocation3 + $0x20] sm:$0xf] %vm1456_vm13, %v1425_v12  ;;  %v1590_v12 = vld [vmem:[#allocation2 + $0x64] sm:$0xf]  ;;  %v1649_v15 = vrot.slane %v1647_v5, 5 }
  0xe1   : > { %v1427_v17 = vpop.permute.xlu1 %1426  ;;  %1251 = vrot.lane.b32.xlu0 %v1132_v52, %s2850_s12  ;;  %v1657_v52 = vshrl.u32 %v1578_v3, 16  ;;  %v1749_v11 = vshll.u32 %v1590_v12, 16 }
  0xe2   : > { %1466 = vst.msk [vmem:[#allocation3 + $0x24] sm:$0xf] %vm1456_vm13, %v1427_v17  ;;  %v1486_v17 = vld [vmem:[#allocation2 + $0x60] sm:$0xf] }
  0xe3   : > { %1253 = vrot.lane.b32.xlu1 %v1142_v14, %s2850_s12  ;;  %v1413_v22 = vpop.permute.xlu0 %1412  ;;  %v1646_v14 = vrot.slane %v1644_v35, 4  ;;  %v3417_v39 = vrot.slane %v1749_v11, 5  ;;  %v1582_v35 = vld [vmem:[#allocation2 + $0x44] sm:$0x1] }
  0xe4   : > { %1459 = vst.msk [vmem:[#allocation3 + $0x8] sm:$0xf] %vm1456_vm13, %v1413_v22  ;;  %v1753_v22 = vshrl.u32 %v1590_v12, 16  ;;  %v1761_v12 = vrot.slane %v1759_v43, 5 }
  0xe5   : > { %v1415_v29 = vpop.permute.xlu1 %1414  ;;  %1267 = vrot.lane.b32.xlu0 %v1228_v21, %s2850_s12  ;;  %v1659_v21 = vrot.slane %v1657_v52, 4  ;;  %v1650_v28 = vor.u32 %v1649_v15, %v1646_v14  ;;  %v1687_v14 = vshll.u32 %v1582_v35, 16 }
  0xe6   : > { %1460 = vst.msk [vmem:[#allocation3 + $0xc] sm:$0xf] %vm1456_vm13, %v1415_v29  ;;  %v1742_v29 = vrot.slane %v1740_v63, 4  ;;  %v1755_v40 = vrot.slane %v1753_v22, 4 }
  0xe7   : > { %1269 = vrot.lane.b32.xlu1 %v1238_v25, %s2850_s12  ;;  %v1429_v33 = vpop.permute.xlu0 %1428  ;;  %v1487_v25 = vld [vmem:[#allocation2 + $0x64] sm:$0xf]  ;;  %v1651_v48 = vrot.slane %v1650_v28, 4 }
  0xe8   : > { %1467 = vst.msk [vmem:[#allocation3 + $0x28] sm:$0xf] %vm1456_vm13, %v1429_v33  ;;  %v1671_v33 = vshll.u32 %v1580_v23, 16  ;;  %v1756_v59 = vor.u32 %v1755_v40, %v3417_v39  ;;  %v1860_v40 = vld [vmem:[#allocation2 + $0x38] sm:$0x1] }
  0xe9   : > { %v1431_v41 = vpop.permute.xlu1 %1430  ;;  %1416 = vrot.lane.b32.xlu0 %v1369_v32, %s2851_s13  ;;  %v1480_v32 = vld [vmem:[#allocation2 + $0x3c] sm:$0xf] }
  0xea   : > { %1468 = vst.msk [vmem:[#allocation3 + $0x2c] sm:$0xf] %vm1456_vm13, %v1431_v41  ;;  %v1592_v41 = vld [vmem:[#allocation2 + $0x6c] sm:$0xf] }
  0xeb   : > { %1418 = vrot.lane.b32.xlu1 %v1372_v37, %s2851_s13  ;;  %v1507_v47 = vpop.permute.xlu0 %1506  ;;  %v1660_v37 = vor.u32 %v1659_v21, %v3410_v19  ;;  %v1764_v27 = vshrl.u32 %v1592_v41, 16 }
  0xec   : > { %1555 = vst.msk [vmem:[#allocation3] sm:$0xf] %vm1554_vm14, %v1507_v47 }
  0xed   : > { %v1509_v54 = vpop.permute.xlu1 %1508  ;;  %1432 = vrot.lane.b32.xlu0 %v1397_v45, %s2851_s13  ;;  %v1677_v45 = vshll.u32 %v1581_v31, 16  ;;  %v1766_v7 = vrot.slane %v1764_v27, 4  ;;  %v1862_v27 = vld [vmem:[#allocation2 + $0x40] sm:$0xf] }
  0xee   : > { %1556 = vst.msk [vmem:[#allocation3 + $0x4] sm:$0xf] %vm1554_vm14, %v1509_v54  ;;  %v1673_v54 = vrot.slane %v1671_v33, 5 }
  0xef   : > { %1434 = vrot.lane.b32.xlu1 %v1400_v49, %s2851_s13  ;;  %v1523_v57 = vpop.permute.xlu0 %1522  ;;  %v1746_v49 = vor.u32 %v1745_v30, %v1742_v29  ;;  %v1859_v29 = vld [vmem:[#allocation2 + $0x34] sm:$0xf] }
  0xf0   : > { %1563 = vst.msk [vmem:[#allocation3 + $0x20] sm:$0xf] %vm1554_vm14, %v1523_v57  ;;  %v1661_v57 = vrot.slane %v1660_v37, 4 }
  0xf1   : > { %v1525_v60 = vpop.permute.xlu1 %1524  ;;  %1420 = vrot.lane.b32.xlu0 %v1376_v55, %s2851_s13  ;;  %v1767_v55 = vshll.u32 %v1592_v41, 16  ;;  %v1747_v5 = vrot.slane %v1746_v49, 4  ;;  %v1871_v41 = vld [vmem:[#allocation2 + $0x64] sm:$0xf]  ;;  %v1919_v49 = vrot.slane %v1860_v40, 5 }
  0xf2   : > { %1564 = vst.msk [vmem:[#allocation3 + $0x24] sm:$0xf] %vm1554_vm14, %v1525_v60  ;;  %v1489_v60 = vld [vmem:[#allocation2 + $0x70] sm:$0xf] }
  0xf3   : > { %1422 = vrot.lane.b32.xlu1 %v1379_v58, %s2851_s13  ;;  %v1511_v0 = vpop.permute.xlu0 %1510  ;;  %v1665_v58 = vrot.slane %v1663_v38, 5  ;;  %v1916_v38 = vrot.slane %v1859_v29, 5 }
  0xf4   : > { %1557 = vst.msk [vmem:[#allocation3 + $0x8] sm:$0xf] %vm1554_vm14, %v1511_v0  ;;  %v1773_v0 = vshll.u32 %v1593_v50, 16 }
  0xf5   : > { %v1513_v4 = vpop.permute.xlu1 %1512  ;;  %1436 = vrot.lane.b32.xlu0 %v1404_v61, %s2851_s13  ;;  %v1679_v61 = vrot.slane %v1677_v45, 5  ;;  %v1666_v52 = vsel %vm3004_vm7, %v1661_v57, %v1665_v58  ;;  %v1861_v57 = vld [vmem:[#allocation2 + $0x3c] sm:$0xe] }
  0xf6   : > { %1558 = vst.msk [vmem:[#allocation3 + $0xc] sm:$0xf] %vm1554_vm14, %v1513_v4  ;;  %v1656_v4 = vsel %vm3004_vm7, %v1651_v48, %v3410_v19  ;;  %v1775_v15 = vrot.slane %v1773_v0, 5  ;;  %v1918_v48 = vrot.slane %v1916_v38, 4 }
  0xf7   : > { %1438 = vrot.lane.b32.xlu1 %v1407_v1, %s2851_s13  ;;  %v1527_v8 = vpop.permute.xlu0 %1526  ;;  %v1777_v1 = vshrl.u32 %v1593_v50, 16  ;;  %v1872_v50 = vld [vmem:[#allocation2 + $0x68] sm:$0x1] }
  0xf8   : > { %1565 = vst.msk [vmem:[#allocation3 + $0x28] sm:$0xf] %vm1554_vm14, %v1527_v8  ;;  %v1769_v8 = vrot.slane %v1767_v55, 5  ;;  %v1917_v55 = vsel %vm2932_vm4, %v2620_v44, %v1916_v38  ;;  %v1920_v58 = vsel %vm2932_vm4, %v1918_v48, %v1919_v49  ;;  %v1947_v43 = vrot.slane %v1872_v50, 5 }
  0xf9   : > { %v1529_v13 = vpop.permute.xlu1 %1528  ;;  %1514 = vrot.lane.b32.xlu0 %v1478_v6, %s2852_s16  ;;  %v1674_v6 = vor.u32 %v1673_v54, %v1670_v53  ;;  %v1779_v63 = vrot.slane %v1777_v1, 4  ;;  %v1874_v1 = vld [vmem:[#allocation2 + $0x70] sm:$0xf] }
  0xfa   : > { %1566 = vst.msk [vmem:[#allocation3 + $0x2c] sm:$0xf] %vm1554_vm14, %v1529_v13  ;;  %v1684_v13 = vor.u32 %v1683_v62, %v1679_v61  ;;  %v1770_v21 = vor.u32 %v1769_v8, %v1766_v7 }
  0xfb   : > { %1516 = vrot.lane.b32.xlu1 %v1479_v10, %s2852_s16  ;;  %v1788_v18 = vpop.permute.xlu0 %1787  ;;  %v1757_v10 = vrot.slane %v1756_v59, 4  ;;  %v1675_v19 = vrot.slane %v1674_v6, 4  ;;  %v1780_v26 = vor.u32 %v1779_v63, %v1775_v15 }
  0xfc   : > { %1836 = vst.msk [vmem:[#allocation3] sm:$0xf] %vm1835_vm15, %v1788_v18  ;;  %v1752_v18 = vsel %vm3004_vm7, %v1747_v5, %v3417_v39  ;;  %v1685_v23 = vrot.slane %v1684_v13, 4  ;;  %v1771_v31 = vrot.slane %v1770_v21, 4  ;;  %v1873_v5 = vld [vmem:[#allocation2 + $0x6c] sm:$0xe] }
  0xfd   : > { %v1790_v20 = vpop.permute.xlu1 %1789  ;;  %1530 = vrot.lane.b32.xlu0 %v1486_v17, %s2852_s16  ;;  %v1594_v17 = vld [vmem:[#allocation2 + $0x74] sm:$0x1]  ;;  %v1762_v22 = vsel %vm3004_vm7, %v1757_v10, %v1761_v12  ;;  %v1680_v30 = vsel %vm3004_vm7, %v1675_v19, %v1679_v61  ;;  %v1923_v61 = vrot.slane %v1862_v27, 5  ;;  %v2625_v13 = vrot.slane %v1873_v5, 9 }
  0xfe   : > { %1837 = vst.msk [vmem:[#allocation3 + $0x4] sm:$0xf] %vm1835_vm15, %v1790_v20  ;;  %v1783_v20 = vshll.u32 %v1594_v17, 16  ;;  %v1875_v10 = vld [vmem:[#allocation2 + $0x74] sm:$0x1] }
  0xff   : > { %1532 = vrot.lane.b32.xlu1 %v1487_v25, %s2852_s16  ;;  %v1804_v36 = vpop.permute.xlu0 %1803  ;;  %v1689_v25 = vrot.slane %v1687_v14, 5  ;;  %v1925_v7 = vrot.slane %v1923_v61, 4 }
 0x100   : > { %1844 = vst.msk [vmem:[#allocation3 + $0x20] sm:$0xf] %vm1835_vm15, %v1804_v36  ;;  %v1781_v36 = vrot.slane %v1780_v26, 4  ;;  %v1785_v37 = vrot.slane %v1783_v20, 5 }
 0x101   : > { %v1806_v47 = vpop.permute.xlu1 %1805  ;;  %1518 = vrot.lane.b32.xlu0 %v1480_v32, %s2852_s16  ;;  %v1690_v33 = vsel %vm3004_vm7, %v1685_v23, %v1689_v25 }
 0x102   : > { %1845 = vst.msk [vmem:[#allocation3 + $0x24] sm:$0xf] %vm1835_vm15, %v1806_v47  ;;  %v1786_v47 = vsel %vm3004_vm7, %v1781_v36, %v1785_v37 }
 0x103   : > { %1520 = vrot.lane.b32.xlu1 %v1481_v42, %s2852_s16  ;;  %v1792_v56 = vpop.permute.xlu0 %1791  ;;  %v1776_v42 = vsel %vm3004_vm7, %v1771_v31, %v1775_v15 }
 0x104   : > { %1838 = vst.msk [vmem:[#allocation3 + $0x8] sm:$0xf] %vm1835_vm15, %v1792_v56  ;;  %v2624_v56 = vrot.slane %v1870_v46, 9 }
 0x105   : > { %v1794_v3 = vpop.permute.xlu1 %1793  ;;  %1534 = vrot.lane.b32.xlu0 %v1488_v51, %s2852_s16  ;;  %v1944_v51 = vrot.slane %v1871_v41, 5 }
 0x106   : > { %1839 = vst.msk [vmem:[#allocation3 + $0xc] sm:$0xf] %vm1835_vm15, %v1794_v3 }
 0x107   : > { %1536 = vrot.lane.b32.xlu1 %v1489_v60, %s2852_s16  ;;  %v1808_v9 = vpop.permute.xlu0 %1807  ;;  %v1946_v59 = vrot.slane %v1944_v51, 4  ;;  %v1863_v60 = vld [vmem:[#allocation2 + $0x44] sm:$0x1]  ;;  %v1945_v3 = vsel %vm2932_vm4, %v2624_v56, %v1944_v51  ;;  %s2597_s16 = sshll.u32 %s3563_s11, 2 }
 0x108   : > { %1846 = vst.msk [vmem:[#allocation3 + $0x28] sm:$0xf] %vm1835_vm15, %v1808_v9  ;;  %v1926_v8 = vrot.slane %v1863_v60, 5  ;;  %v1951_v9 = vrot.slane %v1874_v1, 5  ;;  %s3615_s8 = scalar_lea.vmem %s3701_s5, %s2597_s16 }
 0x109   : > { %v1810_v16 = vpop.permute.xlu1 %1809  ;;  %1795 = vrot.lane.b32.xlu0 %v1656_v4, %s2853_s29  ;;  %v2621_v4 = vrot.slane %v1861_v57, 9  ;;  %v1948_v6 = vsel %vm2932_vm4, %v1946_v59, %v1947_v43 }
 0x10a   : > { %1847 = vst.msk [vmem:[#allocation3 + $0x2c] sm:$0xf] %vm1835_vm15, %v1810_v16  ;;  %v1927_v15 = vsel %vm2932_vm4, %v1925_v7, %v1926_v8  ;;  %v1953_v63 = vrot.slane %v1951_v9, 4  ;;  %v1954_v16 = vrot.slane %v1875_v10, 5 }
 0x10b   : > { %1797 = vrot.lane.b32.xlu1 %v1666_v52, %s2853_s29  ;;  %v1957_v11 = vpop.permute.xlu0 %1956  ;;  %v1924_v12 = vsel %vm2932_vm4, %v2621_v4, %v1923_v61 }
 0x10c   : > { %2005 = vst.msk [vmem:[#allocation3] sm:$0xf] %vm2004_vm0, %v1957_v11  ;;  %v1955_v21 = vsel %vm2932_vm4, %v1953_v63, %v1954_v16 }
 0x10d   : > { %v1959_v28 = vpop.permute.xlu1 %1958  ;;  %1811 = vrot.lane.b32.xlu0 %v1752_v18, %s2853_s29  ;;  %v1952_v18 = vsel %vm2932_vm4, %v2625_v13, %v1951_v9 }
 0x10e   : > { %2006 = vst.msk [vmem:[#allocation3 + $0x4] sm:$0xf] %vm2004_vm0, %v1959_v28 }
 0x10f   : > { %1813 = vrot.lane.b32.xlu1 %v1762_v22, %s2853_s29  ;;  %v1973_v32 = vpop.permute.xlu0 %1972 }
 0x110   : > { %2013 = vst.msk [vmem:[#allocation3 + $0x20] sm:$0xf] %vm2004_vm0, %v1973_v32 }
 0x111   : > { %v1975_v39 = vpop.permute.xlu1 %1974  ;;  %1799 = vrot.lane.b32.xlu0 %v1680_v30, %s2853_s29 }
 0x112   : > { %2014 = vst.msk [vmem:[#allocation3 + $0x24] sm:$0xf] %vm2004_vm0, %v1975_v39 }
 0x113   : > { %1801 = vrot.lane.b32.xlu1 %v1690_v33, %s2853_s29  ;;  %v697_v45 = vpop.permute.xlu0 %696 }
 0x114   : > { %741 = vst.msk [vmem:[#allocation3 + $0x10] sm:$0xf] %vm736_vm9, %v697_v45 }
 0x115   : > { %v699_v53 = vpop.permute.xlu1 %698  ;;  %1815 = vrot.lane.b32.xlu0 %v1776_v42, %s2853_s29  ;;  %v2796_v54 = vld [vmem:[#allocation3] sm:$0xff]  }
 0x116   : > { %742 = vst.msk [vmem:[#allocation3 + $0x14] sm:$0xf] %vm736_vm9, %v699_v53  ;;  %2714 = vmatprep.mubr.msk.bf16.mxu0 %vm2120_vm1, %v2796_v54 }
 0x117   : > { %1817 = vrot.lane.b32.xlu1 %v1786_v47, %s2853_s29  ;;  %v713_v24 = vpop.permute.xlu0 %712  ;;  %s3578_s29 = scalar_lea.vmem %s3700_s4, %s2597_s16 }
 0x118   : > { %749 = vst.msk [vmem:[#allocation3 + $0x30] sm:$0xf] %vm736_vm9, %v713_v24 }
 0x119   : > { %v715_v62 = vpop.permute.xlu1 %714  ;;  %1964 = vrot.lane.b32.xlu0 %v1917_v55, %s2854_s30  ;;  %v2798_v0 = vld [vmem:[#allocation3 + $0x20] sm:$0xff]  }
 0x11a   : > { %750 = vst.msk [vmem:[#allocation3 + $0x34] sm:$0xf] %vm736_vm9, %v715_v62  ;;  %2722 = vmatprep.mubr.msk.bf16.mxu1 %vm2120_vm1, %v2798_v0 }
 0x11b   : > { %1966 = vrot.lane.b32.xlu1 %v1920_v58, %s2854_s30  ;;  %v1961_v35 = vpop.permute.xlu0 %1960 }
 0x11c   : > { %2007 = vst.msk [vmem:[#allocation3 + $0x8] sm:$0xf] %vm2004_vm0, %v1961_v35 }
 0x11d   : > { %v1963_v52 = vpop.permute.xlu1 %1962  ;;  %1980 = vrot.lane.b32.xlu0 %v1945_v3, %s2854_s30 }
 0x11e   : > { %2008 = vst.msk [vmem:[#allocation3 + $0xc] sm:$0xf] %vm2004_vm0, %v1963_v52 }
 0x11f   : > { %1982 = vrot.lane.b32.xlu1 %v1948_v6, %s2854_s30  ;;  %v1977_v14 = vpop.permute.xlu0 %1976 }
 0x120   : > { %2015 = vst.msk [vmem:[#allocation3 + $0x28] sm:$0xf] %vm2004_vm0, %v1977_v14 }
 0x121   : > { %v1979_v17 = vpop.permute.xlu1 %1978  ;;  %1968 = vrot.lane.b32.xlu0 %v1924_v12, %s2854_s30 }
 0x122   : > { %2016 = vst.msk [vmem:[#allocation3 + $0x2c] sm:$0xf] %vm2004_vm0, %v1979_v17 }
 0x123   : > { %1970 = vrot.lane.b32.xlu1 %v1927_v15, %s2854_s30  ;;  %v701_v19 = vpop.permute.xlu0 %700 }
 0x124   : > { %743 = vst.msk [vmem:[#allocation3 + $0x18] sm:$0xf] %vm736_vm9, %v701_v19 }
 0x125   : > { %v703_v11 = vpop.permute.xlu1 %702  ;;  %1984 = vrot.lane.b32.xlu0 %v1952_v18, %s2854_s30  ;;  %v2801_v22 = vld [vmem:[#allocation3 + $0x8] sm:$0xff]  }
 0x126   : > { %744 = vst.msk [vmem:[#allocation3 + $0x1c] sm:$0xf] %vm736_vm9, %v703_v11  ;;  %2715 = vmatmul.mubr.msk.bf16.vlgmr.msra.gmra.mxu0 %vm2120_vm1, %v2801_v22  ;;  %v3568_v22 = vld [vmem:[%s3699_s3] ss:$0 sm:$0xff] }
 0x127   : > { %1986 = vrot.lane.b32.xlu1 %v1955_v21, %s2854_s30  ;;  %v717_v23 = vpop.permute.xlu0 %716  ;;  %s2855_s30 = smov 120  }
 0x128   : > { %751 = vst.msk [vmem:[#allocation3 + $0x38] sm:$0xf] %vm736_vm9, %v717_v23 }
 0x129   : > { %v719_v25 = vpop.permute.xlu1 %718  ;;  %v2802_v26 = vld [vmem:[#allocation3 + $0x28] sm:$0xff]  }
 0x12a   : > { %752 = vst.msk [vmem:[#allocation3 + $0x3c] sm:$0xf] %vm736_vm9, %v719_v25  ;;  %2723 = vmatmul.mubr.msk.bf16.vlgmr.msra.gmra.mxu1 %vm2120_vm1, %v2802_v26 }
 0x12b   : > { %v869_v2 = vpop.permute.xlu0 %868 }
 0x12c   : > { %913 = vst.msk [vmem:[#allocation3 + $0x10] sm:$0xf] %vm908_vm10, %v869_v2 }
 0x12d   : > { %v871_v20 = vpop.permute.xlu1 %870 }
 0x12e   : > { %914 = vst.msk [vmem:[#allocation3 + $0x14] sm:$0xf] %vm908_vm10, %v871_v20 }
 0x12f   : > { %v885_v28 = vpop.permute.xlu0 %884 }
 0x130   : > { %921 = vst.msk [vmem:[#allocation3 + $0x30] sm:$0xf] %vm908_vm10, %v885_v28 }
 0x131   : > { %v887_v29 = vpop.permute.xlu1 %886 }
 0x132   : > { %922 = vst.msk [vmem:[#allocation3 + $0x34] sm:$0xf] %vm908_vm10, %v887_v29 }
 0x133   : > { %v873_v30 = vpop.permute.xlu0 %872 }
 0x134   : > { %915 = vst.msk [vmem:[#allocation3 + $0x18] sm:$0xf] %vm908_vm10, %v873_v30 }
 0x135   : > { %v875_v31 = vpop.permute.xlu1 %874 }
 0x136   : > { %916 = vst.msk [vmem:[#allocation3 + $0x1c] sm:$0xf] %vm908_vm10, %v875_v31 }
 0x137   : > { %v889_v32 = vpop.permute.xlu0 %888 }
 0x138   : > { %923 = vst.msk [vmem:[#allocation3 + $0x38] sm:$0xf] %vm908_vm10, %v889_v32 }
 0x139   : > { %v891_v34 = vpop.permute.xlu1 %890 }
 0x13a   : > { %924 = vst.msk [vmem:[#allocation3 + $0x3c] sm:$0xf] %vm908_vm10, %v891_v34 }
 0x13b   : > { %v967_v33 = vpop.permute.xlu0 %966 }
 0x13c   : > { %1011 = vst.msk [vmem:[#allocation3 + $0x10] sm:$0xf] %vm1006_vm11, %v967_v33 }
 0x13d   : > { %v969_v36 = vpop.permute.xlu1 %968 }
 0x13e   : > { %1012 = vst.msk [vmem:[#allocation3 + $0x14] sm:$0xf] %vm1006_vm11, %v969_v36 }
 0x13f   : > { %v983_v37 = vpop.permute.xlu0 %982 }
 0x140   : > { %1019 = vst.msk [vmem:[#allocation3 + $0x30] sm:$0xf] %vm1006_vm11, %v983_v37 }
 0x141   : > { %v985_v38 = vpop.permute.xlu1 %984 }
 0x142   : > { %1020 = vst.msk [vmem:[#allocation3 + $0x34] sm:$0xf] %vm1006_vm11, %v985_v38 }
 0x143   : > { %v971_v39 = vpop.permute.xlu0 %970 }
 0x144   : > { %1013 = vst.msk [vmem:[#allocation3 + $0x18] sm:$0xf] %vm1006_vm11, %v971_v39 }
 0x145   : > { %v973_v40 = vpop.permute.xlu1 %972 }
 0x146   : > { %1014 = vst.msk [vmem:[#allocation3 + $0x1c] sm:$0xf] %vm1006_vm11, %v973_v40 }
 0x147   : > { %v987_v41 = vpop.permute.xlu0 %986 }
 0x148   : > { %1021 = vst.msk [vmem:[#allocation3 + $0x38] sm:$0xf] %vm1006_vm11, %v987_v41 }
 0x149   : > { %v989_v42 = vpop.permute.xlu1 %988 }
 0x14a   : > { %1022 = vst.msk [vmem:[#allocation3 + $0x3c] sm:$0xf] %vm1006_vm11, %v989_v42 }
 0x14b   : > { %v1248_v44 = vpop.permute.xlu0 %1247 }
 0x14c   : > { %1292 = vst.msk [vmem:[#allocation3 + $0x10] sm:$0xf] %vm1287_vm12, %v1248_v44 }
 0x14d   : > { %v1250_v45 = vpop.permute.xlu1 %1249 }
 0x14e   : > { %1293 = vst.msk [vmem:[#allocation3 + $0x14] sm:$0xf] %vm1287_vm12, %v1250_v45 }
 0x14f   : > { %v1264_v46 = vpop.permute.xlu0 %1263 }
 0x150   : > { %1300 = vst.msk [vmem:[#allocation3 + $0x30] sm:$0xf] %vm1287_vm12, %v1264_v46 }
 0x151   : > { %v1266_v47 = vpop.permute.xlu1 %1265 }
 0x152   : > { %1301 = vst.msk [vmem:[#allocation3 + $0x34] sm:$0xf] %vm1287_vm12, %v1266_v47 }
 0x153   : > { %v1252_v48 = vpop.permute.xlu0 %1251 }
 0x154   : > { %1294 = vst.msk [vmem:[#allocation3 + $0x18] sm:$0xf] %vm1287_vm12, %v1252_v48 }
 0x155   : > { %v1254_v49 = vpop.permute.xlu1 %1253 }
 0x156   : > { %1295 = vst.msk [vmem:[#allocation3 + $0x1c] sm:$0xf] %vm1287_vm12, %v1254_v49 }
 0x157   : > { %v1268_v50 = vpop.permute.xlu0 %1267 }
 0x158   : > { %1302 = vst.msk [vmem:[#allocation3 + $0x38] sm:$0xf] %vm1287_vm12, %v1268_v50 }
 0x159   : > { %v1270_v51 = vpop.permute.xlu1 %1269 }
 0x15a   : > { %1303 = vst.msk [vmem:[#allocation3 + $0x3c] sm:$0xf] %vm1287_vm12, %v1270_v51 }
 0x15b   : > { %v1417_v53 = vpop.permute.xlu0 %1416 }
 0x15c   : > { %1461 = vst.msk [vmem:[#allocation3 + $0x10] sm:$0xf] %vm1456_vm13, %v1417_v53 }
 0x15d   : > { %v1419_v54 = vpop.permute.xlu1 %1418 }
 0x15e   : > { %1462 = vst.msk [vmem:[#allocation3 + $0x14] sm:$0xf] %vm1456_vm13, %v1419_v54 }
 0x15f   : > { %v1433_v27 = vpop.permute.xlu0 %1432 }
 0x160   : > { %1469 = vst.msk [vmem:[#allocation3 + $0x30] sm:$0xf] %vm1456_vm13, %v1433_v27 }
 0x161   : > { %v1435_v55 = vpop.permute.xlu1 %1434 }
 0x162   : > { %1470 = vst.msk [vmem:[#allocation3 + $0x34] sm:$0xf] %vm1456_vm13, %v1435_v55 }
 0x163   : > { %v1421_v56 = vpop.permute.xlu0 %1420 }
 0x164   : > { %1463 = vst.msk [vmem:[#allocation3 + $0x18] sm:$0xf] %vm1456_vm13, %v1421_v56 }
 0x165   : > { %v1423_v24 = vpop.permute.xlu1 %1422 }
 0x166   : > { %1464 = vst.msk [vmem:[#allocation3 + $0x1c] sm:$0xf] %vm1456_vm13, %v1423_v24 }
 0x167   : > { %v1437_v57 = vpop.permute.xlu0 %1436 }
 0x168   : > { %1471 = vst.msk [vmem:[#allocation3 + $0x38] sm:$0xf] %vm1456_vm13, %v1437_v57 }
 0x169   : > { %v1439_v58 = vpop.permute.xlu1 %1438 }
 0x16a   : > { %1472 = vst.msk [vmem:[#allocation3 + $0x3c] sm:$0xf] %vm1456_vm13, %v1439_v58 }
 0x16b   : > { %v1515_v59 = vpop.permute.xlu0 %1514 }
 0x16c   : > { %1559 = vst.msk [vmem:[#allocation3 + $0x10] sm:$0xf] %vm1554_vm14, %v1515_v59 }
 0x16d   : > { %v1517_v43 = vpop.permute.xlu1 %1516 }
 0x16e   : > { %1560 = vst.msk [vmem:[#allocation3 + $0x14] sm:$0xf] %vm1554_vm14, %v1517_v43 }
 0x16f   : > { %v1531_v60 = vpop.permute.xlu0 %1530 }
 0x170   : > { %1567 = vst.msk [vmem:[#allocation3 + $0x30] sm:$0xf] %vm1554_vm14, %v1531_v60 }
 0x171   : > { %v1533_v61 = vpop.permute.xlu1 %1532 }
 0x172   : > { %1568 = vst.msk [vmem:[#allocation3 + $0x34] sm:$0xf] %vm1554_vm14, %v1533_v61 }
 0x173   : > { %v1519_v62 = vpop.permute.xlu0 %1518 }
 0x174   : > { %1561 = vst.msk [vmem:[#allocation3 + $0x18] sm:$0xf] %vm1554_vm14, %v1519_v62 }
 0x175   : > { %v1521_v0 = vpop.permute.xlu1 %1520 }
 0x176   : > { %1562 = vst.msk [vmem:[#allocation3 + $0x1c] sm:$0xf] %vm1554_vm14, %v1521_v0 }
 0x177   : > { %v1535_v1 = vpop.permute.xlu0 %1534 }
 0x178   : > { %1569 = vst.msk [vmem:[#allocation3 + $0x38] sm:$0xf] %vm1554_vm14, %v1535_v1 }
 0x179   : > { %v1537_v3 = vpop.permute.xlu1 %1536 }
 0x17a   : > { %1570 = vst.msk [vmem:[#allocation3 + $0x3c] sm:$0xf] %vm1554_vm14, %v1537_v3 }
 0x17b   : > { %v1796_v4 = vpop.permute.xlu0 %1795 }
 0x17c   : > { %1840 = vst.msk [vmem:[#allocation3 + $0x10] sm:$0xf] %vm1835_vm15, %v1796_v4 }
 0x17d   : > { %v1798_v35 = vpop.permute.xlu1 %1797 }
 0x17e   : > { %1841 = vst.msk [vmem:[#allocation3 + $0x14] sm:$0xf] %vm1835_vm15, %v1798_v35 }
 0x17f   : > { %v1812_v5 = vpop.permute.xlu0 %1811 }
 0x180   : > { %1848 = vst.msk [vmem:[#allocation3 + $0x30] sm:$0xf] %vm1835_vm15, %v1812_v5 }
 0x181   : > { %v1814_v6 = vpop.permute.xlu1 %1813 }
 0x182   : > { %1849 = vst.msk [vmem:[#allocation3 + $0x34] sm:$0xf] %vm1835_vm15, %v1814_v6 }
 0x183   : > { %v1800_v7 = vpop.permute.xlu0 %1799 }
 0x184   : > { %1842 = vst.msk [vmem:[#allocation3 + $0x18] sm:$0xf] %vm1835_vm15, %v1800_v7 }
 0x185   : > { %v1802_v8 = vpop.permute.xlu1 %1801 }
 0x186   : > { %1843 = vst.msk [vmem:[#allocation3 + $0x1c] sm:$0xf] %vm1835_vm15, %v1802_v8 }
 0x187   : > { %v1816_v9 = vpop.permute.xlu0 %1815 }
 0x188   : > { %1850 = vst.msk [vmem:[#allocation3 + $0x38] sm:$0xf] %vm1835_vm15, %v1816_v9 }
 0x189   : > { %v1818_v52 = vpop.permute.xlu1 %1817 }
 0x18a   : > { %1851 = vst.msk [vmem:[#allocation3 + $0x3c] sm:$0xf] %vm1835_vm15, %v1818_v52 }
 0x18b   : > { %v1965_v10 = vpop.permute.xlu0 %1964 }
 0x18c   : > { %2009 = vst.msk [vmem:[#allocation3 + $0x10] sm:$0xf] %vm2004_vm0, %v1965_v10 }
 0x18d   : > { %v1967_v12 = vpop.permute.xlu1 %1966 }
 0x18e   : > { %2010 = vst.msk [vmem:[#allocation3 + $0x14] sm:$0xf] %vm2004_vm0, %v1967_v12 }
 0x18f   : > { %v1981_v13 = vpop.permute.xlu0 %1980 }
 0x190   : > { %2017 = vst.msk [vmem:[#allocation3 + $0x30] sm:$0xf] %vm2004_vm0, %v1981_v13 }
 0x191   : > { %v1983_v14 = vpop.permute.xlu1 %1982 }
 0x192   : > { %2018 = vst.msk [vmem:[#allocation3 + $0x34] sm:$0xf] %vm2004_vm0, %v1983_v14 }
 0x193   : > { %v1969_v15 = vpop.permute.xlu0 %1968 }
 0x194   : > { %2011 = vst.msk [vmem:[#allocation3 + $0x18] sm:$0xf] %vm2004_vm0, %v1969_v15 }
 0x195   : > { %v1971_v63 = vpop.permute.xlu1 %1970  ;;  %v2803_v16 = vld [vmem:[#allocation3 + $0x10] sm:$0xff]  }
 0x196   : > { %2012 = vst.msk [vmem:[#allocation3 + $0x1c] sm:$0xf] %vm2004_vm0, %v1971_v63  ;;  %2718 = vmatprep.mubr.msk.bf16.mxu0 %vm2120_vm1, %v2803_v16 }
 0x197   : > { %v1985_v17 = vpop.permute.xlu0 %1984 }
 0x198   : > { %2019 = vst.msk [vmem:[#allocation3 + $0x38] sm:$0xf] %vm2004_vm0, %v1985_v17 }
 0x199   : > { %v1987_v18 = vpop.permute.xlu1 %1986  ;;  %v2804_v19 = vld [vmem:[#allocation3 + $0x30] sm:$0xff]  }
 0x19a   : > { %2020 = vst.msk [vmem:[#allocation3 + $0x3c] sm:$0xf] %vm2004_vm0, %v1987_v18  ;;  %2726 = vmatprep.mubr.msk.bf16.mxu1 %vm2120_vm1, %v2804_v19 }
 0x19d   : > { %v2805_v21 = vld [vmem:[#allocation3 + $0x18] sm:$0xff]  }
 0x19e   : > { %2719 = vmatmul.mubr.msk.bf16.gmra.mxu0 %vm2120_vm1, %v2805_v21 }
 0x1a1   : > { %v2806_v11 = vld [vmem:[#allocation3 + $0x38] sm:$0xff]  }
 0x1a2   : > { %2727 = vmatmul.mubr.msk.bf16.gmra.mxu1 %vm2120_vm1, %v2806_v11 }
 0x1e6   : > { %v2716_v23 = vpop.f32.mrf.mxu0 }
 0x1e7   : > { %v2192_v25 = vadd.f32 %v2716_v23, %v3568_v22 }
 0x1e8   : > { %v2183_v26 = vpop.f32.mrf.mxu0 }
 0x1e9   : > { %v2248_v2 = vmax.f32 %v2192_v25, 0.0  ;;  %v2184_v20 = vadd.f32 %v3568_v22, %v2183_v26 }
 0x1ea   : > { %v2717_v28 = vpop.f32.mrf.mxu0  ;;  %v2724_v29 = vpop.f32.mrf.mxu1 }
 0x1eb   : > { %v2675_v30 = vpack.c.bf16 %v2248_v2, %v2248_v2  ;;  %v2246_v31 = vmax.f32 %v2184_v20, 0.0  ;;  %v2195_v32 = vadd.f32 %v2717_v28, %v3568_v22  ;;  %v2224_v34 = vadd.f32 %v2724_v29, %v3568_v22 }
 0x1ec   : > { %v2186_v33 = vpop.f32.mrf.mxu0  ;;  %v2215_v36 = vpop.f32.mrf.mxu1 }
 0x1ed   : > { %2328 = vst.msk [vmem:[%s3578_s29 + $0x8] sm:$0xf] %vm398_vm2, %v2675_v30  ;;  %v2673_v37 = vpack.c.bf16 %v2246_v31, %v2246_v31  ;;  %v2249_v38 = vmax.f32 %v2195_v32, 0.0  ;;  %v2256_v39 = vmax.f32 %v2224_v34, 0.0  ;;  %v2187_v40 = vadd.f32 %v3568_v22, %v2186_v33  ;;  %2346 = vrot.lane.b32.xlu0 %v2675_v30, %s2855_s30 }
 0x1ee   : > { %v2216_v41 = vadd.f32 %v3568_v22, %v2215_v36  ;;  %v2725_v42 = vpop.f32.mrf.mxu1 }
 0x1ef   : > { %2326 = vst.msk [vmem:[%s3578_s29] sm:$0xf] %vm398_vm2, %v2673_v37  ;;  %v2676_v44 = vpack.c.bf16 %v2249_v38, %v2249_v38  ;;  %v2683_v45 = vpack.c.bf16 %v2256_v39, %v2256_v39  ;;  %v2247_v46 = vmax.f32 %v2187_v40, 0.0  ;;  %v2227_v47 = vadd.f32 %v2725_v42, %v3568_v22 }
 0x1f0   : > { %v2254_v48 = vmax.f32 %v2216_v41, 0.0  ;;  %v2218_v49 = vpop.f32.mrf.mxu1 }
 0x1f1   : > { %2329 = vst.msk [vmem:[%s3578_s29 + $0xc] sm:$0xf] %vm398_vm2, %v2676_v44  ;;  %2336 = vst.msk [vmem:[%s3578_s29 + $0x28] sm:$0xf] %vm398_vm2, %v2683_v45  ;;  %v2674_v50 = vpack.c.bf16 %v2247_v46, %v2247_v46  ;;  %v2257_v51 = vmax.f32 %v2227_v47, 0.0  ;;  %v2219_v53 = vadd.f32 %v3568_v22, %v2218_v49  ;;  %2362 = vrot.lane.b32.xlu0 %v2683_v45, %s2855_s30  ;;  %2348 = vrot.lane.b32.xlu1 %v2676_v44, %s2855_s30 }
 0x1f2   : > { %v2681_v54 = vpack.c.bf16 %v2254_v48, %v2254_v48 }
 0x1f3   : > { %2327 = vst.msk [vmem:[%s3578_s29 + $0x4] sm:$0xf] %vm398_vm2, %v2674_v50  ;;  %v2684_v27 = vpack.c.bf16 %v2257_v51, %v2257_v51  ;;  %v2255_v55 = vmax.f32 %v2219_v53, 0.0 }
 0x1f4   : > { %2334 = vst.msk [vmem:[%s3578_s29 + $0x20] sm:$0xf] %vm398_vm2, %v2681_v54 }
 0x1f5   : > { %2337 = vst.msk [vmem:[%s3578_s29 + $0x2c] sm:$0xf] %vm398_vm2, %v2684_v27  ;;  %v2682_v56 = vpack.c.bf16 %v2255_v55, %v2255_v55  ;;  %2364 = vrot.lane.b32.xlu1 %v2684_v27, %s2855_s30  ;;  %2342 = vrot.lane.b32.xlu0 %v2673_v37, %s2855_s30 }
 0x1f7   : > { %2335 = vst.msk [vmem:[%s3578_s29 + $0x24] sm:$0xf] %vm398_vm2, %v2682_v56 }
 0x1f9   : > { %2344 = vrot.lane.b32.xlu1 %v2674_v50, %s2855_s30  ;;  %2358 = vrot.lane.b32.xlu0 %v2681_v54, %s2855_s30 }
 0x1fd   : > { %2360 = vrot.lane.b32.xlu1 %v2682_v56, %s2855_s30 }
 0x25e   : > { %v2720_v24 = vpop.f32.mrf.mxu0 }
 0x25f   : > { %v2208_v57 = vadd.f32 %v2720_v24, %v3568_v22  ;;  %v2347_v58 = vpop.permute.xlu0 %2346 }
 0x260   : > { %2392 = vst.msk [vmem:[%s3615_s8 + $0x8] sm:$0xf] %vm398_vm2, %v2347_v58  ;;  %v2199_v59 = vpop.f32.mrf.mxu0 }
 0x261   : > { %v2252_v43 = vmax.f32 %v2208_v57, 0.0  ;;  %v2200_v60 = vadd.f32 %v3568_v22, %v2199_v59 }
 0x262   : > { %v2721_v61 = vpop.f32.mrf.mxu0  ;;  %v2728_v62 = vpop.f32.mrf.mxu1 }
 0x263   : > { %v2679_v0 = vpack.c.bf16 %v2252_v43, %v2252_v43  ;;  %v2250_v1 = vmax.f32 %v2200_v60, 0.0  ;;  %v2211_v3 = vadd.f32 %v2721_v61, %v3568_v22  ;;  %v2240_v4 = vadd.f32 %v2728_v62, %v3568_v22  ;;  %v2363_v35 = vpop.permute.xlu0 %2362  ;;  %v2349_v5 = vpop.permute.xlu1 %2348 }
 0x264   : > { %2400 = vst.msk [vmem:[%s3615_s8 + $0x28] sm:$0xf] %vm398_vm2, %v2363_v35  ;;  %2393 = vst.msk [vmem:[%s3615_s8 + $0xc] sm:$0xf] %vm398_vm2, %v2349_v5  ;;  %v2202_v6 = vpop.f32.mrf.mxu0  ;;  %v2231_v7 = vpop.f32.mrf.mxu1 }
 0x265   : > { %2332 = vst.msk [vmem:[%s3578_s29 + $0x18] sm:$0xf] %vm398_vm2, %v2679_v0  ;;  %v2677_v8 = vpack.c.bf16 %v2250_v1, %v2250_v1  ;;  %v2253_v9 = vmax.f32 %v2211_v3, 0.0  ;;  %v2260_v52 = vmax.f32 %v2240_v4, 0.0  ;;  %v2203_v10 = vadd.f32 %v3568_v22, %v2202_v6  ;;  %2354 = vrot.lane.b32.xlu0 %v2679_v0, %s2855_s30 }
 0x266   : > { %v2232_v12 = vadd.f32 %v3568_v22, %v2231_v7  ;;  %v2729_v13 = vpop.f32.mrf.mxu1 }
 0x267   : > { %2330 = vst.msk [vmem:[%s3578_s29 + $0x10] sm:$0xf] %vm398_vm2, %v2677_v8  ;;  %v2680_v14 = vpack.c.bf16 %v2253_v9, %v2253_v9  ;;  %v2687_v15 = vpack.c.bf16 %v2260_v52, %v2260_v52  ;;  %v2251_v63 = vmax.f32 %v2203_v10, 0.0  ;;  %v2243_v16 = vadd.f32 %v2729_v13, %v3568_v22  ;;  %v2365_v17 = vpop.permute.xlu1 %2364  ;;  %v2343_v18 = vpop.permute.xlu0 %2342 }
 0x268   : > { %v2258_v19 = vmax.f32 %v2232_v12, 0.0  ;;  %2401 = vst.msk [vmem:[%s3615_s8 + $0x2c] sm:$0xf] %vm398_vm2, %v2365_v17  ;;  %2390 = vst.msk [vmem:[%s3615_s8] sm:$0xf] %vm398_vm2, %v2343_v18  ;;  %v2234_v21 = vpop.f32.mrf.mxu1 }
 0x269   : > { %2333 = vst.msk [vmem:[%s3578_s29 + $0x1c] sm:$0xf] %vm398_vm2, %v2680_v14  ;;  %2340 = vst.msk [vmem:[%s3578_s29 + $0x38] sm:$0xf] %vm398_vm2, %v2687_v15  ;;  %v2678_v11 = vpack.c.bf16 %v2251_v63, %v2251_v63  ;;  %v2261_v23 = vmax.f32 %v2243_v16, 0.0  ;;  %v2235_v25 = vadd.f32 %v3568_v22, %v2234_v21  ;;  %2356 = vrot.lane.b32.xlu1 %v2680_v14, %s2855_s30  ;;  %2350 = vrot.lane.b32.xlu0 %v2677_v8, %s2855_s30 }
 0x26a   : > { %v2685_v26 = vpack.c.bf16 %v2258_v19, %v2258_v19 }
 0x26b   : > { %2331 = vst.msk [vmem:[%s3578_s29 + $0x14] sm:$0xf] %vm398_vm2, %v2678_v11  ;;  %v2688_v2 = vpack.c.bf16 %v2261_v23, %v2261_v23  ;;  %v2259_v20 = vmax.f32 %v2235_v25, 0.0  ;;  %v2345_v28 = vpop.permute.xlu1 %2344  ;;  %v2359_v29 = vpop.permute.xlu0 %2358 }
 0x26c   : > { %2338 = vst.msk [vmem:[%s3578_s29 + $0x30] sm:$0xf] %vm398_vm2, %v2685_v26  ;;  %2391 = vst.msk [vmem:[%s3615_s8 + $0x4] sm:$0xf] %vm398_vm2, %v2345_v28 }
 0x26d   : > { %2398 = vst.msk [vmem:[%s3615_s8 + $0x20] sm:$0xf] %vm398_vm2, %v2359_v29  ;;  %2341 = vst.msk [vmem:[%s3578_s29 + $0x3c] sm:$0xf] %vm398_vm2, %v2688_v2  ;;  %v2686_v22 = vpack.c.bf16 %v2259_v20, %v2259_v20  ;;  %2352 = vrot.lane.b32.xlu1 %v2678_v11, %s2855_s30  ;;  %2366 = vrot.lane.b32.xlu0 %v2685_v26, %s2855_s30 }
 0x26f   : > { %2339 = vst.msk [vmem:[%s3578_s29 + $0x34] sm:$0xf] %vm398_vm2, %v2686_v22  ;;  %v2361_v30 = vpop.permute.xlu1 %2360 }
 0x270   : > { %2399 = vst.msk [vmem:[%s3615_s8 + $0x24] sm:$0xf] %vm398_vm2, %v2361_v30 }
 0x271   : > { %2368 = vrot.lane.b32.xlu1 %v2686_v22, %s2855_s30  ;;  %2370 = vrot.lane.b32.xlu0 %v2687_v15, %s2855_s30 }
 0x275   : > { %2372 = vrot.lane.b32.xlu1 %v2688_v2, %s2855_s30 }
 0x2d7   : > { %v2355_v31 = vpop.permute.xlu0 %2354 }
 0x2d8   : > { %2396 = vst.msk [vmem:[%s3615_s8 + $0x18] sm:$0xf] %vm398_vm2, %v2355_v31 }
 0x2db   : > { %v2357_v32 = vpop.permute.xlu1 %2356  ;;  %v2351_v34 = vpop.permute.xlu0 %2350 }
 0x2dc   : > { %2397 = vst.msk [vmem:[%s3615_s8 + $0x1c] sm:$0xf] %vm398_vm2, %v2357_v32  ;;  %2394 = vst.msk [vmem:[%s3615_s8 + $0x10] sm:$0xf] %vm398_vm2, %v2351_v34 }
 0x2df   : > { %v2353_v33 = vpop.permute.xlu1 %2352  ;;  %v2367_v36 = vpop.permute.xlu0 %2366 }
 0x2e0   : > { %2395 = vst.msk [vmem:[%s3615_s8 + $0x14] sm:$0xf] %vm398_vm2, %v2353_v33  ;;  %2402 = vst.msk [vmem:[%s3615_s8 + $0x30] sm:$0xf] %vm398_vm2, %v2367_v36 }
 0x2e3   : > { %v2369_v37 = vpop.permute.xlu1 %2368  ;;  %v2371_v38 = vpop.permute.xlu0 %2370 }
 0x2e4   : > { %2403 = vst.msk [vmem:[%s3615_s8 + $0x34] sm:$0xf] %vm398_vm2, %v2369_v37  ;;  %2404 = vst.msk [vmem:[%s3615_s8 + $0x38] sm:$0xf] %vm398_vm2, %v2371_v38 }
 0x2e7   : > { %v2373_v39 = vpop.permute.xlu1 %2372 }
 0x2e8   : > { %2405 = vst.msk [vmem:[%s3615_s8 + $0x3c] sm:$0xf] %vm398_vm2, %v2373_v39 }
 0x2e9 PF: > { %s16_s22 = sadd.s32 1, %s2845_s22   ;;  %s3706_s18 = smov %s2837_s20 }
 0x2ea   : > { %p13_p9 = scmp.ge.s32.totalorder %s16_s22, 6   ;;  %s3707_s19 = smov %s2841_s21 }
 0x2eb   : > { %s3708_s20 = smov %s3711_s23  ;;  %s3709_s21 = smov %s3715_s24 }
 0x2ec   :  { %15 = sbr.rel (!%p13_p9) target bundleno = 3 (0x3), region = 84 }

// kernel: ssh_forward.3
= control target key start
LH: loop header
LB: loop body
LE: loop exit
PB: predicated region body
PF: predicated region fallthrough
CT: control target
= control target key end

     0   :  { %s2911_s18 = smov 0   ;;  %s2913_s19 = smov 0   ;;  %s3785_s0 = inlined_call_operand.vmem [shape: bf16[2,18,18,16], index: 0, kind: input, shape index: {}, may-alias: {0,1}]   ;;  %s3786_s1 = inlined_call_operand.vmem [shape: bf16[2,18,18,16], index: 1, kind: input, shape index: {}, may-alias: {0,1}]   ;;  %s3787_s2 = inlined_call_operand.vmem [shape: bf16[144,24], index: 2, kind: input, shape index: {}]   ;;  %s3788_s3 = inlined_call_operand.vmem [shape: f32[1,24], index: 3, kind: input, shape index: {}]   ;;  %s3789_s4 = inlined_call_operand.vmem [shape: bf16[2,16,16,16], index: 4, kind: output, shape index: {0}]   ;;  %s3790_s5 = inlined_call_operand.vmem [shape: bf16[2,16,16,8], index: 5, kind: output, shape index: {1}]  }
   0x1   :  { %s2915_s20 = smov 0   ;;  %s2917_s21 = smov 0  }
   0x2   :  { %s2919_s22 = smov 0  }
   0x3 LB: > { %s25_s23 = sadd.s32 1, %s2863_s20  ;;  %s28_s24 = sadd.s32 1, %s2867_s21  ;;  %s2871_s22 = sphi %s2919_s22, %s16_s22   ;;  %s2867_s21 = sphi %s2917_s21, %s3799_s21   ;;  %s2863_s20 = sphi %s2915_s20, %s3798_s20   ;;  %s2859_s19 = sphi %s2913_s19, %s3797_s19   ;;  %s2855_s18 = sphi %s2911_s18, %s3796_s18  }
   0x4   : > { %p26_p0 = scmp.ge.s32.totalorder %s25_s23, 2  ;;  %p2620_p1 = scmp.ge.s32.totalorder %s2871_s22, 1 }
   0x5   : > { %p250_p2 = scmp.lt.s32.totalorder %s2871_s22, 5 }
   0x6   : > { %s3801_s23 = smov (%p26_p0, %s25_s23), 0  ;;  %s3803_s24 = smov (!%p26_p0, %s28_s24), %s2867_s21 }
   0x7   : > { %p251_p3 = pnand %p2620_p1, %p250_p2  ;;  %p30_p4 = scmp.ge.s32.totalorder %s3803_s24, 2 }
   0x8   : > { %s2941_s25 = sshll.u32 (!%p251_p3), %s2855_s18, 3  ;;  %p321_p5 = scmp.lt.s32.totalorder (!%p251_p3), %s2859_s19, 1 }
   0x9   : > { %s3805_s24 = smov (%p30_p4, %s3803_s24), 0  ;;  %254 = sbr.rel (%p251_p3) target bundleno = 701 (0x2bd), region = 36 }
   0xa   : > { %p323_p6 = scmp.lt.s32.totalorder (!%p251_p3), %s2941_s25, 17  ;;  %s2873_s9 = smov (!%p251_p3), 48  }
   0xb   : > { %s2874_s10 = smov (!%p251_p3), 32   ;;  %s2875_s11 = smov (!%p251_p3), 16  }
   0xc   : > { %s2876_s12 = smov (!%p251_p3), 64   ;;  %s2877_s13 = smov (!%p251_p3), 80  }
   0xd   : > { %s2878_s14 = smov (!%p251_p3), 96   ;;  %s2879_s15 = smov (!%p251_p3), 112  }
   0xe   : > { %s3807_s19 = smov (!%p321_p5, %s2859_s19), 1  ;;  %vm398_vm0 = vcmask 125952   ;;  %vm401_vm1 = vcmask 122880   ;;  %vm801_vm2 = vcmask 1042432   ;;  %vm802_vm3 = vcmask 1046532   ;;  %s2734_s16 = sadd.s32 8, %s2941_s25 }
   0xf   : > { %s324_s26 = scalar_select %p323_p6, %s2941_s25, 17  ;;  %vm493_vm4 = vsmask.f32 3328  ;;  %vm494_vm5 = vsmask.f32 7440  ;;  %vm3007_vm6 = vmor %vm801_vm2, %vm802_vm3  ;;  %vm736_vm8 = vcmask 257152  }
  0x10   : > { %s2754_s27 = smul.u32 54, %s3807_s19  ;;  %vm3025_vm7 = vmor %vm493_vm4, %vm494_vm5  ;;  %p3100_p7 = scmp.lt.s32.totalorder %s2734_s16, 17  ;;  %vm908_vm9 = vcmask 388352   ;;  %vm1006_vm10 = vcmask 519552   ;;  %vm1287_vm11 = vcmask 650752   ;;  %vm1456_vm12 = vcmask 781952  }
  0x11   : > { %s2753_s28 = smul.u32 3, %s324_s26  ;;  %vm1554_vm13 = vcmask 913152   ;;  %vm1835_vm14 = vcmask 1044352   ;;  %vm2155_vm15 = vcmask 130048   ;;  %p354_p8 = scmp.lt.s32.totalorder %s2941_s25, 15 }
  0x12   : > { %s3809_s16 = smov (!%p3100_p7, %s2734_s16), 17 }
  0x13   : > { %s327_s29 = sadd.s32 %s2754_s27, %s2753_s28  ;;  %s2755_s18 = smul.u32 3, %s3809_s16 }
  0x14   : > { %s2622_s30 = sshll.u32 %s327_s29, 2  ;;  %s3811_s25 = smov (!%p354_p8, %s2941_s25), 15 }
  0x15   : > { %s2953_s8 = scalar_lea.vmem %s3785_s0, %s2622_s30  ;;  %s345_s26 = sadd.s32 %s2755_s18, %s2754_s27 }
  0x16   : > { %v378_v0 = vld [vmem:[%s2953_s8 + $0x10] sm:$0xf]  ;;  %v377_v1 = vld [vmem:[%s2953_s8 + $0xc] sm:$0xf]  ;;  %v390_v2 = vld [vmem:[%s2953_s8 + $0x40] sm:$0xf] }
  0x17   : > { %404 = vst.msk [vmem:[#allocation2 + $0x10] sm:$0xf] %vm398_vm0, %v378_v0  ;;  %403 = vst.msk [vmem:[#allocation2 + $0xc] sm:$0xf] %vm398_vm0, %v377_v1  ;;  %v389_v3 = vld [vmem:[%s2953_s8 + $0x3c] sm:$0xf] }
  0x18   : > { %416 = vst.msk [vmem:[#allocation2 + $0x40] sm:$0xf] %vm398_vm0, %v390_v2  ;;  %v375_v4 = vld [vmem:[%s2953_s8 + $0x4] sm:$0xf]  ;;  %v376_v5 = vld [vmem:[%s2953_s8 + $0x8] sm:$0x1] }
  0x19   : > { %415 = vst.msk [vmem:[#allocation2 + $0x3c] sm:$0xf] %vm398_vm0, %v389_v3  ;;  %400 = vst.msk [vmem:[#allocation2 + $0x4] sm:$0xf] %vm398_vm0, %v375_v4  ;;  %v374_v6 = vld [vmem:[%s2953_s8] sm:$0xf] }
  0x1a   : > { %402 = vst.msk [vmem:[#allocation2 + $0x8] sm:$0x1] %vm401_vm1, %v376_v5  ;;  %v387_v7 = vld [vmem:[%s2953_s8 + $0x34] sm:$0xf]  ;;  %v388_v8 = vld [vmem:[%s2953_s8 + $0x38] sm:$0x1] }
  0x1b   : > { %399 = vst.msk [vmem:[#allocation2] sm:$0xf] %vm398_vm0, %v374_v6  ;;  %413 = vst.msk [vmem:[#allocation2 + $0x34] sm:$0xf] %vm398_vm0, %v387_v7  ;;  %v386_v9 = vld [vmem:[%s2953_s8 + $0x30] sm:$0xf] }
  0x1c   : > { %414 = vst.msk [vmem:[#allocation2 + $0x38] sm:$0x1] %vm401_vm1, %v388_v8  ;;  %v379_v10 = vld [vmem:[%s2953_s8 + $0x14] sm:$0x1]  ;;  %v391_v11 = vld [vmem:[%s2953_s8 + $0x44] sm:$0x1] }
  0x1d   : > { %412 = vst.msk [vmem:[#allocation2 + $0x30] sm:$0xf] %vm398_vm0, %v386_v9  ;;  %v381_v12 = vld [vmem:[%s2953_s8 + $0x1c] sm:$0xf]  ;;  %v380_v13 = vld [vmem:[%s2953_s8 + $0x18] sm:$0xf] }
  0x1e   : > { %405 = vst.msk [vmem:[#allocation2 + $0x14] sm:$0x1] %vm401_vm1, %v379_v10  ;;  %417 = vst.msk [vmem:[#allocation2 + $0x44] sm:$0x1] %vm401_vm1, %v391_v11  ;;  %v393_v14 = vld [vmem:[%s2953_s8 + $0x4c] sm:$0xf] }
  0x1f   : > { %407 = vst.msk [vmem:[#allocation2 + $0x1c] sm:$0xf] %vm398_vm0, %v381_v12  ;;  %406 = vst.msk [vmem:[#allocation2 + $0x18] sm:$0xf] %vm398_vm0, %v380_v13  ;;  %v392_v15 = vld [vmem:[%s2953_s8 + $0x48] sm:$0xf] }
  0x20   : > { %419 = vst.msk [vmem:[#allocation2 + $0x4c] sm:$0xf] %vm398_vm0, %v393_v14  ;;  %v382_v16 = vld [vmem:[%s2953_s8 + $0x20] sm:$0x1]  ;;  %v394_v17 = vld [vmem:[%s2953_s8 + $0x50] sm:$0x1] }
  0x21   : > { %418 = vst.msk [vmem:[#allocation2 + $0x48] sm:$0xf] %vm398_vm0, %v392_v15  ;;  %v384_v18 = vld [vmem:[%s2953_s8 + $0x28] sm:$0xf]  ;;  %v383_v19 = vld [vmem:[%s2953_s8 + $0x24] sm:$0xf] }
  0x22   : > { %408 = vst.msk [vmem:[#allocation2 + $0x20] sm:$0x1] %vm401_vm1, %v382_v16  ;;  %420 = vst.msk [vmem:[#allocation2 + $0x50] sm:$0x1] %vm401_vm1, %v394_v17  ;;  %v396_v20 = vld [vmem:[%s2953_s8 + $0x58] sm:$0xf] }
  0x23   : > { %410 = vst.msk [vmem:[#allocation2 + $0x28] sm:$0xf] %vm398_vm0, %v384_v18  ;;  %409 = vst.msk [vmem:[#allocation2 + $0x24] sm:$0xf] %vm398_vm0, %v383_v19  ;;  %v395_v21 = vld [vmem:[%s2953_s8 + $0x54] sm:$0xf] }
  0x24   : > { %422 = vst.msk [vmem:[#allocation2 + $0x58] sm:$0xf] %vm398_vm0, %v396_v20  ;;  %v385_v22 = vld [vmem:[%s2953_s8 + $0x2c] sm:$0x1]  ;;  %v397_v23 = vld [vmem:[%s2953_s8 + $0x5c] sm:$0x1] }
  0x25   : > { %v927_v24 = vld [vmem:[#allocation2 + $0x10] sm:$0xf]  ;;  %v926_v25 = vld [vmem:[#allocation2 + $0xc] sm:$0xf]  ;;  %v935_v26 = vld [vmem:[#allocation2 + $0x40] sm:$0xf] }
  0x26   : > { %421 = vst.msk [vmem:[#allocation2 + $0x54] sm:$0xf] %vm398_vm0, %v395_v21  ;;  %960 = vrot.lane.b32.xlu1 %v927_v24, %s2873_s9  ;;  %958 = vrot.lane.b32.xlu0 %v926_v25, %s2873_s9  ;;  %v934_v27 = vld [vmem:[#allocation2 + $0x3c] sm:$0xf]  ;;  %v754_v28 = vld [vmem:[#allocation2 + $0x4] sm:$0xf] }
  0x27   : > { %411 = vst.msk [vmem:[#allocation2 + $0x2c] sm:$0x1] %vm401_vm1, %v385_v22  ;;  %423 = vst.msk [vmem:[#allocation2 + $0x5c] sm:$0x1] %vm401_vm1, %v397_v23  ;;  %v755_v29 = vld [vmem:[#allocation2 + $0x8] sm:$0x1] }
  0x28   : > { %v806_v31 = vrot.slane %v754_v28, 5  ;;  %v809_v32 = vrot.slane %v755_v29, 5  ;;  %v753_v33 = vld [vmem:[#allocation2] sm:$0xe]  ;;  %v766_v34 = vld [vmem:[#allocation2 + $0x34] sm:$0xf] }
  0x29   : > { %v2634_v35 = vrot.slane %v753_v33, 9  ;;  %v767_v36 = vld [vmem:[#allocation2 + $0x38] sm:$0x1]  ;;  %v834_v37 = vrot.slane %v766_v34, 5  ;;  %v765_v38 = vld [vmem:[#allocation2 + $0x30] sm:$0xe] }
  0x2a   : > { %v808_v39 = vrot.slane %v806_v31, 4  ;;  %v837_v40 = vrot.slane %v767_v36, 5  ;;  %v2638_v41 = vrot.slane %v765_v38, 9  ;;  %v481_v42 = vld [vmem:[#allocation2 + $0x30] sm:$0xf]  ;;  %976 = vrot.lane.b32.xlu1 %v935_v26, %s2873_s9  ;;  %974 = vrot.lane.b32.xlu0 %v934_v27, %s2873_s9  ;;  %s2625_s30 = sshll.u32 %s345_s26, 2 }
  0x2b   : > { %v807_v43 = vsel %vm3007_vm6, %v2634_v35, %v806_v31  ;;  %v836_v44 = vrot.slane %v834_v37, 4  ;;  %v482_v45 = vld [vmem:[#allocation2 + $0x34] sm:$0xf]  ;;  %v593_v46 = vshrl.u32 %v481_v42, 16  ;;  %v596_v47 = vshll.u32 %v481_v42, 16  ;;  %s3157_s16 = scalar_lea.vmem %s3786_s1, %s2625_s30 }
  0x2c   : > { %v810_v48 = vsel %vm3007_vm6, %v808_v39, %v809_v32  ;;  %v835_v49 = vsel %vm3007_vm6, %v2638_v41, %v834_v37  ;;  %v602_v50 = vshll.u32 %v482_v45, 16  ;;  %v606_v51 = vshrl.u32 %v482_v45, 16  ;;  %v469_v52 = vld [vmem:[#allocation2] sm:$0xf]  ;;  %v470_v53 = vld [vmem:[#allocation2 + $0x4] sm:$0xf] }
  0x2d   : > { %v838_v54 = vsel %vm3007_vm6, %v836_v44, %v837_v40  ;;  %v595_v55 = vrot.slane %v593_v46, 4  ;;  %v598_v56 = vrot.slane %v596_v47, 5  ;;  %v497_v57 = vshrl.u32 %v469_v52, 16  ;;  %v483_v58 = vld [vmem:[#allocation2 + $0x38] sm:$0x1] }
  0x2e   : > { %v604_v59 = vrot.slane %v602_v50, 5  ;;  %v500_v60 = vshll.u32 %v469_v52, 16  ;;  %v506_v61 = vshll.u32 %v470_v53, 16  ;;  %v510_v62 = vshrl.u32 %v470_v53, 16  ;;  %v471_v63 = vld [vmem:[#allocation2 + $0x8] sm:$0x1]  ;;  %862 = vrot.lane.b32.xlu1 %v810_v48, %s2874_s10  ;;  %860 = vrot.lane.b32.xlu0 %v807_v43, %s2874_s10 }
  0x2f   : > { %v599_v0 = vor.u32 %v598_v56, %v595_v55  ;;  %v499_v1 = vrot.slane %v497_v57, 4  ;;  %v608_v2 = vrot.slane %v606_v51, 4  ;;  %v612_v3 = vshll.u32 %v483_v58, 16  ;;  %v1024_v4 = vld [vmem:[#allocation2 + $0x10] sm:$0xf] }
  0x30   : > { %v502_v6 = vrot.slane %v500_v60, 5  ;;  %v508_v7 = vrot.slane %v506_v61, 5  ;;  %v512_v8 = vrot.slane %v510_v62, 4  ;;  %v516_v9 = vshll.u32 %v471_v63, 16  ;;  %v1025_v10 = vld [vmem:[#allocation2 + $0x14] sm:$0x1] }
  0x31   : > { %v600_v11 = vrot.slane %v599_v0, 4  ;;  %v609_v12 = vor.u32 %v608_v2, %v604_v59  ;;  %v614_v13 = vrot.slane %v612_v3, 5  ;;  %v1057_v14 = vshll.u32 %v1024_v4, 16  ;;  %v1023_v15 = vld [vmem:[#allocation2 + $0xc] sm:$0xf] }
  0x32   : > { %v503_v16 = vor.u32 %v502_v6, %v499_v1  ;;  %v513_v17 = vor.u32 %v512_v8, %v508_v7  ;;  %v518_v18 = vrot.slane %v516_v9, 5  ;;  %v1061_v19 = vshrl.u32 %v1024_v4, 16  ;;  %v1036_v20 = vld [vmem:[#allocation2 + $0x40] sm:$0xf]  ;;  %878 = vrot.lane.b32.xlu1 %v838_v54, %s2874_s10  ;;  %876 = vrot.lane.b32.xlu0 %v835_v49, %s2874_s10  ;;  %v1037_v32 = vld [vmem:[#allocation2 + $0x44] sm:$0x1] }
  0x33   : > { %v605_v21 = vsel %vm3025_vm7, %v600_v11, %v604_v59  ;;  %v610_v22 = vrot.slane %v609_v12, 4  ;;  %v1059_v23 = vrot.slane %v1057_v14, 5  ;;  %v1067_v24 = vshll.u32 %v1025_v10, 16  ;;  %v1035_v34 = vld [vmem:[#allocation2 + $0x3c] sm:$0xf] }
  0x34   : > { %v504_v25 = vrot.slane %v503_v16, 4  ;;  %v514_v26 = vrot.slane %v513_v17, 4  ;;  %v1063_v27 = vrot.slane %v1061_v19, 4  ;;  %v1048_v28 = vshrl.u32 %v1023_v15, 16  ;;  %v1305_v47 = vld [vmem:[#allocation2 + $0x10] sm:$0xf] }
  0x35   : > { %v615_v29 = vsel %vm3025_vm7, %v610_v22, %v614_v13  ;;  %v1051_v31 = vshll.u32 %v1023_v15, 16  ;;  %v1153_v33 = vshll.u32 %v1036_v20, 16  ;;  %v1069_v37 = vrot.slane %v1067_v24, 5  ;;  %v1306_v58 = vld [vmem:[#allocation2 + $0x14] sm:$0x1] }
  0x36   : > { %v509_v35 = vsel %vm3025_vm7, %v504_v25, %v508_v7  ;;  %v1064_v36 = vor.u32 %v1063_v27, %v1059_v23  ;;  %v1050_v38 = vrot.slane %v1048_v28, 4  ;;  %704 = vrot.lane.b32.xlu1 %v605_v21, %s2875_s11  ;;  %v519_v39 = vsel %vm3025_vm7, %v514_v26, %v518_v18  ;;  %v1304_v61 = vld [vmem:[#allocation2 + $0xc] sm:$0xe]  ;;  %v1317_v62 = vld [vmem:[#allocation2 + $0x40] sm:$0xf] }
  0x37   : > { %688 = vrot.lane.b32.xlu0 %v509_v35, %s2875_s11  ;;  %v1053_v40 = vrot.slane %v1051_v31, 5  ;;  %v1155_v41 = vrot.slane %v1153_v33, 5  ;;  %v1157_v42 = vshrl.u32 %v1036_v20, 16  ;;  %v1163_v44 = vshll.u32 %v1037_v32, 16  ;;  %v1572_v0 = vld [vmem:[#allocation2 + $0x1c] sm:$0xf] }
  0x38   : > { %v1065_v43 = vrot.slane %v1064_v36, 4  ;;  %v1144_v45 = vshrl.u32 %v1035_v34, 16  ;;  %v1147_v46 = vshll.u32 %v1035_v34, 16  ;;  %v1354_v54 = vrot.slane %v1305_v47, 5  ;;  %v1571_v3 = vld [vmem:[#allocation2 + $0x18] sm:$0xf] }
  0x39   : > { %v1054_v48 = vor.u32 %v1053_v40, %v1050_v38  ;;  %v1159_v49 = vrot.slane %v1157_v42, 4  ;;  %v1165_v56 = vrot.slane %v1163_v44, 5  ;;  %v1357_v2 = vrot.slane %v1306_v58, 5  ;;  %v1318_v9 = vld [vmem:[#allocation2 + $0x44] sm:$0x1] }
  0x3a   : > { %v1146_v50 = vrot.slane %v1144_v45, 4  ;;  %v1149_v51 = vrot.slane %v1147_v46, 5  ;;  %706 = vrot.lane.b32.xlu1 %v615_v29, %s2875_s11  ;;  %v1070_v55 = vsel %vm3025_vm7, %v1065_v43, %v1069_v37  ;;  %v1356_v1 = vrot.slane %v1354_v54, 4  ;;  %v1316_v10 = vld [vmem:[#allocation2 + $0x3c] sm:$0xe] }
  0x3b   : > { %690 = vrot.lane.b32.xlu0 %v519_v39, %s2875_s11  ;;  %v1055_v52 = vrot.slane %v1054_v48, 4  ;;  %v1160_v53 = vor.u32 %v1159_v49, %v1155_v41  ;;  %v2642_v7 = vrot.slane %v1304_v61, 9  ;;  %v1382_v8 = vrot.slane %v1317_v62, 5  ;;  %v1584_v16 = vld [vmem:[#allocation2 + $0x4c] sm:$0xf] }
  0x3c   : > { %v1150_v57 = vor.u32 %v1149_v51, %v1146_v50  ;;  %v1605_v11 = vshll.u32 %v1572_v0, 16  ;;  %v1609_v12 = vshrl.u32 %v1572_v0, 16  ;;  %v1596_v13 = vshrl.u32 %v1571_v3, 16  ;;  %v1583_v21 = vld [vmem:[#allocation2 + $0x48] sm:$0xf] }
  0x3d   : > { %v1060_v59 = vsel %vm3025_vm7, %v1055_v52, %v1059_v23  ;;  %v1161_v60 = vrot.slane %v1160_v53, 4  ;;  %v1599_v14 = vshll.u32 %v1571_v3, 16  ;;  %v1358_v15 = vsel %vm3007_vm6, %v1356_v1, %v1357_v2  ;;  %v1573_v24 = vld [vmem:[#allocation2 + $0x20] sm:$0x1]  ;;  %v473_v32 = vld [vmem:[#allocation2 + $0x10] sm:$0xf] }
  0x3e   : > { %v1151_v63 = vrot.slane %v1150_v57, 4  ;;  %1241 = vrot.lane.b32.xlu1 %v1070_v55, %s2876_s12  ;;  %v1355_v17 = vsel %vm3007_vm6, %v2642_v7, %v1354_v54  ;;  %v1384_v18 = vrot.slane %v1382_v8, 4  ;;  %v1385_v19 = vrot.slane %v1318_v9, 5  ;;  %v472_v35 = vld [vmem:[#allocation2 + $0xc] sm:$0xf] }
  0x3f   : > { %1239 = vrot.lane.b32.xlu0 %v1060_v59, %s2876_s12  ;;  %v1166_v4 = vsel %vm3025_vm7, %v1161_v60, %v1165_v56  ;;  %v2646_v20 = vrot.slane %v1316_v10, 9  ;;  %v3059_v22 = vrot.slane %v1605_v11, 5  ;;  %v1611_v23 = vrot.slane %v1609_v12, 4  ;;  %v1585_v39 = vld [vmem:[#allocation2 + $0x50] sm:$0x1] }
  0x40   : > { %v1156_v6 = vsel %vm3025_vm7, %v1151_v63, %v1155_v41  ;;  %v1598_v25 = vrot.slane %v1596_v13, 4  ;;  %v1601_v26 = vrot.slane %v1599_v14, 5  ;;  %v1701_v27 = vshll.u32 %v1584_v16, 16  ;;  %v1475_v43 = vld [vmem:[#allocation2 + $0x1c] sm:$0xf] }
  0x41   : > { %v1705_v28 = vshrl.u32 %v1584_v16, 16  ;;  %v1692_v29 = vshrl.u32 %v1583_v21, 16  ;;  %v1695_v31 = vshll.u32 %v1583_v21, 16  ;;  %v1386_v33 = vsel %vm3007_vm6, %v1384_v18, %v1385_v19  ;;  %v1474_v48 = vld [vmem:[#allocation2 + $0x18] sm:$0xf] }
  0x42   : > { %1257 = vrot.lane.b32.xlu1 %v1166_v4, %s2876_s12  ;;  %v1383_v34 = vsel %vm3007_vm6, %v2646_v20, %v1382_v8  ;;  %v1612_v36 = vor.u32 %v1611_v23, %v3059_v22  ;;  %v1615_v37 = vshll.u32 %v1573_v24, 16  ;;  %v1602_v38 = vor.u32 %v1601_v26, %v1598_v25  ;;  %v485_v50 = vld [vmem:[#allocation2 + $0x40] sm:$0xf]  ;;  %v484_v53 = vld [vmem:[#allocation2 + $0x3c] sm:$0xf] }
  0x43   : > { %1255 = vrot.lane.b32.xlu0 %v1156_v6, %s2876_s12  ;;  %v1703_v40 = vrot.slane %v1701_v27, 5  ;;  %v1707_v41 = vrot.slane %v1705_v28, 4  ;;  %v530_v42 = vshll.u32 %v473_v32, 16  ;;  %v1694_v44 = vrot.slane %v1692_v29, 4  ;;  %v1483_v54 = vld [vmem:[#allocation2 + $0x4c] sm:$0xf] }
  0x44   : > { %v1697_v45 = vrot.slane %v1695_v31, 5  ;;  %v534_v46 = vshrl.u32 %v473_v32, 16  ;;  %v521_v47 = vshrl.u32 %v472_v35, 16  ;;  %v524_v49 = vshll.u32 %v472_v35, 16  ;;  %v474_v60 = vld [vmem:[#allocation2 + $0x14] sm:$0x1] }
  0x45   : > { %v1617_v51 = vrot.slane %v1615_v37, 5  ;;  %v1711_v52 = vshll.u32 %v1585_v39, 16  ;;  %v1613_v55 = vrot.slane %v1612_v36, 4  ;;  %v1603_v56 = vrot.slane %v1602_v38, 4  ;;  %v1482_v0 = vld [vmem:[#allocation2 + $0x48] sm:$0xf] }
  0x46   : > { %1410 = vrot.lane.b32.xlu1 %v1358_v15, %s2877_s13  ;;  %v1708_v57 = vor.u32 %v1707_v41, %v1703_v40  ;;  %v532_v58 = vrot.slane %v530_v42, 5  ;;  %v1698_v59 = vor.u32 %v1697_v45, %v1694_v44  ;;  %v536_v61 = vrot.slane %v534_v46, 4  ;;  %v486_v15 = vld [vmem:[#allocation2 + $0x44] sm:$0x1]  ;;  %v757_v27 = vld [vmem:[#allocation2 + $0x10] sm:$0xf] }
  0x47   : > { %1408 = vrot.lane.b32.xlu0 %v1355_v17, %s2877_s13  ;;  %v523_v62 = vrot.slane %v521_v47, 4  ;;  %v626_v63 = vshll.u32 %v485_v50, 16  ;;  %v526_v1 = vrot.slane %v524_v49, 5  ;;  %v630_v2 = vshrl.u32 %v485_v50, 16  ;;  %v769_v31 = vld [vmem:[#allocation2 + $0x40] sm:$0xf] }
  0x48   : > { %v617_v3 = vshrl.u32 %v484_v53, 16  ;;  %v620_v4 = vshll.u32 %v484_v53, 16  ;;  %v1618_v6 = vsel %vm3025_vm7, %v1613_v55, %v1617_v51  ;;  %v1709_v7 = vrot.slane %v1708_v57, 4  ;;  %v758_v36 = vld [vmem:[#allocation2 + $0x14] sm:$0x1] }
  0x49   : > { %v1713_v8 = vrot.slane %v1711_v52, 5  ;;  %v540_v9 = vshll.u32 %v474_v60, 16  ;;  %v1608_v10 = vsel %vm3025_vm7, %v1603_v56, %v3059_v22  ;;  %v1699_v11 = vrot.slane %v1698_v59, 4  ;;  %v756_v37 = vld [vmem:[#allocation2 + $0xc] sm:$0xe] }
  0x4a   : > { %1426 = vrot.lane.b32.xlu1 %v1386_v33, %s2877_s13  ;;  %v537_v12 = vor.u32 %v536_v61, %v532_v58  ;;  %v628_v13 = vrot.slane %v626_v63, 5  ;;  %v527_v14 = vor.u32 %v526_v1, %v523_v62  ;;  %v632_v16 = vrot.slane %v630_v2, 4  ;;  %v768_v41 = vld [vmem:[#allocation2 + $0x3c] sm:$0xe]  ;;  %v1026_v47 = vld [vmem:[#allocation2 + $0x18] sm:$0xf] }
  0x4b   : > { %1424 = vrot.lane.b32.xlu0 %v1383_v34, %s2877_s13  ;;  %v619_v17 = vrot.slane %v617_v3, 4  ;;  %v622_v18 = vrot.slane %v620_v4, 5  ;;  %v1714_v19 = vsel %vm3025_vm7, %v1709_v7, %v1713_v8  ;;  %v1704_v20 = vsel %vm3025_vm7, %v1699_v11, %v1703_v40  ;;  %v770_v40 = vld [vmem:[#allocation2 + $0x44] sm:$0x1]  ;;  %v1027_v46 = vld [vmem:[#allocation2 + $0x1c] sm:$0xf] }
  0x4c   : > { %v542_v21 = vrot.slane %v540_v9, 5  ;;  %v636_v22 = vshll.u32 %v486_v15, 16  ;;  %v538_v23 = vrot.slane %v537_v12, 4  ;;  %v528_v24 = vrot.slane %v527_v14, 4  ;;  %v1039_v57 = vld [vmem:[#allocation2 + $0x4c] sm:$0xf] }
  0x4d   : > { %v633_v25 = vor.u32 %v632_v16, %v628_v13  ;;  %v623_v26 = vor.u32 %v622_v18, %v619_v17  ;;  %v813_v29 = vrot.slane %v757_v27, 5  ;;  %v841_v38 = vrot.slane %v769_v31, 5  ;;  %v1028_v1 = vld [vmem:[#allocation2 + $0x20] sm:$0x1]  ;;  %v929_v7 = vld [vmem:[#allocation2 + $0x1c] sm:$0xf] }
  0x4e   : > { %1508 = vrot.lane.b32.xlu1 %v1475_v43, %s2878_s14  ;;  %v638_v28 = vrot.slane %v636_v22, 5  ;;  %v543_v32 = vsel %vm3025_vm7, %v538_v23, %v542_v21  ;;  %v533_v33 = vsel %vm3025_vm7, %v528_v24, %v532_v58  ;;  %v816_v39 = vrot.slane %v758_v36, 5  ;;  %v1038_v58 = vld [vmem:[#allocation2 + $0x48] sm:$0xf]  ;;  %v445_v8 = vld [vmem:[#allocation2 + $0x30] sm:$0xf] }
  0x4f   : > { %1506 = vrot.lane.b32.xlu0 %v1474_v48, %s2878_s14  ;;  %v634_v34 = vrot.slane %v633_v25, 4  ;;  %v624_v35 = vrot.slane %v623_v26, 4  ;;  %v815_v44 = vrot.slane %v813_v29, 4  ;;  %v2635_v45 = vrot.slane %v756_v37, 9  ;;  %v928_v9 = vld [vmem:[#allocation2 + $0x18] sm:$0xf] }
  0x50   : > { %v843_v48 = vrot.slane %v841_v38, 4  ;;  %v844_v49 = vrot.slane %v770_v40, 5  ;;  %v2639_v50 = vrot.slane %v768_v41, 9  ;;  %v1081_v51 = vshll.u32 %v1027_v46, 16  ;;  %461 = vst.msk [vmem:[#allocation3 + $0x40] sm:$0xf] %vm398_vm0, %v445_v8 }
  0x51   : > { %v639_v42 = vsel %vm3025_vm7, %v634_v34, %v638_v28  ;;  %v629_v43 = vsel %vm3025_vm7, %v624_v35, %v628_v13  ;;  %v1085_v52 = vshrl.u32 %v1027_v46, 16  ;;  %v1072_v53 = vshrl.u32 %v1026_v47, 16  ;;  %v437_v13 = vld [vmem:[#allocation2] sm:$0xf]  ;;  %v1040_v15 = vld [vmem:[#allocation2 + $0x50] sm:$0x1] }
  0x52   : > { %1524 = vrot.lane.b32.xlu1 %v1483_v54, %s2878_s14  ;;  %v817_v54 = vsel %vm3007_vm6, %v815_v44, %v816_v39  ;;  %v814_v55 = vsel %vm3007_vm6, %v2635_v45, %v813_v29  ;;  %v1075_v56 = vshll.u32 %v1026_v47, 16  ;;  %v845_v59 = vsel %vm3007_vm6, %v843_v48, %v844_v49  ;;  %453 = vst.msk [vmem:[#allocation3] sm:$0xf] %vm398_vm0, %v437_v13  ;;  %v937_v21 = vld [vmem:[#allocation2 + $0x4c] sm:$0xf]  ;;  %v2804_v31 = vld [vmem:[%s3787_s2 + $0x38] sm:$0xff]  }
  0x53   : > { %1522 = vrot.lane.b32.xlu0 %v1482_v0, %s2878_s14  ;;  %v842_v60 = vsel %vm3007_vm6, %v2639_v50, %v841_v38  ;;  %v3114_v61 = vrot.slane %v1081_v51, 5  ;;  %v1087_v62 = vrot.slane %v1085_v52, 4  ;;  %v1074_v63 = vrot.slane %v1072_v53, 4  ;;  %v936_v24 = vld [vmem:[#allocation2 + $0x48] sm:$0xf] }
  0x54   : > { %v1177_v0 = vshll.u32 %v1039_v57, 16  ;;  %v1077_v2 = vrot.slane %v1075_v56, 5  ;;  %v1181_v3 = vshrl.u32 %v1039_v57, 16  ;;  %v1168_v4 = vshrl.u32 %v1038_v58, 16  ;;  %v1308_v29 = vld [vmem:[#allocation2 + $0x1c] sm:$0xf] }
  0x55   : > { %v1091_v11 = vshll.u32 %v1028_v1, 16  ;;  %v1187_v23 = vshll.u32 %v1040_v15, 16  ;;  %v1309_v38 = vld [vmem:[#allocation2 + $0x20] sm:$0x1]  ;;  %v2880_v39 = vmov 0   ;;  %v2806_v52 = vld [vmem:[%s3787_s2 + $0x28] sm:$0xff]  }
  0x56   : > { %1789 = vrot.lane.b32.xlu1 %v1618_v6, %s2879_s15  ;;  %v1171_v6 = vshll.u32 %v1038_v58, 16  ;;  %v3123_v12 = vrot.slane %v1177_v0, 5  ;;  %v1078_v14 = vor.u32 %v1077_v2, %v1074_v63  ;;  %v1183_v16 = vrot.slane %v1181_v3, 4  ;;  %2180 = vmatprep.subr.bf16.mxu0 %v2880_v39  ;;  %v1307_v40 = vld [vmem:[#allocation2 + $0x18] sm:$0xe] }
  0x57   : > { %1787 = vrot.lane.b32.xlu0 %v1608_v10, %s2879_s15  ;;  %v1088_v10 = vor.u32 %v1087_v62, %v3114_v61  ;;  %v1170_v17 = vrot.slane %v1168_v4, 4  ;;  %v1093_v22 = vrot.slane %v1091_v11, 5  ;;  %2735 = vmatprep.subr.bf16.mxu1 %v2880_v39  ;;  %v3147_v41 = vld [vmem:[#allocation2 + $0x4c] sm:$0xf]  ;;  %v1364_v45 = vrot.slane %v1309_v38, 5  ;;  %v2807_v4 = vld [vmem:[%s3787_s2 + $0x20] sm:$0xff]  }
  0x58   : > { %v1173_v18 = vrot.slane %v1171_v6, 5  ;;  %v1079_v26 = vrot.slane %v1078_v14, 4  ;;  %v1184_v27 = vor.u32 %v1183_v16, %v3123_v12  ;;  %2181 = vmatpush1.bf16.msra.mxu0 %v2804_v31  ;;  %2744 = vmatpush1.bf16.msra.mxu1 %v2804_v31  ;;  %v1574_v46 = vld [vmem:[#allocation2 + $0x24] sm:$0xf]  ;;  %v2643_v49 = vrot.slane %v1307_v40, 9 }
  0x59   : > { %v1089_v25 = vrot.slane %v1088_v10, 4  ;;  %2182 = vmatprep.subr.bf16.mxu0 %v2880_v39  ;;  %2736 = vmatprep.subr.bf16.mxu1 %v2880_v39  ;;  %v1321_v50 = vld [vmem:[#allocation2 + $0x50] sm:$0x1]  ;;  %v1389_v51 = vrot.slane %v3147_v41, 5  ;;  %v1319_v53 = vld [vmem:[#allocation2 + $0x48] sm:$0xe] }
  0x5a   : > { %1805 = vrot.lane.b32.xlu1 %v1714_v19, %s2879_s15  ;;  %v446_v19 = vld [vmem:[#allocation2 + $0x34] sm:$0xf]  ;;  %v1174_v28 = vor.u32 %v1173_v18, %v1170_v17  ;;  %v1084_v35 = vsel %vm3025_vm7, %v1079_v26, %v3114_v61  ;;  %v1185_v36 = vrot.slane %v1184_v27, 4  ;;  %v425_v56 = vld [vmem:[%s3157_s16 + $0x4] sm:$0xf]  ;;  %v1620_v57 = vshrl.u32 %v1574_v46, 16 }
  0x5b   : > { %1803 = vrot.lane.b32.xlu0 %v1704_v20, %s2879_s15  ;;  %462 = vst.msk [vmem:[#allocation3 + $0x48] sm:$0xf] %vm398_vm0, %v446_v19  ;;  %v438_v20 = vld [vmem:[#allocation2 + $0x4] sm:$0xf]  ;;  %v1094_v34 = vsel %vm3025_vm7, %v1089_v25, %v1093_v22  ;;  %v1623_v58 = vshll.u32 %v1574_v46, 16  ;;  %v1391_v0 = vrot.slane %v1389_v51, 4 }
  0x5c   : > { %454 = vst.msk [vmem:[#allocation3 + $0x8] sm:$0xf] %vm398_vm0, %v438_v20  ;;  %v1175_v37 = vrot.slane %v1174_v28, 4  ;;  %432 = vst.msk [vmem:[#allocation2 + $0x64] sm:$0xf] %vm398_vm0, %v425_v56  ;;  %v1392_v1 = vrot.slane %v1321_v50, 5 }
  0x5d   : > { %v1586_v62 = vld [vmem:[#allocation2 + $0x54] sm:$0xf]  ;;  %v2647_v2 = vrot.slane %v1319_v53, 9  ;;  %v1576_v3 = vld [vmem:[#allocation2 + $0x2c] sm:$0x1]  ;;  %v1622_v11 = vrot.slane %v1620_v57, 4 }
  0x5e   : > { %694 = vrot.lane.b32.xlu1 %v543_v32, %s2875_s11  ;;  %v1189_v32 = vrot.slane %v1187_v23, 5  ;;  %v1180_v48 = vsel %vm3025_vm7, %v1175_v37, %v3123_v12  ;;  %v426_v10 = vld [vmem:[%s3157_s16 + $0x8] sm:$0x1]  ;;  %v1625_v12 = vrot.slane %v1623_v58, 5  ;;  %v1716_v13 = vshrl.u32 %v1586_v62, 16  ;;  %v2808_v25 = vld [vmem:[%s3787_s2 + $0x18] sm:$0xff]  }
  0x5f   : > { %692 = vrot.lane.b32.xlu0 %v533_v33, %s2875_s11  ;;  %v1361_v33 = vrot.slane %v1308_v29, 5  ;;  %v1719_v14 = vshll.u32 %v1586_v62, 16  ;;  %v476_v15 = vld [vmem:[#allocation2 + $0x1c] sm:$0xf]  ;;  %433 = vst.msk [vmem:[#allocation2 + $0x68] sm:$0x1] %vm401_vm1, %v426_v10  ;;  %v1393_v16 = vsel %vm3007_vm6, %v1391_v0, %v1392_v1  ;;  %v1390_v17 = vsel %vm3007_vm6, %v2647_v2, %v1389_v51 }
  0x60   : > { %v1190_v47 = vsel %vm3025_vm7, %v1185_v36, %v1189_v32  ;;  %v1639_v18 = vshll.u32 %v1576_v3, 16  ;;  %v475_v19 = vld [vmem:[#allocation2 + $0x18] sm:$0xf]  ;;  %v440_v20 = vld [vmem:[#allocation2 + $0x10] sm:$0xf]  ;;  %v1626_v26 = vor.u32 %v1625_v12, %v1622_v11  ;;  %v1718_v28 = vrot.slane %v1716_v13, 4 }
  0x61   : > { %v1363_v44 = vrot.slane %v1361_v33, 4  ;;  %v1362_v63 = vsel %vm3007_vm6, %v2643_v49, %v1361_v33  ;;  %456 = vst.msk [vmem:[#allocation3 + $0x18] sm:$0xf] %vm398_vm0, %v440_v20  ;;  %v1588_v27 = vld [vmem:[#allocation2 + $0x5c] sm:$0x1]  ;;  %v1721_v29 = vrot.slane %v1719_v14, 5 }
  0x62   : > { %710 = vrot.lane.b32.xlu1 %v639_v42, %s2875_s11  ;;  %v2805_v42 = vld [vmem:[%s3787_s2 + $0x30] sm:$0xff]   ;;  %v558_v31 = vshrl.u32 %v476_v15, 16  ;;  %v1477_v32 = vld [vmem:[#allocation2 + $0x28] sm:$0xf]  ;;  %v545_v33 = vshrl.u32 %v475_v19, 16  ;;  %v3211_v40 = vrot.slane %v1639_v18, 5 }
  0x63   : > { %708 = vrot.lane.b32.xlu0 %v629_v43, %s2875_s11  ;;  %v1575_v43 = vld [vmem:[#allocation2 + $0x28] sm:$0xf]  ;;  %2183 = vmatpush1.bf16.msra.mxu0 %v2805_v42  ;;  %v1365_v61 = vsel %vm3007_vm6, %v1363_v44, %v1364_v45  ;;  %v1476_v36 = vld [vmem:[#allocation2 + $0x24] sm:$0xf]  ;;  %v488_v37 = vld [vmem:[#allocation2 + $0x4c] sm:$0xf]  ;;  %v1722_v46 = vor.u32 %v1721_v29, %v1718_v28 }
  0x64   : > { %2745 = vmatpush1.bf16.msra.mxu1 %v2805_v42  ;;  %2184 = vmatprep.subr.bf16.mxu0 %v2880_v39  ;;  %v1735_v42 = vshll.u32 %v1588_v27, 16  ;;  %v2809_v44 = vld [vmem:[%s3787_s2 + $0x10] sm:$0xff]   ;;  %v1627_v45 = vrot.slane %v1626_v26, 4  ;;  %v560_v49 = vrot.slane %v558_v31, 4  ;;  %v547_v50 = vrot.slane %v545_v33, 4 }
  0x65   : > { %2737 = vmatprep.subr.bf16.mxu1 %v2880_v39  ;;  %v654_v53 = vshrl.u32 %v488_v37, 16  ;;  %v1484_v56 = vld [vmem:[#allocation2 + $0x54] sm:$0xf]  ;;  %v1853_v62 = vld [vmem:[#allocation2 + $0x1c] sm:$0xf]  ;;  %v1723_v2 = vrot.slane %v1722_v46, 4 }
  0x66   : > { %866 = vrot.lane.b32.xlu1 %v817_v54, %s2874_s10  ;;  %v1629_v54 = vshll.u32 %v1575_v43, 16  ;;  %v1854_v3 = vld [vmem:[#allocation2 + $0x20] sm:$0x1]  ;;  %v1866_v29 = vld [vmem:[#allocation2 + $0x50] sm:$0x1] }
  0x67   : > { %864 = vrot.lane.b32.xlu0 %v814_v55, %s2874_s10  ;;  %v1633_v55 = vshrl.u32 %v1575_v43, 16  ;;  %2185 = vmatpush1.bf16.msra.mxu0 %v2806_v52  ;;  %v487_v43 = vld [vmem:[#allocation2 + $0x48] sm:$0xf]  ;;  %v656_v11 = vrot.slane %v654_v53, 4  ;;  %v1905_v18 = vrot.slane %v1854_v3, 5 }
  0x68   : > { %v3185_v6 = vrot.slane %v1629_v54, 5  ;;  %2746 = vmatpush1.bf16.msra.mxu1 %v2806_v52  ;;  %2186 = vmatprep.subr.bf16.mxu0 %v2880_v39  ;;  %v650_v52 = vshll.u32 %v488_v37, 16  ;;  %v2810_v54 = vld [vmem:[%s3787_s2 + $0x8] sm:$0xff]   ;;  %v641_v57 = vshrl.u32 %v487_v43, 16  ;;  %v644_v58 = vshll.u32 %v487_v43, 16 }
  0x69   : > { %2738 = vmatprep.subr.bf16.mxu1 %v2880_v39  ;;  %v1933_v37 = vrot.slane %v1866_v29, 5  ;;  %v761_v46 = vld [vmem:[#allocation2 + $0x20] sm:$0x1] }
  0x6a   : > { %882 = vrot.lane.b32.xlu1 %v845_v59, %s2874_s10  ;;  %v1587_v59 = vld [vmem:[#allocation2 + $0x58] sm:$0xf]  ;;  %v1632_v0 = vsel %vm3025_vm7, %v1627_v45, %v3185_v6  ;;  %v3240_v10 = vrot.slane %v650_v52, 5  ;;  %v643_v12 = vrot.slane %v641_v57, 4  ;;  %v646_v13 = vrot.slane %v644_v58, 5 }
  0x6b   : > { %880 = vrot.lane.b32.xlu0 %v842_v60, %s2874_s10  ;;  %v424_v60 = vld [vmem:[%s3157_s16] sm:$0xf]  ;;  %v1725_v8 = vshll.u32 %v1587_v59, 16  ;;  %2187 = vmatpush1.bf16.msra.mxu0 %v2807_v4  ;;  %v823_v53 = vrot.slane %v761_v46, 5  ;;  %v773_v57 = vld [vmem:[#allocation2 + $0x50] sm:$0x1] }
  0x6c   : > { %431 = vst.msk [vmem:[#allocation2 + $0x60] sm:$0xf] %vm398_vm0, %v424_v60  ;;  %2747 = vmatpush1.bf16.msra.mxu1 %v2807_v4  ;;  %2188 = vmatprep.subr.bf16.mxu0 %v2880_v39  ;;  %v448_v4 = vld [vmem:[#allocation2 + $0x40] sm:$0xf]  ;;  %v647_v33 = vor.u32 %v646_v13, %v643_v12  ;;  %v1031_v12 = vld [vmem:[#allocation2 + $0x2c] sm:$0x1] }
  0x6d   : > { %v3198_v22 = vrot.slane %v1725_v8, 5  ;;  %2739 = vmatprep.subr.bf16.mxu1 %v2880_v39  ;;  %464 = vst.msk [vmem:[#allocation3 + $0x58] sm:$0xf] %vm398_vm0, %v448_v4  ;;  %v1115_v29 = vshll.u32 %v1031_v12, 16  ;;  %v450_v46 = vld [vmem:[#allocation2 + $0x4c] sm:$0xf] }
  0x6e   : > { %964 = vrot.lane.b32.xlu1 %v929_v7, %s2873_s9  ;;  %v1635_v7 = vrot.slane %v1633_v55, 4  ;;  %v1485_v55 = vld [vmem:[#allocation2 + $0x58] sm:$0xf]  ;;  %v648_v45 = vrot.slane %v647_v33, 4  ;;  %v930_v33 = vld [vmem:[#allocation2 + $0x24] sm:$0xf] }
  0x6f   : > { %962 = vrot.lane.b32.xlu0 %v928_v9, %s2873_s9  ;;  %v1729_v9 = vshrl.u32 %v1587_v59, 16  ;;  %2189 = vmatpush1.bf16.msra.mxu0 %v2808_v25  ;;  %v3226_v59 = vrot.slane %v1735_v42, 5  ;;  %v1728_v26 = vsel %vm3025_vm7, %v1723_v2, %v3198_v22  ;;  %v851_v2 = vrot.slane %v773_v57, 5  ;;  %466 = vst.msk [vmem:[#allocation3 + $0x68] sm:$0xf] %vm398_vm0, %v450_v46 }
  0x70   : > { %2748 = vmatpush1.bf16.msra.mxu1 %v2808_v25  ;;  %2190 = vmatprep.subr.bf16.mxu0 %v2880_v39  ;;  %v1865_v25 = vld [vmem:[#allocation2 + $0x4c] sm:$0xf] }
  0x71   : > { %v1731_v23 = vrot.slane %v1729_v9, 4  ;;  %2740 = vmatprep.subr.bf16.mxu1 %v2880_v39  ;;  %v489_v9 = vld [vmem:[#allocation2 + $0x50] sm:$0x1] }
  0x72   : > { %980 = vrot.lane.b32.xlu1 %v937_v21, %s2873_s9  ;;  %v1636_v21 = vor.u32 %v1635_v7, %v3185_v6  ;;  %v447_v6 = vld [vmem:[#allocation2 + $0x3c] sm:$0xf]  ;;  %v660_v20 = vshll.u32 %v489_v9, 16  ;;  %v1042_v9 = vld [vmem:[#allocation2 + $0x58] sm:$0xf] }
  0x73   : > { %978 = vrot.lane.b32.xlu0 %v936_v24, %s2873_s9  ;;  %v554_v24 = vshll.u32 %v476_v15, 16  ;;  %v1732_v41 = vor.u32 %v1731_v23, %v3198_v22  ;;  %2191 = vmatpush1.bf16.msra.mxu0 %v2809_v44  ;;  %v1902_v15 = vrot.slane %v1853_v62, 5  ;;  %463 = vst.msk [vmem:[#allocation3 + $0x50] sm:$0xf] %vm398_vm0, %v447_v6  ;;  %v2812_v22 = vld [vmem:[%s3787_s2 + $0x40] sm:$0xff]  }
  0x74   : > { %v3209_v38 = vrot.slane %v1636_v21, 4  ;;  %2749 = vmatpush1.bf16.msra.mxu1 %v2809_v44  ;;  %2192 = vmatprep.subr.bf16.mxu0 %v2880_v39  ;;  %v662_v42 = vrot.slane %v660_v20, 5  ;;  %v1205_v20 = vshrl.u32 %v1042_v9, 16 }
  0x75   : > { %v1733_v1 = vrot.slane %v1732_v41, 4  ;;  %2741 = vmatprep.subr.bf16.mxu1 %v2880_v39  ;;  %v1904_v23 = vrot.slane %v1902_v15, 4 }
  0x76   : > { %1245 = vrot.lane.b32.xlu1 %v1094_v34, %s2876_s12  ;;  %v548_v34 = vshll.u32 %v475_v19, 16 }
  0x77   : > { %1243 = vrot.lane.b32.xlu0 %v1084_v35, %s2876_s12  ;;  %v439_v35 = vld [vmem:[#allocation2 + $0xc] sm:$0xf]  ;;  %2193 = vmatpush1.bf16.msra.mxu0 %v2810_v54  ;;  %v1738_v19 = vsel %vm3025_vm7, %v1733_v1, %v3226_v59 }
  0x78   : > { %455 = vst.msk [vmem:[#allocation3 + $0x10] sm:$0xf] %vm398_vm0, %v439_v35  ;;  %v550_v51 = vrot.slane %v548_v34, 5  ;;  %2750 = vmatpush1.bf16.msra.mxu1 %v2810_v54  ;;  %2194 = vmatprep.subr.bf16.mxu0 %v2880_v39  ;;  %v760_v34 = vld [vmem:[#allocation2 + $0x1c] sm:$0xf]  ;;  %v1906_v35 = vsel %vm3007_vm6, %v1904_v23, %v1905_v18 }
  0x79   : > { %2742 = vmatprep.subr.bf16.mxu1 %v2880_v39  ;;  %1973 = vst.msk [vmem:[#allocation3 + $0xc] sm:$0xf] %vm398_vm0, %v1906_v35  ;;  %v820_v43 = vrot.slane %v760_v34, 5  ;;  %v427_v18 = vld [vmem:[%s3157_s16 + $0xc] sm:$0xf] }
  0x7a   : > { %1261 = vrot.lane.b32.xlu1 %v1190_v47, %s2876_s12  ;;  %v477_v47 = vld [vmem:[#allocation2 + $0x20] sm:$0x1]  ;;  %v551_v8 = vor.u32 %v550_v51, %v547_v50  ;;  %v772_v50 = vld [vmem:[#allocation2 + $0x4c] sm:$0xf]  ;;  %v1030_v51 = vld [vmem:[#allocation2 + $0x28] sm:$0xf] }
  0x7b   : > { %1259 = vrot.lane.b32.xlu0 %v1180_v48, %s2876_s12  ;;  %v3217_v48 = vrot.slane %v554_v24, 5  ;;  %v564_v60 = vshll.u32 %v477_v47, 16  ;;  %v1864_v24 = vld [vmem:[#allocation2 + $0x48] sm:$0xe]  ;;  %v822_v52 = vrot.slane %v820_v43, 4  ;;  %v848_v58 = vrot.slane %v772_v50, 5 }
  0x7c   : > { %v552_v28 = vrot.slane %v551_v8, 4  ;;  %v2654_v31 = vrot.slane %v1864_v24, 9  ;;  %v1105_v62 = vshll.u32 %v1030_v51, 16  ;;  %434 = vst.msk [vmem:[#allocation2 + $0x6c] sm:$0xf] %vm398_vm0, %v427_v18 }
  0x7d   : > { %v561_v7 = vor.u32 %v560_v49, %v3217_v48  ;;  %v759_v49 = vld [vmem:[#allocation2 + $0x18] sm:$0xe]  ;;  %v824_v3 = vsel %vm3007_vm6, %v822_v52, %v823_v53  ;;  %v1867_v52 = vld [vmem:[#allocation2 + $0x54] sm:$0xe] }
  0x7e   : > { %1414 = vrot.lane.b32.xlu1 %v1365_v61, %s2877_s13  ;;  %v1852_v61 = vld [vmem:[#allocation2 + $0x18] sm:$0xe]  ;;  %v557_v44 = vsel %vm3025_vm7, %v552_v28, %v3217_v48  ;;  %v1029_v48 = vld [vmem:[#allocation2 + $0x24] sm:$0xf]  ;;  %v3303_v13 = vrot.slane %v1105_v62, 5 }
  0x7f   : > { %1412 = vrot.lane.b32.xlu0 %v1362_v63, %s2877_s13  ;;  %v1642_v63 = vsel %vm3025_vm7, %v3209_v38, %v3211_v40  ;;  %v2650_v14 = vrot.slane %v1852_v61, 9  ;;  %v562_v27 = vrot.slane %v561_v7, 4  ;;  %v771_v61 = vld [vmem:[#allocation2 + $0x48] sm:$0xe]  ;;  %v1099_v1 = vshll.u32 %v1029_v48, 16 }
  0x80   : > { %v850_v7 = vrot.slane %v848_v58, 4  ;;  %v2640_v8 = vrot.slane %v771_v61, 9  ;;  %v939_v61 = vld [vmem:[#allocation2 + $0x58] sm:$0xf]  ;;  %v938_v62 = vld [vmem:[#allocation2 + $0x54] sm:$0xf] }
  0x81   : > { %v1903_v21 = vsel %vm3007_vm6, %v2650_v14, %v1902_v15 }
  0x82   : > { %1430 = vrot.lane.b32.xlu1 %v1393_v16, %s2877_s13  ;;  %v566_v16 = vrot.slane %v564_v60, 5  ;;  %1972 = vst.msk [vmem:[#allocation3 + $0x4] sm:$0xf] %vm398_vm0, %v1903_v21  ;;  %v852_v23 = vsel %vm3007_vm6, %v850_v7, %v851_v2  ;;  %v849_v24 = vsel %vm3007_vm6, %v2640_v8, %v848_v58  ;;  %v3332_v58 = vld [vmem:[#allocation2 + $0x28] sm:$0xf] }
  0x83   : > { %1428 = vrot.lane.b32.xlu0 %v1390_v17, %s2877_s13  ;;  %v2811_v17 = vld [vmem:[%s3787_s2] sm:$0xff]   ;;  %v1868_v7 = vld [vmem:[#allocation2 + $0x58] sm:$0xf]  ;;  %v1869_v8 = vld [vmem:[#allocation2 + $0x5c] sm:$0x1] }
  0x84   : > { %2195 = vmatpush1.bf16.msra.mxu0 %v2811_v17  ;;  %2751 = vmatpush1.bf16.msra.mxu1 %v2811_v17  ;;  %v567_v41 = vsel %vm3025_vm7, %v562_v27, %v566_v16  ;;  %v1101_v16 = vrot.slane %v1099_v1, 5  ;;  %v428_v17 = vld [vmem:[%s3157_s16 + $0x10] sm:$0xf]  ;;  %v2655_v1 = vrot.slane %v1867_v52, 9 }
  0x85   : > { %2210 = vmatprep.subr.bf16.mxu0 %v2880_v39  ;;  %2743 = vmatprep.subr.bf16.mxu1 %v2880_v39  ;;  %435 = vst.msk [vmem:[#allocation2 + $0x70] sm:$0xf] %vm398_vm0, %v428_v17 }
  0x86   : > { %1512 = vrot.lane.b32.xlu1 %v1477_v32, %s2878_s14  ;;  %v657_v32 = vor.u32 %v656_v11, %v3240_v10 }
  0x87   : > { %1510 = vrot.lane.b32.xlu0 %v1476_v36, %s2878_s14  ;;  %v1930_v36 = vrot.slane %v1865_v25, 5 }
  0x88   : > { %v658_v39 = vrot.slane %v657_v32, 4  ;;  %2211 = vmatpush2.bf16.msra.mxu0 %v2812_v22  ;;  %2752 = vmatpush2.bf16.msra.mxu1 %v2812_v22  ;;  %v931_v32 = vld [vmem:[#allocation2 + $0x28] sm:$0xf]  ;;  %v441_v22 = vld [vmem:[#allocation2 + $0x18] sm:$0xf] }
  0x89   : > { %v1931_v38 = vsel %vm3007_vm6, %v2654_v31, %v1930_v36  ;;  %v1932_v40 = vrot.slane %v1930_v36, 4  ;;  %v442_v31 = vld [vmem:[#allocation2 + $0x1c] sm:$0xf]  ;;  %457 = vst.msk [vmem:[#allocation3 + $0x20] sm:$0xf] %vm398_vm0, %v441_v22 }
  0x8a   : > { %1528 = vrot.lane.b32.xlu1 %v1485_v55, %s2878_s14  ;;  %1980 = vst.msk [vmem:[#allocation3 + $0x44] sm:$0xf] %vm398_vm0, %v1931_v38  ;;  %v663_v54 = vsel %vm3025_vm7, %v658_v39, %v662_v42  ;;  %v653_v55 = vsel %vm3025_vm7, %v648_v45, %v3240_v10  ;;  %v1041_v10 = vld [vmem:[#allocation2 + $0x54] sm:$0xf]  ;;  %v1043_v36 = vld [vmem:[#allocation2 + $0x5c] sm:$0x1] }
  0x8b   : > { %1526 = vrot.lane.b32.xlu0 %v1484_v56, %s2878_s14  ;;  %v1934_v47 = vsel %vm3007_vm6, %v1932_v40, %v1933_v37  ;;  %v2636_v56 = vrot.slane %v759_v49, 9  ;;  %v1192_v21 = vshrl.u32 %v1041_v10, 16  ;;  %v1195_v25 = vshll.u32 %v1041_v10, 16  ;;  %458 = vst.msk [vmem:[#allocation3 + $0x28] sm:$0xf] %vm398_vm0, %v442_v31 }
  0x8c   : > { %1981 = vst.msk [vmem:[#allocation3 + $0x4c] sm:$0xf] %vm398_vm0, %v1934_v47  ;;  %v1855_v37 = vld [vmem:[#allocation2 + $0x24] sm:$0xe]  ;;  %v1207_v40 = vrot.slane %v1205_v20, 4  ;;  %v1211_v57 = vshll.u32 %v1043_v36, 16 }
  0x8d   : > { %v821_v4 = vsel %vm3007_vm6, %v2636_v56, %v820_v43  ;;  %v1856_v42 = vld [vmem:[#allocation2 + $0x28] sm:$0xf]  ;;  %v2651_v43 = vrot.slane %v1855_v37, 9  ;;  %v1857_v39 = vld [vmem:[#allocation2 + $0x2c] sm:$0x1]  ;;  %v1937_v10 = vrot.slane %v1868_v7, 5 }
  0x8e   : > { %1793 = vrot.lane.b32.xlu1 %v1642_v63, %s2879_s15  ;;  %v1109_v63 = vshrl.u32 %v1030_v51, 16  ;;  %v1909_v45 = vrot.slane %v1856_v42, 5  ;;  %v1912_v50 = vrot.slane %v1857_v39, 5  ;;  %v449_v51 = vld [vmem:[#allocation2 + $0x48] sm:$0xf] }
  0x8f   : > { %1791 = vrot.lane.b32.xlu0 %v1632_v0, %s2879_s15  ;;  %v1096_v0 = vshrl.u32 %v1029_v48, 16  ;;  %465 = vst.msk [vmem:[#allocation3 + $0x60] sm:$0xf] %vm398_vm0, %v449_v51  ;;  %v1938_v20 = vsel %vm3007_vm6, %v2655_v1, %v1937_v10  ;;  %v3380_v37 = vld [vmem:[#allocation2 + $0x38] sm:$0x1] }
  0x90   : > { %v1111_v14 = vrot.slane %v1109_v63, 4  ;;  %v1910_v53 = vsel %vm3007_vm6, %v2651_v43, %v1909_v45  ;;  %v1911_v48 = vrot.slane %v1909_v45, 4  ;;  %1982 = vst.msk [vmem:[#allocation3 + $0x54] sm:$0xf] %vm398_vm0, %v1938_v20  ;;  %v3386_v39 = vld [vmem:[#allocation2 + $0x28] sm:$0xf] }
  0x91   : > { %v1098_v15 = vrot.slane %v1096_v0, 4  ;;  %1974 = vst.msk [vmem:[#allocation3 + $0x14] sm:$0xf] %vm398_vm0, %v1910_v53  ;;  %v1479_v20 = vld [vmem:[#allocation2 + $0x34] sm:$0xf] }
  0x92   : > { %1809 = vrot.lane.b32.xlu1 %v1738_v19, %s2879_s15  ;;  %v1201_v19 = vshll.u32 %v1042_v9, 16  ;;  %v1112_v34 = vor.u32 %v1111_v14, %v3303_v13  ;;  %v1368_v9 = vrot.slane %v3332_v58, 5  ;;  %v582_v58 = vshrl.u32 %v3386_v39, 16 }
  0x93   : > { %1807 = vrot.lane.b32.xlu0 %v1728_v26, %s2879_s15  ;;  %v429_v26 = vld [vmem:[%s3157_s16 + $0x14] sm:$0x1]  ;;  %v1102_v35 = vor.u32 %v1101_v16, %v1098_v15  ;;  %v1213_v15 = vrot.slane %v1211_v57, 5  ;;  %v1940_v16 = vrot.slane %v1869_v8, 5  ;;  %v578_v57 = vshll.u32 %v3386_v39, 16 }
  0x94   : > { %436 = vst.msk [vmem:[#allocation2 + $0x74] sm:$0x1] %vm401_vm1, %v429_v26  ;;  %v3323_v38 = vrot.slane %v1201_v19, 5  ;;  %v3355_v19 = vld [vmem:[#allocation2 + $0x58] sm:$0xf]  ;;  %vm2421_vm1 = vcmask 60416  }
  0x95   : > { %v1103_v56 = vrot.slane %v1102_v35, 4  ;;  %v1396_v31 = vrot.slane %v3355_v19, 5  ;;  %v1322_v35 = vld [vmem:[#allocation2 + $0x54] sm:$0xe]  ;;  %v1871_v19 = vld [vmem:[#allocation2 + $0x64] sm:$0xf] }
  0x96   : > { %698 = vrot.lane.b32.xlu1 %v567_v41, %s2875_s11  ;;  %v1194_v41 = vrot.slane %v1192_v21, 4  ;;  %v1208_v63 = vor.u32 %v1207_v40, %v3323_v38  ;;  %v1939_v21 = vrot.slane %v1937_v10, 4  ;;  %v2648_v43 = vrot.slane %v1322_v35, 9 }
  0x97   : > { %696 = vrot.lane.b32.xlu0 %v557_v44, %s2875_s11  ;;  %v1197_v44 = vrot.slane %v1195_v25, 5  ;;  %v1108_v14 = vsel %vm3025_vm7, %v1103_v56, %v3303_v13  ;;  %v1312_v25 = vld [vmem:[#allocation2 + $0x2c] sm:$0x1]  ;;  %v1310_v13 = vld [vmem:[#allocation2 + $0x24] sm:$0xe] }
  0x98   : > { %v3289_v59 = vpop.permute.xlu1 %960  ;;  %v3291_v60 = vpop.permute.xlu0 %958  ;;  %v1209_v17 = vrot.slane %v1208_v63, 4  ;;  %v1941_v26 = vsel %vm3007_vm6, %v1939_v21, %v1940_v16  ;;  %v1478_v21 = vld [vmem:[#allocation2 + $0x30] sm:$0xf] }
  0x99   : > { %v1198_v0 = vor.u32 %v1197_v44, %v1194_v41  ;;  %1983 = vst.msk [vmem:[#allocation3 + $0x5c] sm:$0xf] %vm398_vm0, %v1941_v26  ;;  %v1590_v44 = vld [vmem:[#allocation2 + $0x64] sm:$0xf] }
  0x9a   : > { %714 = vrot.lane.b32.xlu1 %v663_v54, %s2875_s11  ;;  %v1113_v54 = vrot.slane %v1112_v34, 4  ;;  %v2644_v34 = vrot.slane %v1310_v13, 9  ;;  %v1749_v56 = vshll.u32 %v1590_v44, 16  ;;  %v1753_v1 = vshrl.u32 %v1590_v44, 16 }
  0x9b   : > { %712 = vrot.lane.b32.xlu0 %v653_v55, %s2875_s11  ;;  %v1117_v55 = vrot.slane %v1115_v29, 5  ;;  %v1199_v18 = vrot.slane %v1198_v0, 4  ;;  %v1324_v29 = vld [vmem:[#allocation2 + $0x5c] sm:$0x1]  ;;  %v1397_v0 = vsel %vm3007_vm6, %v2648_v43, %v1396_v31  ;;  %v444_v43 = vld [vmem:[#allocation2 + $0x28] sm:$0xf] }
  0x9c   : > { %v3299_v11 = vpop.permute.xlu1 %976  ;;  %v3301_v6 = vpop.permute.xlu0 %974  ;;  %v1369_v46 = vsel %vm3007_vm6, %v2644_v34, %v1368_v9  ;;  %460 = vst.msk [vmem:[#allocation3 + $0x38] sm:$0xf] %vm398_vm0, %v444_v43 }
  0x9d   : > { %v1118_v12 = vsel %vm3025_vm7, %v1113_v54, %v1117_v55  ;;  %v1859_v55 = vld [vmem:[#allocation2 + $0x34] sm:$0xf] }
  0x9e   : > { %870 = vrot.lane.b32.xlu1 %v824_v3, %s2874_s10 }
  0x9f   : > { %868 = vrot.lane.b32.xlu0 %v821_v4, %s2874_s10  ;;  %v1913_v4 = vsel %vm3007_vm6, %v1911_v48, %v1912_v50 }
  0xa0   : > { %v3316_v27 = vpop.permute.xlu1 %862  ;;  %v861_v28 = vpop.permute.xlu0 %860  ;;  %1975 = vst.msk [vmem:[#allocation3 + $0x1c] sm:$0xf] %vm398_vm0, %v1913_v4  ;;  %v1860_v4 = vld [vmem:[#allocation2 + $0x38] sm:$0x1] }
  0xa1   : > { %v1919_v10 = vrot.slane %v1860_v4, 5 }
  0xa2   : > { %886 = vrot.lane.b32.xlu1 %v852_v23, %s2874_s10 }
  0xa3   : > { %884 = vrot.lane.b32.xlu0 %v849_v24, %s2874_s10 }
  0xa4   : > { %v879_v47 = vpop.permute.xlu1 %878  ;;  %v877_v49 = vpop.permute.xlu0 %876 }
  0xa6   : > { %968 = vrot.lane.b32.xlu1 %v931_v32, %s2873_s9  ;;  %v1204_v32 = vsel %vm3025_vm7, %v1199_v18, %v3323_v38  ;;  %v1398_v38 = vrot.slane %v1396_v31, 4 }
  0xa7   : > { %966 = vrot.lane.b32.xlu0 %v930_v33, %s2873_s9  ;;  %v1371_v33 = vrot.slane %v1312_v25, 5 }
  0xa8   : > { %v705_v2 = vpop.permute.xlu1 %704 }
  0xa9   : > { %v689_v3 = vpop.permute.xlu0 %688  ;;  %745 = vst.msk [vmem:[#allocation3 + $0x40] sm:$0xf] %vm736_vm8, %v705_v2 }
  0xaa   : > { %737 = vst.msk [vmem:[#allocation3] sm:$0xf] %vm736_vm8, %v689_v3  ;;  %984 = vrot.lane.b32.xlu1 %v939_v61, %s2873_s9  ;;  %v3399_v61 = vld [vmem:[#allocation2 + $0x24] sm:$0xf]  ;;  %v1858_v3 = vld [vmem:[#allocation2 + $0x30] sm:$0xe] }
  0xab   : > { %917 = vst.msk [vmem:[#allocation3 + $0x40] sm:$0xf] %vm908_vm9, %v877_v49  ;;  %909 = vst.msk [vmem:[#allocation3] sm:$0xf] %vm908_vm9, %v861_v28  ;;  %982 = vrot.lane.b32.xlu0 %v938_v62, %s2873_s9  ;;  %v1370_v28 = vrot.slane %v1368_v9, 4  ;;  %v1916_v62 = vrot.slane %v1859_v55, 5 }
  0xac   : > { %1007 = vst.msk [vmem:[#allocation3] sm:$0xf] %vm1006_vm10, %v3291_v60  ;;  %1015 = vst.msk [vmem:[#allocation3 + $0x40] sm:$0xf] %vm1006_vm10, %v3301_v6  ;;  %v707_v23 = vpop.permute.xlu1 %706  ;;  %v1578_v60 = vld [vmem:[#allocation2 + $0x34] sm:$0xf] }
  0xad   : > { %v691_v24 = vpop.permute.xlu0 %690  ;;  %746 = vst.msk [vmem:[#allocation3 + $0x48] sm:$0xf] %vm736_vm8, %v707_v23  ;;  %v1577_v6 = vld [vmem:[#allocation2 + $0x30] sm:$0xf]  ;;  %v1653_v40 = vshll.u32 %v1578_v60, 16  ;;  %v1657_v41 = vshrl.u32 %v1578_v60, 16  ;;  %v1372_v45 = vsel %vm3007_vm6, %v1370_v28, %v1371_v33 }
  0xae   : > { %738 = vst.msk [vmem:[#allocation3 + $0x8] sm:$0xf] %vm736_vm8, %v691_v24  ;;  %1249 = vrot.lane.b32.xlu1 %v1118_v12, %s2876_s12  ;;  %v1647_v42 = vshll.u32 %v1577_v6, 16  ;;  %v1589_v49 = vld [vmem:[#allocation2 + $0x60] sm:$0xf]  ;;  %v2652_v8 = vrot.slane %v1858_v3, 9 }
  0xaf   : > { %918 = vst.msk [vmem:[#allocation3 + $0x48] sm:$0xf] %vm908_vm9, %v879_v47  ;;  %910 = vst.msk [vmem:[#allocation3 + $0x8] sm:$0xf] %vm908_vm9, %v3316_v27  ;;  %1247 = vrot.lane.b32.xlu0 %v1108_v14, %s2876_s12  ;;  %v1214_v27 = vsel %vm3025_vm7, %v1209_v17, %v1213_v15  ;;  %v1663_v47 = vshll.u32 %v3380_v37, 16  ;;  %v3393_v52 = vrot.slane %v1653_v40, 5 }
  0xb0   : > { %1008 = vst.msk [vmem:[#allocation3 + $0x8] sm:$0xf] %vm1006_vm10, %v3289_v59  ;;  %1016 = vst.msk [vmem:[#allocation3 + $0x48] sm:$0xf] %vm1006_vm10, %v3299_v11  ;;  %v1242_v36 = vpop.permute.xlu1 %1241  ;;  %v1644_v59 = vshrl.u32 %v1577_v6, 16  ;;  %v1399_v11 = vrot.slane %v1324_v29, 5  ;;  %v1917_v25 = vsel %vm3007_vm6, %v2652_v8, %v1916_v62 }
  0xb1   : > { %v1240_v22 = vpop.permute.xlu0 %1239  ;;  %1289 = vst.msk [vmem:[#allocation3 + $0x8] sm:$0xf] %vm1287_vm11, %v1242_v36  ;;  %v1659_v53 = vrot.slane %v1657_v41, 4  ;;  %v1649_v54 = vrot.slane %v1647_v42, 5  ;;  %v1740_v2 = vshrl.u32 %v1589_v49, 16  ;;  %v1743_v7 = vshll.u32 %v1589_v49, 16 }
  0xb2   : > { %1288 = vst.msk [vmem:[#allocation3] sm:$0xf] %vm1287_vm11, %v1240_v22  ;;  %1265 = vrot.lane.b32.xlu1 %v1214_v27, %s2876_s12  ;;  %v1646_v48 = vrot.slane %v1644_v59, 4  ;;  %v1400_v63 = vsel %vm3007_vm6, %v1398_v38, %v1399_v11  ;;  %v1918_v9 = vrot.slane %v1916_v62, 4  ;;  %v569_v17 = vshrl.u32 %v3399_v61, 16 }
  0xb3   : > { %1263 = vrot.lane.b32.xlu0 %v1204_v32, %s2876_s12  ;;  %v1660_v15 = vor.u32 %v1659_v53, %v3393_v52  ;;  %v572_v18 = vshll.u32 %v3399_v61, 16  ;;  %v1591_v23 = vld [vmem:[#allocation2 + $0x68] sm:$0x1]  ;;  %v3412_v24 = vrot.slane %v1749_v56, 5  ;;  %v1944_v60 = vrot.slane %v1871_v19, 5 }
  0xb4   : > { %v1258_v50 = vpop.permute.xlu1 %1257  ;;  %v1650_v16 = vor.u32 %v1649_v54, %v1646_v48  ;;  %v1920_v13 = vsel %vm3007_vm6, %v1918_v9, %v1919_v10  ;;  %v1755_v6 = vrot.slane %v1753_v1, 4  ;;  %v1742_v26 = vrot.slane %v1740_v2, 4  ;;  %1976 = vst.msk [vmem:[#allocation3 + $0x24] sm:$0xf] %vm398_vm0, %v1917_v25  ;;  %v1870_v28 = vld [vmem:[#allocation2 + $0x60] sm:$0xe] }
  0xb5   : > { %v1256_v51 = vpop.permute.xlu0 %1255  ;;  %1297 = vst.msk [vmem:[#allocation3 + $0x48] sm:$0xf] %vm1287_vm11, %v1258_v50  ;;  %v1872_v29 = vld [vmem:[#allocation2 + $0x68] sm:$0x1]  ;;  %v1745_v31 = vrot.slane %v1743_v7, 5  ;;  %v2656_v32 = vrot.slane %v1870_v28, 9 }
  0xb6   : > { %1296 = vst.msk [vmem:[#allocation3 + $0x40] sm:$0xf] %vm1287_vm11, %v1256_v51  ;;  %1418 = vrot.lane.b32.xlu1 %v1372_v45, %s2877_s13  ;;  %v491_v27 = vld [vmem:[#allocation2 + $0x58] sm:$0xf]  ;;  %v1946_v33 = vrot.slane %v1944_v60, 4  ;;  %v1947_v34 = vrot.slane %v1872_v29, 5 }
  0xb7   : > { %1416 = vrot.lane.b32.xlu0 %v1369_v46, %s2877_s13  ;;  %1977 = vst.msk [vmem:[#allocation3 + $0x2c] sm:$0xf] %vm398_vm0, %v1920_v13  ;;  %v1661_v22 = vrot.slane %v1660_v15, 4  ;;  %v1665_v37 = vrot.slane %v1663_v47, 5  ;;  %v3422_v40 = vrot.slane %v578_v57, 5  ;;  %v584_v41 = vrot.slane %v582_v58, 4 }
  0xb8   : > { %v1411_v12 = vpop.permute.xlu1 %1410  ;;  %v490_v59 = vld [vmem:[#allocation2 + $0x54] sm:$0xf]  ;;  %v1651_v42 = vrot.slane %v1650_v16, 4  ;;  %v480_v11 = vld [vmem:[#allocation2 + $0x2c] sm:$0x1]  ;;  %v571_v38 = vrot.slane %v569_v17, 4  ;;  %v1945_v44 = vsel %vm3007_vm6, %v2656_v32, %v1944_v60  ;;  %v1948_v39 = vsel %vm3007_vm6, %v1946_v33, %v1947_v34 }
  0xb9   : > { %v1409_v14 = vpop.permute.xlu0 %1408  ;;  %1458 = vst.msk [vmem:[#allocation3 + $0x8] sm:$0xf] %vm1456_vm12, %v1411_v12  ;;  %v1487_v45 = vld [vmem:[#allocation2 + $0x64] sm:$0xf]  ;;  %v1756_v46 = vor.u32 %v1755_v6, %v3412_v24  ;;  %v1759_v47 = vshll.u32 %v1591_v23, 16  ;;  %v574_v49 = vrot.slane %v572_v18, 5  ;;  %v1746_v53 = vor.u32 %v1745_v31, %v1742_v26 }
  0xba   : > { %1457 = vst.msk [vmem:[#allocation3] sm:$0xf] %vm1456_vm12, %v1409_v14  ;;  %1434 = vrot.lane.b32.xlu1 %v1400_v63, %s2877_s13  ;;  %v674_v50 = vshll.u32 %v491_v27, 16  ;;  %v1486_v51 = vld [vmem:[#allocation2 + $0x60] sm:$0xf]  ;;  %v678_v48 = vshrl.u32 %v491_v27, 16  ;;  %v1666_v61 = vsel %vm3025_vm7, %v1661_v22, %v1665_v37  ;;  %v1656_v62 = vsel %vm3025_vm7, %v1651_v42, %v3393_v52 }
  0xbb   : > { %1432 = vrot.lane.b32.xlu0 %v1397_v0, %s2877_s13  ;;  %1984 = vst.msk [vmem:[#allocation3 + $0x64] sm:$0xf] %vm398_vm0, %v1945_v44  ;;  %1985 = vst.msk [vmem:[#allocation3 + $0x6c] sm:$0xf] %vm398_vm0, %v1948_v39  ;;  %v665_v54 = vshrl.u32 %v490_v59, 16  ;;  %v668_v55 = vshll.u32 %v490_v59, 16  ;;  %v585_v63 = vor.u32 %v584_v41, %v3422_v40  ;;  %v575_v3 = vor.u32 %v574_v49, %v571_v38 }
  0xbc   : > { %v1427_v35 = vpop.permute.xlu1 %1426  ;;  %v443_v58 = vld [vmem:[#allocation2 + $0x24] sm:$0xf]  ;;  %v588_v0 = vshll.u32 %v480_v11, 16  ;;  %v1757_v1 = vrot.slane %v1756_v46, 4  ;;  %v1761_v2 = vrot.slane %v1759_v47, 5  ;;  %v3447_v4 = vrot.slane %v674_v50, 5 }
  0xbd   : > { %v1425_v36 = vpop.permute.xlu0 %1424  ;;  %1466 = vst.msk [vmem:[#allocation3 + $0x48] sm:$0xf] %vm1456_vm12, %v1427_v35  ;;  %v452_v7 = vld [vmem:[#allocation2 + $0x58] sm:$0xf]  ;;  %v1747_v8 = vrot.slane %v1746_v53, 4  ;;  %v680_v10 = vrot.slane %v678_v48, 4 }
  0xbe   : > { %1465 = vst.msk [vmem:[#allocation3 + $0x40] sm:$0xf] %vm1456_vm12, %v1425_v36  ;;  %1516 = vrot.lane.b32.xlu1 %v1479_v20, %s2878_s14  ;;  %v492_v9 = vld [vmem:[#allocation2 + $0x5c] sm:$0x1]  ;;  %v667_v12 = vrot.slane %v665_v54, 4  ;;  %v670_v52 = vrot.slane %v668_v55, 5 }
  0xbf   : > { %1514 = vrot.lane.b32.xlu0 %v1478_v21, %s2878_s14  ;;  %459 = vst.msk [vmem:[#allocation3 + $0x30] sm:$0xf] %vm398_vm0, %v443_v58  ;;  %468 = vst.msk [vmem:[#allocation3 + $0x78] sm:$0xf] %vm398_vm0, %v452_v7  ;;  %v451_v16 = vld [vmem:[#allocation2 + $0x54] sm:$0xf]  ;;  %v1762_v21 = vsel %vm3025_vm7, %v1757_v1, %v1761_v2  ;;  %v1752_v23 = vsel %vm3025_vm7, %v1747_v8, %v3412_v24  ;;  %v681_v25 = vor.u32 %v680_v10, %v3447_v4 }
  0xc0   : > { %v1509_v56 = vpop.permute.xlu1 %1508  ;;  %467 = vst.msk [vmem:[#allocation3 + $0x70] sm:$0xf] %vm398_vm0, %v451_v16  ;;  %v586_v17 = vrot.slane %v585_v63, 4  ;;  %v590_v18 = vrot.slane %v588_v0, 5  ;;  %v576_v19 = vrot.slane %v575_v3, 4  ;;  %v684_v20 = vshll.u32 %v492_v9, 16 }
  0xc1   : > { %v1507_v57 = vpop.permute.xlu0 %1506  ;;  %1556 = vst.msk [vmem:[#allocation3 + $0x8] sm:$0xf] %vm1554_vm13, %v1509_v56  ;;  %v671_v13 = vor.u32 %v670_v52, %v667_v12  ;;  %v763_v60 = vld [vmem:[#allocation2 + $0x28] sm:$0xf]  ;;  %v775_v31 = vld [vmem:[#allocation2 + $0x58] sm:$0xf] }
  0xc2   : > { %1555 = vst.msk [vmem:[#allocation3] sm:$0xf] %vm1554_vm13, %v1507_v57  ;;  %1532 = vrot.lane.b32.xlu1 %v1487_v45, %s2878_s14  ;;  %v591_v28 = vsel %vm3025_vm7, %v586_v17, %v590_v18  ;;  %v827_v29 = vrot.slane %v763_v60, 5  ;;  %v581_v24 = vsel %vm3025_vm7, %v576_v19, %v3422_v40  ;;  %v682_v27 = vrot.slane %v681_v25, 4  ;;  %v764_v36 = vld [vmem:[#allocation2 + $0x2c] sm:$0x1] }
  0xc3   : > { %1530 = vrot.lane.b32.xlu0 %v1486_v51, %s2878_s14  ;;  %v686_v32 = vrot.slane %v684_v20, 5  ;;  %v672_v33 = vrot.slane %v671_v13, 4  ;;  %v762_v22 = vld [vmem:[#allocation2 + $0x24] sm:$0xe]  ;;  %v855_v37 = vrot.slane %v775_v31, 5  ;;  %v830_v38 = vrot.slane %v764_v36, 5 }
  0xc4   : > { %v1525_v14 = vpop.permute.xlu1 %1524  ;;  %v829_v41 = vrot.slane %v827_v29, 4  ;;  %v776_v59 = vld [vmem:[#allocation2 + $0x5c] sm:$0x1]  ;;  %v774_v42 = vld [vmem:[#allocation2 + $0x54] sm:$0xe]  ;;  %v2637_v43 = vrot.slane %v762_v22, 9 }
  0xc5   : > { %v1523_v15 = vpop.permute.xlu0 %1522  ;;  %1564 = vst.msk [vmem:[#allocation3 + $0x48] sm:$0xf] %vm1554_vm13, %v1525_v14  ;;  %v687_v40 = vsel %vm3025_vm7, %v682_v27, %v686_v32  ;;  %v677_v11 = vsel %vm3025_vm7, %v672_v33, %v3447_v4  ;;  %v1033_v44 = vld [vmem:[#allocation2 + $0x34] sm:$0xf]  ;;  %v1032_v39 = vld [vmem:[#allocation2 + $0x30] sm:$0xf] }
  0xc6   : > { %1563 = vst.msk [vmem:[#allocation3 + $0x40] sm:$0xf] %vm1554_vm13, %v1523_v15  ;;  %1797 = vrot.lane.b32.xlu1 %v1666_v61, %s2879_s15  ;;  %v2815_v49 = vld [vmem:[#allocation3 + $0x4] ss:$8 sps:$4 sm:$0xff]   ;;  %v857_v50 = vrot.slane %v855_v37, 4  ;;  %v858_v51 = vrot.slane %v776_v59, 5  ;;  %v831_v56 = vsel %vm3007_vm6, %v829_v41, %v830_v38  ;;  %v828_v57 = vsel %vm3007_vm6, %v2637_v43, %v827_v29 }
  0xc7   : > { %1795 = vrot.lane.b32.xlu0 %v1656_v62, %s2879_s15  ;;  %v2641_v53 = vrot.slane %v774_v42, 9  ;;  %v1129_v48 = vshll.u32 %v1033_v44, 16  ;;  %v1133_v54 = vshrl.u32 %v1033_v44, 16  ;;  %v1120_v55 = vshrl.u32 %v1032_v39, 16  ;;  %2684 = vmatprep.mubr.msk.bf16.mxu0 %vm2155_vm15, %v2815_v49  ;;  %v1045_v61 = vld [vmem:[#allocation2 + $0x64] sm:$0xf] }
  0xc8   : > { %v1790_v6 = vpop.permute.xlu1 %1789  ;;  %v1123_v58 = vshll.u32 %v1032_v39, 16  ;;  %v1044_v62 = vld [vmem:[#allocation2 + $0x60] sm:$0xf]  ;;  %v2818_v2 = vld [vmem:[#allocation3 + $0x44] ss:$8 sps:$4 sm:$0xff]   ;;  %v859_v3 = vsel %vm3007_vm6, %v857_v50, %v858_v51  ;;  %v1225_v10 = vshll.u32 %v1045_v61, 16 }
  0xc9   : > { %v1788_v26 = vpop.permute.xlu0 %1787  ;;  %1837 = vst.msk [vmem:[#allocation3 + $0x8] sm:$0xf] %vm1835_vm14, %v1790_v6  ;;  %v856_v4 = vsel %vm3007_vm6, %v2641_v53, %v855_v37  ;;  %v3496_v7 = vrot.slane %v1129_v48, 5  ;;  %v1135_v8 = vrot.slane %v1133_v54, 4  ;;  %v1122_v9 = vrot.slane %v1120_v55, 4  ;;  %2688 = vmatprep.mubr.msk.bf16.mxu1 %vm2155_vm15, %v2818_v2 }
  0xca   : > { %1836 = vst.msk [vmem:[#allocation3] sm:$0xf] %vm1835_vm14, %v1788_v26  ;;  %1813 = vrot.lane.b32.xlu1 %v1762_v21, %s2879_s15  ;;  %v1034_v12 = vld [vmem:[#allocation2 + $0x38] sm:$0x1]  ;;  %v1125_v52 = vrot.slane %v1123_v58, 5  ;;  %v1229_v14 = vshrl.u32 %v1045_v61, 16 }
  0xcb   : > { %1811 = vrot.lane.b32.xlu0 %v1752_v23, %s2879_s15  ;;  %v1216_v15 = vshrl.u32 %v1044_v62, 16  ;;  %v1219_v16 = vshll.u32 %v1044_v62, 16  ;;  %v933_v19 = vld [vmem:[#allocation2 + $0x34] sm:$0xf]  ;;  %v932_v20 = vld [vmem:[#allocation2 + $0x30] sm:$0xf]  ;;  %v1136_v21 = vor.u32 %v1135_v8, %v3496_v7 }
  0xcc   : > { %v1806_v34 = vpop.permute.xlu1 %1805  ;;  %v1139_v23 = vshll.u32 %v1034_v12, 16  ;;  %v1227_v25 = vrot.slane %v1225_v10, 5  ;;  %v1126_v13 = vor.u32 %v1125_v52, %v1122_v9  ;;  %v1046_v60 = vld [vmem:[#allocation2 + $0x68] sm:$0x1]  ;;  %v1231_v6 = vrot.slane %v1229_v14, 4 }
  0xcd   : > { %v1804_v35 = vpop.permute.xlu0 %1803  ;;  %1845 = vst.msk [vmem:[#allocation3 + $0x48] sm:$0xf] %vm1835_vm14, %v1806_v34  ;;  %v1218_v26 = vrot.slane %v1216_v15, 4  ;;  %v1235_v32 = vshll.u32 %v1046_v60, 16  ;;  %v940_v33 = vld [vmem:[#allocation2 + $0x60] sm:$0xf] }
  0xce   : > { %1844 = vst.msk [vmem:[#allocation3 + $0x40] sm:$0xf] %vm1835_vm14, %v1804_v35  ;;  %702 = vrot.lane.b32.xlu1 %v591_v28, %s2875_s11  ;;  %v1221_v28 = vrot.slane %v1219_v16, 5  ;;  %v1141_v27 = vrot.slane %v1139_v23, 5  ;;  %v1137_v34 = vrot.slane %v1136_v21, 4  ;;  %v1127_v35 = vrot.slane %v1126_v13, 4 }
  0xcf   : > { %700 = vrot.lane.b32.xlu0 %v581_v24, %s2875_s11  ;;  %v941_v24 = vld [vmem:[#allocation2 + $0x64] sm:$0xf]  ;;  %v1232_v36 = vor.u32 %v1231_v6, %v1227_v25  ;;  %v1314_v37 = vld [vmem:[#allocation2 + $0x34] sm:$0xf]  ;;  %v1237_v42 = vrot.slane %v1235_v32, 5 }
  0xd0   : > { %v695_v45 = vpop.permute.xlu1 %694  ;;  %v1222_v22 = vor.u32 %v1221_v28, %v1218_v26  ;;  %v1132_v38 = vsel %vm3025_vm7, %v1127_v35, %v3496_v7  ;;  %v1315_v39 = vld [vmem:[#allocation2 + $0x38] sm:$0x1]  ;;  %v1313_v49 = vld [vmem:[#allocation2 + $0x30] sm:$0xe]  ;;  %v1581_v50 = vld [vmem:[#allocation2 + $0x40] sm:$0xf] }
  0xd1   : > { %v693_v46 = vpop.permute.xlu0 %692  ;;  %v2813_v47 = vld [vmem:[#allocation3] ss:$8 sps:$4 sm:$0xff]   ;;  %740 = vst.msk [vmem:[#allocation3 + $0x18] sm:$0xf] %vm736_vm8, %v695_v45  ;;  %v1233_v43 = vrot.slane %v1232_v36, 4  ;;  %v1378_v51 = vrot.slane %v1315_v39, 5 }
  0xd2   : > { %739 = vst.msk [vmem:[#allocation3 + $0x10] sm:$0xf] %vm736_vm8, %v693_v46  ;;  %718 = vrot.lane.b32.xlu1 %v687_v40, %s2875_s11  ;;  %2213 = vmatmul.mubr.bf16.vlgmr.msra.gmra.mxu0 %v2813_v47  ;;  %v1375_v40 = vrot.slane %v1314_v37, 5  ;;  %v1223_v44 = vrot.slane %v1222_v22, 4  ;;  %v1326_v45 = vld [vmem:[#allocation2 + $0x64] sm:$0xf] }
  0xd3   : > { %716 = vrot.lane.b32.xlu0 %v677_v11, %s2875_s11  ;;  %v1142_v11 = vsel %vm3025_vm7, %v1137_v34, %v1141_v27  ;;  %v1403_v53 = vrot.slane %v1326_v45, 5  ;;  %v1580_v48 = vld [vmem:[#allocation2 + $0x3c] sm:$0xf]  ;;  %v1238_v54 = vsel %vm3025_vm7, %v1233_v43, %v1237_v42  ;;  %v1327_v58 = vld [vmem:[#allocation2 + $0x68] sm:$0x1] }
  0xd4   : > { %v711_v63 = vpop.permute.xlu1 %710  ;;  %v1228_v55 = vsel %vm3025_vm7, %v1223_v44, %v1227_v25  ;;  %v1325_v61 = vld [vmem:[#allocation2 + $0x60] sm:$0xe]  ;;  %v1668_v2 = vshrl.u32 %v1580_v48, 16  ;;  %v1406_v7 = vrot.slane %v1327_v58, 5  ;;  %v1593_v9 = vld [vmem:[#allocation2 + $0x70] sm:$0xf] }
  0xd5   : > { %v709_v0 = vpop.permute.xlu0 %708  ;;  %v2816_v1 = vld [vmem:[#allocation3 + $0x40] ss:$8 sps:$4 sm:$0xff]   ;;  %748 = vst.msk [vmem:[#allocation3 + $0x58] sm:$0xf] %vm736_vm8, %v711_v63  ;;  %v2649_v8 = vrot.slane %v1325_v61, 9  ;;  %v1773_v23 = vshll.u32 %v1593_v9, 16 }
  0xd6   : > { %747 = vst.msk [vmem:[#allocation3 + $0x50] sm:$0xf] %vm736_vm8, %v709_v0  ;;  %874 = vrot.lane.b32.xlu1 %v831_v56, %s2874_s10  ;;  %2245 = vmatmul.mubr.bf16.vlgmr.msra.gmra.mxu1 %v2816_v1  ;;  %v1377_v56 = vrot.slane %v1375_v40, 4  ;;  %v1677_v0 = vshll.u32 %v1581_v50, 16  ;;  %v1681_v1 = vshrl.u32 %v1581_v50, 16  ;;  %v1777_v6 = vshrl.u32 %v1593_v9, 16 }
  0xd7   : > { %872 = vrot.lane.b32.xlu0 %v828_v57, %s2874_s10  ;;  %v2645_v57 = vrot.slane %v1313_v49, 9  ;;  %v1592_v52 = vld [vmem:[#allocation2 + $0x6c] sm:$0xf]  ;;  %v1404_v60 = vsel %vm3007_vm6, %v2649_v8, %v1403_v53  ;;  %v1861_v28 = vld [vmem:[#allocation2 + $0x3c] sm:$0xe]  ;;  %v1775_v37 = vrot.slane %v1773_v23, 5 }
  0xd8   : > { %v867_v17 = vpop.permute.xlu1 %866  ;;  %v1379_v10 = vsel %vm3007_vm6, %v1377_v56, %v1378_v51  ;;  %v3533_v16 = vrot.slane %v1677_v0, 5  ;;  %v1764_v26 = vshrl.u32 %v1592_v52, 16  ;;  %v1874_v36 = vld [vmem:[#allocation2 + $0x70] sm:$0xf]  ;;  %v1481_v22 = vld [vmem:[#allocation2 + $0x40] sm:$0xf] }
  0xd9   : > { %v865_v18 = vpop.permute.xlu0 %864  ;;  %912 = vst.msk [vmem:[#allocation3 + $0x18] sm:$0xf] %vm908_vm9, %v867_v17  ;;  %v1376_v12 = vsel %vm3007_vm6, %v2645_v57, %v1375_v40  ;;  %v1683_v17 = vrot.slane %v1681_v1, 4  ;;  %v1951_v42 = vrot.slane %v1874_v36, 5  ;;  %v1873_v44 = vld [vmem:[#allocation2 + $0x6c] sm:$0xe] }
  0xda   : > { %911 = vst.msk [vmem:[#allocation3 + $0x10] sm:$0xf] %vm908_vm9, %v865_v18  ;;  %890 = vrot.lane.b32.xlu1 %v859_v3, %s2874_s10  ;;  %v1671_v3 = vshll.u32 %v1580_v48, 16  ;;  %v1862_v18 = vld [vmem:[#allocation2 + $0x40] sm:$0xf]  ;;  %v1766_v43 = vrot.slane %v1764_v26, 4 }
  0xdb   : > { %888 = vrot.lane.b32.xlu0 %v856_v4, %s2874_s10  ;;  %v1405_v4 = vrot.slane %v1403_v53, 4  ;;  %v1923_v25 = vrot.slane %v1862_v18, 5  ;;  %v1684_v40 = vor.u32 %v1683_v17, %v3533_v16  ;;  %v1875_v39 = vld [vmem:[#allocation2 + $0x74] sm:$0x1]  ;;  %v1480_v45 = vld [vmem:[#allocation2 + $0x3c] sm:$0xf] }
  0xdc   : > { %v883_v29 = vpop.permute.xlu1 %882  ;;  %v1673_v21 = vrot.slane %v1671_v3, 5  ;;  %v1953_v49 = vrot.slane %v1951_v42, 4  ;;  %v1954_v50 = vrot.slane %v1875_v39, 5  ;;  %v1594_v48 = vld [vmem:[#allocation2 + $0x74] sm:$0x1]  ;;  %s2628_s10 = sshll.u32 %s3807_s19, 5 }
  0xdd   : > { %v881_v31 = vpop.permute.xlu0 %880  ;;  %920 = vst.msk [vmem:[#allocation3 + $0x58] sm:$0xf] %vm908_vm9, %v883_v29  ;;  %v1407_v13 = vsel %vm3007_vm6, %v1405_v4, %v1406_v7  ;;  %v1863_v29 = vld [vmem:[#allocation2 + $0x44] sm:$0x1]  ;;  %v1925_v27 = vrot.slane %v1923_v25, 4  ;;  %v1685_v56 = vrot.slane %v1684_v40, 4 }
  0xde   : > { %919 = vst.msk [vmem:[#allocation3 + $0x50] sm:$0xf] %vm908_vm9, %v881_v31  ;;  %972 = vrot.lane.b32.xlu1 %v933_v19, %s2873_s9  ;;  %v1582_v19 = vld [vmem:[#allocation2 + $0x44] sm:$0x1]  ;;  %v1767_v31 = vshll.u32 %v1592_v52, 16  ;;  %v1926_v32 = vrot.slane %v1863_v29, 5 }
  0xdf   : > { %970 = vrot.lane.b32.xlu0 %v932_v20, %s2873_s9  ;;  %v1670_v20 = vrot.slane %v1668_v2, 4  ;;  %v1687_v35 = vshll.u32 %v1582_v19, 16  ;;  %v1489_v58 = vld [vmem:[#allocation2 + $0x70] sm:$0xf]  ;;  %v1488_v61 = vld [vmem:[#allocation2 + $0x6c] sm:$0xf] }
  0xe0   : > { %v965_v41 = vpop.permute.xlu1 %964  ;;  %v1783_v0 = vshll.u32 %v1594_v48, 16  ;;  %v2819_v23 = vld [vmem:[#allocation3 + $0x14] ss:$8 sps:$4 sm:$0xff]  }
  0xe1   : > { %v963_v59 = vpop.permute.xlu0 %962  ;;  %1010 = vst.msk [vmem:[#allocation3 + $0x18] sm:$0xf] %vm1006_vm10, %v965_v41  ;;  %v1689_v57 = vrot.slane %v1687_v35, 5  ;;  %2685 = vmatprep.mubr.msk.bf16.mxu0 %vm2155_vm15, %v2819_v23 }
  0xe2   : > { %1009 = vst.msk [vmem:[#allocation3 + $0x10] sm:$0xf] %vm1006_vm10, %v963_v59  ;;  %988 = vrot.lane.b32.xlu1 %v941_v24, %s2873_s9  ;;  %v2653_v24 = vrot.slane %v1861_v28, 9  ;;  %v1927_v59 = vsel %vm3007_vm6, %v1925_v27, %v1926_v32  ;;  %v1785_v8 = vrot.slane %v1783_v0, 5  ;;  %v2821_v28 = vld [vmem:[#allocation3 + $0x54] ss:$8 sps:$4 sm:$0xff]  }
  0xe3   : > { %986 = vrot.lane.b32.xlu0 %v940_v33, %s2873_s9  ;;  %1979 = vst.msk [vmem:[#allocation3 + $0x3c] sm:$0xf] %vm398_vm0, %v1927_v59  ;;  %v1690_v30 = vsel %vm3025_vm7, %v1685_v56, %v1689_v57  ;;  %2689 = vmatprep.mubr.msk.bf16.mxu1 %vm2155_vm15, %v2821_v28  ;;  %s2627_s9 = sshll.u32 %s3811_s25, 1 }
  0xe4   : > { %v981_v46 = vpop.permute.xlu1 %980  ;;  %v1924_v41 = vsel %vm3007_vm6, %v2653_v24, %v1923_v25  ;;  %s3652_s11 = sadd.s32 %s2628_s10, %s2627_s9 }
  0xe5   : > { %v979_v47 = vpop.permute.xlu0 %978  ;;  %1018 = vst.msk [vmem:[#allocation3 + $0x58] sm:$0xf] %vm1006_vm10, %v981_v46  ;;  %v1769_v46 = vrot.slane %v1767_v31, 5 }
  0xe6   : > { %1017 = vst.msk [vmem:[#allocation3 + $0x50] sm:$0xf] %vm1006_vm10, %v979_v47  ;;  %1253 = vrot.lane.b32.xlu1 %v1142_v11, %s2876_s12  ;;  %v1674_v11 = vor.u32 %v1673_v21, %v1670_v20  ;;  %v2657_v47 = vrot.slane %v1873_v44, 9 }
  0xe7   : > { %1251 = vrot.lane.b32.xlu0 %v1132_v38, %s2876_s12  ;;  %v1779_v38 = vrot.slane %v1777_v6, 4  ;;  %1978 = vst.msk [vmem:[#allocation3 + $0x34] sm:$0xf] %vm398_vm0, %v1924_v41  ;;  %v1770_v1 = vor.u32 %v1769_v46, %v1766_v43 }
  0xe8   : > { %v1246_v62 = vpop.permute.xlu1 %1245 }
  0xe9   : > { %v1244_v63 = vpop.permute.xlu0 %1243  ;;  %1291 = vst.msk [vmem:[#allocation3 + $0x18] sm:$0xf] %vm1287_vm11, %v1246_v62  ;;  %v1675_v62 = vrot.slane %v1674_v11, 4  ;;  %v1771_v9 = vrot.slane %v1770_v1, 4 }
  0xea   : > { %1290 = vst.msk [vmem:[#allocation3 + $0x10] sm:$0xf] %vm1287_vm11, %v1244_v63  ;;  %1269 = vrot.lane.b32.xlu1 %v1238_v54, %s2876_s12  ;;  %v1952_v54 = vsel %vm3007_vm6, %v2657_v47, %v1951_v42  ;;  %v1780_v63 = vor.u32 %v1779_v38, %v1775_v37 }
  0xeb   : > { %1267 = vrot.lane.b32.xlu0 %v1228_v55, %s2876_s12  ;;  %v1955_v55 = vsel %vm3007_vm6, %v1953_v49, %v1954_v50  ;;  %1986 = vst.msk [vmem:[#allocation3 + $0x74] sm:$0xf] %vm398_vm0, %v1952_v54  ;;  %v1680_v4 = vsel %vm3025_vm7, %v1675_v62, %v3533_v16 }
  0xec   : > { %v1262_v14 = vpop.permute.xlu1 %1261  ;;  %1987 = vst.msk [vmem:[#allocation3 + $0x7c] sm:$0xf] %vm398_vm0, %v1955_v55  ;;  %v1781_v7 = vrot.slane %v1780_v63, 4  ;;  %v2823_v55 = vld [vmem:[#allocation3 + $0x24] ss:$8 sps:$4 sm:$0xff]  }
  0xed   : > { %v1260_v15 = vpop.permute.xlu0 %1259  ;;  %1299 = vst.msk [vmem:[#allocation3 + $0x58] sm:$0xf] %vm1287_vm11, %v1262_v14  ;;  %v1776_v14 = vsel %vm3025_vm7, %v1771_v9, %v1775_v37  ;;  %v2825_v63 = vld [vmem:[#allocation3 + $0x64] ss:$8 sps:$4 sm:$0xff]  }
  0xee   : > { %1298 = vst.msk [vmem:[#allocation3 + $0x50] sm:$0xf] %vm1287_vm11, %v1260_v15  ;;  %1422 = vrot.lane.b32.xlu1 %v1379_v10, %s2877_s13  ;;  %v1786_v52 = vsel %vm3025_vm7, %v1781_v7, %v1785_v8 }
  0xef   : > { %1420 = vrot.lane.b32.xlu0 %v1376_v12, %s2877_s13 }
  0xf0   : > { %v1415_v33 = vpop.permute.xlu1 %1414 }
  0xf1   : > { %v1413_v34 = vpop.permute.xlu0 %1412  ;;  %1460 = vst.msk [vmem:[#allocation3 + $0x18] sm:$0xf] %vm1456_vm12, %v1415_v33 }
  0xf2   : > { %1459 = vst.msk [vmem:[#allocation3 + $0x10] sm:$0xf] %vm1456_vm12, %v1413_v34  ;;  %1438 = vrot.lane.b32.xlu1 %v1407_v13, %s2877_s13 }
  0xf3   : > { %1436 = vrot.lane.b32.xlu0 %v1404_v60, %s2877_s13  ;;  %v2830_v28 = vld [vmem:[#allocation3 + $0x74] ss:$8 sps:$4 sm:$0xff]  }
  0xf4   : > { %v1431_v51 = vpop.permute.xlu1 %1430 }
  0xf5   : > { %v1429_v53 = vpop.permute.xlu0 %1428  ;;  %1468 = vst.msk [vmem:[#allocation3 + $0x58] sm:$0xf] %vm1456_vm12, %v1431_v51 }
  0xf6   : > { %1467 = vst.msk [vmem:[#allocation3 + $0x50] sm:$0xf] %vm1456_vm12, %v1429_v53  ;;  %1520 = vrot.lane.b32.xlu1 %v1481_v22, %s2878_s14 }
  0xf7   : > { %1518 = vrot.lane.b32.xlu0 %v1480_v45, %s2878_s14 }
  0xf8   : > { %v1513_v2 = vpop.permute.xlu1 %1512 }
  0xf9   : > { %v1511_v3 = vpop.permute.xlu0 %1510  ;;  %1558 = vst.msk [vmem:[#allocation3 + $0x18] sm:$0xf] %vm1554_vm13, %v1513_v2 }
  0xfa   : > { %1557 = vst.msk [vmem:[#allocation3 + $0x10] sm:$0xf] %vm1554_vm13, %v1511_v3  ;;  %1536 = vrot.lane.b32.xlu1 %v1489_v58, %s2878_s14 }
  0xfb   : > { %1534 = vrot.lane.b32.xlu0 %v1488_v61, %s2878_s14  ;;  %s2629_s14 = sshll.u32 %s3652_s11, 2 }
  0xfc   : > { %v1529_v10 = vpop.permute.xlu1 %1528  ;;  %s3666_s19 = scalar_lea.vmem %s3789_s4, %s2629_s14  ;;  %s3710_s27 = scalar_lea.vmem %s3790_s5, %s2629_s14 }
  0xfd   : > { %v1527_v12 = vpop.permute.xlu0 %1526  ;;  %1566 = vst.msk [vmem:[#allocation3 + $0x58] sm:$0xf] %vm1554_vm13, %v1529_v10 }
  0xfe   : > { %1565 = vst.msk [vmem:[#allocation3 + $0x50] sm:$0xf] %vm1554_vm13, %v1527_v12  ;;  %1801 = vrot.lane.b32.xlu1 %v1690_v30, %s2879_s15 }
  0xff   : > { %1799 = vrot.lane.b32.xlu0 %v1680_v4, %s2879_s15 }
 0x100   : > { %v1794_v15 = vpop.permute.xlu1 %1793 }
 0x101   : > { %v1792_v16 = vpop.permute.xlu0 %1791  ;;  %1839 = vst.msk [vmem:[#allocation3 + $0x18] sm:$0xf] %vm1835_vm14, %v1794_v15 }
 0x102   : > { %1838 = vst.msk [vmem:[#allocation3 + $0x10] sm:$0xf] %vm1835_vm14, %v1792_v16  ;;  %1817 = vrot.lane.b32.xlu1 %v1786_v52, %s2879_s15 }
 0x103   : > { %1815 = vrot.lane.b32.xlu0 %v1776_v14, %s2879_s15 }
 0x104   : > { %v1810_v17 = vpop.permute.xlu1 %1809 }
 0x105   : > { %v1808_v18 = vpop.permute.xlu0 %1807  ;;  %1847 = vst.msk [vmem:[#allocation3 + $0x58] sm:$0xf] %vm1835_vm14, %v1810_v17 }
 0x106   : > { %1846 = vst.msk [vmem:[#allocation3 + $0x50] sm:$0xf] %vm1835_vm14, %v1808_v18 }
 0x108   : > { %v699_v19 = vpop.permute.xlu1 %698  ;;  %v1991_v21 = vld [vmem:[#allocation3 + $0x18] sm:$0xff] }
 0x109   : > { %v697_v20 = vpop.permute.xlu0 %696  ;;  %v1990_v5 = vld [vmem:[#allocation3 + $0x10] sm:$0xff]  ;;  %742 = vst.msk [vmem:[#allocation3 + $0x28] sm:$0xf] %vm736_vm8, %v699_v19 }
 0x10a   : > { %741 = vst.msk [vmem:[#allocation3 + $0x20] sm:$0xf] %vm736_vm8, %v697_v20  ;;  %v2661_v25 = vcombine.low %v1990_v5, %v1991_v21 }
 0x10c   : > { %2221 = vmatmul.mubr.bf16.gmra.mxu0 %v2661_v25  ;;  %v715_v13 = vpop.permute.xlu1 %714  ;;  %v1999_v26 = vld [vmem:[#allocation3 + $0x58] sm:$0xff] }
 0x10d   : > { %v713_v60 = vpop.permute.xlu0 %712  ;;  %v1998_v6 = vld [vmem:[#allocation3 + $0x50] sm:$0xff]  ;;  %750 = vst.msk [vmem:[#allocation3 + $0x68] sm:$0xf] %vm736_vm8, %v715_v13  ;;  %2686 = vmatprep.mubr.msk.bf16.mxu0 %vm2155_vm15, %v2823_v55 }
 0x10e   : > { %749 = vst.msk [vmem:[#allocation3 + $0x60] sm:$0xf] %vm736_vm8, %v713_v60  ;;  %v2669_v29 = vcombine.low %v1998_v6, %v1999_v26  ;;  %v2827_v6 = vld [vmem:[#allocation3 + $0x34] ss:$8 sps:$4 sm:$0xff]  }
 0x110   : > { %2253 = vmatmul.mubr.bf16.gmra.mxu1 %v2669_v29  ;;  %v871_v31 = vpop.permute.xlu1 %870 }
 0x111   : > { %v869_v24 = vpop.permute.xlu0 %868  ;;  %914 = vst.msk [vmem:[#allocation3 + $0x28] sm:$0xf] %vm908_vm9, %v871_v31  ;;  %2690 = vmatprep.mubr.msk.bf16.mxu1 %vm2155_vm15, %v2825_v63  ;;  %v3657_v31 = vld [vmem:[%s3788_s3] ss:$0 sm:$0xff] }
 0x112   : > { %913 = vst.msk [vmem:[#allocation3 + $0x20] sm:$0xf] %vm908_vm9, %v869_v24 }
 0x114   : > { %v887_v27 = vpop.permute.xlu1 %886 }
 0x115   : > { %v885_v32 = vpop.permute.xlu0 %884  ;;  %922 = vst.msk [vmem:[#allocation3 + $0x68] sm:$0xf] %vm908_vm9, %v887_v27 }
 0x116   : > { %921 = vst.msk [vmem:[#allocation3 + $0x60] sm:$0xf] %vm908_vm9, %v885_v32 }
 0x118   : > { %v969_v33 = vpop.permute.xlu1 %968 }
 0x119   : > { %v967_v34 = vpop.permute.xlu0 %966  ;;  %1012 = vst.msk [vmem:[#allocation3 + $0x28] sm:$0xf] %vm1006_vm10, %v969_v33 }
 0x11a   : > { %1011 = vst.msk [vmem:[#allocation3 + $0x20] sm:$0xf] %vm1006_vm10, %v967_v34 }
 0x11c   : > { %v985_v35 = vpop.permute.xlu1 %984 }
 0x11d   : > { %v983_v36 = vpop.permute.xlu0 %982  ;;  %1020 = vst.msk [vmem:[#allocation3 + $0x68] sm:$0xf] %vm1006_vm10, %v985_v35 }
 0x11e   : > { %1019 = vst.msk [vmem:[#allocation3 + $0x60] sm:$0xf] %vm1006_vm10, %v983_v36 }
 0x120   : > { %v1250_v22 = vpop.permute.xlu1 %1249 }
 0x121   : > { %v1248_v37 = vpop.permute.xlu0 %1247  ;;  %1293 = vst.msk [vmem:[#allocation3 + $0x28] sm:$0xf] %vm1287_vm11, %v1250_v22 }
 0x122   : > { %1292 = vst.msk [vmem:[#allocation3 + $0x20] sm:$0xf] %vm1287_vm11, %v1248_v37 }
 0x124   : > { %v1266_v41 = vpop.permute.xlu1 %1265 }
 0x125   : > { %v1264_v59 = vpop.permute.xlu0 %1263  ;;  %1301 = vst.msk [vmem:[#allocation3 + $0x68] sm:$0xf] %vm1287_vm11, %v1266_v41 }
 0x126   : > { %1300 = vst.msk [vmem:[#allocation3 + $0x60] sm:$0xf] %vm1287_vm11, %v1264_v59 }
 0x128   : > { %v1419_v42 = vpop.permute.xlu1 %1418 }
 0x129   : > { %v1417_v40 = vpop.permute.xlu0 %1416  ;;  %1462 = vst.msk [vmem:[#allocation3 + $0x28] sm:$0xf] %vm1456_vm12, %v1419_v42 }
 0x12a   : > { %1461 = vst.msk [vmem:[#allocation3 + $0x20] sm:$0xf] %vm1456_vm12, %v1417_v40 }
 0x12c   : > { %v1435_v11 = vpop.permute.xlu1 %1434 }
 0x12d   : > { %v1433_v38 = vpop.permute.xlu0 %1432  ;;  %1470 = vst.msk [vmem:[#allocation3 + $0x68] sm:$0xf] %vm1456_vm12, %v1435_v11 }
 0x12e   : > { %1469 = vst.msk [vmem:[#allocation3 + $0x60] sm:$0xf] %vm1456_vm12, %v1433_v38 }
 0x130   : > { %v1517_v43 = vpop.permute.xlu1 %1516 }
 0x131   : > { %v1515_v44 = vpop.permute.xlu0 %1514  ;;  %1560 = vst.msk [vmem:[#allocation3 + $0x28] sm:$0xf] %vm1554_vm13, %v1517_v43 }
 0x132   : > { %1559 = vst.msk [vmem:[#allocation3 + $0x20] sm:$0xf] %vm1554_vm13, %v1515_v44 }
 0x134   : > { %v1533_v39 = vpop.permute.xlu1 %1532 }
 0x135   : > { %v1531_v45 = vpop.permute.xlu0 %1530  ;;  %1568 = vst.msk [vmem:[#allocation3 + $0x68] sm:$0xf] %vm1554_vm13, %v1533_v39 }
 0x136   : > { %1567 = vst.msk [vmem:[#allocation3 + $0x60] sm:$0xf] %vm1554_vm13, %v1531_v45 }
 0x138   : > { %v1798_v46 = vpop.permute.xlu1 %1797 }
 0x139   : > { %v1796_v47 = vpop.permute.xlu0 %1795  ;;  %1841 = vst.msk [vmem:[#allocation3 + $0x28] sm:$0xf] %vm1835_vm14, %v1798_v46 }
 0x13a   : > { %1840 = vst.msk [vmem:[#allocation3 + $0x20] sm:$0xf] %vm1835_vm14, %v1796_v47 }
 0x13c   : > { %v1814_v49 = vpop.permute.xlu1 %1813 }
 0x13d   : > { %v1812_v50 = vpop.permute.xlu0 %1811  ;;  %1849 = vst.msk [vmem:[#allocation3 + $0x68] sm:$0xf] %vm1835_vm14, %v1814_v49 }
 0x13e   : > { %1848 = vst.msk [vmem:[#allocation3 + $0x60] sm:$0xf] %vm1835_vm14, %v1812_v50 }
 0x140   : > { %v703_v51 = vpop.permute.xlu1 %702  ;;  %v1993_v54 = vld [vmem:[#allocation3 + $0x28] sm:$0xff] }
 0x141   : > { %v701_v53 = vpop.permute.xlu0 %700  ;;  %v1992_v48 = vld [vmem:[#allocation3 + $0x20] sm:$0xff]  ;;  %744 = vst.msk [vmem:[#allocation3 + $0x38] sm:$0xf] %vm736_vm8, %v703_v51 }
 0x142   : > { %743 = vst.msk [vmem:[#allocation3 + $0x30] sm:$0xf] %vm736_vm8, %v701_v53  ;;  %v2663_v56 = vcombine.low %v1992_v48, %v1993_v54 }
 0x144   : > { %2229 = vmatmul.mubr.bf16.gmra.mxu0 %v2663_v56  ;;  %v719_v57 = vpop.permute.xlu1 %718  ;;  %v2001_v62 = vld [vmem:[#allocation3 + $0x68] sm:$0xff] }
 0x145   : > { %v717_v58 = vpop.permute.xlu0 %716  ;;  %v2000_v61 = vld [vmem:[#allocation3 + $0x60] sm:$0xff]  ;;  %752 = vst.msk [vmem:[#allocation3 + $0x78] sm:$0xf] %vm736_vm8, %v719_v57  ;;  %2687 = vmatprep.mubr.msk.bf16.mxu0 %vm2155_vm15, %v2827_v6 }
 0x146   : > { %751 = vst.msk [vmem:[#allocation3 + $0x70] sm:$0xf] %vm736_vm8, %v717_v58  ;;  %v2671_v0 = vcombine.low %v2000_v61, %v2001_v62 }
 0x148   : > { %2261 = vmatmul.mubr.bf16.gmra.mxu1 %v2671_v0  ;;  %v875_v1 = vpop.permute.xlu1 %874 }
 0x149   : > { %v873_v2 = vpop.permute.xlu0 %872  ;;  %916 = vst.msk [vmem:[#allocation3 + $0x38] sm:$0xf] %vm908_vm9, %v875_v1  ;;  %2691 = vmatprep.mubr.msk.bf16.mxu1 %vm2155_vm15, %v2830_v28 }
 0x14a   : > { %915 = vst.msk [vmem:[#allocation3 + $0x30] sm:$0xf] %vm908_vm9, %v873_v2 }
 0x14c   : > { %v891_v3 = vpop.permute.xlu1 %890 }
 0x14d   : > { %v889_v30 = vpop.permute.xlu0 %888  ;;  %924 = vst.msk [vmem:[#allocation3 + $0x78] sm:$0xf] %vm908_vm9, %v891_v3 }
 0x14e   : > { %923 = vst.msk [vmem:[#allocation3 + $0x70] sm:$0xf] %vm908_vm9, %v889_v30 }
 0x150   : > { %v973_v4 = vpop.permute.xlu1 %972 }
 0x151   : > { %v971_v7 = vpop.permute.xlu0 %970  ;;  %1014 = vst.msk [vmem:[#allocation3 + $0x38] sm:$0xf] %vm1006_vm10, %v973_v4 }
 0x152   : > { %1013 = vst.msk [vmem:[#allocation3 + $0x30] sm:$0xf] %vm1006_vm10, %v971_v7 }
 0x154   : > { %v989_v8 = vpop.permute.xlu1 %988 }
 0x155   : > { %v987_v9 = vpop.permute.xlu0 %986  ;;  %1022 = vst.msk [vmem:[#allocation3 + $0x78] sm:$0xf] %vm1006_vm10, %v989_v8 }
 0x156   : > { %1021 = vst.msk [vmem:[#allocation3 + $0x70] sm:$0xf] %vm1006_vm10, %v987_v9 }
 0x158   : > { %v1254_v10 = vpop.permute.xlu1 %1253 }
 0x159   : > { %v1252_v12 = vpop.permute.xlu0 %1251  ;;  %1295 = vst.msk [vmem:[#allocation3 + $0x38] sm:$0xf] %vm1287_vm11, %v1254_v10 }
 0x15a   : > { %1294 = vst.msk [vmem:[#allocation3 + $0x30] sm:$0xf] %vm1287_vm11, %v1252_v12 }
 0x15c   : > { %v1270_v52 = vpop.permute.xlu1 %1269 }
 0x15d   : > { %v1268_v14 = vpop.permute.xlu0 %1267  ;;  %1303 = vst.msk [vmem:[#allocation3 + $0x78] sm:$0xf] %vm1287_vm11, %v1270_v52 }
 0x15e   : > { %1302 = vst.msk [vmem:[#allocation3 + $0x70] sm:$0xf] %vm1287_vm11, %v1268_v14 }
 0x160   : > { %v1423_v15 = vpop.permute.xlu1 %1422 }
 0x161   : > { %v1421_v16 = vpop.permute.xlu0 %1420  ;;  %1464 = vst.msk [vmem:[#allocation3 + $0x38] sm:$0xf] %vm1456_vm12, %v1423_v15 }
 0x162   : > { %1463 = vst.msk [vmem:[#allocation3 + $0x30] sm:$0xf] %vm1456_vm12, %v1421_v16 }
 0x164   : > { %v1439_v17 = vpop.permute.xlu1 %1438 }
 0x165   : > { %v1437_v18 = vpop.permute.xlu0 %1436  ;;  %1472 = vst.msk [vmem:[#allocation3 + $0x78] sm:$0xf] %vm1456_vm12, %v1439_v17 }
 0x166   : > { %1471 = vst.msk [vmem:[#allocation3 + $0x70] sm:$0xf] %vm1456_vm12, %v1437_v18 }
 0x168   : > { %v1521_v19 = vpop.permute.xlu1 %1520 }
 0x169   : > { %v1519_v20 = vpop.permute.xlu0 %1518  ;;  %1562 = vst.msk [vmem:[#allocation3 + $0x38] sm:$0xf] %vm1554_vm13, %v1521_v19 }
 0x16a   : > { %1561 = vst.msk [vmem:[#allocation3 + $0x30] sm:$0xf] %vm1554_vm13, %v1519_v20 }
 0x16c   : > { %v1537_v5 = vpop.permute.xlu1 %1536 }
 0x16d   : > { %v1535_v21 = vpop.permute.xlu0 %1534  ;;  %1570 = vst.msk [vmem:[#allocation3 + $0x78] sm:$0xf] %vm1554_vm13, %v1537_v5 }
 0x16e   : > { %1569 = vst.msk [vmem:[#allocation3 + $0x70] sm:$0xf] %vm1554_vm13, %v1535_v21 }
 0x170   : > { %v1802_v23 = vpop.permute.xlu1 %1801 }
 0x171   : > { %v1800_v25 = vpop.permute.xlu0 %1799  ;;  %1843 = vst.msk [vmem:[#allocation3 + $0x38] sm:$0xf] %vm1835_vm14, %v1802_v23 }
 0x172   : > { %1842 = vst.msk [vmem:[#allocation3 + $0x30] sm:$0xf] %vm1835_vm14, %v1800_v25 }
 0x174   : > { %v1818_v13 = vpop.permute.xlu1 %1817 }
 0x175   : > { %v1816_v60 = vpop.permute.xlu0 %1815  ;;  %1851 = vst.msk [vmem:[#allocation3 + $0x78] sm:$0xf] %vm1835_vm14, %v1818_v13 }
 0x176   : > { %1850 = vst.msk [vmem:[#allocation3 + $0x70] sm:$0xf] %vm1835_vm14, %v1816_v60 }
 0x179   : > { %v2829_v26 = vld [vmem:[#allocation3 + $0x30] ss:$8 sps:$4 sm:$0xff]  }
 0x17a   : > { %2237 = vmatmul.mubr.bf16.gmra.mxu0 %v2829_v26 }
 0x17d   : > { %v2832_v29 = vld [vmem:[#allocation3 + $0x70] ss:$8 sps:$4 sm:$0xff]  }
 0x17e   : > { %2269 = vmatmul.mubr.bf16.gmra.mxu1 %v2832_v29 }
 0x192   : > { %v2214_v24 = vpop.f32.mrf.mxu0 }
 0x193   : > { %v2215_v27 = vadd.f32 %v3657_v31, %v2214_v24 }
 0x194   : > { %v2216_v32 = vpop.f32.mrf.mxu0 }
 0x195   : > { %v2277_v33 = vmax.f32 %v2215_v27, 0.0 }
 0x196   : > { %v2217_v34 = vpop.f32.mrf.mxu0  ;;  %v2246_v35 = vpop.f32.mrf.mxu1 }
 0x197   : > { %v2717_v36 = vpack.c.bf16 %v2277_v33, %v2277_v33  ;;  %v2218_v22 = vadd.f32 %v3657_v31, %v2217_v34  ;;  %v2247_v37 = vadd.f32 %v3657_v31, %v2246_v35 }
 0x198   : > { %v2219_v41 = vpop.f32.mrf.mxu0  ;;  %v2248_v59 = vpop.f32.mrf.mxu1 }
 0x199   : > { %2357 = vst.msk [vmem:[%s3666_s19] sm:$0xf] %vm398_vm0, %v2717_v36  ;;  %v2278_v42 = vmax.f32 %v2218_v22, 0.0  ;;  %v2285_v40 = vmax.f32 %v2247_v37, 0.0  ;;  %2373 = vrot.lane.b32.xlu0 %v2717_v36, %s2879_s15 }
 0x19a   : > { %v2249_v11 = vpop.f32.mrf.mxu1 }
 0x19b   : > { %v2718_v38 = vpack.c.bf16 %v2278_v42, %v2278_v42  ;;  %v2725_v43 = vpack.c.bf16 %v2285_v40, %v2285_v40  ;;  %v2250_v44 = vadd.f32 %v3657_v31, %v2249_v11 }
 0x19c   : > { %v2251_v39 = vpop.f32.mrf.mxu1 }
 0x19d   : > { %2358 = vst.msk [vmem:[%s3666_s19 + $0x4] sm:$0xf] %vm398_vm0, %v2718_v38  ;;  %2365 = vst.msk [vmem:[%s3666_s19 + $0x20] sm:$0xf] %vm398_vm0, %v2725_v43  ;;  %v2286_v45 = vmax.f32 %v2250_v44, 0.0  ;;  %2375 = vrot.lane.b32.xlu1 %v2718_v38, %s2879_s15  ;;  %2389 = vrot.lane.b32.xlu0 %v2725_v43, %s2879_s15 }
 0x19f   : > { %v2726_v46 = vpack.c.bf16 %v2286_v45, %v2286_v45 }
 0x1a1   : > { %2366 = vst.msk [vmem:[%s3666_s19 + $0x24] sm:$0xf] %vm398_vm0, %v2726_v46  ;;  %2391 = vrot.lane.b32.xlu1 %v2726_v46, %s2879_s15 }
 0x1cc   : > { %v2222_v47 = vpop.f32.mrf.mxu0 }
 0x1cd   : > { %v2223_v49 = vadd.f32 %v3657_v31, %v2222_v47 }
 0x1ce   : > { %v2224_v50 = vpop.f32.mrf.mxu0 }
 0x1cf   : > { %v2279_v51 = vmax.f32 %v2223_v49, 0.0 }
 0x1d0   : > { %v2225_v53 = vpop.f32.mrf.mxu0  ;;  %v2254_v48 = vpop.f32.mrf.mxu1 }
 0x1d1   : > { %v2719_v54 = vpack.c.bf16 %v2279_v51, %v2279_v51  ;;  %v2226_v55 = vadd.f32 %v3657_v31, %v2225_v53  ;;  %v2255_v56 = vadd.f32 %v3657_v31, %v2254_v48 }
 0x1d2   : > { %v2227_v57 = vpop.f32.mrf.mxu0  ;;  %v2256_v58 = vpop.f32.mrf.mxu1 }
 0x1d3   : > { %2359 = vst.msk [vmem:[%s3666_s19 + $0x8] sm:$0xf] %vm398_vm0, %v2719_v54  ;;  %v2280_v61 = vmax.f32 %v2226_v55, 0.0  ;;  %v2287_v62 = vmax.f32 %v2255_v56, 0.0  ;;  %2377 = vrot.lane.b32.xlu0 %v2719_v54, %s2879_s15 }
 0x1d4   : > { %v2257_v63 = vpop.f32.mrf.mxu1 }
 0x1d5   : > { %v2720_v0 = vpack.c.bf16 %v2280_v61, %v2280_v61  ;;  %v2727_v1 = vpack.c.bf16 %v2287_v62, %v2287_v62  ;;  %v2258_v2 = vadd.f32 %v3657_v31, %v2257_v63 }
 0x1d6   : > { %v2259_v3 = vpop.f32.mrf.mxu1 }
 0x1d7   : > { %2360 = vst.msk [vmem:[%s3666_s19 + $0xc] sm:$0xf] %vm398_vm0, %v2720_v0  ;;  %2367 = vst.msk [vmem:[%s3666_s19 + $0x28] sm:$0xf] %vm398_vm0, %v2727_v1  ;;  %v2288_v30 = vmax.f32 %v2258_v2, 0.0  ;;  %2379 = vrot.lane.b32.xlu1 %v2720_v0, %s2879_s15  ;;  %2393 = vrot.lane.b32.xlu0 %v2727_v1, %s2879_s15 }
 0x1d9   : > { %v2728_v4 = vpack.c.bf16 %v2288_v30, %v2288_v30 }
 0x1db   : > { %2368 = vst.msk [vmem:[%s3666_s19 + $0x2c] sm:$0xf] %vm398_vm0, %v2728_v4  ;;  %2395 = vrot.lane.b32.xlu1 %v2728_v4, %s2879_s15 }
 0x204   : > { %v2230_v7 = vpop.f32.mrf.mxu0 }
 0x205   : > { %v2231_v8 = vadd.f32 %v3657_v31, %v2230_v7 }
 0x206   : > { %v2232_v9 = vpop.f32.mrf.mxu0 }
 0x207   : > { %v2281_v10 = vmax.f32 %v2231_v8, 0.0 }
 0x208   : > { %v2233_v12 = vpop.f32.mrf.mxu0  ;;  %v2262_v52 = vpop.f32.mrf.mxu1 }
 0x209   : > { %v2721_v14 = vpack.c.bf16 %v2281_v10, %v2281_v10  ;;  %v2234_v15 = vadd.f32 %v3657_v31, %v2233_v12  ;;  %v2263_v16 = vadd.f32 %v3657_v31, %v2262_v52 }
 0x20a   : > { %v2235_v17 = vpop.f32.mrf.mxu0  ;;  %v2264_v18 = vpop.f32.mrf.mxu1 }
 0x20b   : > { %2361 = vst.msk [vmem:[%s3666_s19 + $0x10] sm:$0xf] %vm398_vm0, %v2721_v14  ;;  %v2282_v19 = vmax.f32 %v2234_v15, 0.0  ;;  %v2289_v20 = vmax.f32 %v2263_v16, 0.0  ;;  %2381 = vrot.lane.b32.xlu0 %v2721_v14, %s2879_s15  ;;  %v2374_v13 = vpop.permute.xlu0 %2373 }
 0x20c   : > { %v2265_v5 = vpop.f32.mrf.mxu1  ;;  %2422 = vst.msk [vmem:[%s3710_s27] sm:$0xf] %vm2421_vm1, %v2374_v13 }
 0x20d   : > { %v2722_v21 = vpack.c.bf16 %v2282_v19, %v2282_v19  ;;  %v2729_v23 = vpack.c.bf16 %v2289_v20, %v2289_v20  ;;  %v2266_v25 = vadd.f32 %v3657_v31, %v2265_v5 }
 0x20e   : > { %v2267_v60 = vpop.f32.mrf.mxu1 }
 0x20f   : > { %2362 = vst.msk [vmem:[%s3666_s19 + $0x14] sm:$0xf] %vm398_vm0, %v2722_v21  ;;  %2369 = vst.msk [vmem:[%s3666_s19 + $0x30] sm:$0xf] %vm398_vm0, %v2729_v23  ;;  %v2290_v6 = vmax.f32 %v2266_v25, 0.0  ;;  %2383 = vrot.lane.b32.xlu1 %v2722_v21, %s2879_s15  ;;  %2397 = vrot.lane.b32.xlu0 %v2729_v23, %s2879_s15  ;;  %v2376_v28 = vpop.permute.xlu1 %2375  ;;  %v2390_v29 = vpop.permute.xlu0 %2389 }
 0x210   : > { %2423 = vst.msk [vmem:[%s3710_s27 + $0x4] sm:$0xf] %vm2421_vm1, %v2376_v28  ;;  %2430 = vst.msk [vmem:[%s3710_s27 + $0x20] sm:$0xf] %vm2421_vm1, %v2390_v29 }
 0x211   : > { %v2730_v26 = vpack.c.bf16 %v2290_v6, %v2290_v6 }
 0x213   : > { %2370 = vst.msk [vmem:[%s3666_s19 + $0x34] sm:$0xf] %vm398_vm0, %v2730_v26  ;;  %2399 = vrot.lane.b32.xlu1 %v2730_v26, %s2879_s15  ;;  %v2392_v24 = vpop.permute.xlu1 %2391 }
 0x214   : > { %2431 = vst.msk [vmem:[%s3710_s27 + $0x24] sm:$0xf] %vm2421_vm1, %v2392_v24 }
 0x23a   : > { %v2238_v27 = vpop.f32.mrf.mxu0 }
 0x23b   : > { %v2239_v32 = vadd.f32 %v3657_v31, %v2238_v27 }
 0x23c   : > { %v2240_v33 = vpop.f32.mrf.mxu0 }
 0x23d   : > { %v2283_v34 = vmax.f32 %v2239_v32, 0.0 }
 0x23e   : > { %v2241_v35 = vpop.f32.mrf.mxu0  ;;  %v2270_v36 = vpop.f32.mrf.mxu1 }
 0x23f   : > { %v2723_v22 = vpack.c.bf16 %v2283_v34, %v2283_v34  ;;  %v2242_v37 = vadd.f32 %v3657_v31, %v2241_v35  ;;  %v2271_v41 = vadd.f32 %v3657_v31, %v2270_v36 }
 0x240   : > { %v2243_v59 = vpop.f32.mrf.mxu0  ;;  %v2272_v42 = vpop.f32.mrf.mxu1 }
 0x241   : > { %2363 = vst.msk [vmem:[%s3666_s19 + $0x18] sm:$0xf] %vm398_vm0, %v2723_v22  ;;  %v2284_v40 = vmax.f32 %v2242_v37, 0.0  ;;  %v2291_v11 = vmax.f32 %v2271_v41, 0.0  ;;  %2385 = vrot.lane.b32.xlu0 %v2723_v22, %s2879_s15 }
 0x242   : > { %v2273_v38 = vpop.f32.mrf.mxu1 }
 0x243   : > { %v2724_v43 = vpack.c.bf16 %v2284_v40, %v2284_v40  ;;  %v2731_v44 = vpack.c.bf16 %v2291_v11, %v2291_v11  ;;  %v2274_v39 = vadd.f32 %v3657_v31, %v2273_v38 }
 0x244   : > { %v2275_v46 = vpop.f32.mrf.mxu1 }
 0x245   : > { %v2378_v45 = vpop.permute.xlu0 %2377  ;;  %2364 = vst.msk [vmem:[%s3666_s19 + $0x1c] sm:$0xf] %vm398_vm0, %v2724_v43  ;;  %2371 = vst.msk [vmem:[%s3666_s19 + $0x38] sm:$0xf] %vm398_vm0, %v2731_v44  ;;  %v2292_v47 = vmax.f32 %v2274_v39, 0.0  ;;  %2387 = vrot.lane.b32.xlu1 %v2724_v43, %s2879_s15  ;;  %2401 = vrot.lane.b32.xlu0 %v2731_v44, %s2879_s15 }
 0x246   : > { %2424 = vst.msk [vmem:[%s3710_s27 + $0x8] sm:$0xf] %vm2421_vm1, %v2378_v45 }
 0x247   : > { %v2732_v49 = vpack.c.bf16 %v2292_v47, %v2292_v47 }
 0x249   : > { %v2380_v31 = vpop.permute.xlu1 %2379  ;;  %v2394_v50 = vpop.permute.xlu0 %2393  ;;  %2372 = vst.msk [vmem:[%s3666_s19 + $0x3c] sm:$0xf] %vm398_vm0, %v2732_v49  ;;  %2403 = vrot.lane.b32.xlu1 %v2732_v49, %s2879_s15 }
 0x24a   : > { %2425 = vst.msk [vmem:[%s3710_s27 + $0xc] sm:$0xf] %vm2421_vm1, %v2380_v31  ;;  %2432 = vst.msk [vmem:[%s3710_s27 + $0x28] sm:$0xf] %vm2421_vm1, %v2394_v50 }
 0x24d   : > { %v2396_v51 = vpop.permute.xlu1 %2395 }
 0x24e   : > { %2433 = vst.msk [vmem:[%s3710_s27 + $0x2c] sm:$0xf] %vm2421_vm1, %v2396_v51 }
 0x27d   : > { %v2382_v53 = vpop.permute.xlu0 %2381 }
 0x27e   : > { %2426 = vst.msk [vmem:[%s3710_s27 + $0x10] sm:$0xf] %vm2421_vm1, %v2382_v53 }
 0x281   : > { %v2384_v48 = vpop.permute.xlu1 %2383  ;;  %v2398_v54 = vpop.permute.xlu0 %2397 }
 0x282   : > { %2427 = vst.msk [vmem:[%s3710_s27 + $0x14] sm:$0xf] %vm2421_vm1, %v2384_v48  ;;  %2434 = vst.msk [vmem:[%s3710_s27 + $0x30] sm:$0xf] %vm2421_vm1, %v2398_v54 }
 0x285   : > { %v2400_v55 = vpop.permute.xlu1 %2399 }
 0x286   : > { %2435 = vst.msk [vmem:[%s3710_s27 + $0x34] sm:$0xf] %vm2421_vm1, %v2400_v55 }
 0x2b3   : > { %v2386_v56 = vpop.permute.xlu0 %2385 }
 0x2b4   : > { %2428 = vst.msk [vmem:[%s3710_s27 + $0x18] sm:$0xf] %vm2421_vm1, %v2386_v56 }
 0x2b7   : > { %v2388_v57 = vpop.permute.xlu1 %2387  ;;  %v2402_v58 = vpop.permute.xlu0 %2401 }
 0x2b8   : > { %2429 = vst.msk [vmem:[%s3710_s27 + $0x1c] sm:$0xf] %vm2421_vm1, %v2388_v57  ;;  %2436 = vst.msk [vmem:[%s3710_s27 + $0x38] sm:$0xf] %vm2421_vm1, %v2402_v58 }
 0x2bb   : > { %v2404_v61 = vpop.permute.xlu1 %2403 }
 0x2bc   : > { %2437 = vst.msk [vmem:[%s3710_s27 + $0x3c] sm:$0xf] %vm2421_vm1, %v2404_v61 }
 0x2bd PF: > { %s16_s22 = sadd.s32 1, %s2871_s22   ;;  %s3796_s18 = smov %s2863_s20 }
 0x2be   : > { %p13_p9 = scmp.ge.s32.totalorder %s16_s22, 6   ;;  %s3797_s19 = smov %s2867_s21 }
 0x2bf   : > { %s3798_s20 = smov %s3801_s23  ;;  %s3799_s21 = smov %s3805_s24 }
 0x2c0   :  { %15 = sbr.rel (!%p13_p9) target bundleno = 3 (0x3), region = 84 }

// kernel: ssh_forward.5
= control target key start
LH: loop header
LB: loop body
LE: loop exit
PB: predicated region body
PF: predicated region fallthrough
CT: control target
= control target key end

     0   :  { %11 = vsyncpa [#allocation5], 0  ;;  %s4197_s0 = inlined_call_operand.vmem [shape: bf16[2,18,18,8], index: 0, kind: input, shape index: {}, may-alias: {0,1}]   ;;  %s4198_s1 = inlined_call_operand.vmem [shape: bf16[2,18,18,8], index: 1, kind: input, shape index: {}, may-alias: {0,1}]   ;;  %s4199_s2 = inlined_call_operand.vmem [shape: bf16[72,8], index: 2, kind: input, shape index: {}]   ;;  %s4200_s3 = inlined_call_operand.vmem [shape: f32[1,8], index: 3, kind: input, shape index: {}]   ;;  %s4201_s4 = inlined_call_operand.vmem [shape: bf16[2,16,16,16], index: 4, kind: input, shape index: {}]   ;;  %s4202_s5 = inlined_call_operand.vmem [shape: bf16[2,16,16,8], index: 5, kind: input, shape index: {}]   ;;  %s4203_s6 = inlined_call_operand.hbm [shape: f32[2,16,16,32], index: 6, kind: output, shape index: {}]  }
   0x1   :  { %13 = vsyncpa [#allocation5 + $0x1], 0  ;;  %s3225_s21 = smov 0   ;;  %s3227_s22 = smov 0  }
   0x2   :  { %s3229_s23 = smov 0   ;;  %s3231_s24 = smov 0  }
   0x3   :  { %s3233_s25 = smov 0   ;;  %s3235_s26 = smov 0  }
   0x4   :  { %s3237_s27 = smov 0   ;;  %s3239_s28 = smov 0  }
   0x5 LB: > { %s2737_s29 = sadd.s32 4294967295, %s3178_s28   ;;  %s2738_s30 = sadd.s32 4294967294, %s3178_s28   ;;  %s3178_s28 = sphi %s3239_s28, %s19_s28   ;;  %s3174_s27 = sphi %s3237_s27, %s4228_s27   ;;  %s3170_s26 = sphi %s3235_s26, %s4227_s26   ;;  %s3166_s25 = sphi %s3233_s25, %s4226_s25   ;;  %s3162_s24 = sphi %s3231_s24, %s4225_s24   ;;  %s3158_s23 = sphi %s3229_s23, %s4224_s23   ;;  %s3154_s22 = sphi %s3227_s22, %s4223_s22   ;;  %s3150_s21 = sphi %s3225_s21, %s4222_s21  }
   0x6   : > { %s28_s7 = sadd.s32 1, %s3170_s26  ;;  %s31_s8 = sadd.s32 1, %s3174_s27 }
   0x7   : > { %p29_p0 = scmp.ge.s32.totalorder %s28_s7, 2  ;;  %p208_p1 = scmp.ne.s32.totalorder %s3158_s23, %s3154_s22 }
   0x8   : > { %p209_p2 = scmp.eq.s32.totalorder %s2737_s29, 3  ;;  %p214_p5 = scmp.ne.s32.totalorder %s3154_s22, %s3150_s21 }
   0x9   : > { %s4230_s7 = smov (%p29_p0, %s28_s7), 0  ;;  %s4232_s8 = smov (!%p29_p0, %s31_s8), %s3174_s27 }
   0xa   : > { %s194_s9 = ssub.s32 %s3170_s26, %s4230_s7  ;;  %p3276_p3 = por %p209_p2, %p208_p1 }
   0xb   : > { %p33_p4 = scmp.ge.s32.totalorder %s4232_s8, 2  ;;  %p215_p6 = scmp.eq.s32.totalorder %s2738_s30, 3 }
   0xc   : > { %p2743_p7 = scmp.ge.s32.totalorder %s3178_s28, 1  ;;  %p309_p9 = scmp.lt.s32.totalorder %s3178_s28, 5 }
   0xd   : > { %s4234_s8 = smov (%p33_p4, %s4232_s8), 0  ;;  %p3285_p8 = por %p215_p6, %p214_p5 }
   0xe   : > { %s193_s12 = ssub.s32 %s3174_s27, %s4234_s8  ;;  %s198_s13 = sadd.s32 1, %s3158_s23 }
   0xf   : > { %s195_s14 = sor.u32 %s194_s9, %s193_s12  ;;  %p310_p10 = pnand %p2743_p7, %p309_p9 }
  0x10   : > { %p196_p11 = scmp.eq.s32.totalorder %s195_s14, 0  ;;  %s3297_s16 = sshll.u32 (!%p310_p10), %s3162_s24, 3 }
  0x11   : > { %313 = sbr.rel (%p310_p10) target bundleno = 764 (0x2fc), region = 44  ;;  %p387_p12 = scmp.lt.s32.totalorder (!%p310_p10), %s3166_s25, 1 }
  0x12   : > { %s3294_s15 = scalar_select %p196_p11, %s3158_s23, %s198_s13  }
  0x13   : > { %p389_p13 = scmp.lt.s32.totalorder (!%p310_p10), %s3297_s16, 17  ;;  %s3180_s14 = smov (!%p310_p10), 16  }
  0x14   : > { %s2884_s9 = sadd.s32 (!%p310_p10), 8, %s3297_s16  ;;  %p420_p1 = scmp.lt.s32.totalorder (!%p310_p10), %s3297_s16, 15 }
  0x15   : > { %p407_p0 = scmp.lt.s32.totalorder (!%p310_p10), %s2884_s9, 17 }
  0x16   : > { %s3302_s17 = scalar_select %p387_p12, %s3166_s25, 1  ;;  %vm868_vm0 = vcmask 1042432   ;;  %vm869_vm1 = vcmask 1046532   ;;  %vm465_vm2 = vcmask 60416   ;;  %vm468_vm3 = vcmask 57344  }
  0x17   : > { %s390_s18 = scalar_select %p389_p13, %s3297_s16, 17  ;;  %vm3315_vm4 = vmor %vm868_vm0, %vm869_vm1  ;;  %vm560_vm5 = vsmask.f32 3328  ;;  %vm561_vm6 = vsmask.f32 7440  ;;  %vm2212_vm8 = vcmask 1043456  }
  0x18   : > { %s2951_s19 = smul.u32 54, %s3302_s17  ;;  %vm3387_vm7 = vmor %vm560_vm5, %vm561_vm6  ;;  %s4236_s9 = smov (!%p407_p0, %s2884_s9), 17  ;;  %vm803_vm9 = vcmask 126016   ;;  %vm975_vm10 = vcmask 191616   ;;  %vm1073_vm11 = vcmask 257216   ;;  %vm1354_vm12 = vcmask 322816  }
  0x19   : > { %s2950_s20 = smul.u32 3, %s390_s18  ;;  %s3181_s18 = smov 8   ;;  %vm1523_vm13 = vcmask 388416   ;;  %vm1621_vm14 = vcmask 454016   ;;  %vm1902_vm15 = vcmask 519616   ;;  %vm2071_vm0 = vcmask 585216  }
  0x1a   : > { %s2952_s12 = smul.u32 3, %s4236_s9  ;;  %vm2187_vm1 = vcmask 588800   ;;  %s4238_s16 = smov (!%p420_p1, %s3297_s16), 15 }
  0x1b   : > { %s393_s29 = sadd.s32 %s2951_s19, %s2950_s20  ;;  %s3182_s20 = smov 24  }
  0x1c   : > { %s2746_s30 = sshll.u32 %s393_s29, 2  ;;  %s4204_s29 = smov 32  }
  0x1d   : > { %s3311_s13 = scalar_lea.vmem %s4197_s0, %s2746_s30  ;;  %s4210_s30 = smov 40  }
  0x1e   : > { %v441_v0 = vld [vmem:[%s3311_s13] sm:$0xf]  ;;  %v442_v1 = vld [vmem:[%s3311_s13 + $0x4] sm:$0xf]  ;;  %v443_v3 = vld [vmem:[%s3311_s13 + $0x8] sm:$0x1] }
  0x1f   : > { %466 = vst.msk [vmem:[#allocation2] sm:$0xf] %vm465_vm2, %v441_v0  ;;  %467 = vst.msk [vmem:[#allocation2 + $0x4] sm:$0xf] %vm465_vm2, %v442_v1  ;;  %v453_v4 = vld [vmem:[%s3311_s13 + $0x30] sm:$0xf] }
  0x20   : > { %469 = vst.msk [vmem:[#allocation2 + $0x8] sm:$0x1] %vm468_vm3, %v443_v3  ;;  %v454_v5 = vld [vmem:[%s3311_s13 + $0x34] sm:$0xf]  ;;  %v455_v6 = vld [vmem:[%s3311_s13 + $0x38] sm:$0x1] }
  0x21   : > { %479 = vst.msk [vmem:[#allocation2 + $0x30] sm:$0xf] %vm465_vm2, %v453_v4  ;;  %480 = vst.msk [vmem:[#allocation2 + $0x34] sm:$0xf] %vm465_vm2, %v454_v5  ;;  %v444_v7 = vld [vmem:[%s3311_s13 + $0xc] sm:$0xf] }
  0x22   : > { %481 = vst.msk [vmem:[#allocation2 + $0x38] sm:$0x1] %vm468_vm3, %v455_v6  ;;  %v445_v8 = vld [vmem:[%s3311_s13 + $0x10] sm:$0xf]  ;;  %v446_v9 = vld [vmem:[%s3311_s13 + $0x14] sm:$0x1] }
  0x23   : > { %470 = vst.msk [vmem:[#allocation2 + $0xc] sm:$0xf] %vm465_vm2, %v444_v7  ;;  %471 = vst.msk [vmem:[#allocation2 + $0x10] sm:$0xf] %vm465_vm2, %v445_v8  ;;  %v456_v10 = vld [vmem:[%s3311_s13 + $0x3c] sm:$0xf] }
  0x24   : > { %472 = vst.msk [vmem:[#allocation2 + $0x14] sm:$0x1] %vm468_vm3, %v446_v9  ;;  %v457_v11 = vld [vmem:[%s3311_s13 + $0x40] sm:$0xf]  ;;  %v458_v12 = vld [vmem:[%s3311_s13 + $0x44] sm:$0x1] }
  0x25   : > { %482 = vst.msk [vmem:[#allocation2 + $0x3c] sm:$0xf] %vm465_vm2, %v456_v10  ;;  %483 = vst.msk [vmem:[#allocation2 + $0x40] sm:$0xf] %vm465_vm2, %v457_v11  ;;  %v448_v13 = vld [vmem:[%s3311_s13 + $0x1c] sm:$0xf] }
  0x26   : > { %484 = vst.msk [vmem:[#allocation2 + $0x44] sm:$0x1] %vm468_vm3, %v458_v12  ;;  %v447_v14 = vld [vmem:[%s3311_s13 + $0x18] sm:$0xf]  ;;  %v460_v15 = vld [vmem:[%s3311_s13 + $0x4c] sm:$0xf] }
  0x27   : > { %474 = vst.msk [vmem:[#allocation2 + $0x1c] sm:$0xf] %vm465_vm2, %v448_v13  ;;  %473 = vst.msk [vmem:[#allocation2 + $0x18] sm:$0xf] %vm465_vm2, %v447_v14  ;;  %v459_v16 = vld [vmem:[%s3311_s13 + $0x48] sm:$0xf] }
  0x28   : > { %486 = vst.msk [vmem:[#allocation2 + $0x4c] sm:$0xf] %vm465_vm2, %v460_v15  ;;  %v449_v17 = vld [vmem:[%s3311_s13 + $0x20] sm:$0x1]  ;;  %v461_v18 = vld [vmem:[%s3311_s13 + $0x50] sm:$0x1] }
  0x29   : > { %485 = vst.msk [vmem:[#allocation2 + $0x48] sm:$0xf] %vm465_vm2, %v459_v16  ;;  %v451_v19 = vld [vmem:[%s3311_s13 + $0x28] sm:$0xf]  ;;  %v450_v20 = vld [vmem:[%s3311_s13 + $0x24] sm:$0xf] }
  0x2a   : > { %475 = vst.msk [vmem:[#allocation2 + $0x20] sm:$0x1] %vm468_vm3, %v449_v17  ;;  %487 = vst.msk [vmem:[#allocation2 + $0x50] sm:$0x1] %vm468_vm3, %v461_v18  ;;  %v463_v21 = vld [vmem:[%s3311_s13 + $0x58] sm:$0xf] }
  0x2b   : > { %477 = vst.msk [vmem:[#allocation2 + $0x28] sm:$0xf] %vm465_vm2, %v451_v19  ;;  %476 = vst.msk [vmem:[#allocation2 + $0x24] sm:$0xf] %vm465_vm2, %v450_v20  ;;  %v462_v22 = vld [vmem:[%s3311_s13 + $0x54] sm:$0xf] }
  0x2c   : > { %489 = vst.msk [vmem:[#allocation2 + $0x58] sm:$0xf] %vm465_vm2, %v463_v21  ;;  %v452_v23 = vld [vmem:[%s3311_s13 + $0x2c] sm:$0x1]  ;;  %v464_v24 = vld [vmem:[%s3311_s13 + $0x5c] sm:$0x1] }
  0x2d   : > { %v820_v25 = vld [vmem:[#allocation2] sm:$0xe]  ;;  %v821_v26 = vld [vmem:[#allocation2 + $0x4] sm:$0xf]  ;;  %v822_v27 = vld [vmem:[#allocation2 + $0x8] sm:$0x1] }
  0x2e   : > { %488 = vst.msk [vmem:[#allocation2 + $0x54] sm:$0xf] %vm465_vm2, %v462_v22  ;;  %v2758_v28 = vrot.slane %v820_v25, 9  ;;  %v873_v29 = vrot.slane %v821_v26, 5  ;;  %v876_v30 = vrot.slane %v822_v27, 5  ;;  %s4208_s13 = smov 48  }
  0x2f   : > { %478 = vst.msk [vmem:[#allocation2 + $0x2c] sm:$0x1] %vm468_vm3, %v452_v23  ;;  %490 = vst.msk [vmem:[#allocation2 + $0x5c] sm:$0x1] %vm468_vm3, %v464_v24  ;;  %v832_v31 = vld [vmem:[#allocation2 + $0x30] sm:$0xe] }
  0x30   : > { %v833_v32 = vld [vmem:[#allocation2 + $0x34] sm:$0xf]  ;;  %v2762_v33 = vrot.slane %v832_v31, 9  ;;  %v834_v34 = vld [vmem:[#allocation2 + $0x38] sm:$0x1]  ;;  %v874_v35 = vsel %vm3315_vm4, %v2758_v28, %v873_v29  ;;  %v875_v36 = vrot.slane %v873_v29, 4 }
  0x31   : > { %v901_v37 = vrot.slane %v833_v32, 5  ;;  %v904_v38 = vrot.slane %v834_v34, 5  ;;  %v823_v39 = vld [vmem:[#allocation2 + $0xc] sm:$0xe]  ;;  %927 = vrot.lane.b32.xlu0 %v874_v35, %s3180_s14  ;;  %v824_v40 = vld [vmem:[#allocation2 + $0x10] sm:$0xf] }
  0x32   : > { %v2759_v41 = vrot.slane %v823_v39, 9  ;;  %v825_v42 = vld [vmem:[#allocation2 + $0x14] sm:$0x1]  ;;  %v877_v43 = vsel %vm3315_vm4, %v875_v36, %v876_v30  ;;  %v880_v46 = vrot.slane %v824_v40, 5  ;;  %v835_v47 = vld [vmem:[#allocation2 + $0x3c] sm:$0xe] }
  0x33   : > { %v902_v44 = vsel %vm3315_vm4, %v2762_v33, %v901_v37  ;;  %v903_v45 = vrot.slane %v901_v37, 4  ;;  %v836_v48 = vld [vmem:[#allocation2 + $0x40] sm:$0xf]  ;;  %929 = vrot.lane.b32.xlu1 %v877_v43, %s3180_s14  ;;  %v883_v49 = vrot.slane %v825_v42, 5  ;;  %v837_v51 = vld [vmem:[#allocation2 + $0x44] sm:$0x1] }
  0x34   : > { %v908_v50 = vrot.slane %v836_v48, 5  ;;  %v882_v53 = vrot.slane %v880_v46, 4  ;;  %v2763_v54 = vrot.slane %v835_v47, 9  ;;  %v536_v55 = vld [vmem:[#allocation2] sm:$0xf]  ;;  %v881_v57 = vsel %vm3315_vm4, %v2759_v41, %v880_v46 }
  0x35   : > { %v905_v52 = vsel %vm3315_vm4, %v903_v45, %v904_v38  ;;  %v537_v56 = vld [vmem:[#allocation2 + $0x4] sm:$0xf]  ;;  %943 = vrot.lane.b32.xlu0 %v902_v44, %s3180_s14  ;;  %v911_v58 = vrot.slane %v837_v51, 5  ;;  %v564_v59 = vshrl.u32 %v536_v55, 16  ;;  %v567_v60 = vshll.u32 %v536_v55, 16 }
  0x36   : > { %v548_v61 = vld [vmem:[#allocation2 + $0x30] sm:$0xf]  ;;  %v910_v62 = vrot.slane %v908_v50, 4  ;;  %v573_v63 = vshll.u32 %v537_v56, 16  ;;  %v577_v0 = vshrl.u32 %v537_v56, 16  ;;  %v884_v4 = vsel %vm3315_vm4, %v882_v53, %v883_v49 }
  0x37   : > { %v549_v1 = vld [vmem:[#allocation2 + $0x34] sm:$0xf]  ;;  %v660_v3 = vshrl.u32 %v548_v61, 16  ;;  %945 = vrot.lane.b32.xlu1 %v905_v52, %s3180_s14  ;;  %v566_v5 = vrot.slane %v564_v59, 4  ;;  %v569_v6 = vrot.slane %v567_v60, 5  ;;  %v663_v7 = vshll.u32 %v548_v61, 16 }
  0x38   : > { %v538_v8 = vld [vmem:[#allocation2 + $0x8] sm:$0x1]  ;;  %v575_v9 = vrot.slane %v573_v63, 5  ;;  %v669_v11 = vshll.u32 %v549_v1, 16  ;;  %v673_v12 = vshrl.u32 %v549_v1, 16  ;;  %v579_v16 = vrot.slane %v577_v0, 4 }
  0x39   : > { %v662_v10 = vrot.slane %v660_v3, 4  ;;  %v550_v13 = vld [vmem:[#allocation2 + $0x38] sm:$0x1]  ;;  %931 = vrot.lane.b32.xlu0 %v881_v57, %s3180_s14  ;;  %v570_v14 = vor.u32 %v569_v6, %v566_v5  ;;  %v665_v15 = vrot.slane %v663_v7, 5  ;;  %v583_v17 = vshll.u32 %v538_v8, 16 }
  0x3a   : > { %v539_v18 = vld [vmem:[#allocation2 + $0xc] sm:$0xf]  ;;  %v909_v19 = vsel %vm3315_vm4, %v2763_v54, %v908_v50  ;;  %v671_v20 = vrot.slane %v669_v11, 5  ;;  %v675_v21 = vrot.slane %v673_v12, 4  ;;  %v540_v22 = vld [vmem:[#allocation2 + $0x10] sm:$0xf]  ;;  %v580_v27 = vor.u32 %v579_v16, %v575_v9 }
  0x3b   : > { %v588_v23 = vshrl.u32 %v539_v18, 16  ;;  %933 = vrot.lane.b32.xlu1 %v884_v4, %s3180_s14  ;;  %v571_v25 = vrot.slane %v570_v14, 4  ;;  %v666_v26 = vor.u32 %v665_v15, %v662_v10  ;;  %v679_v28 = vshll.u32 %v550_v13, 16  ;;  %v551_v33 = vld [vmem:[#allocation2 + $0x3c] sm:$0xf] }
  0x3c   : > { %v912_v29 = vsel %vm3315_vm4, %v910_v62, %v911_v58  ;;  %v676_v30 = vor.u32 %v675_v21, %v671_v20  ;;  %v591_v32 = vshll.u32 %v539_v18, 16  ;;  %v585_v35 = vrot.slane %v583_v17, 5  ;;  %v541_v37 = vld [vmem:[#allocation2 + $0x14] sm:$0x1]  ;;  %v552_v42 = vld [vmem:[#allocation2 + $0x40] sm:$0xf] }
  0x3d   : > { %v590_v31 = vrot.slane %v588_v23, 4  ;;  %947 = vrot.lane.b32.xlu0 %v909_v19, %s3180_s14  ;;  %v667_v34 = vrot.slane %v666_v26, 4  ;;  %v597_v36 = vshll.u32 %v540_v22, 16  ;;  %v576_v38 = vsel %vm3387_vm7, %v571_v25, %v575_v9  ;;  %v553_v55 = vld [vmem:[#allocation2 + $0x44] sm:$0x1] }
  0x3e   : > { %v581_v39 = vrot.slane %v580_v27, 4  ;;  %v593_v40 = vrot.slane %v591_v32, 5  ;;  %v601_v41 = vshrl.u32 %v540_v22, 16  ;;  %v677_v43 = vrot.slane %v676_v30, 4  ;;  %v1090_v11 = vld [vmem:[#allocation2 + $0xc] sm:$0xf] }
  0x3f   : > { %949 = vrot.lane.b32.xlu1 %v912_v29, %s3180_s14  ;;  %v681_v44 = vrot.slane %v679_v28, 5  ;;  %v599_v45 = vrot.slane %v597_v36, 5  ;;  %v684_v46 = vshrl.u32 %v551_v33, 16  ;;  %v672_v47 = vsel %vm3387_vm7, %v667_v34, %v671_v20  ;;  %v1091_v13 = vld [vmem:[#allocation2 + $0x10] sm:$0xf] }
  0x40   : > { %v594_v48 = vor.u32 %v593_v40, %v590_v31  ;;  %v603_v49 = vrot.slane %v601_v41, 4  ;;  %v607_v50 = vshll.u32 %v541_v37, 16  ;;  %v687_v52 = vshll.u32 %v551_v33, 16  ;;  %v993_v16 = vld [vmem:[#allocation2 + $0xc] sm:$0xf] }
  0x41   : > { %755 = vrot.lane.b32.xlu0 %v576_v38, %s3181_s18  ;;  %v686_v51 = vrot.slane %v684_v46, 4  ;;  %v693_v53 = vshll.u32 %v552_v42, 16  ;;  %v697_v54 = vshrl.u32 %v552_v42, 16  ;;  %v586_v56 = vsel %vm3387_vm7, %v581_v39, %v585_v35  ;;  %v1102_v17 = vld [vmem:[#allocation2 + $0x3c] sm:$0xf] }
  0x42   : > { %v595_v57 = vrot.slane %v594_v48, 4  ;;  %v604_v58 = vor.u32 %v603_v49, %v599_v45  ;;  %v689_v59 = vrot.slane %v687_v52, 5  ;;  %v682_v62 = vsel %vm3387_vm7, %v677_v43, %v681_v44  ;;  %v994_v20 = vld [vmem:[#allocation2 + $0x10] sm:$0xf]  ;;  %v1103_v21 = vld [vmem:[#allocation2 + $0x40] sm:$0xf] }
  0x43   : > { %771 = vrot.lane.b32.xlu1 %v672_v47, %s3181_s18  ;;  %v695_v60 = vrot.slane %v693_v53, 5  ;;  %v699_v61 = vrot.slane %v697_v54, 4  ;;  %v609_v0 = vrot.slane %v607_v50, 5  ;;  %v703_v1 = vshll.u32 %v553_v55, 16  ;;  %v1001_v27 = vld [vmem:[#allocation2 + $0x3c] sm:$0xf] }
  0x44   : > { %v605_v63 = vrot.slane %v604_v58, 4  ;;  %v690_v3 = vor.u32 %v689_v59, %v686_v51  ;;  %v600_v5 = vsel %vm3387_vm7, %v595_v57, %v599_v45  ;;  %v1115_v14 = vshrl.u32 %v1090_v11, 16  ;;  %v1093_v32 = vld [vmem:[#allocation2 + $0x18] sm:$0xf]  ;;  %v1002_v33 = vld [vmem:[#allocation2 + $0x40] sm:$0xf] }
  0x45   : > { %757 = vrot.lane.b32.xlu0 %v586_v56, %s3181_s18  ;;  %v700_v4 = vor.u32 %v699_v61, %v695_v60  ;;  %v705_v9 = vrot.slane %v703_v1, 5  ;;  %v1118_v15 = vshll.u32 %v1090_v11, 16  ;;  %v1124_v18 = vshll.u32 %v1091_v13, 16  ;;  %v1092_v34 = vld [vmem:[#allocation2 + $0x14] sm:$0x1] }
  0x46   : > { %v691_v6 = vrot.slane %v690_v3, 4  ;;  %v610_v7 = vsel %vm3387_vm7, %v605_v63, %v609_v0  ;;  %v1128_v19 = vshrl.u32 %v1091_v13, 16  ;;  %v1117_v22 = vrot.slane %v1115_v14, 4  ;;  %v1094_v38 = vld [vmem:[#allocation2 + $0x1c] sm:$0xf] }
  0x47   : > { %773 = vrot.lane.b32.xlu1 %v682_v62, %s3181_s18  ;;  %v701_v8 = vrot.slane %v700_v4, 4  ;;  %v1120_v23 = vrot.slane %v1118_v15, 5  ;;  %v1211_v25 = vshrl.u32 %v1102_v17, 16  ;;  %v1214_v26 = vshll.u32 %v1102_v17, 16  ;;  %v995_v39 = vld [vmem:[#allocation2 + $0x18] sm:$0xf] }
  0x48   : > { %v696_v10 = vsel %vm3387_vm7, %v691_v6, %v695_v60  ;;  %v1126_v28 = vrot.slane %v1124_v18, 5  ;;  %v1130_v29 = vrot.slane %v1128_v19, 4  ;;  %v1220_v30 = vshll.u32 %v1103_v21, 16  ;;  %v1105_v46 = vld [vmem:[#allocation2 + $0x48] sm:$0xf] }
  0x49   : > { %759 = vrot.lane.b32.xlu0 %v600_v5, %s3181_s18  ;;  %v706_v12 = vsel %vm3387_vm7, %v701_v8, %v705_v9  ;;  %v1224_v31 = vshrl.u32 %v1103_v21, 16  ;;  %v1121_v35 = vor.u32 %v1120_v23, %v1117_v22  ;;  %v1213_v36 = vrot.slane %v1211_v25, 4  ;;  %v996_v47 = vld [vmem:[#allocation2 + $0x1c] sm:$0xf]  ;;  %v1104_v48 = vld [vmem:[#allocation2 + $0x44] sm:$0x1] }
  0x4a   : > { %v1216_v37 = vrot.slane %v1214_v26, 5  ;;  %v1139_v40 = vshrl.u32 %v1093_v32, 16  ;;  %v1142_v41 = vshll.u32 %v1093_v32, 16  ;;  %v1131_v42 = vor.u32 %v1130_v29, %v1126_v28  ;;  %v1106_v53 = vld [vmem:[#allocation2 + $0x4c] sm:$0xf] }
  0x4b   : > { %761 = vrot.lane.b32.xlu1 %v610_v7, %s3181_s18  ;;  %v1134_v43 = vshll.u32 %v1092_v34, 16  ;;  %v1222_v44 = vrot.slane %v1220_v30, 5  ;;  %v1226_v45 = vrot.slane %v1224_v31, 4  ;;  %v1148_v49 = vshll.u32 %v1094_v38, 16  ;;  %v1003_v54 = vld [vmem:[#allocation2 + $0x48] sm:$0xf] }
  0x4c   : > { %v1152_v50 = vshrl.u32 %v1094_v38, 16  ;;  %v1122_v51 = vrot.slane %v1121_v35, 4  ;;  %v1217_v52 = vor.u32 %v1216_v37, %v1213_v36  ;;  %v1141_v55 = vrot.slane %v1139_v40, 4  ;;  %v1004_v59 = vld [vmem:[#allocation2 + $0x4c] sm:$0xf] }
  0x4d   : > { %775 = vrot.lane.b32.xlu0 %v696_v10, %s3181_s18  ;;  %v1144_v56 = vrot.slane %v1142_v41, 5  ;;  %v1235_v57 = vshrl.u32 %v1105_v46, 16  ;;  %v1238_v58 = vshll.u32 %v1105_v46, 16  ;;  %v1132_v60 = vrot.slane %v1131_v42, 4  ;;  %v1095_v0 = vld [vmem:[#allocation2 + $0x20] sm:$0x1] }
  0x4e   : > { %v1136_v61 = vrot.slane %v1134_v43, 5  ;;  %v1227_v62 = vor.u32 %v1226_v45, %v1222_v44  ;;  %v1230_v63 = vshll.u32 %v1104_v48, 16  ;;  %v1150_v1 = vrot.slane %v1148_v49, 5  ;;  %v1107_v18 = vld [vmem:[#allocation2 + $0x50] sm:$0x1] }
  0x4f   : > { %777 = vrot.lane.b32.xlu1 %v706_v12, %s3181_s18  ;;  %v1154_v3 = vrot.slane %v1152_v50, 4  ;;  %v1244_v4 = vshll.u32 %v1106_v53, 16  ;;  %v1248_v5 = vshrl.u32 %v1106_v53, 16  ;;  %v1127_v6 = vsel %vm3387_vm7, %v1122_v51, %v1126_v28  ;;  %v1372_v28 = vld [vmem:[#allocation2 + $0x10] sm:$0xf] }
  0x50   : > { %v1218_v7 = vrot.slane %v1217_v52, 4  ;;  %v1145_v8 = vor.u32 %v1144_v56, %v1141_v55  ;;  %v1237_v9 = vrot.slane %v1235_v57, 4  ;;  %v1240_v10 = vrot.slane %v1238_v58, 5  ;;  %v1371_v31 = vld [vmem:[#allocation2 + $0xc] sm:$0xe] }
  0x51   : > { %1025 = vrot.lane.b32.xlu0 %v993_v16, %s3182_s20  ;;  %v1137_v11 = vsel %vm3387_vm7, %v1132_v60, %v1136_v61  ;;  %v1232_v12 = vrot.slane %v1230_v63, 5  ;;  %v1158_v13 = vshll.u32 %v1095_v0, 16  ;;  %v1228_v14 = vrot.slane %v1227_v62, 4  ;;  %v1373_v36 = vld [vmem:[#allocation2 + $0x14] sm:$0x1] }
  0x52   : > { %v1155_v15 = vor.u32 %v1154_v3, %v1150_v1  ;;  %v1246_v16 = vrot.slane %v1244_v4, 5  ;;  %v1250_v17 = vrot.slane %v1248_v5, 4  ;;  %v1223_v19 = vsel %vm3387_vm7, %v1218_v7, %v1222_v44  ;;  %v1384_v37 = vld [vmem:[#allocation2 + $0x40] sm:$0xf]  ;;  %v1383_v40 = vld [vmem:[#allocation2 + $0x3c] sm:$0xe] }
  0x53   : > { %1027 = vrot.lane.b32.xlu1 %v994_v20, %s3182_s20  ;;  %v1146_v20 = vrot.slane %v1145_v8, 4  ;;  %v1241_v21 = vor.u32 %v1240_v10, %v1237_v9  ;;  %v1160_v22 = vrot.slane %v1158_v13, 5  ;;  %v1233_v23 = vsel %vm3387_vm7, %v1228_v14, %v1232_v12  ;;  %v1385_v45 = vld [vmem:[#allocation2 + $0x44] sm:$0x1]  ;;  %v1375_v46 = vld [vmem:[#allocation2 + $0x1c] sm:$0xf] }
  0x54   : > { %v1156_v25 = vrot.slane %v1155_v15, 4  ;;  %v1251_v26 = vor.u32 %v1250_v17, %v1246_v16  ;;  %v1421_v35 = vrot.slane %v1372_v28, 5  ;;  %v1424_v43 = vrot.slane %v1373_v36, 5  ;;  %v1374_v49 = vld [vmem:[#allocation2 + $0x18] sm:$0xe] }
  0x55   : > { %1041 = vrot.lane.b32.xlu0 %v1001_v27, %s3182_s20  ;;  %v1254_v27 = vshll.u32 %v1107_v18, 16  ;;  %v1151_v29 = vsel %vm3387_vm7, %v1146_v20, %v1150_v1  ;;  %v1242_v30 = vrot.slane %v1241_v21, 4  ;;  %v1449_v44 = vrot.slane %v1384_v37, 5  ;;  %v504_v50 = vld [vmem:[#allocation2] sm:$0xf] }
  0x56   : > { %v1161_v32 = vsel %vm3387_vm7, %v1156_v25, %v1160_v22  ;;  %v1423_v42 = vrot.slane %v1421_v35, 4  ;;  %v2770_v48 = vrot.slane %v1383_v40, 9  ;;  %v1452_v53 = vrot.slane %v1385_v45, 5  ;;  %520 = vst.msk [vmem:[#allocation3] sm:$0xf] %vm465_vm2, %v504_v50 }
  0x57   : > { %1043 = vrot.lane.b32.xlu1 %v1002_v33, %s3182_s20  ;;  %v1252_v33 = vrot.slane %v1251_v26, 4  ;;  %v1256_v34 = vrot.slane %v1254_v27, 5  ;;  %v1247_v38 = vsel %vm3387_vm7, %v1242_v30, %v1246_v16  ;;  %v1451_v52 = vrot.slane %v1449_v44, 4  ;;  %v512_v55 = vld [vmem:[#allocation2 + $0x30] sm:$0xf] }
  0x58   : > { %v1425_v51 = vsel %vm3315_vm4, %v1423_v42, %v1424_v43  ;;  %v1376_v56 = vld [vmem:[#allocation2 + $0x20] sm:$0x1]  ;;  %v1387_v57 = vld [vmem:[#allocation2 + $0x4c] sm:$0xf]  ;;  %528 = vst.msk [vmem:[#allocation3 + $0x20] sm:$0xf] %vm465_vm2, %v512_v55  ;;  %v1450_v58 = vsel %vm3315_vm4, %v2770_v48, %v1449_v44 }
  0x59   : > { %1029 = vrot.lane.b32.xlu0 %v995_v39, %s3182_s20  ;;  %v2766_v39 = vrot.slane %v1371_v31, 9  ;;  %v1257_v41 = vsel %vm3387_vm7, %v1252_v33, %v1256_v34  ;;  %v1386_v60 = vld [vmem:[#allocation2 + $0x48] sm:$0xe]  ;;  %v1453_v61 = vsel %vm3315_vm4, %v1451_v52, %v1452_v53  ;;  %v1431_v63 = vrot.slane %v1376_v56, 5  ;;  %v505_v1 = vld [vmem:[#allocation2 + $0x4] sm:$0xf] }
  0x5a   : > { %v1456_v0 = vrot.slane %v1387_v57, 5  ;;  %v1388_v3 = vld [vmem:[#allocation2 + $0x50] sm:$0x1]  ;;  %521 = vst.msk [vmem:[#allocation3 + $0x4] sm:$0xf] %vm465_vm2, %v505_v1 }
  0x5b   : > { %1031 = vrot.lane.b32.xlu1 %v996_v47, %s3182_s20  ;;  %v1422_v47 = vsel %vm3315_vm4, %v2766_v39, %v1421_v35  ;;  %v513_v4 = vld [vmem:[#allocation2 + $0x34] sm:$0xf]  ;;  %v1459_v9 = vrot.slane %v1388_v3, 5  ;;  %v506_v10 = vld [vmem:[#allocation2 + $0xc] sm:$0xf] }
  0x5c   : > { %529 = vst.msk [vmem:[#allocation3 + $0x24] sm:$0xf] %vm465_vm2, %v513_v4  ;;  %v1458_v8 = vrot.slane %v1456_v0, 4  ;;  %522 = vst.msk [vmem:[#allocation3 + $0x8] sm:$0xf] %vm465_vm2, %v506_v10 }
  0x5d   : > { %1045 = vrot.lane.b32.xlu0 %v1003_v54, %s3182_s20  ;;  %v1428_v54 = vrot.slane %v1375_v46, 5  ;;  %v1638_v13 = vld [vmem:[#allocation2 + $0x18] sm:$0xf]  ;;  %v1639_v15 = vld [vmem:[#allocation2 + $0x1c] sm:$0xf] }
  0x5e   : > { %v1460_v14 = vsel %vm3315_vm4, %v1458_v8, %v1459_v9  ;;  %v514_v16 = vld [vmem:[#allocation2 + $0x3c] sm:$0xf]  ;;  %v1663_v17 = vshrl.u32 %v1638_v13, 16  ;;  %v1666_v18 = vshll.u32 %v1638_v13, 16  ;;  %v1541_v20 = vld [vmem:[#allocation2 + $0x18] sm:$0xf] }
  0x5f   : > { %1047 = vrot.lane.b32.xlu1 %v1004_v59, %s3182_s20  ;;  %v2767_v59 = vrot.slane %v1374_v49, 9  ;;  %v1430_v62 = vrot.slane %v1428_v54, 4  ;;  %530 = vst.msk [vmem:[#allocation3 + $0x28] sm:$0xf] %vm465_vm2, %v514_v16  ;;  %v1672_v21 = vshll.u32 %v1639_v15, 16  ;;  %v1676_v22 = vshrl.u32 %v1639_v15, 16 }
  0x60   : > { %v1542_v25 = vld [vmem:[#allocation2 + $0x1c] sm:$0xf]  ;;  %v1665_v26 = vrot.slane %v1663_v17, 4  ;;  %v1668_v27 = vrot.slane %v1666_v18, 5  ;;  %v1651_v28 = vld [vmem:[#allocation2 + $0x4c] sm:$0xf] }
  0x61   : > { %1306 = vrot.lane.b32.xlu0 %v1127_v6, %s4204_s29  ;;  %v1429_v5 = vsel %vm3315_vm4, %v2767_v59, %v1428_v54  ;;  %v2771_v6 = vrot.slane %v1386_v60, 9  ;;  %v1432_v7 = vsel %vm3315_vm4, %v1430_v62, %v1431_v63  ;;  %v1550_v33 = vld [vmem:[#allocation2 + $0x4c] sm:$0xf]  ;;  %v3488_v34 = vrot.slane %v1672_v21, 5  ;;  %v1640_v36 = vld [vmem:[#allocation2 + $0x20] sm:$0x1] }
  0x62   : > { %v1678_v35 = vrot.slane %v1676_v22, 4  ;;  %v1768_v37 = vshll.u32 %v1651_v28, 16  ;;  %v1669_v39 = vor.u32 %v1668_v27, %v1665_v26  ;;  %v1642_v40 = vld [vmem:[#allocation2 + $0x28] sm:$0xf]  ;;  %v1543_v44 = vld [vmem:[#allocation2 + $0x24] sm:$0xf] }
  0x63   : > { %1308 = vrot.lane.b32.xlu1 %v1137_v11, %s4204_s29  ;;  %v507_v11 = vld [vmem:[#allocation2 + $0x10] sm:$0xf]  ;;  %v1457_v12 = vsel %vm3315_vm4, %v2771_v6, %v1456_v0  ;;  %v1544_v43 = vld [vmem:[#allocation2 + $0x28] sm:$0xf]  ;;  %v1682_v48 = vshll.u32 %v1640_v36, 16  ;;  %v1696_v53 = vshll.u32 %v1642_v40, 16 }
  0x64   : > { %523 = vst.msk [vmem:[#allocation3 + $0xc] sm:$0xf] %vm465_vm2, %v507_v11  ;;  %v1652_v49 = vld [vmem:[#allocation2 + $0x50] sm:$0x1]  ;;  %v1653_v50 = vld [vmem:[#allocation2 + $0x54] sm:$0xf] }
  0x65   : > { %1322 = vrot.lane.b32.xlu0 %v1223_v19, %s4204_s29  ;;  %v515_v19 = vld [vmem:[#allocation2 + $0x40] sm:$0xf]  ;;  %v1700_v54 = vshrl.u32 %v1642_v40, 16  ;;  %v1654_v55 = vld [vmem:[#allocation2 + $0x58] sm:$0xf]  ;;  %v1670_v57 = vrot.slane %v1669_v39, 4 }
  0x66   : > { %531 = vst.msk [vmem:[#allocation3 + $0x2c] sm:$0xf] %vm465_vm2, %v515_v19  ;;  %v1551_v56 = vld [vmem:[#allocation2 + $0x54] sm:$0xf]  ;;  %v1786_v62 = vshll.u32 %v1653_v50, 16  ;;  %v1684_v1 = vrot.slane %v1682_v48, 5 }
  0x67   : > { %1324 = vrot.lane.b32.xlu1 %v1233_v23, %s4204_s29  ;;  %v1650_v23 = vld [vmem:[#allocation2 + $0x48] sm:$0xf]  ;;  %v1778_v3 = vshll.u32 %v1652_v49, 16  ;;  %v1792_v4 = vshll.u32 %v1654_v55, 16  ;;  %v1552_v6 = vld [vmem:[#allocation2 + $0x58] sm:$0xf]  ;;  %v1675_v11 = vsel %vm3387_vm7, %v1670_v57, %v3488_v34 }
  0x68   : > { %v1759_v30 = vshrl.u32 %v1650_v23, 16  ;;  %v1762_v31 = vshll.u32 %v1650_v23, 16  ;;  %v1698_v9 = vrot.slane %v1696_v53, 5  ;;  %v1702_v10 = vrot.slane %v1700_v54, 4  ;;  %v1920_v36 = vld [vmem:[#allocation2 + $0x1c] sm:$0xf] }
  0x69   : > { %1310 = vrot.lane.b32.xlu0 %v1151_v29, %s4204_s29  ;;  %v1549_v29 = vld [vmem:[#allocation2 + $0x48] sm:$0xf]  ;;  %v1788_v16 = vrot.slane %v1786_v62, 5  ;;  %v1780_v17 = vrot.slane %v1778_v3, 5  ;;  %v1794_v18 = vrot.slane %v1792_v4, 5 }
  0x6a   : > { %v1761_v45 = vrot.slane %v1759_v30, 4  ;;  %v1764_v46 = vrot.slane %v1762_v31, 5  ;;  %v1703_v22 = vor.u32 %v1702_v10, %v1698_v9  ;;  %v542_v31 = vld [vmem:[#allocation2 + $0x18] sm:$0xf]  ;;  %v1921_v48 = vld [vmem:[#allocation2 + $0x20] sm:$0x1] }
  0x6b   : > { %1312 = vrot.lane.b32.xlu1 %v1161_v32, %s4204_s29  ;;  %v1641_v32 = vld [vmem:[#allocation2 + $0x24] sm:$0xf]  ;;  %v612_v40 = vshrl.u32 %v542_v31, 16  ;;  %v1932_v49 = vld [vmem:[#allocation2 + $0x4c] sm:$0xf] }
  0x6c   : > { %v1690_v42 = vshll.u32 %v1641_v32, 16  ;;  %v1765_v60 = vor.u32 %v1764_v46, %v1761_v45  ;;  %v1969_v45 = vrot.slane %v1920_v36, 5  ;;  %v1919_v46 = vld [vmem:[#allocation2 + $0x18] sm:$0xe]  ;;  %v1997_v62 = vrot.slane %v1932_v49, 5 }
  0x6d   : > { %1326 = vrot.lane.b32.xlu0 %v1247_v38, %s4204_s29  ;;  %v1772_v38 = vshrl.u32 %v1651_v28, 16  ;;  %v614_v57 = vrot.slane %v612_v40, 4  ;;  %v1922_v40 = vld [vmem:[#allocation2 + $0x24] sm:$0xe] }
  0x6e   : > { %v1692_v59 = vrot.slane %v1690_v42, 5  ;;  %v1766_v13 = vrot.slane %v1765_v60, 4  ;;  %v554_v42 = vld [vmem:[#allocation2 + $0x48] sm:$0xf]  ;;  %v1971_v60 = vrot.slane %v1969_v45, 4 }
  0x6f   : > { %1328 = vrot.lane.b32.xlu1 %v1257_v41, %s4204_s29  ;;  %s411_s29 = sadd.s32 %s2952_s12, %s2951_s19  ;;  %v1687_v41 = vshrl.u32 %v1641_v32, 16  ;;  %v1774_v52 = vrot.slane %v1772_v38, 4  ;;  %v708_v53 = vshrl.u32 %v554_v42, 16  ;;  %v711_v54 = vshll.u32 %v554_v42, 16  ;;  %s3187_s19 = smov 64  }
  0x70   : > { %s2749_s9 = sshll.u32 %s411_s29, 2  ;;  %s4221_s12 = smov 56  }
  0x71   : > { %1475 = vrot.lane.b32.xlu0 %v1422_v47, %s4210_s30  ;;  %v1679_v47 = vor.u32 %v1678_v35, %v3488_v34  ;;  %s3496_s29 = scalar_lea.vmem %s4198_s1, %s2749_s9  ;;  %s4206_s9 = smov 56   ;;  %v1704_v34 = vrot.slane %v1703_v22, 4 }
  0x72   : > { %v492_v63 = vld [vmem:[%s3496_s29 + $0x4] sm:$0xf]  ;;  %v491_v0 = vld [vmem:[%s3496_s29] sm:$0xf]  ;;  %v493_v32 = vld [vmem:[%s3496_s29 + $0x8] sm:$0x1] }
  0x73   : > { %1477 = vrot.lane.b32.xlu1 %v1425_v51, %s4210_s30  ;;  %v1770_v51 = vrot.slane %v1768_v37, 5  ;;  %499 = vst.msk [vmem:[#allocation2 + $0x64] sm:$0xf] %vm465_vm2, %v492_v63  ;;  %498 = vst.msk [vmem:[#allocation2 + $0x60] sm:$0xf] %vm465_vm2, %v491_v0 }
  0x74   : > { %500 = vst.msk [vmem:[#allocation2 + $0x68] sm:$0x1] %vm468_vm3, %v493_v32  ;;  %v543_v37 = vld [vmem:[#allocation2 + $0x1c] sm:$0xf]  ;;  %v1931_v63 = vld [vmem:[#allocation2 + $0x48] sm:$0xe] }
  0x75   : > { %1491 = vrot.lane.b32.xlu0 %v1450_v58, %s4210_s30  ;;  %v1689_v58 = vrot.slane %v1687_v41, 4  ;;  %v1775_v8 = vor.u32 %v1774_v52, %v1770_v51  ;;  %v1771_v26 = vsel %vm3387_vm7, %v1766_v13, %v1770_v51  ;;  %v615_v41 = vshll.u32 %v542_v31, 16  ;;  %v555_v52 = vld [vmem:[#allocation2 + $0x4c] sm:$0xf]  ;;  %v1933_v0 = vld [vmem:[#allocation2 + $0x50] sm:$0x1] }
  0x76   : > { %v625_v51 = vshrl.u32 %v543_v37, 16  ;;  %v717_v4 = vshll.u32 %v555_v52, 16  ;;  %v2778_v10 = vrot.slane %v1931_v63, 9  ;;  %v1999_v13 = vrot.slane %v1997_v62, 4 }
  0x77   : > { %1493 = vrot.lane.b32.xlu1 %v1453_v61, %s4210_s30  ;;  %v1783_v61 = vshrl.u32 %v1653_v50, 16  ;;  %v1776_v21 = vrot.slane %v1775_v8, 4  ;;  %v621_v50 = vshll.u32 %v543_v37, 16  ;;  %v713_v8 = vrot.slane %v711_v54, 5 }
  0x78   : > { %v627_v3 = vrot.slane %v625_v51, 4  ;;  %v1998_v22 = vsel %vm3315_vm4, %v2778_v10, %v1997_v62  ;;  %v558_v51 = vld [vmem:[#allocation2 + $0x58] sm:$0xf] }
  0x79   : > { %1479 = vrot.lane.b32.xlu0 %v1429_v5, %s4210_s30  ;;  %v1796_v5 = vshrl.u32 %v1654_v55, 16  ;;  %v1785_v15 = vrot.slane %v1783_v61, 4  ;;  %v1972_v61 = vrot.slane %v1921_v48, 5  ;;  %v3074_v10 = vld [vmem:[%s4199_s2 + $0x18] sm:$0xff]  }
  0x7b   : > { %1481 = vrot.lane.b32.xlu1 %v1432_v7, %s4210_s30  ;;  %v1680_v7 = vrot.slane %v1679_v47, 4  ;;  %v1798_v19 = vrot.slane %v1796_v5, 4  ;;  %v1789_v28 = vor.u32 %v1788_v16, %v1785_v15  ;;  %v721_v5 = vshrl.u32 %v555_v52, 16 }
  0x7d   : > { %1495 = vrot.lane.b32.xlu0 %v1457_v12, %s4210_s30  ;;  %v1643_v12 = vld [vmem:[#allocation2 + $0x2c] sm:$0x1]  ;;  %v1790_v39 = vrot.slane %v1789_v28, 4 }
  0x7e   : > { %v1706_v23 = vshll.u32 %v1643_v12, 16  ;;  %v1973_v12 = vsel %vm3315_vm4, %v1971_v60, %v1972_v61 }
  0x7f   : > { %1497 = vrot.lane.b32.xlu1 %v1460_v14, %s4210_s30  ;;  %v1693_v14 = vor.u32 %v1692_v59, %v1689_v58  ;;  %v1795_v55 = vsel %vm3387_vm7, %v1790_v39, %v1794_v18  ;;  %v617_v58 = vrot.slane %v615_v41, 5  ;;  %v1924_v39 = vld [vmem:[#allocation2 + $0x2c] sm:$0x1]  ;;  %s2752_s30 = sshll.u32 %s3302_s17, 5 }
  0x80   : > { %v1708_v35 = vrot.slane %v1706_v23, 5 }
  0x81   : > { %1573 = vrot.lane.b32.xlu0 %v1541_v20, %s4208_s13  ;;  %v1685_v20 = vsel %vm3387_vm7, %v1680_v7, %v1684_v1  ;;  %v1694_v27 = vrot.slane %v1693_v14, 4  ;;  %v623_v1 = vrot.slane %v621_v50, 5  ;;  %v710_v7 = vrot.slane %v708_v53, 4  ;;  %v3565_v50 = vld [vmem:[#allocation2 + $0x58] sm:$0xf] }
  0x82   : > { %v1709_v47 = vsel %vm3387_vm7, %v1704_v34, %v1708_v35  ;;  %v2000_v14 = vrot.slane %v1933_v0, 5  ;;  %v546_v34 = vld [vmem:[#allocation2 + $0x28] sm:$0xf]  ;;  %v2004_v0 = vrot.slane %v3565_v50, 5 }
  0x83   : > { %1575 = vrot.lane.b32.xlu1 %v1542_v25, %s4208_s13  ;;  %v1655_v25 = vld [vmem:[#allocation2 + $0x5c] sm:$0x1]  ;;  %v1699_v38 = vsel %vm3387_vm7, %v1694_v27, %v1698_v9  ;;  %v628_v15 = vor.u32 %v627_v3, %v623_v1 }
  0x84   : > { %v1802_v30 = vshll.u32 %v1655_v25, 16  ;;  %v495_v25 = vld [vmem:[%s3496_s29 + $0x10] sm:$0xf]  ;;  %v2001_v28 = vsel %vm3315_vm4, %v1999_v13, %v2000_v14  ;;  %v547_v14 = vld [vmem:[#allocation2 + $0x2c] sm:$0x1] }
  0x85   : > { %1589 = vrot.lane.b32.xlu0 %v1549_v29, %s4208_s13  ;;  %v1799_v29 = vor.u32 %v1798_v19, %v1794_v18  ;;  %v723_v18 = vrot.slane %v721_v5, 4  ;;  %v556_v19 = vld [vmem:[#allocation2 + $0x50] sm:$0x1]  ;;  %502 = vst.msk [vmem:[#allocation2 + $0x70] sm:$0xf] %vm465_vm2, %v495_v25 }
  0x86   : > { %v3073_v5 = vld [vmem:[%s4199_s2 + $0x20] ss:$0 sps:$4 sm:$0xff]   ;;  %v517_v25 = vld [vmem:[#allocation2 + $0x4c] sm:$0xf] }
  0x87   : > { %1591 = vrot.lane.b32.xlu1 %v1550_v33, %s4208_s13  ;;  %v1781_v33 = vsel %vm3387_vm7, %v1776_v21, %v1780_v17  ;;  %v3537_v17 = vrot.slane %v717_v4, 5  ;;  %v3540_v21 = vld [vmem:[#allocation2 + $0x28] sm:$0xf]  ;;  %v741_v4 = vshll.u32 %v558_v51, 16  ;;  %2948 = vmatprep.subr.msk.bf16.mxu0 %vm2212_vm8, %v3073_v5  ;;  %533 = vst.msk [vmem:[#allocation3 + $0x34] sm:$0xf] %vm465_vm2, %v517_v25 }
  0x88   : > { %v1976_v37 = vrot.slane %v3540_v21, 5  ;;  %2949 = vmatprep.subr.msk.bf16.mxu1 %vm2212_vm8, %v3073_v5 }
  0x89   : > { %1577 = vrot.lane.b32.xlu0 %v1543_v44, %s4208_s13  ;;  %v1804_v44 = vrot.slane %v1802_v30, 5  ;;  %v629_v30 = vrot.slane %v628_v15, 4  ;;  %v724_v32 = vor.u32 %v723_v18, %v3537_v17  ;;  %v496_v15 = vld [vmem:[%s3496_s29 + $0x14] sm:$0x1] }
  0x8a   : > { %v1978_v54 = vrot.slane %v1976_v37, 4  ;;  %503 = vst.msk [vmem:[#allocation2 + $0x74] sm:$0x1] %vm468_vm3, %v496_v15  ;;  %v829_v15 = vld [vmem:[#allocation2 + $0x24] sm:$0xe]  ;;  %vm2474_vm3 = vcmask 195712  }
  0x8b   : > { %1579 = vrot.lane.b32.xlu1 %v1544_v43, %s4208_s13  ;;  %v1800_v43 = vrot.slane %v1799_v29, 4  ;;  %v545_v29 = vld [vmem:[#allocation2 + $0x24] sm:$0xf]  ;;  %v725_v48 = vrot.slane %v724_v32, 4  ;;  %v3076_v32 = vld [vmem:[%s4199_s2 + $0x10] sm:$0xff]  }
  0x8c   : > { %v636_v41 = vshrl.u32 %v545_v29, 16  ;;  %v639_v42 = vshll.u32 %v545_v29, 16  ;;  %v3605_v29 = vrot.slane %v741_v4, 5 }
  0x8d   : > { %1593 = vrot.lane.b32.xlu0 %v1551_v56, %s4208_s13  ;;  %v2774_v56 = vrot.slane %v1919_v46, 9  ;;  %v1805_v59 = vsel %vm3387_vm7, %v1800_v43, %v1804_v44  ;;  %v645_v44 = vshll.u32 %v546_v34, 16  ;;  %v557_v46 = vld [vmem:[#allocation2 + $0x54] sm:$0xf] }
  0x8e   : > { %v641_v60 = vrot.slane %v639_v42, 5  ;;  %v732_v61 = vshrl.u32 %v557_v46, 16  ;;  %v735_v62 = vshll.u32 %v557_v46, 16  ;;  %v3078_v46 = vld [vmem:[%s4199_s2 + $0x8] sm:$0xff]  }
  0x8f   : > { %1595 = vrot.lane.b32.xlu1 %v1552_v6, %s4208_s13  ;;  %v544_v6 = vld [vmem:[#allocation2 + $0x20] sm:$0x1]  ;;  %v1970_v9 = vsel %vm3315_vm4, %v2774_v56, %v1969_v45  ;;  %v649_v45 = vshrl.u32 %v546_v34, 16  ;;  %v2775_v56 = vrot.slane %v1922_v40, 9  ;;  %v559_v34 = vld [vmem:[#allocation2 + $0x5c] sm:$0x1] }
  0x90   : > { %v631_v16 = vshll.u32 %v544_v6, 16  ;;  %v737_v18 = vrot.slane %v735_v62, 5  ;;  %s4218_s13 = smov 32  }
  0x91   : > { %1854 = vrot.lane.b32.xlu0 %v1675_v11, %s4206_s9  ;;  %v618_v11 = vor.u32 %v617_v58, %v614_v57  ;;  %v3573_v57 = vld [vmem:[#allocation2 + $0x5c] sm:$0x1]  ;;  %v1934_v58 = vld [vmem:[#allocation2 + $0x54] sm:$0xe]  ;;  %v651_v3 = vrot.slane %v649_v45, 4  ;;  %v751_v45 = vshll.u32 %v559_v34, 16 }
  0x92   : > { %v633_v31 = vrot.slane %v631_v16, 5  ;;  %v2779_v13 = vrot.slane %v1934_v58, 9  ;;  %v3079_v58 = vld [vmem:[%s4199_s2] sm:$0xff]  }
  0x93   : > { %1856 = vrot.lane.b32.xlu1 %v1685_v20, %s4206_s9  ;;  %v714_v20 = vor.u32 %v713_v8, %v710_v7  ;;  %v619_v23 = vrot.slane %v618_v11, 4  ;;  %v745_v7 = vshrl.u32 %v558_v51, 16  ;;  %v509_v8 = vld [vmem:[#allocation2 + $0x1c] sm:$0xf] }
  0x94   : > { %525 = vst.msk [vmem:[#allocation3 + $0x14] sm:$0xf] %vm465_vm2, %v509_v8 }
  0x95   : > { %1870 = vrot.lane.b32.xlu0 %v1771_v26, %s4206_s9  ;;  %v494_v26 = vld [vmem:[%s3496_s29 + $0xc] sm:$0xf]  ;;  %v715_v36 = vrot.slane %v714_v20, 4  ;;  %s4219_s29 = smov 40  }
  0x96   : > { %501 = vst.msk [vmem:[#allocation2 + $0x6c] sm:$0xf] %vm465_vm2, %v494_v26 }
  0x97   : > { %1872 = vrot.lane.b32.xlu1 %v1781_v33, %s4206_s9  ;;  %v727_v33 = vshll.u32 %v556_v19, 16  ;;  %v720_v53 = vsel %vm3387_vm7, %v715_v36, %v3537_v17  ;;  %v734_v17 = vrot.slane %v732_v61, 4  ;;  %v2214_v19 = vsel %vm2212_vm8, %v3073_v5, 0  ;;  %v839_v61 = vld [vmem:[#allocation2 + $0x4c] sm:$0xf] }
  0x98   : > { %2913 = vmatpush3.bf16.msra.mxu0 %v2214_v19  ;;  %2943 = vmatpush3.bf16.msra.mxu1 %v2214_v19  ;;  %v2005_v36 = vsel %vm3315_vm4, %v2779_v13, %v2004_v0  ;;  %v915_v8 = vrot.slane %v839_v61, 5  ;;  %v1005_v61 = vld [vmem:[#allocation2 + $0x54] sm:$0xf] }
  0x99   : > { %1858 = vrot.lane.b32.xlu0 %v1699_v38, %s4206_s9  ;;  %v624_v38 = vsel %vm3387_vm7, %v619_v23, %v623_v1  ;;  %v729_v49 = vrot.slane %v727_v33, 5  ;;  %v3579_v1 = vrot.slane %v645_v44, 5  ;;  %v2007_v23 = vrot.slane %v3573_v57, 5  ;;  %2914 = vmatprep.subr.bf16.mxu0 %v3074_v10 }
  0x9a   : > { %2939 = vmatprep.subr.bf16.mxu1 %v3074_v10 }
  0x9b   : > { %1860 = vrot.lane.b32.xlu1 %v1709_v47, %s4206_s9  ;;  %v634_v47 = vsel %vm3387_vm7, %v629_v30, %v633_v31  ;;  %v730_v6 = vsel %vm3387_vm7, %v725_v48, %v729_v49  ;;  %v652_v26 = vor.u32 %v651_v3, %v3579_v1  ;;  %v747_v30 = vrot.slane %v745_v7, 4  ;;  %v516_v31 = vld [vmem:[#allocation2 + $0x48] sm:$0xf]  ;;  %v827_v48 = vld [vmem:[#allocation2 + $0x1c] sm:$0xf] }
  0x9c   : > { %532 = vst.msk [vmem:[#allocation3 + $0x30] sm:$0xf] %vm465_vm2, %v516_v31  ;;  %2915 = vmatpush3.bf16.msra.mxu0 %v3074_v10  ;;  %2944 = vmatpush3.bf16.msra.mxu1 %v3074_v10  ;;  %v887_v57 = vrot.slane %v827_v48, 5  ;;  %v518_v3 = vld [vmem:[#allocation2 + $0x54] sm:$0xf] }
  0x9d   : > { %1874 = vrot.lane.b32.xlu0 %v1795_v55, %s4206_s9  ;;  %v1979_v55 = vrot.slane %v1924_v39, 5  ;;  %v748_v44 = vor.u32 %v747_v30, %v3605_v29  ;;  %2916 = vmatprep.subr.bf16.mxu0 %v3076_v32  ;;  %534 = vst.msk [vmem:[#allocation3 + $0x38] sm:$0xf] %vm465_vm2, %v518_v3  ;;  %v830_v10 = vld [vmem:[#allocation2 + $0x28] sm:$0xf] }
  0x9e   : > { %2940 = vmatprep.subr.bf16.mxu1 %v3076_v32 }
  0x9f   : > { %1876 = vrot.lane.b32.xlu1 %v1805_v59, %s4206_s9  ;;  %v638_v59 = vrot.slane %v636_v41, 4  ;;  %v1980_v21 = vsel %vm3315_vm4, %v1978_v54, %v1979_v55  ;;  %v653_v41 = vrot.slane %v652_v26, 4  ;;  %v511_v54 = vld [vmem:[#allocation2 + $0x28] sm:$0xf]  ;;  %v749_v55 = vrot.slane %v748_v44, 4  ;;  %s4220_s9 = smov 48  }
  0xa0   : > { %2917 = vmatpush3.bf16.msra.mxu0 %v3076_v32  ;;  %2945 = vmatpush3.bf16.msra.mxu1 %v3076_v32  ;;  %527 = vst.msk [vmem:[#allocation3 + $0x1c] sm:$0xf] %vm465_vm2, %v511_v54  ;;  %v841_v26 = vld [vmem:[#allocation2 + $0x54] sm:$0xe]  ;;  %v843_v32 = vld [vmem:[#allocation2 + $0x5c] sm:$0x1] }
  0xa1   : > { %2023 = vrot.lane.b32.xlu0 %v1970_v9, %s3187_s19  ;;  %v508_v9 = vld [vmem:[#allocation2 + $0x18] sm:$0xf]  ;;  %v642_v16 = vor.u32 %v641_v60, %v638_v59  ;;  %2918 = vmatprep.subr.bf16.mxu0 %v3078_v46  ;;  %v510_v59 = vld [vmem:[#allocation2 + $0x24] sm:$0xf]  ;;  %v828_v60 = vld [vmem:[#allocation2 + $0x20] sm:$0x1] }
  0xa2   : > { %524 = vst.msk [vmem:[#allocation3 + $0x10] sm:$0xf] %vm465_vm2, %v508_v9  ;;  %2941 = vmatprep.subr.bf16.mxu1 %v3078_v46  ;;  %526 = vst.msk [vmem:[#allocation3 + $0x18] sm:$0xf] %vm465_vm2, %v510_v59  ;;  %v890_v7 = vrot.slane %v828_v60, 5 }
  0xa3   : > { %2025 = vrot.lane.b32.xlu1 %v1973_v12, %s3187_s19  ;;  %v3547_v27 = vpop.permute.xlu0 %927  ;;  %v1977_v12 = vsel %vm3315_vm4, %v2775_v56, %v1976_v37  ;;  %v643_v37 = vrot.slane %v642_v16, 4  ;;  %v753_v56 = vrot.slane %v751_v45, 5  ;;  %v917_v16 = vrot.slane %v915_v8, 4 }
  0xa4   : > { %2919 = vmatpush3.bf16.msra.mxu0 %v3078_v46  ;;  %2946 = vmatpush3.bf16.msra.mxu1 %v3078_v46  ;;  %v1097_v46 = vld [vmem:[#allocation2 + $0x28] sm:$0xf] }
  0xa5   : > { %v3554_v35 = vpop.permute.xlu1 %929  ;;  %2039 = vrot.lane.b32.xlu0 %v1998_v22, %s3187_s19  ;;  %v2006_v22 = vrot.slane %v2004_v0, 4  ;;  %v648_v49 = vsel %vm3387_vm7, %v643_v37, %v3579_v1  ;;  %v519_v1 = vld [vmem:[#allocation2 + $0x58] sm:$0xf]  ;;  %v754_v5 = vsel %vm3387_vm7, %v749_v55, %v753_v56  ;;  %2920 = vmatprep.subr.bf16.mxu0 %v3079_v58  ;;  %v1172_v54 = vshll.u32 %v1097_v46, 16  ;;  %v998_v55 = vld [vmem:[#allocation2 + $0x28] sm:$0xf] }
  0xa6   : > { %535 = vst.msk [vmem:[#allocation3 + $0x3c] sm:$0xf] %vm465_vm2, %v519_v1  ;;  %2942 = vmatprep.subr.bf16.mxu1 %v3079_v58  ;;  %v1109_v56 = vld [vmem:[#allocation2 + $0x58] sm:$0xf]  ;;  %vm2361_vm2 = vcmask 130048  }
  0xa7   : > { %2041 = vrot.lane.b32.xlu1 %v2001_v28, %s3187_s19  ;;  %v3561_v43 = vpop.permute.xlu0 %943  ;;  %v655_v28 = vshll.u32 %v547_v14, 16  ;;  %v2008_v40 = vsel %vm3315_vm4, %v2006_v22, %v2007_v23  ;;  %v2761_v23 = vrot.slane %v829_v15, 9  ;;  %v1268_v3 = vshll.u32 %v1109_v56, 16 }
  0xa8   : > { %2921 = vmatpush3.bf16.msra.mxu0 %v3079_v58  ;;  %2947 = vmatpush3.bf16.msra.mxu1 %v3079_v58 }
  0xa9   : > { %v3567_v52 = vpop.permute.xlu1 %945  ;;  %763 = vrot.lane.b32.xlu0 %v624_v38, %s3181_s18  ;;  %v738_v38 = vor.u32 %v737_v18, %v734_v17  ;;  %v657_v42 = vrot.slane %v655_v28, 5  ;;  %v894_v18 = vrot.slane %v830_v10, 5  ;;  %v1100_v10 = vld [vmem:[#allocation2 + $0x34] sm:$0xf] }
  0xab   : > { %765 = vrot.lane.b32.xlu1 %v634_v47, %s3181_s18  ;;  %v3576_v63 = vpop.permute.xlu0 %931  ;;  %v739_v50 = vrot.slane %v738_v38, 4  ;;  %v896_v28 = vrot.slane %v894_v18, 4  ;;  %v895_v34 = vsel %vm3315_vm4, %v2761_v23, %v894_v18  ;;  %v1200_v23 = vshrl.u32 %v1100_v10, 16 }
  0xad   : > { %v3589_v11 = vpop.permute.xlu1 %933  ;;  %779 = vrot.lane.b32.xlu0 %v720_v53, %s3181_s18  ;;  %v826_v53 = vld [vmem:[#allocation2 + $0x18] sm:$0xe]  ;;  %v744_v62 = vsel %vm3387_vm7, %v739_v50, %v3605_v29  ;;  %v997_v50 = vld [vmem:[#allocation2 + $0x24] sm:$0xf] }
  0xae   : > { %v2760_v0 = vrot.slane %v826_v53, 9 }
  0xaf   : > { %781 = vrot.lane.b32.xlu1 %v730_v6, %s3181_s18  ;;  %v3599_v20 = vpop.permute.xlu0 %947  ;;  %v889_v6 = vrot.slane %v887_v57, 4 }
  0xb1   : > { %v3611_v33 = vpop.permute.xlu1 %949  ;;  %2027 = vrot.lane.b32.xlu0 %v1977_v12, %s3187_s19  ;;  %v888_v12 = vsel %vm3315_vm4, %v2760_v0, %v887_v57  ;;  %v3705_v0 = vrot.slane %v1172_v54, 5 }
  0xb3   : > { %2029 = vrot.lane.b32.xlu1 %v1980_v21, %s3187_s19  ;;  %v756_v39 = vpop.permute.xlu0 %755  ;;  %v831_v21 = vld [vmem:[#allocation2 + $0x2c] sm:$0x1] }
  0xb4   : > { %804 = vst.msk [vmem:[#allocation3] sm:$0xf] %vm803_vm9, %v756_v39  ;;  %v897_v29 = vrot.slane %v831_v21, 5  ;;  %v925_v39 = vrot.slane %v843_v32, 5  ;;  %v1000_v21 = vld [vmem:[#allocation2 + $0x34] sm:$0xf] }
  0xb5   : > { %v772_v47 = vpop.permute.xlu1 %771  ;;  %2043 = vrot.lane.b32.xlu0 %v2005_v36, %s3187_s19  ;;  %976 = vst.msk [vmem:[#allocation3] sm:$0xf] %vm975_vm10, %v3547_v27  ;;  %v658_v27 = vsel %vm3387_vm7, %v653_v41, %v657_v42  ;;  %v1096_v42 = vld [vmem:[#allocation2 + $0x24] sm:$0xf] }
  0xb6   : > { %812 = vst.msk [vmem:[#allocation3 + $0x20] sm:$0xf] %vm803_vm9, %v772_v47  ;;  %v898_v37 = vsel %vm3315_vm4, %v896_v28, %v897_v29  ;;  %v1163_v48 = vshrl.u32 %v1096_v42, 16  ;;  %v1112_v28 = vld [vmem:[#allocation2 + $0x64] sm:$0xf] }
  0xb7   : > { %2045 = vrot.lane.b32.xlu1 %v2008_v40, %s3187_s19  ;;  %v758_v51 = vpop.permute.xlu0 %757  ;;  %984 = vst.msk [vmem:[#allocation3 + $0x20] sm:$0xf] %vm975_vm10, %v3561_v43  ;;  %v1007_v29 = vld [vmem:[#allocation2 + $0x60] sm:$0xf] }
  0xb8   : > { %805 = vst.msk [vmem:[#allocation3 + $0x4] sm:$0xf] %vm803_vm9, %v758_v51  ;;  %v1108_v51 = vld [vmem:[#allocation2 + $0x54] sm:$0xf]  ;;  %v1165_v58 = vrot.slane %v1163_v48, 4 }
  0xb9   : > { %v774_v43 = vpop.permute.xlu1 %773  ;;  %767 = vrot.lane.b32.xlu0 %v648_v49, %s3181_s18  ;;  %977 = vst.msk [vmem:[#allocation3 + $0x4] sm:$0xf] %vm975_vm10, %v3554_v35  ;;  %v838_v35 = vld [vmem:[#allocation2 + $0x48] sm:$0xe]  ;;  %v1166_v49 = vshll.u32 %v1096_v42, 16  ;;  %v1262_v60 = vshll.u32 %v1108_v51, 16 }
  0xba   : > { %813 = vst.msk [vmem:[#allocation3 + $0x24] sm:$0xf] %vm803_vm9, %v774_v43  ;;  %v2764_v13 = vrot.slane %v838_v35, 9  ;;  %v1259_v43 = vshrl.u32 %v1108_v51, 16  ;;  %v1099_v35 = vld [vmem:[#allocation2 + $0x30] sm:$0xf] }
  0xbb   : > { %769 = vrot.lane.b32.xlu1 %v658_v27, %s3181_s18  ;;  %v760_v4 = vpop.permute.xlu0 %759  ;;  %985 = vst.msk [vmem:[#allocation3 + $0x24] sm:$0xf] %vm975_vm10, %v3567_v52  ;;  %v840_v52 = vld [vmem:[#allocation2 + $0x50] sm:$0x1]  ;;  %v1176_v27 = vshrl.u32 %v1097_v46, 16  ;;  %v1168_v59 = vrot.slane %v1166_v49, 5 }
  0xbc   : > { %806 = vst.msk [vmem:[#allocation3 + $0x8] sm:$0xf] %vm803_vm9, %v760_v4  ;;  %v918_v17 = vrot.slane %v840_v52, 5  ;;  %v916_v22 = vsel %vm3315_vm4, %v2764_v13, %v915_v8  ;;  %v1272_v4 = vshrl.u32 %v1109_v56, 16  ;;  %v1264_v52 = vrot.slane %v1262_v60, 5 }
  0xbd   : > { %v762_v9 = vpop.permute.xlu1 %761  ;;  %783 = vrot.lane.b32.xlu0 %v744_v62, %s3181_s18  ;;  %978 = vst.msk [vmem:[#allocation3 + $0x8] sm:$0xf] %vm975_vm10, %v3576_v63  ;;  %v891_v63 = vsel %vm3315_vm4, %v889_v6, %v890_v7  ;;  %v1178_v1 = vrot.slane %v1176_v27, 4  ;;  %v1098_v6 = vld [vmem:[#allocation2 + $0x2c] sm:$0x1]  ;;  %v1169_v8 = vor.u32 %v1168_v59, %v1165_v58  ;;  %v1187_v13 = vshrl.u32 %v1099_v35, 16 }
  0xbe   : > { %807 = vst.msk [vmem:[#allocation3 + $0xc] sm:$0xf] %vm803_vm9, %v762_v9  ;;  %v1261_v9 = vrot.slane %v1259_v43, 4  ;;  %v1274_v18 = vrot.slane %v1272_v4, 4  ;;  %v1202_v42 = vrot.slane %v1200_v23, 4 }
  0xbf   : > { %785 = vrot.lane.b32.xlu1 %v754_v5, %s3181_s18  ;;  %v776_v14 = vpop.permute.xlu0 %775  ;;  %979 = vst.msk [vmem:[#allocation3 + $0xc] sm:$0xf] %vm975_vm10, %v3589_v11  ;;  %v842_v11 = vld [vmem:[#allocation2 + $0x58] sm:$0xf]  ;;  %v1389_v23 = vld [vmem:[#allocation2 + $0x54] sm:$0xe] }
  0xc0   : > { %814 = vst.msk [vmem:[#allocation3 + $0x28] sm:$0xf] %vm803_vm9, %v776_v14  ;;  %v922_v30 = vrot.slane %v842_v11, 5  ;;  %v1006_v5 = vld [vmem:[#allocation2 + $0x58] sm:$0xf]  ;;  %v1190_v14 = vshll.u32 %v1099_v35, 16 }
  0xc1   : > { %v778_v19 = vpop.permute.xlu1 %777  ;;  %935 = vrot.lane.b32.xlu0 %v888_v12, %s3180_s14  ;;  %986 = vst.msk [vmem:[#allocation3 + $0x28] sm:$0xf] %vm975_vm10, %v3599_v20  ;;  %v919_v20 = vsel %vm3315_vm4, %v917_v16, %v918_v17  ;;  %v999_v12 = vld [vmem:[#allocation2 + $0x30] sm:$0xf]  ;;  %v1182_v16 = vshll.u32 %v1098_v6, 16  ;;  %v3712_v17 = vrot.slane %v1268_v3, 5 }
  0xc2   : > { %815 = vst.msk [vmem:[#allocation3 + $0x2c] sm:$0xf] %vm803_vm9, %v778_v19  ;;  %v924_v38 = vrot.slane %v922_v30, 4  ;;  %v1111_v19 = vld [vmem:[#allocation2 + $0x60] sm:$0xf] }
  0xc3   : > { %937 = vrot.lane.b32.xlu1 %v891_v63, %s3180_s14  ;;  %987 = vst.msk [vmem:[#allocation3 + $0x2c] sm:$0xf] %vm975_vm10, %v3611_v33  ;;  %v1026_v25 = vpop.permute.xlu0 %1025  ;;  %v2765_v33 = vrot.slane %v841_v26, 9  ;;  %v1179_v63 = vor.u32 %v1178_v1, %v3705_v0  ;;  %v1110_v11 = vld [vmem:[#allocation2 + $0x5c] sm:$0x1]  ;;  %v1170_v26 = vrot.slane %v1169_v8, 4 }
  0xc4   : > { %1074 = vst.msk [vmem:[#allocation3] sm:$0xf] %vm1073_vm11, %v1026_v25  ;;  %v926_v45 = vsel %vm3315_vm4, %v924_v38, %v925_v39  ;;  %v1283_v32 = vshrl.u32 %v1111_v19, 16  ;;  %v1275_v38 = vor.u32 %v1274_v18, %v3712_v17  ;;  %v1278_v39 = vshll.u32 %v1110_v11, 16  ;;  %v1101_v48 = vld [vmem:[#allocation2 + $0x38] sm:$0x1] }
  0xc5   : > { %v1028_v31 = vpop.permute.xlu1 %1027  ;;  %951 = vrot.lane.b32.xlu0 %v916_v22, %s3180_s14  ;;  %v923_v41 = vsel %vm3315_vm4, %v2765_v33, %v922_v30  ;;  %v1196_v22 = vshll.u32 %v1100_v10, 16  ;;  %v1189_v30 = vrot.slane %v1187_v13, 4  ;;  %v1206_v58 = vshll.u32 %v1101_v48, 16  ;;  %v1377_v13 = vld [vmem:[#allocation2 + $0x24] sm:$0xe] }
  0xc6   : > { %1075 = vst.msk [vmem:[#allocation3 + $0x4] sm:$0xf] %vm1073_vm11, %v1028_v31  ;;  %v1192_v31 = vrot.slane %v1190_v14, 5  ;;  %v1285_v51 = vrot.slane %v1283_v32, 4  ;;  %v1280_v56 = vrot.slane %v1278_v39, 5  ;;  %v2768_v11 = vrot.slane %v1377_v13, 9 }
  0xc7   : > { %953 = vrot.lane.b32.xlu1 %v919_v20, %s3180_s14  ;;  %v1042_v36 = vpop.permute.xlu0 %1041  ;;  %v1265_v20 = vor.u32 %v1264_v52, %v1261_v9  ;;  %v1378_v9 = vld [vmem:[#allocation2 + $0x28] sm:$0xf]  ;;  %v1379_v18 = vld [vmem:[#allocation2 + $0x2c] sm:$0x1]  ;;  %v1392_v48 = vld [vmem:[#allocation2 + $0x60] sm:$0xe] }
  0xc8   : > { %1082 = vst.msk [vmem:[#allocation3 + $0x20] sm:$0xf] %vm1073_vm11, %v1042_v36  ;;  %v1180_v36 = vrot.slane %v1179_v63, 4 }
  0xc9   : > { %v1044_v40 = vpop.permute.xlu1 %1043  ;;  %939 = vrot.lane.b32.xlu0 %v895_v34, %s3180_s14  ;;  %v1286_v34 = vshll.u32 %v1111_v19, 16  ;;  %v1266_v49 = vrot.slane %v1265_v20, 4  ;;  %v1390_v19 = vld [vmem:[#allocation2 + $0x58] sm:$0xf]  ;;  %v1438_v20 = vrot.slane %v1379_v18, 5 }
  0xca   : > { %1083 = vst.msk [vmem:[#allocation3 + $0x24] sm:$0xf] %vm1073_vm11, %v1044_v40  ;;  %v1008_v40 = vld [vmem:[#allocation2 + $0x64] sm:$0xf] }
  0xcb   : > { %941 = vrot.lane.b32.xlu1 %v898_v37, %s3180_s14  ;;  %v1030_v44 = vpop.permute.xlu0 %1029  ;;  %v1184_v37 = vrot.slane %v1182_v16, 5  ;;  %v1435_v16 = vrot.slane %v1378_v9, 5 }
  0xcc   : > { %1076 = vst.msk [vmem:[#allocation3 + $0x8] sm:$0xf] %vm1073_vm11, %v1030_v44  ;;  %v1292_v44 = vshll.u32 %v1112_v28, 16 }
  0xcd   : > { %v1032_v47 = vpop.permute.xlu1 %1031  ;;  %955 = vrot.lane.b32.xlu0 %v923_v41, %s3180_s14  ;;  %v1198_v41 = vrot.slane %v1196_v22, 5  ;;  %v1185_v27 = vsel %vm3387_vm7, %v1180_v36, %v1184_v37  ;;  %v1436_v32 = vsel %vm3315_vm4, %v2768_v11, %v1435_v16  ;;  %v1380_v36 = vld [vmem:[#allocation2 + $0x30] sm:$0xe] }
  0xce   : > { %1077 = vst.msk [vmem:[#allocation3 + $0xc] sm:$0xf] %vm1073_vm11, %v1032_v47  ;;  %v1175_v47 = vsel %vm3387_vm7, %v1170_v26, %v3705_v0  ;;  %v1294_v59 = vrot.slane %v1292_v44, 5  ;;  %v1437_v26 = vrot.slane %v1435_v16, 4  ;;  %v1393_v44 = vld [vmem:[#allocation2 + $0x64] sm:$0xf] }
  0xcf   : > { %957 = vrot.lane.b32.xlu1 %v926_v45, %s3180_s14  ;;  %v1046_v53 = vpop.permute.xlu0 %1045  ;;  %v1296_v45 = vshrl.u32 %v1112_v28, 16  ;;  %v1463_v28 = vrot.slane %v1390_v19, 5 }
  0xd0   : > { %1084 = vst.msk [vmem:[#allocation3 + $0x28] sm:$0xf] %vm1073_vm11, %v1046_v53  ;;  %v1288_v53 = vrot.slane %v1286_v34, 5  ;;  %v2772_v34 = vrot.slane %v1389_v23, 9  ;;  %v1439_v37 = vsel %vm3315_vm4, %v1437_v26, %v1438_v20  ;;  %v1647_v23 = vld [vmem:[#allocation2 + $0x3c] sm:$0xf] }
  0xd1   : > { %v1048_v57 = vpop.permute.xlu1 %1047  ;;  %1033 = vrot.lane.b32.xlu0 %v997_v50, %s3182_s20  ;;  %v1193_v50 = vor.u32 %v1192_v31, %v1189_v30  ;;  %v1298_v43 = vrot.slane %v1296_v45, 4  ;;  %v1391_v30 = vld [vmem:[#allocation2 + $0x5c] sm:$0x1]  ;;  %v1381_v31 = vld [vmem:[#allocation2 + $0x34] sm:$0xf] }
  0xd2   : > { %1085 = vst.msk [vmem:[#allocation3 + $0x2c] sm:$0xf] %vm1073_vm11, %v1048_v57  ;;  %v1203_v57 = vor.u32 %v1202_v42, %v1198_v41  ;;  %v1289_v1 = vor.u32 %v1288_v53, %v1285_v51  ;;  %v1466_v39 = vrot.slane %v1391_v30, 5  ;;  %v1382_v42 = vld [vmem:[#allocation2 + $0x38] sm:$0x1]  ;;  %v1464_v45 = vsel %vm3315_vm4, %v2772_v34, %v1463_v28 }
  0xd3   : > { %1035 = vrot.lane.b32.xlu1 %v998_v55, %s3182_s20  ;;  %v1307_v62 = vpop.permute.xlu0 %1306  ;;  %v1276_v55 = vrot.slane %v1275_v38, 4  ;;  %v1194_v0 = vrot.slane %v1193_v50, 4  ;;  %v1299_v6 = vor.u32 %v1298_v43, %v1294_v59  ;;  %v1465_v38 = vrot.slane %v1463_v28, 4  ;;  %v1646_v26 = vld [vmem:[#allocation2 + $0x38] sm:$0x1] }
  0xd4   : > { %1355 = vst.msk [vmem:[#allocation3] sm:$0xf] %vm1354_vm12, %v1307_v62  ;;  %v1271_v62 = vsel %vm3387_vm7, %v1266_v49, %v3712_v17  ;;  %v1204_v35 = vrot.slane %v1203_v57, 4  ;;  %v1290_v10 = vrot.slane %v1289_v1, 4  ;;  %v1445_v51 = vrot.slane %v1382_v42, 5 }
  0xd5   : > { %v1309_v7 = vpop.permute.xlu1 %1308  ;;  %1049 = vrot.lane.b32.xlu0 %v1005_v61, %s3182_s20  ;;  %v1113_v61 = vld [vmem:[#allocation2 + $0x68] sm:$0x1]  ;;  %v1281_v4 = vsel %vm3387_vm7, %v1276_v55, %v1280_v56  ;;  %v1199_v52 = vsel %vm3387_vm7, %v1194_v0, %v1198_v41  ;;  %v1467_v49 = vsel %vm3315_vm4, %v1465_v38, %v1466_v39  ;;  %v1470_v53 = vrot.slane %v1393_v44, 5  ;;  %v1548_v42 = vld [vmem:[#allocation2 + $0x40] sm:$0xf] }
  0xd6   : > { %1356 = vst.msk [vmem:[#allocation3 + $0x4] sm:$0xf] %vm1354_vm12, %v1309_v7  ;;  %v1302_v7 = vshll.u32 %v1113_v61, 16  ;;  %v2773_v56 = vrot.slane %v1392_v48, 9  ;;  %v1735_v34 = vshrl.u32 %v1647_v23, 16  ;;  %v1730_v38 = vshll.u32 %v1646_v26, 16 }
  0xd7   : > { %1051 = vrot.lane.b32.xlu1 %v1006_v5, %s3182_s20  ;;  %v1323_v15 = vpop.permute.xlu0 %1322  ;;  %v1208_v5 = vrot.slane %v1206_v58, 5  ;;  %v1658_v44 = vld [vmem:[#allocation2 + $0x68] sm:$0x1] }
  0xd8   : > { %1363 = vst.msk [vmem:[#allocation3 + $0x20] sm:$0xf] %vm1354_vm12, %v1323_v15  ;;  %v1300_v15 = vrot.slane %v1299_v6, 4  ;;  %v1304_v63 = vrot.slane %v1302_v7, 5  ;;  %v1471_v61 = vsel %vm3315_vm4, %v2773_v56, %v1470_v53  ;;  %v1545_v6 = vld [vmem:[#allocation2 + $0x30] sm:$0xf] }
  0xd9   : > { %v1325_v25 = vpop.permute.xlu1 %1324  ;;  %1037 = vrot.lane.b32.xlu0 %v999_v12, %s3182_s20  ;;  %v1209_v14 = vsel %vm3387_vm7, %v1204_v35, %v1208_v5  ;;  %v1656_v7 = vld [vmem:[#allocation2 + $0x60] sm:$0xf] }
  0xda   : > { %1364 = vst.msk [vmem:[#allocation3 + $0x24] sm:$0xf] %vm1354_vm12, %v1325_v25  ;;  %v1305_v25 = vsel %vm3387_vm7, %v1300_v15, %v1304_v63  ;;  %v1807_v63 = vshrl.u32 %v1656_v7, 16  ;;  %v1810_v16 = vshll.u32 %v1656_v7, 16 }
  0xdb   : > { %1039 = vrot.lane.b32.xlu1 %v1000_v21, %s3182_s20  ;;  %v1311_v33 = vpop.permute.xlu0 %1310  ;;  %v1295_v21 = vsel %vm3387_vm7, %v1290_v10, %v1294_v59  ;;  %v1472_v59 = vrot.slane %v1470_v53, 4  ;;  %v1546_v10 = vld [vmem:[#allocation2 + $0x34] sm:$0xf]  ;;  %v1737_v53 = vrot.slane %v1735_v34, 4  ;;  %v1925_v34 = vld [vmem:[#allocation2 + $0x30] sm:$0xe] }
  0xdc   : > { %1357 = vst.msk [vmem:[#allocation3 + $0x8] sm:$0xf] %vm1354_vm12, %v1311_v33  ;;  %v1812_v30 = vrot.slane %v1810_v16, 5 }
  0xdd   : > { %v1313_v46 = vpop.permute.xlu1 %1312  ;;  %1053 = vrot.lane.b32.xlu0 %v1007_v29, %s3182_s20 }
  0xde   : > { %1358 = vst.msk [vmem:[#allocation3 + $0xc] sm:$0xf] %vm1354_vm12, %v1313_v46  ;;  %v2769_v46 = vrot.slane %v1380_v36, 9 }
  0xdf   : > { %1055 = vrot.lane.b32.xlu1 %v1008_v40, %s3182_s20  ;;  %v1327_v54 = vpop.permute.xlu0 %1326  ;;  %v1442_v40 = vrot.slane %v1381_v31, 5  ;;  %v1648_v31 = vld [vmem:[#allocation2 + $0x40] sm:$0xf] }
  0xe0   : > { %1365 = vst.msk [vmem:[#allocation3 + $0x28] sm:$0xf] %vm1354_vm12, %v1327_v54 }
  0xe1   : > { %v1329_v60 = vpop.permute.xlu1 %1328  ;;  %1314 = vrot.lane.b32.xlu0 %v1175_v47, %s4218_s13  ;;  %v1444_v50 = vrot.slane %v1442_v40, 4  ;;  %v1443_v55 = vsel %vm3315_vm4, %v2769_v46, %v1442_v40  ;;  %v1748_v46 = vshrl.u32 %v1648_v31, 16 }
  0xe2   : > { %1366 = vst.msk [vmem:[#allocation3 + $0x2c] sm:$0xf] %vm1354_vm12, %v1329_v60 }
  0xe3   : > { %1316 = vrot.lane.b32.xlu1 %v1185_v27, %s4218_s13  ;;  %v1476_v3 = vpop.permute.xlu0 %1475  ;;  %v1394_v27 = vld [vmem:[#allocation2 + $0x68] sm:$0x1]  ;;  %v1446_v58 = vsel %vm3315_vm4, %v1444_v50, %v1445_v51  ;;  %v1660_v50 = vld [vmem:[#allocation2 + $0x70] sm:$0xf]  ;;  %v1555_v51 = vld [vmem:[#allocation2 + $0x6c] sm:$0xf] }
  0xe4   : > { %1524 = vst.msk [vmem:[#allocation3] sm:$0xf] %vm1523_vm13, %v1476_v3  ;;  %v1473_v43 = vrot.slane %v1394_v27, 5  ;;  %v1645_v3 = vld [vmem:[#allocation2 + $0x34] sm:$0xf] }
  0xe5   : > { %v1478_v8 = vpop.permute.xlu1 %1477  ;;  %1330 = vrot.lane.b32.xlu0 %v1271_v62, %s4218_s13  ;;  %v1644_v62 = vld [vmem:[#allocation2 + $0x30] sm:$0xf]  ;;  %v1720_v9 = vshll.u32 %v1645_v3, 16 }
  0xe6   : > { %1525 = vst.msk [vmem:[#allocation3 + $0x4] sm:$0xf] %vm1523_vm13, %v1478_v8  ;;  %v1474_v1 = vsel %vm3315_vm4, %v1472_v59, %v1473_v43  ;;  %v1711_v35 = vshrl.u32 %v1644_v62, 16  ;;  %v1714_v5 = vshll.u32 %v1644_v62, 16  ;;  %v1826_v43 = vshll.u32 %v1658_v44, 16 }
  0xe7   : > { %1332 = vrot.lane.b32.xlu1 %v1281_v4, %s4218_s13  ;;  %v1492_v12 = vpop.permute.xlu0 %1491  ;;  %v3793_v19 = vrot.slane %v1720_v9, 5  ;;  %v1750_v62 = vrot.slane %v1748_v46, 4  ;;  %v2776_v44 = vrot.slane %v1925_v34, 9  ;;  %v1937_v46 = vld [vmem:[#allocation2 + $0x60] sm:$0xe] }
  0xe8   : > { %1532 = vst.msk [vmem:[#allocation3 + $0x20] sm:$0xf] %vm1523_vm13, %v1492_v12  ;;  %v1657_v12 = vld [vmem:[#allocation2 + $0x64] sm:$0xf]  ;;  %v1716_v15 = vrot.slane %v1714_v5, 5 }
  0xe9   : > { %v1494_v17 = vpop.permute.xlu1 %1493  ;;  %1318 = vrot.lane.b32.xlu0 %v1199_v52, %s4218_s13  ;;  %v1724_v52 = vshrl.u32 %v1645_v3, 16  ;;  %v1816_v11 = vshll.u32 %v1657_v12, 16 }
  0xea   : > { %1533 = vst.msk [vmem:[#allocation3 + $0x24] sm:$0xf] %vm1523_vm13, %v1494_v17  ;;  %v1553_v17 = vld [vmem:[#allocation2 + $0x60] sm:$0xf] }
  0xeb   : > { %1320 = vrot.lane.b32.xlu1 %v1209_v14, %s4218_s13  ;;  %v1480_v22 = vpop.permute.xlu0 %1479  ;;  %v1713_v14 = vrot.slane %v1711_v35, 4  ;;  %v3800_v39 = vrot.slane %v1816_v11, 5  ;;  %v1649_v35 = vld [vmem:[#allocation2 + $0x44] sm:$0x1] }
  0xec   : > { %1526 = vst.msk [vmem:[#allocation3 + $0x8] sm:$0xf] %vm1523_vm13, %v1480_v22  ;;  %v1820_v22 = vshrl.u32 %v1657_v12, 16  ;;  %v1828_v12 = vrot.slane %v1826_v43, 5 }
  0xed   : > { %v1482_v29 = vpop.permute.xlu1 %1481  ;;  %1334 = vrot.lane.b32.xlu0 %v1295_v21, %s4218_s13  ;;  %v1726_v21 = vrot.slane %v1724_v52, 4  ;;  %v1717_v28 = vor.u32 %v1716_v15, %v1713_v14  ;;  %v1754_v14 = vshll.u32 %v1649_v35, 16 }
  0xee   : > { %1527 = vst.msk [vmem:[#allocation3 + $0xc] sm:$0xf] %vm1523_vm13, %v1482_v29  ;;  %v1809_v29 = vrot.slane %v1807_v63, 4  ;;  %v1822_v40 = vrot.slane %v1820_v22, 4 }
  0xef   : > { %1336 = vrot.lane.b32.xlu1 %v1305_v25, %s4218_s13  ;;  %v1496_v33 = vpop.permute.xlu0 %1495  ;;  %v1554_v25 = vld [vmem:[#allocation2 + $0x64] sm:$0xf]  ;;  %v1718_v48 = vrot.slane %v1717_v28, 4  ;;  %s2751_s13 = sshll.u32 %s4238_s16, 1  ;;  %s2807_s16 = sshll.u32 %s3166_s25, 5 }
  0xf0   : > { %1534 = vst.msk [vmem:[#allocation3 + $0x28] sm:$0xf] %vm1523_vm13, %v1496_v33  ;;  %v1738_v33 = vshll.u32 %v1647_v23, 16  ;;  %v1823_v59 = vor.u32 %v1822_v40, %v3800_v39  ;;  %v1927_v40 = vld [vmem:[#allocation2 + $0x38] sm:$0x1] }
  0xf1   : > { %v1498_v41 = vpop.permute.xlu1 %1497  ;;  %1483 = vrot.lane.b32.xlu0 %v1436_v32, %s4219_s29  ;;  %v1547_v32 = vld [vmem:[#allocation2 + $0x3c] sm:$0xf] }
  0xf2   : > { %1535 = vst.msk [vmem:[#allocation3 + $0x2c] sm:$0xf] %vm1523_vm13, %v1498_v41  ;;  %v1659_v41 = vld [vmem:[#allocation2 + $0x6c] sm:$0xf] }
  0xf3   : > { %1485 = vrot.lane.b32.xlu1 %v1439_v37, %s4219_s29  ;;  %v1574_v47 = vpop.permute.xlu0 %1573  ;;  %v1727_v37 = vor.u32 %v1726_v21, %v3793_v19  ;;  %v1831_v27 = vshrl.u32 %v1659_v41, 16 }
  0xf4   : > { %1622 = vst.msk [vmem:[#allocation3] sm:$0xf] %vm1621_vm14, %v1574_v47 }
  0xf5   : > { %v1576_v54 = vpop.permute.xlu1 %1575  ;;  %1499 = vrot.lane.b32.xlu0 %v1464_v45, %s4219_s29  ;;  %v1744_v45 = vshll.u32 %v1648_v31, 16  ;;  %v1833_v7 = vrot.slane %v1831_v27, 4  ;;  %v1929_v27 = vld [vmem:[#allocation2 + $0x40] sm:$0xf] }
  0xf6   : > { %1623 = vst.msk [vmem:[#allocation3 + $0x4] sm:$0xf] %vm1621_vm14, %v1576_v54  ;;  %v1740_v54 = vrot.slane %v1738_v33, 5 }
  0xf7   : > { %1501 = vrot.lane.b32.xlu1 %v1467_v49, %s4219_s29  ;;  %v1590_v57 = vpop.permute.xlu0 %1589  ;;  %v1813_v49 = vor.u32 %v1812_v30, %v1809_v29  ;;  %v1926_v29 = vld [vmem:[#allocation2 + $0x34] sm:$0xf] }
  0xf8   : > { %1630 = vst.msk [vmem:[#allocation3 + $0x20] sm:$0xf] %vm1621_vm14, %v1590_v57  ;;  %v1728_v57 = vrot.slane %v1727_v37, 4 }
  0xf9   : > { %v1592_v60 = vpop.permute.xlu1 %1591  ;;  %1487 = vrot.lane.b32.xlu0 %v1443_v55, %s4219_s29  ;;  %v1834_v55 = vshll.u32 %v1659_v41, 16  ;;  %v1814_v5 = vrot.slane %v1813_v49, 4  ;;  %v1938_v41 = vld [vmem:[#allocation2 + $0x64] sm:$0xf]  ;;  %v1986_v49 = vrot.slane %v1927_v40, 5 }
  0xfa   : > { %1631 = vst.msk [vmem:[#allocation3 + $0x24] sm:$0xf] %vm1621_vm14, %v1592_v60  ;;  %v1556_v60 = vld [vmem:[#allocation2 + $0x70] sm:$0xf] }
  0xfb   : > { %1489 = vrot.lane.b32.xlu1 %v1446_v58, %s4219_s29  ;;  %v1578_v0 = vpop.permute.xlu0 %1577  ;;  %v1732_v58 = vrot.slane %v1730_v38, 5  ;;  %v1983_v38 = vrot.slane %v1926_v29, 5 }
  0xfc   : > { %1624 = vst.msk [vmem:[#allocation3 + $0x8] sm:$0xf] %vm1621_vm14, %v1578_v0  ;;  %v1840_v0 = vshll.u32 %v1660_v50, 16 }
  0xfd   : > { %v1580_v4 = vpop.permute.xlu1 %1579  ;;  %1503 = vrot.lane.b32.xlu0 %v1471_v61, %s4219_s29  ;;  %v1746_v61 = vrot.slane %v1744_v45, 5  ;;  %v1733_v52 = vsel %vm3387_vm7, %v1728_v57, %v1732_v58  ;;  %v1928_v57 = vld [vmem:[#allocation2 + $0x3c] sm:$0xe] }
  0xfe   : > { %1625 = vst.msk [vmem:[#allocation3 + $0xc] sm:$0xf] %vm1621_vm14, %v1580_v4  ;;  %v1723_v4 = vsel %vm3387_vm7, %v1718_v48, %v3793_v19  ;;  %v1842_v15 = vrot.slane %v1840_v0, 5  ;;  %v1985_v48 = vrot.slane %v1983_v38, 4 }
  0xff   : > { %1505 = vrot.lane.b32.xlu1 %v1474_v1, %s4219_s29  ;;  %v1594_v8 = vpop.permute.xlu0 %1593  ;;  %v1844_v1 = vshrl.u32 %v1660_v50, 16  ;;  %v1939_v50 = vld [vmem:[#allocation2 + $0x68] sm:$0x1]  ;;  %s3884_s29 = sadd.s32 %s2752_s30, %s2751_s13  ;;  %s378_s13 = sand.u32 1, %s3154_s22  }
 0x100   : > { %1632 = vst.msk [vmem:[#allocation3 + $0x28] sm:$0xf] %vm1621_vm14, %v1594_v8  ;;  %v1836_v8 = vrot.slane %v1834_v55, 5  ;;  %v1984_v55 = vsel %vm3315_vm4, %v2776_v44, %v1983_v38  ;;  %v1987_v58 = vsel %vm3315_vm4, %v1985_v48, %v1986_v49  ;;  %v2014_v43 = vrot.slane %v1939_v50, 5  ;;  %s2753_s17 = sshll.u32 %s3884_s29, 2 }
 0x101   : > { %v1596_v13 = vpop.permute.xlu1 %1595  ;;  %1581 = vrot.lane.b32.xlu0 %v1545_v6, %s4220_s9  ;;  %v1741_v6 = vor.u32 %v1740_v54, %v1737_v53  ;;  %v1846_v63 = vrot.slane %v1844_v1, 4  ;;  %v1941_v1 = vld [vmem:[#allocation2 + $0x70] sm:$0xf]  ;;  %s3977_s30 = scalar_lea.vmem %s4201_s4, %s2753_s17 }
 0x102   : > { %1633 = vst.msk [vmem:[#allocation3 + $0x2c] sm:$0xf] %vm1621_vm14, %v1596_v13  ;;  %v1751_v13 = vor.u32 %v1750_v62, %v1746_v61  ;;  %v1837_v21 = vor.u32 %v1836_v8, %v1833_v7 }
 0x103   : > { %1583 = vrot.lane.b32.xlu1 %v1546_v10, %s4220_s9  ;;  %v1855_v18 = vpop.permute.xlu0 %1854  ;;  %v1824_v10 = vrot.slane %v1823_v59, 4  ;;  %v1742_v19 = vrot.slane %v1741_v6, 4  ;;  %v1847_v26 = vor.u32 %v1846_v63, %v1842_v15 }
 0x104   : > { %1903 = vst.msk [vmem:[#allocation3] sm:$0xf] %vm1902_vm15, %v1855_v18  ;;  %v1819_v18 = vsel %vm3387_vm7, %v1814_v5, %v3800_v39  ;;  %v1752_v23 = vrot.slane %v1751_v13, 4  ;;  %v1838_v31 = vrot.slane %v1837_v21, 4  ;;  %v1940_v5 = vld [vmem:[#allocation2 + $0x6c] sm:$0xe] }
 0x105   : > { %v1857_v20 = vpop.permute.xlu1 %1856  ;;  %1597 = vrot.lane.b32.xlu0 %v1553_v17, %s4220_s9  ;;  %v1661_v17 = vld [vmem:[#allocation2 + $0x74] sm:$0x1]  ;;  %v1829_v22 = vsel %vm3387_vm7, %v1824_v10, %v1828_v12  ;;  %v1747_v30 = vsel %vm3387_vm7, %v1742_v19, %v1746_v61  ;;  %v1990_v61 = vrot.slane %v1929_v27, 5  ;;  %v2781_v13 = vrot.slane %v1940_v5, 9 }
 0x106   : > { %1904 = vst.msk [vmem:[#allocation3 + $0x4] sm:$0xf] %vm1902_vm15, %v1857_v20  ;;  %v1850_v20 = vshll.u32 %v1661_v17, 16  ;;  %v1942_v10 = vld [vmem:[#allocation2 + $0x74] sm:$0x1] }
 0x107   : > { %1599 = vrot.lane.b32.xlu1 %v1554_v25, %s4220_s9  ;;  %v1871_v36 = vpop.permute.xlu0 %1870  ;;  %v1756_v25 = vrot.slane %v1754_v14, 5  ;;  %v1992_v7 = vrot.slane %v1990_v61, 4 }
 0x108   : > { %1911 = vst.msk [vmem:[#allocation3 + $0x20] sm:$0xf] %vm1902_vm15, %v1871_v36  ;;  %v1848_v36 = vrot.slane %v1847_v26, 4  ;;  %v1852_v37 = vrot.slane %v1850_v20, 5 }
 0x109   : > { %v1873_v47 = vpop.permute.xlu1 %1872  ;;  %1585 = vrot.lane.b32.xlu0 %v1547_v32, %s4220_s9  ;;  %v1757_v33 = vsel %vm3387_vm7, %v1752_v23, %v1756_v25 }
 0x10a   : > { %1912 = vst.msk [vmem:[#allocation3 + $0x24] sm:$0xf] %vm1902_vm15, %v1873_v47  ;;  %v1853_v47 = vsel %vm3387_vm7, %v1848_v36, %v1852_v37 }
 0x10b   : > { %1587 = vrot.lane.b32.xlu1 %v1548_v42, %s4220_s9  ;;  %v1859_v56 = vpop.permute.xlu0 %1858  ;;  %v1843_v42 = vsel %vm3387_vm7, %v1838_v31, %v1842_v15 }
 0x10c   : > { %1905 = vst.msk [vmem:[#allocation3 + $0x8] sm:$0xf] %vm1902_vm15, %v1859_v56  ;;  %v2780_v56 = vrot.slane %v1937_v46, 9 }
 0x10d   : > { %v1861_v3 = vpop.permute.xlu1 %1860  ;;  %1601 = vrot.lane.b32.xlu0 %v1555_v51, %s4220_s9  ;;  %v2011_v51 = vrot.slane %v1938_v41, 5 }
 0x10e   : > { %1906 = vst.msk [vmem:[#allocation3 + $0xc] sm:$0xf] %vm1902_vm15, %v1861_v3 }
 0x10f   : > { %1603 = vrot.lane.b32.xlu1 %v1556_v60, %s4220_s9  ;;  %v1875_v9 = vpop.permute.xlu0 %1874  ;;  %v2013_v59 = vrot.slane %v2011_v51, 4  ;;  %v1930_v60 = vld [vmem:[#allocation2 + $0x44] sm:$0x1]  ;;  %v2012_v3 = vsel %vm3315_vm4, %v2780_v56, %v2011_v51  ;;  %s2744_s9 = sshll.u32 %s378_s13, 7 }
 0x110   : > { %1913 = vst.msk [vmem:[#allocation3 + $0x28] sm:$0xf] %vm1902_vm15, %v1875_v9  ;;  %v1993_v8 = vrot.slane %v1930_v60, 5  ;;  %v2018_v9 = vrot.slane %v1941_v1, 5  ;;  %s3985_s29 = scalar_lea.vmem [#allocation4], %s2744_s9 }
 0x111   : > { %v1877_v16 = vpop.permute.xlu1 %1876  ;;  %1862 = vrot.lane.b32.xlu0 %v1723_v4, %s4221_s12  ;;  %v2777_v4 = vrot.slane %v1928_v57, 9  ;;  %v2015_v6 = vsel %vm3315_vm4, %v2013_v59, %v2014_v43 }
 0x112   : > { %1914 = vst.msk [vmem:[#allocation3 + $0x2c] sm:$0xf] %vm1902_vm15, %v1877_v16  ;;  %v1994_v15 = vsel %vm3315_vm4, %v1992_v7, %v1993_v8  ;;  %v2020_v63 = vrot.slane %v2018_v9, 4  ;;  %v2021_v16 = vrot.slane %v1942_v10, 5 }
 0x113   : > { %1864 = vrot.lane.b32.xlu1 %v1733_v52, %s4221_s12  ;;  %v2024_v11 = vpop.permute.xlu0 %2023  ;;  %v1991_v12 = vsel %vm3315_vm4, %v2777_v4, %v1990_v61 }
 0x114   : > { %2072 = vst.msk [vmem:[#allocation3] sm:$0xf] %vm2071_vm0, %v2024_v11  ;;  %v2022_v21 = vsel %vm3315_vm4, %v2020_v63, %v2021_v16 }
 0x115   : > { %v2026_v28 = vpop.permute.xlu1 %2025  ;;  %1878 = vrot.lane.b32.xlu0 %v1819_v18, %s4221_s12  ;;  %v2019_v18 = vsel %vm3315_vm4, %v2781_v13, %v2018_v9  ;;  %vm2555_vm4 = vcmask 261312  }
 0x116   : > { %2073 = vst.msk [vmem:[#allocation3 + $0x4] sm:$0xf] %vm2071_vm0, %v2026_v28 }
 0x117   : > { %1880 = vrot.lane.b32.xlu1 %v1829_v22, %s4221_s12  ;;  %v2040_v32 = vpop.permute.xlu0 %2039 }
 0x118   : > { %2080 = vst.msk [vmem:[#allocation3 + $0x20] sm:$0xf] %vm2071_vm0, %v2040_v32 }
 0x119   : > { %v2042_v39 = vpop.permute.xlu1 %2041  ;;  %1866 = vrot.lane.b32.xlu0 %v1747_v30, %s4221_s12 }
 0x11a   : > { %2081 = vst.msk [vmem:[#allocation3 + $0x24] sm:$0xf] %vm2071_vm0, %v2042_v39 }
 0x11b   : > { %1868 = vrot.lane.b32.xlu1 %v1757_v33, %s4221_s12  ;;  %v764_v45 = vpop.permute.xlu0 %763 }
 0x11c   : > { %808 = vst.msk [vmem:[#allocation3 + $0x10] sm:$0xf] %vm803_vm9, %v764_v45 }
 0x11d   : > { %v766_v53 = vpop.permute.xlu1 %765  ;;  %1882 = vrot.lane.b32.xlu0 %v1843_v42, %s4221_s12  ;;  %v3075_v54 = vld [vmem:[#allocation3] sm:$0xff]  }
 0x11e   : > { %809 = vst.msk [vmem:[#allocation3 + $0x14] sm:$0xf] %vm803_vm9, %v766_v53  ;;  %2922 = vmatprep.mubr.msk.bf16.mxu0 %vm2187_vm1, %v3075_v54 }
 0x11f   : > { %1884 = vrot.lane.b32.xlu1 %v1853_v47, %s4221_s12  ;;  %v780_v24 = vpop.permute.xlu0 %779 }
 0x120   : > { %816 = vst.msk [vmem:[#allocation3 + $0x30] sm:$0xf] %vm803_vm9, %v780_v24 }
 0x121   : > { %v782_v62 = vpop.permute.xlu1 %781  ;;  %2031 = vrot.lane.b32.xlu0 %v1984_v55, %s3187_s19  ;;  %v3077_v0 = vld [vmem:[#allocation3 + $0x20] sm:$0xff]  }
 0x122   : > { %817 = vst.msk [vmem:[#allocation3 + $0x34] sm:$0xf] %vm803_vm9, %v782_v62  ;;  %2930 = vmatprep.mubr.msk.bf16.mxu1 %vm2187_vm1, %v3077_v0 }
 0x123   : > { %2033 = vrot.lane.b32.xlu1 %v1987_v58, %s3187_s19  ;;  %v2028_v35 = vpop.permute.xlu0 %2027 }
 0x124   : > { %2074 = vst.msk [vmem:[#allocation3 + $0x8] sm:$0xf] %vm2071_vm0, %v2028_v35 }
 0x125   : > { %v2030_v52 = vpop.permute.xlu1 %2029  ;;  %2047 = vrot.lane.b32.xlu0 %v2012_v3, %s3187_s19 }
 0x126   : > { %2075 = vst.msk [vmem:[#allocation3 + $0xc] sm:$0xf] %vm2071_vm0, %v2030_v52 }
 0x127   : > { %2049 = vrot.lane.b32.xlu1 %v2015_v6, %s3187_s19  ;;  %v2044_v14 = vpop.permute.xlu0 %2043 }
 0x128   : > { %2082 = vst.msk [vmem:[#allocation3 + $0x28] sm:$0xf] %vm2071_vm0, %v2044_v14 }
 0x129   : > { %v2046_v17 = vpop.permute.xlu1 %2045  ;;  %2035 = vrot.lane.b32.xlu0 %v1991_v12, %s3187_s19 }
 0x12a   : > { %2083 = vst.msk [vmem:[#allocation3 + $0x2c] sm:$0xf] %vm2071_vm0, %v2046_v17 }
 0x12b   : > { %2037 = vrot.lane.b32.xlu1 %v1994_v15, %s3187_s19  ;;  %v768_v19 = vpop.permute.xlu0 %767 }
 0x12c   : > { %810 = vst.msk [vmem:[#allocation3 + $0x18] sm:$0xf] %vm803_vm9, %v768_v19 }
 0x12d   : > { %v770_v11 = vpop.permute.xlu1 %769  ;;  %2051 = vrot.lane.b32.xlu0 %v2019_v18, %s3187_s19  ;;  %v3080_v22 = vld [vmem:[#allocation3 + $0x8] sm:$0xff]  }
 0x12e   : > { %811 = vst.msk [vmem:[#allocation3 + $0x1c] sm:$0xf] %vm803_vm9, %v770_v11  ;;  %2923 = vmatmul.mubr.msk.bf16.vlgmr.msra.gmra.mxu0 %vm2187_vm1, %v3080_v22 }
 0x12f   : > { %2053 = vrot.lane.b32.xlu1 %v2022_v21, %s3187_s19  ;;  %v784_v23 = vpop.permute.xlu0 %783  ;;  %s3893_s19 = scalar_lea.vmem %s4202_s5, %s2753_s17  ;;  %s4145_s17 = scalar_lea.sflag [#allocation5], %s378_s13 }
 0x130   : > { %818 = vst.msk [vmem:[#allocation3 + $0x38] sm:$0xf] %vm803_vm9, %v784_v23  ;;  %v2852_v20 = vld [vmem:[%s3893_s19] sm:$0xff]   ;;  %v2892_v28 = vld [vmem:[%s3893_s19 + $0x8] sm:$0xff]   ;;  %v2893_v29 = vld [vmem:[%s3893_s19 + $0x10] sm:$0xff]  }
 0x131   : > { %v786_v2 = vpop.permute.xlu1 %785  ;;  %v3081_v25 = vld [vmem:[#allocation3 + $0x28] sm:$0xff]   ;;  %v2853_v30 = vunpack.c.l.bf16 %v2852_v20  ;;  %v2854_v31 = vunpack.c.h.bf16 %v2852_v20  ;;  %v2857_v32 = vunpack.c.l.bf16 %v2892_v28  ;;  %v2858_v34 = vunpack.c.h.bf16 %v2892_v28  ;;  %v2894_v33 = vld [vmem:[%s3893_s19 + $0x18] sm:$0xff]   ;;  %v2896_v12 = vld [vmem:[%s3893_s19 + $0x28] sm:$0xff]  }
 0x132   : > { %819 = vst.msk [vmem:[#allocation3 + $0x3c] sm:$0xf] %vm803_vm9, %v786_v2  ;;  %2931 = vmatmul.mubr.msk.bf16.vlgmr.msra.gmra.mxu1 %vm2187_vm1, %v3081_v25  ;;  %v2861_v37 = vunpack.c.l.bf16 %v2893_v29  ;;  %v2862_v38 = vunpack.c.h.bf16 %v2893_v29  ;;  %v2865_v39 = vunpack.c.l.bf16 %v2894_v33  ;;  %v2866_v40 = vunpack.c.h.bf16 %v2894_v33  ;;  %v2895_v41 = vld [vmem:[%s3893_s19 + $0x20] sm:$0xff]   ;;  %v2897_v13 = vld [vmem:[%s3893_s19 + $0x30] sm:$0xff]   ;;  %v2898_v11 = vld [vmem:[%s3893_s19 + $0x38] sm:$0xff]   ;;  %s2818_s19 = sshll.u32 %s3162_s24, 4 }
 0x133   : > { %v936_v26 = vpop.permute.xlu0 %935  ;;  %v3033_v42 = vpack.i.bf16 %v2854_v31, %v2853_v30  ;;  %v3038_v44 = vpack.i.bf16 %v2858_v34, %v2857_v32  ;;  %v2869_v48 = vunpack.c.l.bf16 %v2895_v41  ;;  %v2870_v49 = vunpack.c.h.bf16 %v2895_v41 }
 0x134   : > { %980 = vst.msk [vmem:[#allocation3 + $0x10] sm:$0xf] %vm975_vm10, %v936_v26  ;;  %v3043_v46 = vpack.i.bf16 %v2862_v38, %v2861_v37  ;;  %v3048_v47 = vpack.i.bf16 %v2866_v40, %v2865_v39  ;;  %v2873_v14 = vunpack.c.l.bf16 %v2896_v12  ;;  %v2874_v15 = vunpack.c.h.bf16 %v2896_v12 }
 0x135   : > { %v938_v36 = vpop.permute.xlu1 %937  ;;  %3034 = vrot.lane.b32.xlu0 %v3033_v42, %s3180_s14  ;;  %3039 = vrot.lane.b32.xlu1 %v3038_v44, %s3180_s14  ;;  %v3053_v53 = vpack.i.bf16 %v2870_v49, %v2869_v48  ;;  %v2877_v63 = vunpack.c.l.bf16 %v2897_v13  ;;  %v2878_v16 = vunpack.c.h.bf16 %v2897_v13  ;;  %v2881_v22 = vunpack.c.l.bf16 %v2898_v11  ;;  %v2888_v13 = vld [vmem:[%s3977_s30 + $0x20] sm:$0xff]  }
 0x136   : > { %981 = vst.msk [vmem:[#allocation3 + $0x14] sm:$0xf] %vm975_vm10, %v938_v36  ;;  %v3058_v18 = vpack.i.bf16 %v2874_v15, %v2873_v14  ;;  %v2882_v23 = vunpack.c.h.bf16 %v2898_v11 }
 0x137   : > { %v952_v45 = vpop.permute.xlu0 %951  ;;  %v3063_v19 = vpack.i.bf16 %v2878_v16, %v2877_v63  ;;  %v2837_v63 = vunpack.c.l.bf16 %v2888_v13 }
 0x138   : > { %988 = vst.msk [vmem:[#allocation3 + $0x30] sm:$0xf] %vm975_vm10, %v952_v45  ;;  %v3068_v25 = vpack.i.bf16 %v2882_v23, %v2881_v22  ;;  %v2838_v22 = vunpack.c.h.bf16 %v2888_v13 }
 0x139   : > { %v954_v50 = vpop.permute.xlu1 %953  ;;  %3044 = vrot.lane.b32.xlu0 %v3043_v46, %s3180_s14  ;;  %3049 = vrot.lane.b32.xlu1 %v3048_v47, %s3180_s14  ;;  %2370 = vst.msk [vmem:[%s3985_s29 + $0x40] sm:$0xff] %vm2361_vm2, %v2837_v63 }
 0x13a   : > { %989 = vst.msk [vmem:[#allocation3 + $0x34] sm:$0xf] %vm975_vm10, %v954_v50 }
 0x13b   : > { %v940_v51 = vpop.permute.xlu0 %939  ;;  %2371 = vst.msk [vmem:[%s3985_s29 + $0x48] sm:$0xff] %vm2361_vm2, %v2838_v22 }
 0x13c   : > { %982 = vst.msk [vmem:[#allocation3 + $0x18] sm:$0xf] %vm975_vm10, %v940_v51 }
 0x13d   : > { %v942_v54 = vpop.permute.xlu1 %941  ;;  %3054 = vrot.lane.b32.xlu0 %v3053_v53, %s3180_s14  ;;  %3059 = vrot.lane.b32.xlu1 %v3058_v18, %s3180_s14 }
 0x13e   : > { %983 = vst.msk [vmem:[#allocation3 + $0x1c] sm:$0xf] %vm975_vm10, %v942_v54 }
 0x13f   : > { %v956_v27 = vpop.permute.xlu0 %955 }
 0x140   : > { %990 = vst.msk [vmem:[#allocation3 + $0x38] sm:$0xf] %vm975_vm10, %v956_v27 }
 0x141   : > { %v958_v55 = vpop.permute.xlu1 %957  ;;  %3064 = vrot.lane.b32.xlu0 %v3063_v19, %s3180_s14  ;;  %3069 = vrot.lane.b32.xlu1 %v3068_v25, %s3180_s14  ;;  %s2586_s14 = sadd.s32 %s2818_s19, %s2807_s16  ;;  %s3188_s19 = smov [#allocation4]  }
 0x142   : > { %991 = vst.msk [vmem:[#allocation3 + $0x3c] sm:$0xf] %vm975_vm10, %v958_v55  ;;  %s3090_s16 = sshll.u32 %s3188_s19, 4  ;;  %s3091_s16 = int_to_ptr.vmem [resolvable:$false] %s3090_s16 }
 0x143   : > { %v1034_v56 = vpop.permute.xlu0 %1033 }
 0x144   : > { %1078 = vst.msk [vmem:[#allocation3 + $0x10] sm:$0xf] %vm1073_vm11, %v1034_v56 }
 0x145   : > { %v1036_v24 = vpop.permute.xlu1 %1035 }
 0x146   : > { %1079 = vst.msk [vmem:[#allocation3 + $0x14] sm:$0xf] %vm1073_vm11, %v1036_v24  ;;  %v2885_v24 = vld [vmem:[%s3977_s30 + $0x8] sm:$0xff]  }
 0x147   : > { %v1050_v57 = vpop.permute.xlu0 %1049 }
 0x148   : > { %1086 = vst.msk [vmem:[#allocation3 + $0x30] sm:$0xf] %vm1073_vm11, %v1050_v57 }
 0x149   : > { %v1052_v58 = vpop.permute.xlu1 %1051 }
 0x14a   : > { %1087 = vst.msk [vmem:[#allocation3 + $0x34] sm:$0xf] %vm1073_vm11, %v1052_v58 }
 0x14b   : > { %v1038_v59 = vpop.permute.xlu0 %1037 }
 0x14c   : > { %1080 = vst.msk [vmem:[#allocation3 + $0x18] sm:$0xf] %vm1073_vm11, %v1038_v59  ;;  %v2825_v59 = vunpack.c.l.bf16 %v2885_v24 }
 0x14d   : > { %v1040_v43 = vpop.permute.xlu1 %1039 }
 0x14e   : > { %1081 = vst.msk [vmem:[#allocation3 + $0x1c] sm:$0xf] %vm1073_vm11, %v1040_v43 }
 0x14f   : > { %v1054_v60 = vpop.permute.xlu0 %1053  ;;  %2364 = vst.msk [vmem:[%s3985_s29 + $0x10] sm:$0xff] %vm2361_vm2, %v2825_v59  ;;  %v2891_v59 = vld [vmem:[%s3977_s30 + $0x38] sm:$0xff]  }
 0x150   : > { %1088 = vst.msk [vmem:[#allocation3 + $0x38] sm:$0xf] %vm1073_vm11, %v1054_v60 }
 0x151   : > { %v1056_v61 = vpop.permute.xlu1 %1055 }
 0x152   : > { %1089 = vst.msk [vmem:[#allocation3 + $0x3c] sm:$0xf] %vm1073_vm11, %v1056_v61 }
 0x153   : > { %v1315_v62 = vpop.permute.xlu0 %1314 }
 0x154   : > { %1359 = vst.msk [vmem:[#allocation3 + $0x10] sm:$0xf] %vm1354_vm12, %v1315_v62 }
 0x155   : > { %v1317_v0 = vpop.permute.xlu1 %1316 }
 0x156   : > { %1360 = vst.msk [vmem:[#allocation3 + $0x14] sm:$0xf] %vm1354_vm12, %v1317_v0  ;;  %v2889_v0 = vld [vmem:[%s3977_s30 + $0x28] sm:$0xff]  }
 0x157   : > { %v1331_v1 = vpop.permute.xlu0 %1330 }
 0x158   : > { %1367 = vst.msk [vmem:[#allocation3 + $0x30] sm:$0xf] %vm1354_vm12, %v1331_v1 }
 0x159   : > { %v1333_v3 = vpop.permute.xlu1 %1332 }
 0x15a   : > { %1368 = vst.msk [vmem:[#allocation3 + $0x34] sm:$0xf] %vm1354_vm12, %v1333_v3  ;;  %v2841_v3 = vunpack.c.l.bf16 %v2889_v0 }
 0x15b   : > { %v1319_v4 = vpop.permute.xlu0 %1318 }
 0x15c   : > { %1361 = vst.msk [vmem:[#allocation3 + $0x18] sm:$0xf] %vm1354_vm12, %v1319_v4  ;;  %v2826_v4 = vunpack.c.h.bf16 %v2885_v24 }
 0x15d   : > { %v1321_v35 = vpop.permute.xlu1 %1320  ;;  %2372 = vst.msk [vmem:[%s3985_s29 + $0x50] sm:$0xff] %vm2361_vm2, %v2841_v3 }
 0x15e   : > { %1362 = vst.msk [vmem:[#allocation3 + $0x1c] sm:$0xf] %vm1354_vm12, %v1321_v35 }
 0x15f   : > { %v1335_v5 = vpop.permute.xlu0 %1334  ;;  %2365 = vst.msk [vmem:[%s3985_s29 + $0x18] sm:$0xff] %vm2361_vm2, %v2826_v4 }
 0x160   : > { %1369 = vst.msk [vmem:[#allocation3 + $0x38] sm:$0xf] %vm1354_vm12, %v1335_v5 }
 0x161   : > { %v1337_v6 = vpop.permute.xlu1 %1336 }
 0x162   : > { %1370 = vst.msk [vmem:[#allocation3 + $0x3c] sm:$0xf] %vm1354_vm12, %v1337_v6  ;;  %v2820_v6 = vld [vmem:[%s3977_s30] sm:$0xff]  }
 0x163   : > { %v1484_v7 = vpop.permute.xlu0 %1483  ;;  %v2822_v15 = vunpack.c.h.bf16 %v2820_v6 }
 0x164   : > { %1528 = vst.msk [vmem:[#allocation3 + $0x10] sm:$0xf] %vm1523_vm13, %v1484_v7  ;;  %v2842_v7 = vunpack.c.h.bf16 %v2889_v0 }
 0x165   : > { %v1486_v8 = vpop.permute.xlu1 %1485  ;;  %2363 = vst.msk [vmem:[%s3985_s29 + $0x8] sm:$0xff] %vm2361_vm2, %v2822_v15 }
 0x166   : > { %1529 = vst.msk [vmem:[#allocation3 + $0x14] sm:$0xf] %vm1523_vm13, %v1486_v8  ;;  %v2821_v8 = vunpack.c.l.bf16 %v2820_v6 }
 0x167   : > { %v1500_v9 = vpop.permute.xlu0 %1499  ;;  %2373 = vst.msk [vmem:[%s3985_s29 + $0x58] sm:$0xff] %vm2361_vm2, %v2842_v7 }
 0x168   : > { %1536 = vst.msk [vmem:[#allocation3 + $0x30] sm:$0xf] %vm1523_vm13, %v1500_v9  ;;  %v4006_v9 = vld [vmem:[%s4200_s3] ss:$0 sm:$0xff] }
 0x169   : > { %v1502_v52 = vpop.permute.xlu1 %1501  ;;  %2362 = vst.msk [vmem:[%s3985_s29] sm:$0xff] %vm2361_vm2, %v2821_v8 }
 0x16a   : > { %1537 = vst.msk [vmem:[#allocation3 + $0x34] sm:$0xf] %vm1523_vm13, %v1502_v52 }
 0x16b   : > { %v1488_v10 = vpop.permute.xlu0 %1487 }
 0x16c   : > { %1530 = vst.msk [vmem:[#allocation3 + $0x18] sm:$0xf] %vm1523_vm13, %v1488_v10 }
 0x16d   : > { %v1490_v17 = vpop.permute.xlu1 %1489 }
 0x16e   : > { %1531 = vst.msk [vmem:[#allocation3 + $0x1c] sm:$0xf] %vm1523_vm13, %v1490_v17 }
 0x16f   : > { %v1504_v21 = vpop.permute.xlu0 %1503 }
 0x170   : > { %1538 = vst.msk [vmem:[#allocation3 + $0x38] sm:$0xf] %vm1523_vm13, %v1504_v21 }
 0x171   : > { %v1506_v2 = vpop.permute.xlu1 %1505 }
 0x172   : > { %1539 = vst.msk [vmem:[#allocation3 + $0x3c] sm:$0xf] %vm1523_vm13, %v1506_v2 }
 0x173   : > { %v1582_v26 = vpop.permute.xlu0 %1581 }
 0x174   : > { %1626 = vst.msk [vmem:[#allocation3 + $0x10] sm:$0xf] %vm1621_vm14, %v1582_v26 }
 0x175   : > { %v1584_v20 = vpop.permute.xlu1 %1583 }
 0x176   : > { %1627 = vst.msk [vmem:[#allocation3 + $0x14] sm:$0xf] %vm1621_vm14, %v1584_v20 }
 0x177   : > { %v1598_v28 = vpop.permute.xlu0 %1597 }
 0x178   : > { %1634 = vst.msk [vmem:[#allocation3 + $0x30] sm:$0xf] %vm1621_vm14, %v1598_v28 }
 0x179   : > { %v1600_v29 = vpop.permute.xlu1 %1599 }
 0x17a   : > { %1635 = vst.msk [vmem:[#allocation3 + $0x34] sm:$0xf] %vm1621_vm14, %v1600_v29 }
 0x17b   : > { %v1586_v30 = vpop.permute.xlu0 %1585 }
 0x17c   : > { %1628 = vst.msk [vmem:[#allocation3 + $0x18] sm:$0xf] %vm1621_vm14, %v1586_v30 }
 0x17d   : > { %v1588_v31 = vpop.permute.xlu1 %1587 }
 0x17e   : > { %1629 = vst.msk [vmem:[#allocation3 + $0x1c] sm:$0xf] %vm1621_vm14, %v1588_v31 }
 0x17f   : > { %v1602_v32 = vpop.permute.xlu0 %1601 }
 0x180   : > { %1636 = vst.msk [vmem:[#allocation3 + $0x38] sm:$0xf] %vm1621_vm14, %v1602_v32 }
 0x181   : > { %v1604_v34 = vpop.permute.xlu1 %1603 }
 0x182   : > { %1637 = vst.msk [vmem:[#allocation3 + $0x3c] sm:$0xf] %vm1621_vm14, %v1604_v34 }
 0x183   : > { %v1863_v33 = vpop.permute.xlu0 %1862 }
 0x184   : > { %1907 = vst.msk [vmem:[#allocation3 + $0x10] sm:$0xf] %vm1902_vm15, %v1863_v33 }
 0x185   : > { %v1865_v36 = vpop.permute.xlu1 %1864 }
 0x186   : > { %1908 = vst.msk [vmem:[#allocation3 + $0x14] sm:$0xf] %vm1902_vm15, %v1865_v36 }
 0x187   : > { %v1879_v37 = vpop.permute.xlu0 %1878 }
 0x188   : > { %1915 = vst.msk [vmem:[#allocation3 + $0x30] sm:$0xf] %vm1902_vm15, %v1879_v37 }
 0x189   : > { %v1881_v38 = vpop.permute.xlu1 %1880 }
 0x18a   : > { %1916 = vst.msk [vmem:[#allocation3 + $0x34] sm:$0xf] %vm1902_vm15, %v1881_v38 }
 0x18b   : > { %v1867_v39 = vpop.permute.xlu0 %1866 }
 0x18c   : > { %1909 = vst.msk [vmem:[#allocation3 + $0x18] sm:$0xf] %vm1902_vm15, %v1867_v39  ;;  %v2887_v39 = vld [vmem:[%s3977_s30 + $0x18] sm:$0xff]  }
 0x18d   : > { %v1869_v40 = vpop.permute.xlu1 %1868 }
 0x18e   : > { %1910 = vst.msk [vmem:[#allocation3 + $0x1c] sm:$0xf] %vm1902_vm15, %v1869_v40  ;;  %v2833_v40 = vunpack.c.l.bf16 %v2887_v39 }
 0x18f   : > { %v1883_v41 = vpop.permute.xlu0 %1882 }
 0x190   : > { %1917 = vst.msk [vmem:[#allocation3 + $0x38] sm:$0xf] %vm1902_vm15, %v1883_v41 }
 0x191   : > { %v1885_v42 = vpop.permute.xlu1 %1884  ;;  %2368 = vst.msk [vmem:[%s3985_s29 + $0x30] sm:$0xff] %vm2361_vm2, %v2833_v40 }
 0x192   : > { %1918 = vst.msk [vmem:[#allocation3 + $0x3c] sm:$0xf] %vm1902_vm15, %v1885_v42 }
 0x193   : > { %v2032_v44 = vpop.permute.xlu0 %2031 }
 0x194   : > { %2076 = vst.msk [vmem:[#allocation3 + $0x10] sm:$0xf] %vm2071_vm0, %v2032_v44 }
 0x195   : > { %v2034_v45 = vpop.permute.xlu1 %2033 }
 0x196   : > { %2077 = vst.msk [vmem:[#allocation3 + $0x14] sm:$0xf] %vm2071_vm0, %v2034_v45 }
 0x197   : > { %v2048_v46 = vpop.permute.xlu0 %2047 }
 0x198   : > { %2084 = vst.msk [vmem:[#allocation3 + $0x30] sm:$0xf] %vm2071_vm0, %v2048_v46 }
 0x199   : > { %v2050_v47 = vpop.permute.xlu1 %2049 }
 0x19a   : > { %2085 = vst.msk [vmem:[#allocation3 + $0x34] sm:$0xf] %vm2071_vm0, %v2050_v47 }
 0x19b   : > { %v2036_v48 = vpop.permute.xlu0 %2035 }
 0x19c   : > { %2078 = vst.msk [vmem:[#allocation3 + $0x18] sm:$0xf] %vm2071_vm0, %v2036_v48 }
 0x19d   : > { %v2038_v49 = vpop.permute.xlu1 %2037  ;;  %v3082_v50 = vld [vmem:[#allocation3 + $0x10] sm:$0xff]  }
 0x19e   : > { %2079 = vst.msk [vmem:[#allocation3 + $0x1c] sm:$0xf] %vm2071_vm0, %v2038_v49  ;;  %2926 = vmatprep.mubr.msk.bf16.mxu0 %vm2187_vm1, %v3082_v50  ;;  %v2886_v49 = vld [vmem:[%s3977_s30 + $0x10] sm:$0xff]   ;;  %v2834_v50 = vunpack.c.h.bf16 %v2887_v39 }
 0x19f   : > { %v2052_v51 = vpop.permute.xlu0 %2051 }
 0x1a0   : > { %2086 = vst.msk [vmem:[#allocation3 + $0x38] sm:$0xf] %vm2071_vm0, %v2052_v51  ;;  %v2829_v51 = vunpack.c.l.bf16 %v2886_v49 }
 0x1a1   : > { %v2054_v53 = vpop.permute.xlu1 %2053  ;;  %v3083_v54 = vld [vmem:[#allocation3 + $0x30] sm:$0xff]   ;;  %2369 = vst.msk [vmem:[%s3985_s29 + $0x38] sm:$0xff] %vm2361_vm2, %v2834_v50 }
 0x1a2   : > { %2087 = vst.msk [vmem:[#allocation3 + $0x3c] sm:$0xf] %vm2071_vm0, %v2054_v53  ;;  %2934 = vmatprep.mubr.msk.bf16.mxu1 %vm2187_vm1, %v3083_v54  ;;  %v2830_v53 = vunpack.c.h.bf16 %v2886_v49 }
 0x1a3   : > { %2366 = vst.msk [vmem:[%s3985_s29 + $0x20] sm:$0xff] %vm2361_vm2, %v2829_v51 }
 0x1a4   : > { %2367 = vst.msk [vmem:[%s3985_s29 + $0x28] sm:$0xff] %vm2361_vm2, %v2830_v53 }
 0x1a5   : > { %v3084_v27 = vld [vmem:[#allocation3 + $0x18] sm:$0xff]  }
 0x1a6   : > { %2927 = vmatmul.mubr.msk.bf16.gmra.mxu0 %vm2187_vm1, %v3084_v27 }
 0x1a7   : > { %v3040_v56 = vpop.permute.xlu1 %3039  ;;  %v3035_v58 = vpop.permute.xlu0 %3034 }
 0x1a8   : > { %v3041_v43 = vunpack.i.l.bf16 %v3040_v56  ;;  %v3042_v61 = vunpack.i.h.bf16 %v3040_v56  ;;  %v3036_v35 = vunpack.i.l.bf16 %v3035_v58  ;;  %v3037_v10 = vunpack.i.h.bf16 %v3035_v58  ;;  %v2890_v58 = vld [vmem:[%s3977_s30 + $0x30] sm:$0xff]   ;;  %s2589_s30 = sshll.u32 %s3985_s29, 4  ;;  %s4139_s30 = int_to_ptr.vmem [resolvable:$true] %s2589_s30 }
 0x1a9   : > { %v3085_v55 = vld [vmem:[#allocation3 + $0x38] sm:$0xff]   ;;  %s3086_s12 = scalar_lea.vmem %s4139_s30, 2048  ;;  %p3093_p6 = scmp.lt.s32.totalorder %s4139_s30, %s3091_s16 }
 0x1aa   : > { %2935 = vmatmul.mubr.msk.bf16.gmra.mxu1 %vm2187_vm1, %v3085_v55  ;;  %2477 = vst.msk [vmem:[%s3985_s29 + $0x10] sm:$0xff] %vm2474_vm3, %v3041_v43  ;;  %2478 = vst.msk [vmem:[%s3985_s29 + $0x18] sm:$0xff] %vm2474_vm3, %v3042_v61  ;;  %v2845_v43 = vunpack.c.l.bf16 %v2890_v58  ;;  %v2849_v61 = vunpack.c.l.bf16 %v2891_v59  ;;  %p3087_p2 = scmp.ne.s32.totalorder %s4139_s30, %s3086_s12 }
 0x1ab   : > { %v3980_v57 = vpop.permute.xlu1 %3049  ;;  %v3992_v1 = vpop.permute.xlu0 %3044  ;;  %2475 = vst.msk [vmem:[%s3985_s29] sm:$0xff] %vm2474_vm3, %v3036_v35  ;;  %2476 = vst.msk [vmem:[%s3985_s29 + $0x8] sm:$0xff] %vm2474_vm3, %v3037_v10 }
 0x1ac   : > { %v3051_v38 = vunpack.i.l.bf16 %v3980_v57  ;;  %v3047_v46 = vunpack.i.h.bf16 %v3992_v1  ;;  %v3046_v47 = vunpack.i.l.bf16 %v3992_v1  ;;  %v3052_v48 = vunpack.i.h.bf16 %v3980_v57  ;;  %2374 = vst.msk [vmem:[%s3985_s29 + $0x60] sm:$0xff] %vm2361_vm2, %v2845_v43  ;;  %2376 = vst.msk [vmem:[%s3985_s29 + $0x70] sm:$0xff] %vm2361_vm2, %v2849_v61  ;;  %p3088_p4 = pnand %p3087_p2, %p3276_p3 }
 0x1ae   : > { %2481 = vst.msk [vmem:[%s3985_s29 + $0x30] sm:$0xff] %vm2474_vm3, %v3051_v38  ;;  %2482 = vst.msk [vmem:[%s3985_s29 + $0x38] sm:$0xff] %vm2474_vm3, %v3052_v48  ;;  %p3089_p5 = pneg %p3088_p4 }
 0x1af   : > { %v3060_v60 = vpop.permute.xlu1 %3059  ;;  %v3055_v52 = vpop.permute.xlu0 %3054  ;;  %2479 = vst.msk [vmem:[%s3985_s29 + $0x20] sm:$0xff] %vm2474_vm3, %v3046_v47  ;;  %2480 = vst.msk [vmem:[%s3985_s29 + $0x28] sm:$0xff] %vm2474_vm3, %v3047_v46 }
 0x1b0   : > { %v3061_v62 = vunpack.i.l.bf16 %v3060_v60  ;;  %v3062_v5 = vunpack.i.h.bf16 %v3060_v60  ;;  %v3056_v12 = vunpack.i.l.bf16 %v3055_v52  ;;  %v3057_v19 = vunpack.i.h.bf16 %v3055_v52 }
 0x1b1   : > { %v2846_v60 = vunpack.c.h.bf16 %v2890_v58 }
 0x1b2   : > { %2485 = vst.msk [vmem:[%s3985_s29 + $0x50] sm:$0xff] %vm2474_vm3, %v3061_v62  ;;  %2486 = vst.msk [vmem:[%s3985_s29 + $0x58] sm:$0xff] %vm2474_vm3, %v3062_v5  ;;  %v2850_v62 = vunpack.c.h.bf16 %v2891_v59 }
 0x1b3   : > { %2483 = vst.msk [vmem:[%s3985_s29 + $0x40] sm:$0xff] %vm2474_vm3, %v3056_v12  ;;  %2484 = vst.msk [vmem:[%s3985_s29 + $0x48] sm:$0xff] %vm2474_vm3, %v3057_v19  ;;  %v3065_v54 = vpop.permute.xlu0 %3064  ;;  %v3070_v27 = vpop.permute.xlu1 %3069 }
 0x1b4   : > { %v3067_v55 = vunpack.i.h.bf16 %v3065_v54  ;;  %v3066_v56 = vunpack.i.l.bf16 %v3065_v54  ;;  %v3072_v24 = vunpack.i.h.bf16 %v3070_v27  ;;  %v3071_v57 = vunpack.i.l.bf16 %v3070_v27  ;;  %2375 = vst.msk [vmem:[%s3985_s29 + $0x68] sm:$0xff] %vm2361_vm2, %v2846_v60  ;;  %2377 = vst.msk [vmem:[%s3985_s29 + $0x78] sm:$0xff] %vm2361_vm2, %v2850_v62 }
 0x1b6   : > { %2487 = vst.msk [vmem:[%s3985_s29 + $0x60] sm:$0xff] %vm2474_vm3, %v3066_v56  ;;  %2488 = vst.msk [vmem:[%s3985_s29 + $0x68] sm:$0xff] %vm2474_vm3, %v3067_v55 }
 0x1b7   : > { %2489 = vst.msk [vmem:[%s3985_s29 + $0x70] sm:$0xff] %vm2474_vm3, %v3071_v57  ;;  %2490 = vst.msk [vmem:[%s3985_s29 + $0x78] sm:$0xff] %vm2474_vm3, %v3072_v24 }
 0x1ee   : > { %v2924_v14 = vpop.f32.mrf.mxu0 }
 0x1ef   : > { %v2259_v16 = vadd.f32 %v2924_v14, %v4006_v9 }
 0x1f0   : > { %v2250_v17 = vpop.f32.mrf.mxu0 }
 0x1f1   : > { %v2315_v18 = vmax.f32 %v2259_v16, 0.0  ;;  %v2251_v26 = vadd.f32 %v4006_v9, %v2250_v17 }
 0x1f2   : > { %v2925_v21 = vpop.f32.mrf.mxu0  ;;  %v2932_v11 = vpop.f32.mrf.mxu1 }
 0x1f3   : > { %v2262_v23 = vadd.f32 %v2925_v21, %v4006_v9  ;;  %v2291_v2 = vadd.f32 %v2932_v11, %v4006_v9  ;;  %2511 = vrot.lane.b32.xlu0 %v2315_v18, %s3182_s20  ;;  %v2313_v32 = vmax.f32 %v2251_v26, 0.0 }
 0x1f4   : > { %v2282_v25 = vpop.f32.mrf.mxu1  ;;  %v2253_v29 = vpop.f32.mrf.mxu0 }
 0x1f5   : > { %v2316_v20 = vmax.f32 %v2262_v23, 0.0  ;;  %v2323_v28 = vmax.f32 %v2291_v2, 0.0  ;;  %v2254_v34 = vadd.f32 %v4006_v9, %v2253_v29  ;;  %v2283_v33 = vadd.f32 %v4006_v9, %v2282_v25 }
 0x1f6   : > { %v2933_v30 = vpop.f32.mrf.mxu1 }
 0x1f7   : > { %v2294_v31 = vadd.f32 %v2933_v30, %v4006_v9  ;;  %2527 = vrot.lane.b32.xlu0 %v2323_v28, %s3182_s20  ;;  %2513 = vrot.lane.b32.xlu1 %v2316_v20, %s3182_s20  ;;  %v2314_v41 = vmax.f32 %v2254_v34, 0.0  ;;  %v2321_v42 = vmax.f32 %v2283_v33, 0.0 }
 0x1f8   : > { %v2285_v37 = vpop.f32.mrf.mxu1 }
 0x1f9   : > { %v2324_v36 = vmax.f32 %v2294_v31, 0.0  ;;  %v2286_v44 = vadd.f32 %v4006_v9, %v2285_v37 }
 0x1fb   : > { %2529 = vrot.lane.b32.xlu1 %v2324_v36, %s3182_s20  ;;  %2507 = vrot.lane.b32.xlu0 %v2313_v32, %s3182_s20  ;;  %v2322_v45 = vmax.f32 %v2286_v44, 0.0 }
 0x1ff   : > { %2509 = vrot.lane.b32.xlu1 %v2314_v41, %s3182_s20  ;;  %2523 = vrot.lane.b32.xlu0 %v2321_v42, %s3182_s20 }
 0x203   : > { %2525 = vrot.lane.b32.xlu1 %v2322_v45, %s3182_s20 }
 0x265   : > { %v2512_v0 = vpop.permute.xlu0 %2511 }
 0x266   : > { %2558 = vst.msk [vmem:[%s3985_s29 + $0x10] sm:$0xff] %vm2555_vm4, %v2512_v0  ;;  %v2928_v1 = vpop.f32.mrf.mxu0 }
 0x267   : > { %v2275_v3 = vadd.f32 %v2928_v1, %v4006_v9 }
 0x268   : > { %v2266_v4 = vpop.f32.mrf.mxu0 }
 0x269   : > { %v2319_v35 = vmax.f32 %v2275_v3, 0.0  ;;  %v2267_v5 = vadd.f32 %v4006_v9, %v2266_v4  ;;  %v2528_v6 = vpop.permute.xlu0 %2527  ;;  %v2514_v7 = vpop.permute.xlu1 %2513 }
 0x26a   : > { %2566 = vst.msk [vmem:[%s3985_s29 + $0x50] sm:$0xff] %vm2555_vm4, %v2528_v6  ;;  %2559 = vst.msk [vmem:[%s3985_s29 + $0x18] sm:$0xff] %vm2555_vm4, %v2514_v7  ;;  %v2929_v8 = vpop.f32.mrf.mxu0  ;;  %v2936_v52 = vpop.f32.mrf.mxu1 }
 0x26b   : > { %v2278_v10 = vadd.f32 %v2929_v8, %v4006_v9  ;;  %2519 = vrot.lane.b32.xlu0 %v2319_v35, %s3182_s20  ;;  %v2317_v14 = vmax.f32 %v2267_v5, 0.0  ;;  %v2307_v11 = vadd.f32 %v2936_v52, %v4006_v9 }
 0x26c   : > { %v2269_v12 = vpop.f32.mrf.mxu0  ;;  %v2298_v13 = vpop.f32.mrf.mxu1 }
 0x26d   : > { %v2320_v15 = vmax.f32 %v2278_v10, 0.0  ;;  %v2270_v63 = vadd.f32 %v4006_v9, %v2269_v12  ;;  %v2299_v16 = vadd.f32 %v4006_v9, %v2298_v13  ;;  %v2530_v17 = vpop.permute.xlu1 %2529  ;;  %v2508_v18 = vpop.permute.xlu0 %2507  ;;  %v2327_v20 = vmax.f32 %v2307_v11, 0.0 }
 0x26e   : > { %2567 = vst.msk [vmem:[%s3985_s29 + $0x58] sm:$0xff] %vm2555_vm4, %v2530_v17  ;;  %2556 = vst.msk [vmem:[%s3985_s29] sm:$0xff] %vm2555_vm4, %v2508_v18  ;;  %v2937_v19 = vpop.f32.mrf.mxu1 }
 0x26f   : > { %2521 = vrot.lane.b32.xlu1 %v2320_v15, %s3182_s20  ;;  %2515 = vrot.lane.b32.xlu0 %v2317_v14, %s3182_s20  ;;  %v2318_v22 = vmax.f32 %v2270_v63, 0.0  ;;  %v2325_v23 = vmax.f32 %v2299_v16, 0.0  ;;  %v2310_v28 = vadd.f32 %v2937_v19, %v4006_v9 }
 0x270   : > { %v2301_v21 = vpop.f32.mrf.mxu1 }
 0x271   : > { %v2302_v2 = vadd.f32 %v4006_v9, %v2301_v21  ;;  %v2510_v25 = vpop.permute.xlu1 %2509  ;;  %v2524_v26 = vpop.permute.xlu0 %2523  ;;  %v2328_v31 = vmax.f32 %v2310_v28, 0.0 }
 0x272   : > { %2557 = vst.msk [vmem:[%s3985_s29 + $0x8] sm:$0xff] %vm2555_vm4, %v2510_v25  ;;  %2564 = vst.msk [vmem:[%s3985_s29 + $0x40] sm:$0xff] %vm2555_vm4, %v2524_v26 }
 0x273   : > { %2517 = vrot.lane.b32.xlu1 %v2318_v22, %s3182_s20  ;;  %2531 = vrot.lane.b32.xlu0 %v2325_v23, %s3182_s20  ;;  %v2326_v29 = vmax.f32 %v2302_v2, 0.0 }
 0x275   : > { %v2526_v30 = vpop.permute.xlu1 %2525 }
 0x276   : > { %2565 = vst.msk [vmem:[%s3985_s29 + $0x48] sm:$0xff] %vm2555_vm4, %v2526_v30 }
 0x277   : > { %2533 = vrot.lane.b32.xlu1 %v2326_v29, %s3182_s20  ;;  %2535 = vrot.lane.b32.xlu0 %v2327_v20, %s3182_s20 }
 0x27b   : > { %2537 = vrot.lane.b32.xlu1 %v2328_v31, %s3182_s20  ;;  %s2808_s20 = sshll.u32 %s2586_s14, 7  ;;  %s3092_s14 = scalar_lea.vmem %s3091_s16, 4096 }
 0x27c   : > { %s4137_s25 = scalar_lea.hbm %s4203_s6, %s2808_s20  ;;  %p3094_p7 = scmp.lt.s32.totalorder %s3092_s14, %s3086_s12 }
 0x27e   : > { %p3095_p9 = por %p3094_p7, %p3093_p6 }
 0x280   : > { %p3096_p10 = pnand %p3095_p9, %p3089_p5 }
 0x2dd   : > { %v2520_v32 = vpop.permute.xlu0 %2519 }
 0x2de   : > { %2562 = vst.msk [vmem:[%s3985_s29 + $0x30] sm:$0xff] %vm2555_vm4, %v2520_v32 }
 0x2e1   : > { %v2522_v34 = vpop.permute.xlu1 %2521  ;;  %v2516_v9 = vpop.permute.xlu0 %2515 }
 0x2e2   : > { %2563 = vst.msk [vmem:[%s3985_s29 + $0x38] sm:$0xff] %vm2555_vm4, %v2522_v34  ;;  %2560 = vst.msk [vmem:[%s3985_s29 + $0x20] sm:$0xff] %vm2555_vm4, %v2516_v9 }
 0x2e5   : > { %v2518_v33 = vpop.permute.xlu1 %2517  ;;  %v2532_v36 = vpop.permute.xlu0 %2531 }
 0x2e6   : > { %2561 = vst.msk [vmem:[%s3985_s29 + $0x28] sm:$0xff] %vm2555_vm4, %v2518_v33  ;;  %2568 = vst.msk [vmem:[%s3985_s29 + $0x60] sm:$0xff] %vm2555_vm4, %v2532_v36 }
 0x2e9   : > { %v2534_v37 = vpop.permute.xlu1 %2533  ;;  %v2536_v38 = vpop.permute.xlu0 %2535 }
 0x2ea   : > { %2569 = vst.msk [vmem:[%s3985_s29 + $0x68] sm:$0xff] %vm2555_vm4, %v2534_v37  ;;  %2570 = vst.msk [vmem:[%s3985_s29 + $0x70] sm:$0xff] %vm2555_vm4, %v2536_v38 }
 0x2ed   : > { %v2538_v39 = vpop.permute.xlu1 %2537 }
 0x2ee   : > { %2571 = vst.msk [vmem:[%s3985_s29 + $0x78] sm:$0xff] %vm2555_vm4, %v2538_v39 }
 0x2ef   : > { %3099 = shalt.err (!%p3096_p10)
}
 0x2f0   : > { %s3100_s13 = scalar_lea.hbm %s4137_s25, 2048  ;;  %s3104_s24 = scalar_lea.hbm %s4203_s6, 8192 }
 0x2f1   : > { %p3101_p11 = scmp.ne.s32.totalorder %s4137_s25, %s3100_s13  ;;  %p3105_p0 = scmp.lt.s32.totalorder %s4137_s25, %s4203_s6 }
 0x2f2   : > { %p3106_p1 = scmp.lt.s32.totalorder %s3104_s24, %s3100_s13 }
 0x2f3   : > { %p3102_p12 = pnand %p3101_p11, %p3276_p3 }
 0x2f4   : > { %p3107_p2 = por %p3106_p1, %p3105_p0 }
 0x2f5   : > { %p3103_p13 = pneg %p3102_p12 }
 0x2f7   : > { %p3108_p4 = pnand %p3107_p2, %p3103_p13 }
 0x2f9   : > { %3111 = shalt.err (!%p3108_p4)
}
 0x2fa   : > { %s3189_s12 = smov 128  }
 0x2fb   : > { %2953 = dma.vmem_to_hbm [thread:$0]  (%p3276_p3), %s4139_s30, 2048, %s4137_s25, %s4145_s17, %s3189_s12, %s3189_s12, %s3181_s18  }
 0x2fc PF: > { %p2959_p5 = scmp.ge.s32.totalorder %s3178_s28, 2  ;;  %s2604_s16 = sand.u32 1, %s3150_s21  }
 0x2fd   : > { %s2605_s14 = scalar_lea.sflag [#allocation5], %s2604_s16 }
 0x2fe   : > { %p2956_p6 = pnand %p2959_p5, %p3285_p8 }
 0x300   : > { %p2957_p7 = pneg %p2956_p6 }
 0x302   : > { %3145 = dma.done.wait (%p2957_p7), %s2605_s14, 2048  }
 0x303   : > { %3147 = vsyncadd (%p2957_p7), %s2605_s14, 4294965248  ;;  %s19_s28 = sadd.s32 1, %s3178_s28   ;;  %s4222_s21 = smov %s3154_s22 }
 0x304   : > { %p16_p9 = scmp.ge.s32.totalorder %s19_s28, 6   ;;  %s4223_s22 = smov %s3158_s23 }
 0x305   : > { %s4224_s23 = smov %s3294_s15  ;;  %s4225_s24 = smov %s3170_s26 }
 0x306   : > { %s4226_s25 = smov %s3174_s27  ;;  %s4227_s26 = smov %s4230_s7 }
 0x307   : > { %s4228_s27 = smov %s4234_s8  ;;  %18 = sbr.rel (!%p16_p9) target bundleno = 5 (0x5), region = 91 }
 0x30c   :  { %2610 = vsyncpa [#allocation5], 1 }
 0x30d   :  { %2612 = vsyncpa [#allocation5 + $0x1], 1 }

</bundles_post_ra>
